<compile_context>
chip_gen: v7x
topology: tpu7x:2x2x1
jax: 0.10.0
libtpu: 0.0.40
codegen_flags: <defaults>
</compile_context>

<pallas_src>
import jax
import jax.numpy as jnp
from jax import lax
from jax.experimental import pallas as pl
from jax.experimental.pallas import tpu as pltpu


_PAD_OFF = 8   # activation interior sits at sublane (width) offset 8
_B_MAX = 8     # samples per grid step


# ----------------------------------------------------------------------------
# In-kernel helpers (traced inside the fused kernel)
# ----------------------------------------------------------------------------
def _conv3x3_im2col(a, pad_ref, im_ref, w_ref, b_ref, B, H, W):
    """3x3 'same' conv, stride 1, as a single im2col matmul.

    a:       (B*H*W, Cin) value, rows in (b, h, w) order
    pad_ref: (B, H+2, Wpad, Cin) VMEM scratch, data at [:, 1:H+1, 8:8+W, :]
    im_ref:  (B*H*W, 9*Cin) VMEM scratch (im2col matrix)
    w_ref:   (9*Cin, Cout) weights, rows in (ky, kx, cin) order
    b_ref:   (1, Cout)
    returns  (B*H*W, Cout) f32, rows in (b, h, w) order.
    """
    Cin = pad_ref.shape[-1]
    P = _PAD_OFF

    # Interior write (tile-aligned: sublane offset 8, width multiple of 8).
    pad_ref[:, 1:H + 1, P:P + W, :] = a.reshape(B, H, W, Cin)

    # Zero only the halo ring that the taps actually read (interior is fully
    # overwritten every step, so no full-scratch zeroing).
    zrow = jnp.zeros((B, 1, W + 2, Cin), jnp.float32)
    zcol = jnp.zeros((B, H, 1, Cin), jnp.float32)
    pad_ref[:, 0:1, P - 1:P + W + 1, :] = zrow
    pad_ref[:, H + 1:H + 2, P - 1:P + W + 1, :] = zrow
    pad_ref[:, 1:H + 1, P - 1:P, :] = zcol
    pad_ref[:, 1:H + 1, P + W:P + W + 1, :] = zcol

    # Gather the 9 shifted taps into one contiguous (B*H*W, 9*Cin) matrix.
    for ky in range(3):
        for kx in range(3):
            t = ky * 3 + kx
            c0 = P - 1 + kx
            tap = pad_ref[:, ky:ky + H, c0:c0 + W, :]          # (B, H, W, Cin)
            im_ref[:, t * Cin:(t + 1) * Cin] = tap.reshape(B * H * W, Cin)

    # Single MXU matmul with K = 9*Cin.
    return jnp.dot(im_ref[...], w_ref[...],
                   preferred_element_type=jnp.float32) + b_ref[...]


def _maxpool2x2(a, hm_ref, B, H, W):
    """2x2 / stride-2 max pool of (B*H*W, C) -> (B*Ho*Wo, C), rows (b,i,j)."""
    C = a.shape[-1]
    Ho, Wo = H // 2, W // 2
    # height pairs: cheap vreg-group max
    ar = a.reshape(B * Ho, 2, W, C)
    hm_ref[...] = jnp.maximum(ar[:, 0], ar[:, 1]).reshape(B * Ho * W, C)
    # width pairs: stride-2 sublane selection (W even => uniform stride-2 rows)
    n = B * Ho * Wo
    even = hm_ref[pl.ds(0, n, stride=2), :]
    odd = hm_ref[pl.ds(1, n, stride=2), :]
    return jnp.maximum(even, odd)


# ----------------------------------------------------------------------------
# The fused kernel: one grid step == B samples
# ----------------------------------------------------------------------------
def _cnn_fused_kernel(xcol_ref, w1, b1, w2, b2, w3, b3, w4, b4,
                      fw1, fb1, fw2, fb2,
                      o_ref,
                      pad2, pad3, pad4, im2, im3, im4, hm1, hm2, feat):
    B = o_ref.shape[0]

    # ---- conv1 (im2col precomputed in wrapper): (B*256, 27) @ (27, 32) -----
    a = jnp.dot(xcol_ref[...].reshape(B * 256, 27), w1[...],
                preferred_element_type=jnp.float32) + b1[...]

    # ---- conv2 -> pool1 ------------------------------------------------------
    a = _conv3x3_im2col(a, pad2, im2, w2, b2, B, 16, 16)       # (B*256, 32)
    a = _maxpool2x2(a, hm1, B, 16, 16)                         # (B*64, 32)

    # ---- conv3 -> conv4 -> pool2 --------------------------------------------
    a = _conv3x3_im2col(a, pad3, im3, w3, b3, B, 8, 8)         # (B*64, 64)
    a = _conv3x3_im2col(a, pad4, im4, w4, b4, B, 8, 8)         # (B*64, 64)
    a = _maxpool2x2(a, hm2, B, 8, 8)                           # (B*16, 64)

    # ---- flatten to (B, 1024) (torch NCHW order absorbed by fw1 permute) ----
    a3 = a.reshape(B, 16, 64)                                  # (b, s, c)
    for s in range(16):
        feat[:, s * 64:(s + 1) * 64] = a3[:, s, :]

    # ---- fc1 -> relu -> fc2 --------------------------------------------------
    h = jnp.dot(feat[...], fw1[...],
                preferred_element_type=jnp.float32) + fb1[...]
    h = jnp.maximum(h, 0.0)
    out = jnp.dot(h, fw2[...], preferred_element_type=jnp.float32) + fb2[...]
    o_ref[...] = out.astype(o_ref.dtype)


# ----------------------------------------------------------------------------
# Wrapper
# ----------------------------------------------------------------------------
def _full_spec(shape):
    zeros = (0,) * len(shape)
    return pl.BlockSpec(shape, lambda n, _z=zeros: _z)


@jax.jit
def cnn_forward(x_nchw, params):
    p = params
    N = x_nchw.shape[0]
    num_classes = p["fw2"].shape[-1]
    B = min(N, _B_MAX)
    Np = ((N + B - 1) // B) * B

    x = jnp.transpose(x_nchw, (0, 2, 3, 1)).astype(jnp.float32)   # NCHW->NHWC
    if Np != N:
        x = jnp.pad(x, ((0, Np - N), (0, 0), (0, 0), (0, 0)))

    # conv1 im2col done once in XLA: (Np, 256, 27), columns (ky, kx, cin)
    xp = jnp.pad(x, ((0, 0), (1, 1), (1, 1), (0, 0)))
    xcol = jnp.concatenate(
        [xp[:, ky:ky + 16, kx:kx + 16, :] for ky in range(3) for kx in range(3)],
        axis=-1).reshape(Np, 256, 27)

    # conv weights HWIO -> (9*Cin, Cout), rows in (ky, kx, cin) order
    w1 = p["w1"].reshape(27, 32)
    w2 = p["w2"].reshape(288, 32)
    w3 = p["w3"].reshape(288, 64)
    w4 = p["w4"].reshape(576, 64)
    # fc1 weight: torch NCHW-flatten rows (c*16+s) -> kernel order (s*64+c)
    fw1 = p["fw1"].reshape(64, 16, 128).transpose(1, 0, 2).reshape(1024, 128)

    out = pl.pallas_call(
        _cnn_fused_kernel,
        out_shape=jax.ShapeDtypeStruct((Np, num_classes), jnp.float32),
        grid=(Np // B,),
        in_specs=[
            pl.BlockSpec((B, 256, 27), lambda n: (n, 0, 0)),
            _full_spec((27, 32)), _full_spec((1, 32)),
            _full_spec((288, 32)), _full_spec((1, 32)),
            _full_spec((288, 64)), _full_spec((1, 64)),
            _full_spec((576, 64)), _full_spec((1, 64)),
            _full_spec((1024, 128)), _full_spec((1, 128)),
            _full_spec((128, num_classes)), _full_spec((1, num_classes)),
        ],
        out_specs=pl.BlockSpec((B, num_classes), lambda n: (n, 0)),
        scratch_shapes=[
            pltpu.VMEM((B, 18, 32, 32), jnp.float32),   # padded conv2 input
            pltpu.VMEM((B, 10, 24, 32), jnp.float32),   # padded conv3 input
            pltpu.VMEM((B, 10, 24, 64), jnp.float32),   # padded conv4 input
            pltpu.VMEM((B * 256, 288), jnp.float32),    # im2col conv2
            pltpu.VMEM((B * 64, 288), jnp.float32),     # im2col conv3
            pltpu.VMEM((B * 64, 576), jnp.float32),     # im2col conv4
            pltpu.VMEM((B * 128, 32), jnp.float32),     # height-maxed stage 1
            pltpu.VMEM((B * 32, 64), jnp.float32),      # height-maxed stage 2
            pltpu.VMEM((B, 1024), jnp.float32),         # flattened features
        ],
        compiler_params=pltpu.CompilerParams(
            dimension_semantics=("parallel",),
            vmem_limit_bytes=48 * 1024 * 1024),
    )(xcol, w1, p["b1"].reshape(1, 32), w2, p["b2"].reshape(1, 32),
      w3, p["b3"].reshape(1, 64), w4, p["b4"].reshape(1, 64),
      fw1, p["fb1"].reshape(1, 128), p["fw2"],
      p["fb2"].reshape(1, num_classes))
    return out[:N]


# ----------------------------------------------------------------------------
# Deterministic parameter init (same shapes as the torch module)
# ----------------------------------------------------------------------------
def init_params(key, num_classes):
    def u(k, shape, fan_in):
        bound = 1.0 / jnp.sqrt(float(fan_in))
        return jax.random.uniform(k, shape, jnp.float32, -bound, bound)

    ks = jax.random.split(key, 12)
    p = {}
    # conv weights in HWIO
    p["w1"] = u(ks[0], (3, 3, 3, 32), 3 * 9);    p["b1"] = u(ks[1], (32,), 3 * 9)
    p["w2"] = u(ks[2], (3, 3, 32, 32), 32 * 9);  p["b2"] = u(ks[3], (32,), 32 * 9)
    p["w3"] = u(ks[4], (3, 3, 32, 64), 32 * 9);  p["b3"] = u(ks[5], (64,), 32 * 9)
    p["w4"] = u(ks[6], (3, 3, 64, 64), 64 * 9);  p["b4"] = u(ks[7], (64,), 64 * 9)
    # fc weights as (in, out), in-features in torch NCHW-flatten order
    p["fw1"] = u(ks[8], (1024, 128), 1024);      p["fb1"] = u(ks[9], (128,), 1024)
    p["fw2"] = u(ks[10], (128, num_classes), 128)
    p["fb2"] = u(ks[11], (num_classes,), 128)
    return p


# ----------------------------------------------------------------------------
# Pure-JAX reference (correctness check)
# ----------------------------------------------------------------------------
def reference_forward(x_nchw, p):
    x = jnp.transpose(x_nchw, (0, 2, 3, 1))
    dn = ("NHWC", "HWIO", "NHWC")

    def conv(x, w, b):
        return lax.conv_general_dilated(
            x, w, (1, 1), "SAME", dimension_numbers=dn,
            precision=lax.Precision.HIGHEST) + b

    def pool(x):
        return lax.reduce_window(x, -jnp.inf, lax.max,
                                 (1, 2, 2, 1), (1, 2, 2, 1), "VALID")

    x = conv(x, p["w1"], p["b1"])
    x = conv(x, p["w2"], p["b2"])
    x = pool(x)
    x = conv(x, p["w3"], p["b3"])
    x = conv(x, p["w4"], p["b4"])
    x = pool(x)
    feat = jnp.transpose(x, (0, 3, 1, 2)).reshape(x.shape[0], -1)  # NCHW flatten
    h = jnp.maximum(
        jnp.dot(feat, p["fw1"], precision=lax.Precision.HIGHEST) + p["fb1"], 0.0)
    return jnp.dot(h, p["fw2"], precision=lax.Precision.HIGHEST) + p["fb2"]


if __name__ == "__main__":
    num_classes = 10
    key = jax.random.PRNGKey(0)
    k_x, k_p = jax.random.split(key)

    # spatial 16x16 so after two 2x2 pools: 64 * 4 * 4 = 1024 == fc1 in_features
    x = jax.random.normal(k_x, (2, 3, 16, 16), jnp.float32)    # NCHW, like torch
    params = init_params(k_p, num_classes)

    out = jax.block_until_ready(cnn_forward(x, params))
    assert out.shape == (2, num_classes), out.shape

    ref = jax.block_until_ready(reference_forward(x, params))
    assert jnp.allclose(out, ref, rtol=1e-2, atol=1e-2), (
        float(jnp.max(jnp.abs(out - ref))))

    print("KERNEL_OK")
</pallas_src>

<mosaic_0001>
module attributes {stable_mosaic.version = 11 : i64} {
  func.func @_cnn_fused_kernel(%arg0: i32, %arg1: memref<2x256x27xf32, #tpu.memory_space<vmem>>, %arg2: memref<27x32xf32, #tpu.memory_space<vmem>>, %arg3: memref<1x32xf32, #tpu.memory_space<vmem>>, %arg4: memref<288x32xf32, #tpu.memory_space<vmem>>, %arg5: memref<1x32xf32, #tpu.memory_space<vmem>>, %arg6: memref<288x64xf32, #tpu.memory_space<vmem>>, %arg7: memref<1x64xf32, #tpu.memory_space<vmem>>, %arg8: memref<576x64xf32, #tpu.memory_space<vmem>>, %arg9: memref<1x64xf32, #tpu.memory_space<vmem>>, %arg10: memref<1024x128xf32, #tpu.memory_space<vmem>>, %arg11: memref<1x128xf32, #tpu.memory_space<vmem>>, %arg12: memref<128x10xf32, #tpu.memory_space<vmem>>, %arg13: memref<1x10xf32, #tpu.memory_space<vmem>>, %arg14: memref<2x10xf32, #tpu.memory_space<vmem>>, %arg15: memref<2x18x32x32xf32, #tpu.memory_space<vmem>>, %arg16: memref<2x10x24x32xf32, #tpu.memory_space<vmem>>, %arg17: memref<2x10x24x64xf32, #tpu.memory_space<vmem>>, %arg18: memref<512x288xf32, #tpu.memory_space<vmem>>, %arg19: memref<128x288xf32, #tpu.memory_space<vmem>>, %arg20: memref<128x576xf32, #tpu.memory_space<vmem>>, %arg21: memref<256x32xf32, #tpu.memory_space<vmem>>, %arg22: memref<64x64xf32, #tpu.memory_space<vmem>>, %arg23: memref<2x1024xf32, #tpu.memory_space<vmem>>) attributes {dimension_semantics = [#tpu.dimension_semantics<parallel>], iteration_bounds = array<i64: 1>, scalar_prefetch = 0 : i64, scratch_operands = 9 : i64, tpu.core_type = #tpu.core_type<tc>, window_params = [{transform_indices = @transform_0, window_bounds = array<i64: 2, 256, 27>}, {pipeline_mode = #tpu.pipeline_mode<synchronous>, transform_indices = @transform_1, window_bounds = array<i64: 27, 32>}, {pipeline_mode = #tpu.pipeline_mode<synchronous>, transform_indices = @transform_2, window_bounds = array<i64: 1, 32>}, {pipeline_mode = #tpu.pipeline_mode<synchronous>, transform_indices = @transform_3, window_bounds = array<i64: 288, 32>}, {pipeline_mode = #tpu.pipeline_mode<synchronous>, transform_indices = @transform_4, window_bounds = array<i64: 1, 32>}, {pipeline_mode = #tpu.pipeline_mode<synchronous>, transform_indices = @transform_5, window_bounds = array<i64: 288, 64>}, {pipeline_mode = #tpu.pipeline_mode<synchronous>, transform_indices = @transform_6, window_bounds = array<i64: 1, 64>}, {pipeline_mode = #tpu.pipeline_mode<synchronous>, transform_indices = @transform_7, window_bounds = array<i64: 576, 64>}, {pipeline_mode = #tpu.pipeline_mode<synchronous>, transform_indices = @transform_8, window_bounds = array<i64: 1, 64>}, {pipeline_mode = #tpu.pipeline_mode<synchronous>, transform_indices = @transform_9, window_bounds = array<i64: 1024, 128>}, {pipeline_mode = #tpu.pipeline_mode<synchronous>, transform_indices = @transform_10, window_bounds = array<i64: 1, 128>}, {pipeline_mode = #tpu.pipeline_mode<synchronous>, transform_indices = @transform_11, window_bounds = array<i64: 128, 10>}, {pipeline_mode = #tpu.pipeline_mode<synchronous>, transform_indices = @transform_12, window_bounds = array<i64: 1, 10>}, {transform_indices = @transform_13, window_bounds = array<i64: 2, 10>}]} {
    %c0 = arith.constant 0 : index
    %c0_0 = arith.constant 0 : index
    %c0_1 = arith.constant 0 : index
    %0 = vector.load %arg1[%c0, %c0_0, %c0_1] : memref<2x256x27xf32, #tpu.memory_space<vmem>>, vector<2x256x27xf32>
    %1 = vector.shape_cast %0 : vector<2x256x27xf32> to vector<512x27xf32>
    %c0_2 = arith.constant 0 : index
    %c0_3 = arith.constant 0 : index
    %2 = vector.load %arg2[%c0_2, %c0_3] : memref<27x32xf32, #tpu.memory_space<vmem>>, vector<27x32xf32>
    %cst = arith.constant dense<0.000000e+00> : vector<512x32xf32>
    %3 = tpu.matmul %1, %2, %cst {dimension_numbers = #tpu.dot_dimension_numbers<[1], [0], [0], [1], [0, 0, 1, 1], [], []>} : vector<512x27xf32>, vector<27x32xf32>, vector<512x32xf32> -> vector<512x32xf32>
    %c0_4 = arith.constant 0 : index
    %c0_5 = arith.constant 0 : index
    %4 = vector.load %arg3[%c0_4, %c0_5] : memref<1x32xf32, #tpu.memory_space<vmem>>, vector<1x32xf32>
    %5 = vector.broadcast %4 : vector<1x32xf32> to vector<512x32xf32>
    %6 = arith.addf %3, %5 : vector<512x32xf32>
    %7 = vector.shape_cast %6 : vector<512x32xf32> to vector<2x16x16x32xf32>
    %c0_6 = arith.constant 0 : index
    %c1 = arith.constant 1 : index
    %c8 = arith.constant 8 : index
    %c0_7 = arith.constant 0 : index
    %8 = vector.load %arg15[%c0_6, %c1, %c8, %c0_7] : memref<2x18x32x32xf32, #tpu.memory_space<vmem>>, vector<2x16x16x32xf32>
    tpu.vector_store %arg15[%c0_6, %c1, %c8, %c0_7], %7 {strides = array<i32>} : memref<2x18x32x32xf32, #tpu.memory_space<vmem>>, vector<2x16x16x32xf32>,
    %cst_8 = arith.constant 0.000000e+00 : f32
    %9 = vector.broadcast %cst_8 : f32 to vector<2x1x18x32xf32>
    %cst_9 = arith.constant 0.000000e+00 : f32
    %10 = vector.broadcast %cst_9 : f32 to vector<2x16x1x32xf32>
    %c0_10 = arith.constant 0 : index
    %c0_11 = arith.constant 0 : index
    %c7 = arith.constant 7 : index
    %c0_12 = arith.constant 0 : index
    %11 = vector.load %arg15[%c0_10, %c0_11, %c7, %c0_12] : memref<2x18x32x32xf32, #tpu.memory_space<vmem>>, vector<2x1x18x32xf32>
    tpu.vector_store %arg15[%c0_10, %c0_11, %c7, %c0_12], %9 {strides = array<i32>} : memref<2x18x32x32xf32, #tpu.memory_space<vmem>>, vector<2x1x18x32xf32>,
    %c0_13 = arith.constant 0 : index
    %c17 = arith.constant 17 : index
    %c7_14 = arith.constant 7 : index
    %c0_15 = arith.constant 0 : index
    %12 = vector.load %arg15[%c0_13, %c17, %c7_14, %c0_15] : memref<2x18x32x32xf32, #tpu.memory_space<vmem>>, vector<2x1x18x32xf32>
    tpu.vector_store %arg15[%c0_13, %c17, %c7_14, %c0_15], %9 {strides = array<i32>} : memref<2x18x32x32xf32, #tpu.memory_space<vmem>>, vector<2x1x18x32xf32>,
    %c0_16 = arith.constant 0 : index
    %c1_17 = arith.constant 1 : index
    %c7_18 = arith.constant 7 : index
    %c0_19 = arith.constant 0 : index
    %13 = vector.load %arg15[%c0_16, %c1_17, %c7_18, %c0_19] : memref<2x18x32x32xf32, #tpu.memory_space<vmem>>, vector<2x16x1x32xf32>
    tpu.vector_store %arg15[%c0_16, %c1_17, %c7_18, %c0_19], %10 {strides = array<i32>} : memref<2x18x32x32xf32, #tpu.memory_space<vmem>>, vector<2x16x1x32xf32>,
    %c0_20 = arith.constant 0 : index
    %c1_21 = arith.constant 1 : index
    %c24 = arith.constant 24 : index
    %c0_22 = arith.constant 0 : index
    %14 = vector.load %arg15[%c0_20, %c1_21, %c24, %c0_22] : memref<2x18x32x32xf32, #tpu.memory_space<vmem>>, vector<2x16x1x32xf32>
    tpu.vector_store %arg15[%c0_20, %c1_21, %c24, %c0_22], %10 {strides = array<i32>} : memref<2x18x32x32xf32, #tpu.memory_space<vmem>>, vector<2x16x1x32xf32>,
    %c0_23 = arith.constant 0 : index
    %c0_24 = arith.constant 0 : index
    %c7_25 = arith.constant 7 : index
    %c0_26 = arith.constant 0 : index
    %15 = vector.load %arg15[%c0_23, %c0_24, %c7_25, %c0_26] : memref<2x18x32x32xf32, #tpu.memory_space<vmem>>, vector<2x16x16x32xf32>
    %16 = vector.shape_cast %15 : vector<2x16x16x32xf32> to vector<512x32xf32>
    %c0_27 = arith.constant 0 : index
    %c0_28 = arith.constant 0 : index
    %17 = vector.load %arg18[%c0_27, %c0_28] : memref<512x288xf32, #tpu.memory_space<vmem>>, vector<512x32xf32>
    tpu.vector_store %arg18[%c0_27, %c0_28], %16 {strides = array<i32>} : memref<512x288xf32, #tpu.memory_space<vmem>>, vector<512x32xf32>,
    %c0_29 = arith.constant 0 : index
    %c0_30 = arith.constant 0 : index
    %c8_31 = arith.constant 8 : index
    %c0_32 = arith.constant 0 : index
    %18 = vector.load %arg15[%c0_29, %c0_30, %c8_31, %c0_32] : memref<2x18x32x32xf32, #tpu.memory_space<vmem>>, vector<2x16x16x32xf32>
    %19 = vector.shape_cast %18 : vector<2x16x16x32xf32> to vector<512x32xf32>
    %c0_33 = arith.constant 0 : index
    %c32 = arith.constant 32 : index
    %20 = vector.load %arg18[%c0_33, %c32] : memref<512x288xf32, #tpu.memory_space<vmem>>, vector<512x32xf32>
    tpu.vector_store %arg18[%c0_33, %c32], %19 {strides = array<i32>} : memref<512x288xf32, #tpu.memory_space<vmem>>, vector<512x32xf32>,
    %c0_34 = arith.constant 0 : index
    %c0_35 = arith.constant 0 : index
    %c9 = arith.constant 9 : index
    %c0_36 = arith.constant 0 : index
    %21 = vector.load %arg15[%c0_34, %c0_35, %c9, %c0_36] : memref<2x18x32x32xf32, #tpu.memory_space<vmem>>, vector<2x16x16x32xf32>
    %22 = vector.shape_cast %21 : vector<2x16x16x32xf32> to vector<512x32xf32>
    %c0_37 = arith.constant 0 : index
    %c64 = arith.constant 64 : index
    %23 = vector.load %arg18[%c0_37, %c64] : memref<512x288xf32, #tpu.memory_space<vmem>>, vector<512x32xf32>
    tpu.vector_store %arg18[%c0_37, %c64], %22 {strides = array<i32>} : memref<512x288xf32, #tpu.memory_space<vmem>>, vector<512x32xf32>,
    %c0_38 = arith.constant 0 : index
    %c1_39 = arith.constant 1 : index
    %c7_40 = arith.constant 7 : index
    %c0_41 = arith.constant 0 : index
    %24 = vector.load %arg15[%c0_38, %c1_39, %c7_40, %c0_41] : memref<2x18x32x32xf32, #tpu.memory_space<vmem>>, vector<2x16x16x32xf32>
    %25 = vector.shape_cast %24 : vector<2x16x16x32xf32> to vector<512x32xf32>
    %c0_42 = arith.constant 0 : index
    %c96 = arith.constant 96 : index
    %26 = vector.load %arg18[%c0_42, %c96] : memref<512x288xf32, #tpu.memory_space<vmem>>, vector<512x32xf32>
    tpu.vector_store %arg18[%c0_42, %c96], %25 {strides = array<i32>} : memref<512x288xf32, #tpu.memory_space<vmem>>, vector<512x32xf32>,
    %c0_43 = arith.constant 0 : index
    %c1_44 = arith.constant 1 : index
    %c8_45 = arith.constant 8 : index
    %c0_46 = arith.constant 0 : index
    %27 = vector.load %arg15[%c0_43, %c1_44, %c8_45, %c0_46] : memref<2x18x32x32xf32, #tpu.memory_space<vmem>>, vector<2x16x16x32xf32>
    %28 = vector.shape_cast %27 : vector<2x16x16x32xf32> to vector<512x32xf32>
    %c0_47 = arith.constant 0 : index
    %c128 = arith.constant 128 : index
    %29 = vector.load %arg18[%c0_47, %c128] : memref<512x288xf32, #tpu.memory_space<vmem>>, vector<512x32xf32>
    tpu.vector_store %arg18[%c0_47, %c128], %28 {strides = array<i32>} : memref<512x288xf32, #tpu.memory_space<vmem>>, vector<512x32xf32>,
    %c0_48 = arith.constant 0 : index
    %c1_49 = arith.constant 1 : index
    %c9_50 = arith.constant 9 : index
    %c0_51 = arith.constant 0 : index
    %30 = vector.load %arg15[%c0_48, %c1_49, %c9_50, %c0_51] : memref<2x18x32x32xf32, #tpu.memory_space<vmem>>, vector<2x16x16x32xf32>
    %31 = vector.shape_cast %30 : vector<2x16x16x32xf32> to vector<512x32xf32>
    %c0_52 = arith.constant 0 : index
    %c160 = arith.constant 160 : index
    %32 = vector.load %arg18[%c0_52, %c160] : memref<512x288xf32, #tpu.memory_space<vmem>>, vector<512x32xf32>
    tpu.vector_store %arg18[%c0_52, %c160], %31 {strides = array<i32>} : memref<512x288xf32, #tpu.memory_space<vmem>>, vector<512x32xf32>,
    %c0_53 = arith.constant 0 : index
    %c2 = arith.constant 2 : index
    %c7_54 = arith.constant 7 : index
    %c0_55 = arith.constant 0 : index
    %33 = vector.load %arg15[%c0_53, %c2, %c7_54, %c0_55] : memref<2x18x32x32xf32, #tpu.memory_space<vmem>>, vector<2x16x16x32xf32>
    %34 = vector.shape_cast %33 : vector<2x16x16x32xf32> to vector<512x32xf32>
    %c0_56 = arith.constant 0 : index
    %c192 = arith.constant 192 : index
    %35 = vector.load %arg18[%c0_56, %c192] : memref<512x288xf32, #tpu.memory_space<vmem>>, vector<512x32xf32>
    tpu.vector_store %arg18[%c0_56, %c192], %34 {strides = array<i32>} : memref<512x288xf32, #tpu.memory_space<vmem>>, vector<512x32xf32>,
    %c0_57 = arith.constant 0 : index
    %c2_58 = arith.constant 2 : index
    %c8_59 = arith.constant 8 : index
    %c0_60 = arith.constant 0 : index
    %36 = vector.load %arg15[%c0_57, %c2_58, %c8_59, %c0_60] : memref<2x18x32x32xf32, #tpu.memory_space<vmem>>, vector<2x16x16x32xf32>
    %37 = vector.shape_cast %36 : vector<2x16x16x32xf32> to vector<512x32xf32>
    %c0_61 = arith.constant 0 : index
    %c224 = arith.constant 224 : index
    %38 = vector.load %arg18[%c0_61, %c224] : memref<512x288xf32, #tpu.memory_space<vmem>>, vector<512x32xf32>
    tpu.vector_store %arg18[%c0_61, %c224], %37 {strides = array<i32>} : memref<512x288xf32, #tpu.memory_space<vmem>>, vector<512x32xf32>,
    %c0_62 = arith.constant 0 : index
    %c2_63 = arith.constant 2 : index
    %c9_64 = arith.constant 9 : index
    %c0_65 = arith.constant 0 : index
    %39 = vector.load %arg15[%c0_62, %c2_63, %c9_64, %c0_65] : memref<2x18x32x32xf32, #tpu.memory_space<vmem>>, vector<2x16x16x32xf32>
    %40 = vector.shape_cast %39 : vector<2x16x16x32xf32> to vector<512x32xf32>
    %c0_66 = arith.constant 0 : index
    %c256 = arith.constant 256 : index
    %41 = vector.load %arg18[%c0_66, %c256] : memref<512x288xf32, #tpu.memory_space<vmem>>, vector<512x32xf32>
    tpu.vector_store %arg18[%c0_66, %c256], %40 {strides = array<i32>} : memref<512x288xf32, #tpu.memory_space<vmem>>, vector<512x32xf32>,
    %c0_67 = arith.constant 0 : index
    %c0_68 = arith.constant 0 : index
    %42 = vector.load %arg18[%c0_67, %c0_68] : memref<512x288xf32, #tpu.memory_space<vmem>>, vector<512x288xf32>
    %c0_69 = arith.constant 0 : index
    %c0_70 = arith.constant 0 : index
    %43 = vector.load %arg4[%c0_69, %c0_70] : memref<288x32xf32, #tpu.memory_space<vmem>>, vector<288x32xf32>
    %cst_71 = arith.constant dense<0.000000e+00> : vector<512x32xf32>
    %44 = tpu.matmul %42, %43, %cst_71 {dimension_numbers = #tpu.dot_dimension_numbers<[1], [0], [0], [1], [0, 0, 1, 1], [], []>} : vector<512x288xf32>, vector<288x32xf32>, vector<512x32xf32> -> vector<512x32xf32>
    %c0_72 = arith.constant 0 : index
    %c0_73 = arith.constant 0 : index
    %45 = vector.load %arg5[%c0_72, %c0_73] : memref<1x32xf32, #tpu.memory_space<vmem>>, vector<1x32xf32>
    %46 = vector.broadcast %45 : vector<1x32xf32> to vector<512x32xf32>
    %47 = arith.addf %44, %46 : vector<512x32xf32>
    %48 = vector.shape_cast %47 : vector<512x32xf32> to vector<16x2x16x32xf32>
    %49 = vector.extract_strided_slice %48 {offsets = [0, 0, 0, 0], sizes = [16, 1, 16, 32], strides = [1, 1, 1, 1]} : vector<16x2x16x32xf32> to vector<16x1x16x32xf32>
    %50 = vector.shape_cast %49 : vector<16x1x16x32xf32> to vector<16x16x32xf32>
    %51 = vector.extract_strided_slice %48 {offsets = [0, 1, 0, 0], sizes = [16, 1, 16, 32], strides = [1, 1, 1, 1]} : vector<16x2x16x32xf32> to vector<16x1x16x32xf32>
    %52 = vector.shape_cast %51 : vector<16x1x16x32xf32> to vector<16x16x32xf32>
    %53 = arith.maximumf %50, %52 : vector<16x16x32xf32>
    %54 = vector.shape_cast %53 : vector<16x16x32xf32> to vector<256x32xf32>
    %c0_74 = arith.constant 0 : index
    %c0_75 = arith.constant 0 : index
    %55 = vector.load %arg21[%c0_74, %c0_75] : memref<256x32xf32, #tpu.memory_space<vmem>>, vector<256x32xf32>
    tpu.vector_store %arg21[%c0_74, %c0_75], %54 {strides = array<i32>} : memref<256x32xf32, #tpu.memory_space<vmem>>, vector<256x32xf32>,
    %c0_76 = arith.constant 0 : index
    %c0_77 = arith.constant 0 : index
    %56 = tpu.strided_load %arg21[%c0_76, %c0_77] {strides = array<i32: 2, 1>} : memref<256x32xf32, #tpu.memory_space<vmem>>, vector<128x32xf32>
    %c1_78 = arith.constant 1 : index
    %c0_79 = arith.constant 0 : index
    %57 = tpu.strided_load %arg21[%c1_78, %c0_79] {strides = array<i32: 2, 1>} : memref<256x32xf32, #tpu.memory_space<vmem>>, vector<128x32xf32>
    %58 = arith.maximumf %56, %57 : vector<128x32xf32>
    %59 = vector.shape_cast %58 : vector<128x32xf32> to vector<2x8x8x32xf32>
    %c0_80 = arith.constant 0 : index
    %c1_81 = arith.constant 1 : index
    %c8_82 = arith.constant 8 : index
    %c0_83 = arith.constant 0 : index
    %60 = vector.load %arg16[%c0_80, %c1_81, %c8_82, %c0_83] : memref<2x10x24x32xf32, #tpu.memory_space<vmem>>, vector<2x8x8x32xf32>
    tpu.vector_store %arg16[%c0_80, %c1_81, %c8_82, %c0_83], %59 {strides = array<i32>} : memref<2x10x24x32xf32, #tpu.memory_space<vmem>>, vector<2x8x8x32xf32>,
    %cst_84 = arith.constant 0.000000e+00 : f32
    %61 = vector.broadcast %cst_84 : f32 to vector<2x1x10x32xf32>
    %cst_85 = arith.constant 0.000000e+00 : f32
    %62 = vector.broadcast %cst_85 : f32 to vector<2x8x1x32xf32>
    %c0_86 = arith.constant 0 : index
    %c0_87 = arith.constant 0 : index
    %c7_88 = arith.constant 7 : index
    %c0_89 = arith.constant 0 : index
    %63 = vector.load %arg16[%c0_86, %c0_87, %c7_88, %c0_89] : memref<2x10x24x32xf32, #tpu.memory_space<vmem>>, vector<2x1x10x32xf32>
    tpu.vector_store %arg16[%c0_86, %c0_87, %c7_88, %c0_89], %61 {strides = array<i32>} : memref<2x10x24x32xf32, #tpu.memory_space<vmem>>, vector<2x1x10x32xf32>,
    %c0_90 = arith.constant 0 : index
    %c9_91 = arith.constant 9 : index
    %c7_92 = arith.constant 7 : index
    %c0_93 = arith.constant 0 : index
    %64 = vector.load %arg16[%c0_90, %c9_91, %c7_92, %c0_93] : memref<2x10x24x32xf32, #tpu.memory_space<vmem>>, vector<2x1x10x32xf32>
    tpu.vector_store %arg16[%c0_90, %c9_91, %c7_92, %c0_93], %61 {strides = array<i32>} : memref<2x10x24x32xf32, #tpu.memory_space<vmem>>, vector<2x1x10x32xf32>,
    %c0_94 = arith.constant 0 : index
    %c1_95 = arith.constant 1 : index
    %c7_96 = arith.constant 7 : index
    %c0_97 = arith.constant 0 : index
    %65 = vector.load %arg16[%c0_94, %c1_95, %c7_96, %c0_97] : memref<2x10x24x32xf32, #tpu.memory_space<vmem>>, vector<2x8x1x32xf32>
    tpu.vector_store %arg16[%c0_94, %c1_95, %c7_96, %c0_97], %62 {strides = array<i32>} : memref<2x10x24x32xf32, #tpu.memory_space<vmem>>, vector<2x8x1x32xf32>,
    %c0_98 = arith.constant 0 : index
    %c1_99 = arith.constant 1 : index
    %c16 = arith.constant 16 : index
    %c0_100 = arith.constant 0 : index
    %66 = vector.load %arg16[%c0_98, %c1_99, %c16, %c0_100] : memref<2x10x24x32xf32, #tpu.memory_space<vmem>>, vector<2x8x1x32xf32>
    tpu.vector_store %arg16[%c0_98, %c1_99, %c16, %c0_100], %62 {strides = array<i32>} : memref<2x10x24x32xf32, #tpu.memory_space<vmem>>, vector<2x8x1x32xf32>,
    %c0_101 = arith.constant 0 : index
    %c0_102 = arith.constant 0 : index
    %c7_103 = arith.constant 7 : index
    %c0_104 = arith.constant 0 : index
    %67 = vector.load %arg16[%c0_101, %c0_102, %c7_103, %c0_104] : memref<2x10x24x32xf32, #tpu.memory_space<vmem>>, vector<2x8x8x32xf32>
    %68 = vector.shape_cast %67 : vector<2x8x8x32xf32> to vector<128x32xf32>
    %c0_105 = arith.constant 0 : index
    %c0_106 = arith.constant 0 : index
    %69 = vector.load %arg19[%c0_105, %c0_106] : memref<128x288xf32, #tpu.memory_space<vmem>>, vector<128x32xf32>
    tpu.vector_store %arg19[%c0_105, %c0_106], %68 {strides = array<i32>} : memref<128x288xf32, #tpu.memory_space<vmem>>, vector<128x32xf32>,
    %c0_107 = arith.constant 0 : index
    %c0_108 = arith.constant 0 : index
    %c8_109 = arith.constant 8 : index
    %c0_110 = arith.constant 0 : index
    %70 = vector.load %arg16[%c0_107, %c0_108, %c8_109, %c0_110] : memref<2x10x24x32xf32, #tpu.memory_space<vmem>>, vector<2x8x8x32xf32>
    %71 = vector.shape_cast %70 : vector<2x8x8x32xf32> to vector<128x32xf32>
    %c0_111 = arith.constant 0 : index
    %c32_112 = arith.constant 32 : index
    %72 = vector.load %arg19[%c0_111, %c32_112] : memref<128x288xf32, #tpu.memory_space<vmem>>, vector<128x32xf32>
    tpu.vector_store %arg19[%c0_111, %c32_112], %71 {strides = array<i32>} : memref<128x288xf32, #tpu.memory_space<vmem>>, vector<128x32xf32>,
    %c0_113 = arith.constant 0 : index
    %c0_114 = arith.constant 0 : index
    %c9_115 = arith.constant 9 : index
    %c0_116 = arith.constant 0 : index
    %73 = vector.load %arg16[%c0_113, %c0_114, %c9_115, %c0_116] : memref<2x10x24x32xf32, #tpu.memory_space<vmem>>, vector<2x8x8x32xf32>
    %74 = vector.shape_cast %73 : vector<2x8x8x32xf32> to vector<128x32xf32>
    %c0_117 = arith.constant 0 : index
    %c64_118 = arith.constant 64 : index
    %75 = vector.load %arg19[%c0_117, %c64_118] : memref<128x288xf32, #tpu.memory_space<vmem>>, vector<128x32xf32>
    tpu.vector_store %arg19[%c0_117, %c64_118], %74 {strides = array<i32>} : memref<128x288xf32, #tpu.memory_space<vmem>>, vector<128x32xf32>,
    %c0_119 = arith.constant 0 : index
    %c1_120 = arith.constant 1 : index
    %c7_121 = arith.constant 7 : index
    %c0_122 = arith.constant 0 : index
    %76 = vector.load %arg16[%c0_119, %c1_120, %c7_121, %c0_122] : memref<2x10x24x32xf32, #tpu.memory_space<vmem>>, vector<2x8x8x32xf32>
    %77 = vector.shape_cast %76 : vector<2x8x8x32xf32> to vector<128x32xf32>
    %c0_123 = arith.constant 0 : index
    %c96_124 = arith.constant 96 : index
    %78 = vector.load %arg19[%c0_123, %c96_124] : memref<128x288xf32, #tpu.memory_space<vmem>>, vector<128x32xf32>
    tpu.vector_store %arg19[%c0_123, %c96_124], %77 {strides = array<i32>} : memref<128x288xf32, #tpu.memory_space<vmem>>, vector<128x32xf32>,
    %c0_125 = arith.constant 0 : index
    %c1_126 = arith.constant 1 : index
    %c8_127 = arith.constant 8 : index
    %c0_128 = arith.constant 0 : index
    %79 = vector.load %arg16[%c0_125, %c1_126, %c8_127, %c0_128] : memref<2x10x24x32xf32, #tpu.memory_space<vmem>>, vector<2x8x8x32xf32>
    %80 = vector.shape_cast %79 : vector<2x8x8x32xf32> to vector<128x32xf32>
    %c0_129 = arith.constant 0 : index
    %c128_130 = arith.constant 128 : index
    %81 = vector.load %arg19[%c0_129, %c128_130] : memref<128x288xf32, #tpu.memory_space<vmem>>, vector<128x32xf32>
    tpu.vector_store %arg19[%c0_129, %c128_130], %80 {strides = array<i32>} : memref<128x288xf32, #tpu.memory_space<vmem>>, vector<128x32xf32>,
    %c0_131 = arith.constant 0 : index
    %c1_132 = arith.constant 1 : index
    %c9_133 = arith.constant 9 : index
    %c0_134 = arith.constant 0 : index
    %82 = vector.load %arg16[%c0_131, %c1_132, %c9_133, %c0_134] : memref<2x10x24x32xf32, #tpu.memory_space<vmem>>, vector<2x8x8x32xf32>
    %83 = vector.shape_cast %82 : vector<2x8x8x32xf32> to vector<128x32xf32>
    %c0_135 = arith.constant 0 : index
    %c160_136 = arith.constant 160 : index
    %84 = vector.load %arg19[%c0_135, %c160_136] : memref<128x288xf32, #tpu.memory_space<vmem>>, vector<128x32xf32>
    tpu.vector_store %arg19[%c0_135, %c160_136], %83 {strides = array<i32>} : memref<128x288xf32, #tpu.memory_space<vmem>>, vector<128x32xf32>,
    %c0_137 = arith.constant 0 : index
    %c2_138 = arith.constant 2 : index
    %c7_139 = arith.constant 7 : index
    %c0_140 = arith.constant 0 : index
    %85 = vector.load %arg16[%c0_137, %c2_138, %c7_139, %c0_140] : memref<2x10x24x32xf32, #tpu.memory_space<vmem>>, vector<2x8x8x32xf32>
    %86 = vector.shape_cast %85 : vector<2x8x8x32xf32> to vector<128x32xf32>
    %c0_141 = arith.constant 0 : index
    %c192_142 = arith.constant 192 : index
    %87 = vector.load %arg19[%c0_141, %c192_142] : memref<128x288xf32, #tpu.memory_space<vmem>>, vector<128x32xf32>
    tpu.vector_store %arg19[%c0_141, %c192_142], %86 {strides = array<i32>} : memref<128x288xf32, #tpu.memory_space<vmem>>, vector<128x32xf32>,
    %c0_143 = arith.constant 0 : index
    %c2_144 = arith.constant 2 : index
    %c8_145 = arith.constant 8 : index
    %c0_146 = arith.constant 0 : index
    %88 = vector.load %arg16[%c0_143, %c2_144, %c8_145, %c0_146] : memref<2x10x24x32xf32, #tpu.memory_space<vmem>>, vector<2x8x8x32xf32>
    %89 = vector.shape_cast %88 : vector<2x8x8x32xf32> to vector<128x32xf32>
    %c0_147 = arith.constant 0 : index
    %c224_148 = arith.constant 224 : index
    %90 = vector.load %arg19[%c0_147, %c224_148] : memref<128x288xf32, #tpu.memory_space<vmem>>, vector<128x32xf32>
    tpu.vector_store %arg19[%c0_147, %c224_148], %89 {strides = array<i32>} : memref<128x288xf32, #tpu.memory_space<vmem>>, vector<128x32xf32>,
    %c0_149 = arith.constant 0 : index
    %c2_150 = arith.constant 2 : index
    %c9_151 = arith.constant 9 : index
    %c0_152 = arith.constant 0 : index
    %91 = vector.load %arg16[%c0_149, %c2_150, %c9_151, %c0_152] : memref<2x10x24x32xf32, #tpu.memory_space<vmem>>, vector<2x8x8x32xf32>
    %92 = vector.shape_cast %91 : vector<2x8x8x32xf32> to vector<128x32xf32>
    %c0_153 = arith.constant 0 : index
    %c256_154 = arith.constant 256 : index
    %93 = vector.load %arg19[%c0_153, %c256_154] : memref<128x288xf32, #tpu.memory_space<vmem>>, vector<128x32xf32>
    tpu.vector_store %arg19[%c0_153, %c256_154], %92 {strides = array<i32>} : memref<128x288xf32, #tpu.memory_space<vmem>>, vector<128x32xf32>,
    %c0_155 = arith.constant 0 : index
    %c0_156 = arith.constant 0 : index
    %94 = vector.load %arg19[%c0_155, %c0_156] : memref<128x288xf32, #tpu.memory_space<vmem>>, vector<128x288xf32>
    %c0_157 = arith.constant 0 : index
    %c0_158 = arith.constant 0 : index
    %95 = vector.load %arg6[%c0_157, %c0_158] : memref<288x64xf32, #tpu.memory_space<vmem>>, vector<288x64xf32>
    %cst_159 = arith.constant dense<0.000000e+00> : vector<128x64xf32>
    %96 = tpu.matmul %94, %95, %cst_159 {dimension_numbers = #tpu.dot_dimension_numbers<[1], [0], [0], [1], [0, 0, 1, 1], [], []>} : vector<128x288xf32>, vector<288x64xf32>, vector<128x64xf32> -> vector<128x64xf32>
    %c0_160 = arith.constant 0 : index
    %c0_161 = arith.constant 0 : index
    %97 = vector.load %arg7[%c0_160, %c0_161] : memref<1x64xf32, #tpu.memory_space<vmem>>, vector<1x64xf32>
    %98 = vector.broadcast %97 : vector<1x64xf32> to vector<128x64xf32>
    %99 = arith.addf %96, %98 : vector<128x64xf32>
    %100 = vector.shape_cast %99 : vector<128x64xf32> to vector<2x8x8x64xf32>
    %c0_162 = arith.constant 0 : index
    %c1_163 = arith.constant 1 : index
    %c8_164 = arith.constant 8 : index
    %c0_165 = arith.constant 0 : index
    %101 = vector.load %arg17[%c0_162, %c1_163, %c8_164, %c0_165] : memref<2x10x24x64xf32, #tpu.memory_space<vmem>>, vector<2x8x8x64xf32>
    tpu.vector_store %arg17[%c0_162, %c1_163, %c8_164, %c0_165], %100 {strides = array<i32>} : memref<2x10x24x64xf32, #tpu.memory_space<vmem>>, vector<2x8x8x64xf32>,
    %cst_166 = arith.constant 0.000000e+00 : f32
    %102 = vector.broadcast %cst_166 : f32 to vector<2x1x10x64xf32>
    %cst_167 = arith.constant 0.000000e+00 : f32
    %103 = vector.broadcast %cst_167 : f32 to vector<2x8x1x64xf32>
    %c0_168 = arith.constant 0 : index
    %c0_169 = arith.constant 0 : index
    %c7_170 = arith.constant 7 : index
    %c0_171 = arith.constant 0 : index
    %104 = vector.load %arg17[%c0_168, %c0_169, %c7_170, %c0_171] : memref<2x10x24x64xf32, #tpu.memory_space<vmem>>, vector<2x1x10x64xf32>
    tpu.vector_store %arg17[%c0_168, %c0_169, %c7_170, %c0_171], %102 {strides = array<i32>} : memref<2x10x24x64xf32, #tpu.memory_space<vmem>>, vector<2x1x10x64xf32>,
    %c0_172 = arith.constant 0 : index
    %c9_173 = arith.constant 9 : index
    %c7_174 = arith.constant 7 : index
    %c0_175 = arith.constant 0 : index
    %105 = vector.load %arg17[%c0_172, %c9_173, %c7_174, %c0_175] : memref<2x10x24x64xf32, #tpu.memory_space<vmem>>, vector<2x1x10x64xf32>
    tpu.vector_store %arg17[%c0_172, %c9_173, %c7_174, %c0_175], %102 {strides = array<i32>} : memref<2x10x24x64xf32, #tpu.memory_space<vmem>>, vector<2x1x10x64xf32>,
    %c0_176 = arith.constant 0 : index
    %c1_177 = arith.constant 1 : index
    %c7_178 = arith.constant 7 : index
    %c0_179 = arith.constant 0 : index
    %106 = vector.load %arg17[%c0_176, %c1_177, %c7_178, %c0_179] : memref<2x10x24x64xf32, #tpu.memory_space<vmem>>, vector<2x8x1x64xf32>
    tpu.vector_store %arg17[%c0_176, %c1_177, %c7_178, %c0_179], %103 {strides = array<i32>} : memref<2x10x24x64xf32, #tpu.memory_space<vmem>>, vector<2x8x1x64xf32>,
    %c0_180 = arith.constant 0 : index
    %c1_181 = arith.constant 1 : index
    %c16_182 = arith.constant 16 : index
    %c0_183 = arith.constant 0 : index
    %107 = vector.load %arg17[%c0_180, %c1_181, %c16_182, %c0_183] : memref<2x10x24x64xf32, #tpu.memory_space<vmem>>, vector<2x8x1x64xf32>
    tpu.vector_store %arg17[%c0_180, %c1_181, %c16_182, %c0_183], %103 {strides = array<i32>} : memref<2x10x24x64xf32, #tpu.memory_space<vmem>>, vector<2x8x1x64xf32>,
    %c0_184 = arith.constant 0 : index
    %c0_185 = arith.constant 0 : index
    %c7_186 = arith.constant 7 : index
    %c0_187 = arith.constant 0 : index
    %108 = vector.load %arg17[%c0_184, %c0_185, %c7_186, %c0_187] : memref<2x10x24x64xf32, #tpu.memory_space<vmem>>, vector<2x8x8x64xf32>
    %109 = vector.shape_cast %108 : vector<2x8x8x64xf32> to vector<128x64xf32>
    %c0_188 = arith.constant 0 : index
    %c0_189 = arith.constant 0 : index
    %110 = vector.load %arg20[%c0_188, %c0_189] : memref<128x576xf32, #tpu.memory_space<vmem>>, vector<128x64xf32>
    tpu.vector_store %arg20[%c0_188, %c0_189], %109 {strides = array<i32>} : memref<128x576xf32, #tpu.memory_space<vmem>>, vector<128x64xf32>,
    %c0_190 = arith.constant 0 : index
    %c0_191 = arith.constant 0 : index
    %c8_192 = arith.constant 8 : index
    %c0_193 = arith.constant 0 : index
    %111 = vector.load %arg17[%c0_190, %c0_191, %c8_192, %c0_193] : memref<2x10x24x64xf32, #tpu.memory_space<vmem>>, vector<2x8x8x64xf32>
    %112 = vector.shape_cast %111 : vector<2x8x8x64xf32> to vector<128x64xf32>
    %c0_194 = arith.constant 0 : index
    %c64_195 = arith.constant 64 : index
    %113 = vector.load %arg20[%c0_194, %c64_195] : memref<128x576xf32, #tpu.memory_space<vmem>>, vector<128x64xf32>
    tpu.vector_store %arg20[%c0_194, %c64_195], %112 {strides = array<i32>} : memref<128x576xf32, #tpu.memory_space<vmem>>, vector<128x64xf32>,
    %c0_196 = arith.constant 0 : index
    %c0_197 = arith.constant 0 : index
    %c9_198 = arith.constant 9 : index
    %c0_199 = arith.constant 0 : index
    %114 = vector.load %arg17[%c0_196, %c0_197, %c9_198, %c0_199] : memref<2x10x24x64xf32, #tpu.memory_space<vmem>>, vector<2x8x8x64xf32>
    %115 = vector.shape_cast %114 : vector<2x8x8x64xf32> to vector<128x64xf32>
    %c0_200 = arith.constant 0 : index
    %c128_201 = arith.constant 128 : index
    %116 = vector.load %arg20[%c0_200, %c128_201] : memref<128x576xf32, #tpu.memory_space<vmem>>, vector<128x64xf32>
    tpu.vector_store %arg20[%c0_200, %c128_201], %115 {strides = array<i32>} : memref<128x576xf32, #tpu.memory_space<vmem>>, vector<128x64xf32>,
    %c0_202 = arith.constant 0 : index
    %c1_203 = arith.constant 1 : index
    %c7_204 = arith.constant 7 : index
    %c0_205 = arith.constant 0 : index
    %117 = vector.load %arg17[%c0_202, %c1_203, %c7_204, %c0_205] : memref<2x10x24x64xf32, #tpu.memory_space<vmem>>, vector<2x8x8x64xf32>
    %118 = vector.shape_cast %117 : vector<2x8x8x64xf32> to vector<128x64xf32>
    %c0_206 = arith.constant 0 : index
    %c192_207 = arith.constant 192 : index
    %119 = vector.load %arg20[%c0_206, %c192_207] : memref<128x576xf32, #tpu.memory_space<vmem>>, vector<128x64xf32>
    tpu.vector_store %arg20[%c0_206, %c192_207], %118 {strides = array<i32>} : memref<128x576xf32, #tpu.memory_space<vmem>>, vector<128x64xf32>,
    %c0_208 = arith.constant 0 : index
    %c1_209 = arith.constant 1 : index
    %c8_210 = arith.constant 8 : index
    %c0_211 = arith.constant 0 : index
    %120 = vector.load %arg17[%c0_208, %c1_209, %c8_210, %c0_211] : memref<2x10x24x64xf32, #tpu.memory_space<vmem>>, vector<2x8x8x64xf32>
    %121 = vector.shape_cast %120 : vector<2x8x8x64xf32> to vector<128x64xf32>
    %c0_212 = arith.constant 0 : index
    %c256_213 = arith.constant 256 : index
    %122 = vector.load %arg20[%c0_212, %c256_213] : memref<128x576xf32, #tpu.memory_space<vmem>>, vector<128x64xf32>
    tpu.vector_store %arg20[%c0_212, %c256_213], %121 {strides = array<i32>} : memref<128x576xf32, #tpu.memory_space<vmem>>, vector<128x64xf32>,
    %c0_214 = arith.constant 0 : index
    %c1_215 = arith.constant 1 : index
    %c9_216 = arith.constant 9 : index
    %c0_217 = arith.constant 0 : index
    %123 = vector.load %arg17[%c0_214, %c1_215, %c9_216, %c0_217] : memref<2x10x24x64xf32, #tpu.memory_space<vmem>>, vector<2x8x8x64xf32>
    %124 = vector.shape_cast %123 : vector<2x8x8x64xf32> to vector<128x64xf32>
    %c0_218 = arith.constant 0 : index
    %c320 = arith.constant 320 : index
    %125 = vector.load %arg20[%c0_218, %c320] : memref<128x576xf32, #tpu.memory_space<vmem>>, vector<128x64xf32>
    tpu.vector_store %arg20[%c0_218, %c320], %124 {strides = array<i32>} : memref<128x576xf32, #tpu.memory_space<vmem>>, vector<128x64xf32>,
    %c0_219 = arith.constant 0 : index
    %c2_220 = arith.constant 2 : index
    %c7_221 = arith.constant 7 : index
    %c0_222 = arith.constant 0 : index
    %126 = vector.load %arg17[%c0_219, %c2_220, %c7_221, %c0_222] : memref<2x10x24x64xf32, #tpu.memory_space<vmem>>, vector<2x8x8x64xf32>
    %127 = vector.shape_cast %126 : vector<2x8x8x64xf32> to vector<128x64xf32>
    %c0_223 = arith.constant 0 : index
    %c384 = arith.constant 384 : index
    %128 = vector.load %arg20[%c0_223, %c384] : memref<128x576xf32, #tpu.memory_space<vmem>>, vector<128x64xf32>
    tpu.vector_store %arg20[%c0_223, %c384], %127 {strides = array<i32>} : memref<128x576xf32, #tpu.memory_space<vmem>>, vector<128x64xf32>,
    %c0_224 = arith.constant 0 : index
    %c2_225 = arith.constant 2 : index
    %c8_226 = arith.constant 8 : index
    %c0_227 = arith.constant 0 : index
    %129 = vector.load %arg17[%c0_224, %c2_225, %c8_226, %c0_227] : memref<2x10x24x64xf32, #tpu.memory_space<vmem>>, vector<2x8x8x64xf32>
    %130 = vector.shape_cast %129 : vector<2x8x8x64xf32> to vector<128x64xf32>
    %c0_228 = arith.constant 0 : index
    %c448 = arith.constant 448 : index
    %131 = vector.load %arg20[%c0_228, %c448] : memref<128x576xf32, #tpu.memory_space<vmem>>, vector<128x64xf32>
    tpu.vector_store %arg20[%c0_228, %c448], %130 {strides = array<i32>} : memref<128x576xf32, #tpu.memory_space<vmem>>, vector<128x64xf32>,
    %c0_229 = arith.constant 0 : index
    %c2_230 = arith.constant 2 : index
    %c9_231 = arith.constant 9 : index
    %c0_232 = arith.constant 0 : index
    %132 = vector.load %arg17[%c0_229, %c2_230, %c9_231, %c0_232] : memref<2x10x24x64xf32, #tpu.memory_space<vmem>>, vector<2x8x8x64xf32>
    %133 = vector.shape_cast %132 : vector<2x8x8x64xf32> to vector<128x64xf32>
    %c0_233 = arith.constant 0 : index
    %c512 = arith.constant 512 : index
    %134 = vector.load %arg20[%c0_233, %c512] : memref<128x576xf32, #tpu.memory_space<vmem>>, vector<128x64xf32>
    tpu.vector_store %arg20[%c0_233, %c512], %133 {strides = array<i32>} : memref<128x576xf32, #tpu.memory_space<vmem>>, vector<128x64xf32>,
    %c0_234 = arith.constant 0 : index
    %c0_235 = arith.constant 0 : index
    %135 = vector.load %arg20[%c0_234, %c0_235] : memref<128x576xf32, #tpu.memory_space<vmem>>, vector<128x576xf32>
    %c0_236 = arith.constant 0 : index
    %c0_237 = arith.constant 0 : index
    %136 = vector.load %arg8[%c0_236, %c0_237] : memref<576x64xf32, #tpu.memory_space<vmem>>, vector<576x64xf32>
    %cst_238 = arith.constant dense<0.000000e+00> : vector<128x64xf32>
    %137 = tpu.matmul %135, %136, %cst_238 {dimension_numbers = #tpu.dot_dimension_numbers<[1], [0], [0], [1], [0, 0, 1, 1], [], []>} : vector<128x576xf32>, vector<576x64xf32>, vector<128x64xf32> -> vector<128x64xf32>
    %c0_239 = arith.constant 0 : index
    %c0_240 = arith.constant 0 : index
    %138 = vector.load %arg9[%c0_239, %c0_240] : memref<1x64xf32, #tpu.memory_space<vmem>>, vector<1x64xf32>
    %139 = vector.broadcast %138 : vector<1x64xf32> to vector<128x64xf32>
    %140 = arith.addf %137, %139 : vector<128x64xf32>
    %141 = vector.shape_cast %140 : vector<128x64xf32> to vector<8x2x8x64xf32>
    %142 = vector.extract_strided_slice %141 {offsets = [0, 0, 0, 0], sizes = [8, 1, 8, 64], strides = [1, 1, 1, 1]} : vector<8x2x8x64xf32> to vector<8x1x8x64xf32>
    %143 = vector.shape_cast %142 : vector<8x1x8x64xf32> to vector<8x8x64xf32>
    %144 = vector.extract_strided_slice %141 {offsets = [0, 1, 0, 0], sizes = [8, 1, 8, 64], strides = [1, 1, 1, 1]} : vector<8x2x8x64xf32> to vector<8x1x8x64xf32>
    %145 = vector.shape_cast %144 : vector<8x1x8x64xf32> to vector<8x8x64xf32>
    %146 = arith.maximumf %143, %145 : vector<8x8x64xf32>
    %147 = vector.shape_cast %146 : vector<8x8x64xf32> to vector<64x64xf32>
    %c0_241 = arith.constant 0 : index
    %c0_242 = arith.constant 0 : index
    %148 = vector.load %arg22[%c0_241, %c0_242] : memref<64x64xf32, #tpu.memory_space<vmem>>, vector<64x64xf32>
    tpu.vector_store %arg22[%c0_241, %c0_242], %147 {strides = array<i32>} : memref<64x64xf32, #tpu.memory_space<vmem>>, vector<64x64xf32>,
    %c0_243 = arith.constant 0 : index
    %c0_244 = arith.constant 0 : index
    %149 = tpu.strided_load %arg22[%c0_243, %c0_244] {strides = array<i32: 2, 1>} : memref<64x64xf32, #tpu.memory_space<vmem>>, vector<32x64xf32>
    %c1_245 = arith.constant 1 : index
    %c0_246 = arith.constant 0 : index
    %150 = tpu.strided_load %arg22[%c1_245, %c0_246] {strides = array<i32: 2, 1>} : memref<64x64xf32, #tpu.memory_space<vmem>>, vector<32x64xf32>
    %151 = arith.maximumf %149, %150 : vector<32x64xf32>
    %152 = vector.shape_cast %151 : vector<32x64xf32> to vector<2x16x64xf32>
    %153 = vector.extract_strided_slice %152 {offsets = [0, 0, 0], sizes = [2, 1, 64], strides = [1, 1, 1]} : vector<2x16x64xf32> to vector<2x1x64xf32>
    %154 = vector.shape_cast %153 : vector<2x1x64xf32> to vector<2x64xf32>
    %c0_247 = arith.constant 0 : index
    %c0_248 = arith.constant 0 : index
    %155 = vector.load %arg23[%c0_247, %c0_248] : memref<2x1024xf32, #tpu.memory_space<vmem>>, vector<2x64xf32>
    tpu.vector_store %arg23[%c0_247, %c0_248], %154 {strides = array<i32>} : memref<2x1024xf32, #tpu.memory_space<vmem>>, vector<2x64xf32>,
    %156 = vector.extract_strided_slice %152 {offsets = [0, 1, 0], sizes = [2, 1, 64], strides = [1, 1, 1]} : vector<2x16x64xf32> to vector<2x1x64xf32>
    %157 = vector.shape_cast %156 : vector<2x1x64xf32> to vector<2x64xf32>
    %c0_249 = arith.constant 0 : index
    %c64_250 = arith.constant 64 : index
    %158 = vector.load %arg23[%c0_249, %c64_250] : memref<2x1024xf32, #tpu.memory_space<vmem>>, vector<2x64xf32>
    tpu.vector_store %arg23[%c0_249, %c64_250], %157 {strides = array<i32>} : memref<2x1024xf32, #tpu.memory_space<vmem>>, vector<2x64xf32>,
    %159 = vector.extract_strided_slice %152 {offsets = [0, 2, 0], sizes = [2, 1, 64], strides = [1, 1, 1]} : vector<2x16x64xf32> to vector<2x1x64xf32>
    %160 = vector.shape_cast %159 : vector<2x1x64xf32> to vector<2x64xf32>
    %c0_251 = arith.constant 0 : index
    %c128_252 = arith.constant 128 : index
    %161 = vector.load %arg23[%c0_251, %c128_252] : memref<2x1024xf32, #tpu.memory_space<vmem>>, vector<2x64xf32>
    tpu.vector_store %arg23[%c0_251, %c128_252], %160 {strides = array<i32>} : memref<2x1024xf32, #tpu.memory_space<vmem>>, vector<2x64xf32>,
    %162 = vector.extract_strided_slice %152 {offsets = [0, 3, 0], sizes = [2, 1, 64], strides = [1, 1, 1]} : vector<2x16x64xf32> to vector<2x1x64xf32>
    %163 = vector.shape_cast %162 : vector<2x1x64xf32> to vector<2x64xf32>
    %c0_253 = arith.constant 0 : index
    %c192_254 = arith.constant 192 : index
    %164 = vector.load %arg23[%c0_253, %c192_254] : memref<2x1024xf32, #tpu.memory_space<vmem>>, vector<2x64xf32>
    tpu.vector_store %arg23[%c0_253, %c192_254], %163 {strides = array<i32>} : memref<2x1024xf32, #tpu.memory_space<vmem>>, vector<2x64xf32>,
    %165 = vector.extract_strided_slice %152 {offsets = [0, 4, 0], sizes = [2, 1, 64], strides = [1, 1, 1]} : vector<2x16x64xf32> to vector<2x1x64xf32>
    %166 = vector.shape_cast %165 : vector<2x1x64xf32> to vector<2x64xf32>
    %c0_255 = arith.constant 0 : index
    %c256_256 = arith.constant 256 : index
    %167 = vector.load %arg23[%c0_255, %c256_256] : memref<2x1024xf32, #tpu.memory_space<vmem>>, vector<2x64xf32>
    tpu.vector_store %arg23[%c0_255, %c256_256], %166 {strides = array<i32>} : memref<2x1024xf32, #tpu.memory_space<vmem>>, vector<2x64xf32>,
    %168 = vector.extract_strided_slice %152 {offsets = [0, 5, 0], sizes = [2, 1, 64], strides = [1, 1, 1]} : vector<2x16x64xf32> to vector<2x1x64xf32>
    %169 = vector.shape_cast %168 : vector<2x1x64xf32> to vector<2x64xf32>
    %c0_257 = arith.constant 0 : index
    %c320_258 = arith.constant 320 : index
    %170 = vector.load %arg23[%c0_257, %c320_258] : memref<2x1024xf32, #tpu.memory_space<vmem>>, vector<2x64xf32>
    tpu.vector_store %arg23[%c0_257, %c320_258], %169 {strides = array<i32>} : memref<2x1024xf32, #tpu.memory_space<vmem>>, vector<2x64xf32>,
    %171 = vector.extract_strided_slice %152 {offsets = [0, 6, 0], sizes = [2, 1, 64], strides = [1, 1, 1]} : vector<2x16x64xf32> to vector<2x1x64xf32>
    %172 = vector.shape_cast %171 : vector<2x1x64xf32> to vector<2x64xf32>
    %c0_259 = arith.constant 0 : index
    %c384_260 = arith.constant 384 : index
    %173 = vector.load %arg23[%c0_259, %c384_260] : memref<2x1024xf32, #tpu.memory_space<vmem>>, vector<2x64xf32>
    tpu.vector_store %arg23[%c0_259, %c384_260], %172 {strides = array<i32>} : memref<2x1024xf32, #tpu.memory_space<vmem>>, vector<2x64xf32>,
    %174 = vector.extract_strided_slice %152 {offsets = [0, 7, 0], sizes = [2, 1, 64], strides = [1, 1, 1]} : vector<2x16x64xf32> to vector<2x1x64xf32>
    %175 = vector.shape_cast %174 : vector<2x1x64xf32> to vector<2x64xf32>
    %c0_261 = arith.constant 0 : index
    %c448_262 = arith.constant 448 : index
    %176 = vector.load %arg23[%c0_261, %c448_262] : memref<2x1024xf32, #tpu.memory_space<vmem>>, vector<2x64xf32>
    tpu.vector_store %arg23[%c0_261, %c448_262], %175 {strides = array<i32>} : memref<2x1024xf32, #tpu.memory_space<vmem>>, vector<2x64xf32>,
    %177 = vector.extract_strided_slice %152 {offsets = [0, 8, 0], sizes = [2, 1, 64], strides = [1, 1, 1]} : vector<2x16x64xf32> to vector<2x1x64xf32>
    %178 = vector.shape_cast %177 : vector<2x1x64xf32> to vector<2x64xf32>
    %c0_263 = arith.constant 0 : index
    %c512_264 = arith.constant 512 : index
    %179 = vector.load %arg23[%c0_263, %c512_264] : memref<2x1024xf32, #tpu.memory_space<vmem>>, vector<2x64xf32>
    tpu.vector_store %arg23[%c0_263, %c512_264], %178 {strides = array<i32>} : memref<2x1024xf32, #tpu.memory_space<vmem>>, vector<2x64xf32>,
    %180 = vector.extract_strided_slice %152 {offsets = [0, 9, 0], sizes = [2, 1, 64], strides = [1, 1, 1]} : vector<2x16x64xf32> to vector<2x1x64xf32>
    %181 = vector.shape_cast %180 : vector<2x1x64xf32> to vector<2x64xf32>
    %c0_265 = arith.constant 0 : index
    %c576 = arith.constant 576 : index
    %182 = vector.load %arg23[%c0_265, %c576] : memref<2x1024xf32, #tpu.memory_space<vmem>>, vector<2x64xf32>
    tpu.vector_store %arg23[%c0_265, %c576], %181 {strides = array<i32>} : memref<2x1024xf32, #tpu.memory_space<vmem>>, vector<2x64xf32>,
    %183 = vector.extract_strided_slice %152 {offsets = [0, 10, 0], sizes = [2, 1, 64], strides = [1, 1, 1]} : vector<2x16x64xf32> to vector<2x1x64xf32>
    %184 = vector.shape_cast %183 : vector<2x1x64xf32> to vector<2x64xf32>
    %c0_266 = arith.constant 0 : index
    %c640 = arith.constant 640 : index
    %185 = vector.load %arg23[%c0_266, %c640] : memref<2x1024xf32, #tpu.memory_space<vmem>>, vector<2x64xf32>
    tpu.vector_store %arg23[%c0_266, %c640], %184 {strides = array<i32>} : memref<2x1024xf32, #tpu.memory_space<vmem>>, vector<2x64xf32>,
    %186 = vector.extract_strided_slice %152 {offsets = [0, 11, 0], sizes = [2, 1, 64], strides = [1, 1, 1]} : vector<2x16x64xf32> to vector<2x1x64xf32>
    %187 = vector.shape_cast %186 : vector<2x1x64xf32> to vector<2x64xf32>
    %c0_267 = arith.constant 0 : index
    %c704 = arith.constant 704 : index
    %188 = vector.load %arg23[%c0_267, %c704] : memref<2x1024xf32, #tpu.memory_space<vmem>>, vector<2x64xf32>
    tpu.vector_store %arg23[%c0_267, %c704], %187 {strides = array<i32>} : memref<2x1024xf32, #tpu.memory_space<vmem>>, vector<2x64xf32>,
    %189 = vector.extract_strided_slice %152 {offsets = [0, 12, 0], sizes = [2, 1, 64], strides = [1, 1, 1]} : vector<2x16x64xf32> to vector<2x1x64xf32>
    %190 = vector.shape_cast %189 : vector<2x1x64xf32> to vector<2x64xf32>
    %c0_268 = arith.constant 0 : index
    %c768 = arith.constant 768 : index
    %191 = vector.load %arg23[%c0_268, %c768] : memref<2x1024xf32, #tpu.memory_space<vmem>>, vector<2x64xf32>
    tpu.vector_store %arg23[%c0_268, %c768], %190 {strides = array<i32>} : memref<2x1024xf32, #tpu.memory_space<vmem>>, vector<2x64xf32>,
    %192 = vector.extract_strided_slice %152 {offsets = [0, 13, 0], sizes = [2, 1, 64], strides = [1, 1, 1]} : vector<2x16x64xf32> to vector<2x1x64xf32>
    %193 = vector.shape_cast %192 : vector<2x1x64xf32> to vector<2x64xf32>
    %c0_269 = arith.constant 0 : index
    %c832 = arith.constant 832 : index
    %194 = vector.load %arg23[%c0_269, %c832] : memref<2x1024xf32, #tpu.memory_space<vmem>>, vector<2x64xf32>
    tpu.vector_store %arg23[%c0_269, %c832], %193 {strides = array<i32>} : memref<2x1024xf32, #tpu.memory_space<vmem>>, vector<2x64xf32>,
    %195 = vector.extract_strided_slice %152 {offsets = [0, 14, 0], sizes = [2, 1, 64], strides = [1, 1, 1]} : vector<2x16x64xf32> to vector<2x1x64xf32>
    %196 = vector.shape_cast %195 : vector<2x1x64xf32> to vector<2x64xf32>
    %c0_270 = arith.constant 0 : index
    %c896 = arith.constant 896 : index
    %197 = vector.load %arg23[%c0_270, %c896] : memref<2x1024xf32, #tpu.memory_space<vmem>>, vector<2x64xf32>
    tpu.vector_store %arg23[%c0_270, %c896], %196 {strides = array<i32>} : memref<2x1024xf32, #tpu.memory_space<vmem>>, vector<2x64xf32>,
    %198 = vector.extract_strided_slice %152 {offsets = [0, 15, 0], sizes = [2, 1, 64], strides = [1, 1, 1]} : vector<2x16x64xf32> to vector<2x1x64xf32>
    %199 = vector.shape_cast %198 : vector<2x1x64xf32> to vector<2x64xf32>
    %c0_271 = arith.constant 0 : index
    %c960 = arith.constant 960 : index
    %200 = vector.load %arg23[%c0_271, %c960] : memref<2x1024xf32, #tpu.memory_space<vmem>>, vector<2x64xf32>
    tpu.vector_store %arg23[%c0_271, %c960], %199 {strides = array<i32>} : memref<2x1024xf32, #tpu.memory_space<vmem>>, vector<2x64xf32>,
    %c0_272 = arith.constant 0 : index
    %c0_273 = arith.constant 0 : index
    %201 = vector.load %arg23[%c0_272, %c0_273] : memref<2x1024xf32, #tpu.memory_space<vmem>>, vector<2x1024xf32>
    %c0_274 = arith.constant 0 : index
    %c0_275 = arith.constant 0 : index
    %202 = vector.load %arg10[%c0_274, %c0_275] : memref<1024x128xf32, #tpu.memory_space<vmem>>, vector<1024x128xf32>
    %cst_276 = arith.constant dense<0.000000e+00> : vector<2x128xf32>
    %203 = tpu.matmul %201, %202, %cst_276 {dimension_numbers = #tpu.dot_dimension_numbers<[1], [0], [0], [1], [0, 0, 1, 1], [], []>} : vector<2x1024xf32>, vector<1024x128xf32>, vector<2x128xf32> -> vector<2x128xf32>
    %c0_277 = arith.constant 0 : index
    %c0_278 = arith.constant 0 : index
    %204 = vector.load %arg11[%c0_277, %c0_278] : memref<1x128xf32, #tpu.memory_space<vmem>>, vector<1x128xf32>
    %205 = vector.broadcast %204 : vector<1x128xf32> to vector<2x128xf32>
    %206 = arith.addf %203, %205 : vector<2x128xf32>
    %cst_279 = arith.constant 0.000000e+00 : f32
    %207 = vector.broadcast %cst_279 : f32 to vector<2x128xf32>
    %208 = arith.maximumf %206, %207 : vector<2x128xf32>
    %c0_280 = arith.constant 0 : index
    %c0_281 = arith.constant 0 : index
    %209 = vector.load %arg12[%c0_280, %c0_281] : memref<128x10xf32, #tpu.memory_space<vmem>>, vector<128x10xf32>
    %cst_282 = arith.constant dense<0.000000e+00> : vector<2x10xf32>
    %210 = tpu.matmul %208, %209, %cst_282 {dimension_numbers = #tpu.dot_dimension_numbers<[1], [0], [0], [1], [0, 0, 1, 1], [], []>} : vector<2x128xf32>, vector<128x10xf32>, vector<2x10xf32> -> vector<2x10xf32>
    %c0_283 = arith.constant 0 : index
    %c0_284 = arith.constant 0 : index
    %211 = vector.load %arg13[%c0_283, %c0_284] : memref<1x10xf32, #tpu.memory_space<vmem>>, vector<1x10xf32>
    %212 = vector.broadcast %211 : vector<1x10xf32> to vector<2x10xf32>
    %213 = arith.addf %210, %212 : vector<2x10xf32>
    %c0_285 = arith.constant 0 : index
    %c0_286 = arith.constant 0 : index
    %214 = vector.load %arg14[%c0_285, %c0_286] : memref<2x10xf32, #tpu.memory_space<vmem>>, vector<2x10xf32>
    tpu.vector_store %arg14[%c0_285, %c0_286], %213 {strides = array<i32>} : memref<2x10xf32, #tpu.memory_space<vmem>>, vector<2x10xf32>,
    return
  }
  func.func @transform_0(%arg0: i32) -> (i32, i32, i32) {
    %c0_i32 = arith.constant 0 : i32
    %c0_i32_0 = arith.constant 0 : i32
    %c0_i32_1 = arith.constant 0 : i32
    return %arg0, %c0_i32, %c0_i32_0 : i32, i32, i32
  }
  func.func @transform_1(%arg0: i32) -> (i32, i32) {
    %c0_i32 = arith.constant 0 : i32
    %c0_i32_0 = arith.constant 0 : i32
    %c0_i32_1 = arith.constant 0 : i32
    return %c0_i32, %c0_i32_0 : i32, i32
  }
  func.func @transform_2(%arg0: i32) -> (i32, i32) {
    %c0_i32 = arith.constant 0 : i32
    %c0_i32_0 = arith.constant 0 : i32
    %c0_i32_1 = arith.constant 0 : i32
    return %c0_i32, %c0_i32_0 : i32, i32
  }
  func.func @transform_3(%arg0: i32) -> (i32, i32) {
    %c0_i32 = arith.constant 0 : i32
    %c0_i32_0 = arith.constant 0 : i32
    %c0_i32_1 = arith.constant 0 : i32
    return %c0_i32, %c0_i32_0 : i32, i32
  }
  func.func @transform_4(%arg0: i32) -> (i32, i32) {
    %c0_i32 = arith.constant 0 : i32
    %c0_i32_0 = arith.constant 0 : i32
    %c0_i32_1 = arith.constant 0 : i32
    return %c0_i32, %c0_i32_0 : i32, i32
  }
  func.func @transform_5(%arg0: i32) -> (i32, i32) {
    %c0_i32 = arith.constant 0 : i32
    %c0_i32_0 = arith.constant 0 : i32
    %c0_i32_1 = arith.constant 0 : i32
    return %c0_i32, %c0_i32_0 : i32, i32
  }
  func.func @transform_6(%arg0: i32) -> (i32, i32) {
    %c0_i32 = arith.constant 0 : i32
    %c0_i32_0 = arith.constant 0 : i32
    %c0_i32_1 = arith.constant 0 : i32
    return %c0_i32, %c0_i32_0 : i32, i32
  }
  func.func @transform_7(%arg0: i32) -> (i32, i32) {
    %c0_i32 = arith.constant 0 : i32
    %c0_i32_0 = arith.constant 0 : i32
    %c0_i32_1 = arith.constant 0 : i32
    return %c0_i32, %c0_i32_0 : i32, i32
  }
  func.func @transform_8(%arg0: i32) -> (i32, i32) {
    %c0_i32 = arith.constant 0 : i32
    %c0_i32_0 = arith.constant 0 : i32
    %c0_i32_1 = arith.constant 0 : i32
    return %c0_i32, %c0_i32_0 : i32, i32
  }
  func.func @transform_9(%arg0: i32) -> (i32, i32) {
    %c0_i32 = arith.constant 0 : i32
    %c0_i32_0 = arith.constant 0 : i32
    %c0_i32_1 = arith.constant 0 : i32
    return %c0_i32, %c0_i32_0 : i32, i32
  }
  func.func @transform_10(%arg0: i32) -> (i32, i32) {
    %c0_i32 = arith.constant 0 : i32
    %c0_i32_0 = arith.constant 0 : i32
    %c0_i32_1 = arith.constant 0 : i32
    return %c0_i32, %c0_i32_0 : i32, i32
  }
  func.func @transform_11(%arg0: i32) -> (i32, i32) {
    %c0_i32 = arith.constant 0 : i32
    %c0_i32_0 = arith.constant 0 : i32
    %c0_i32_1 = arith.constant 0 : i32
    return %c0_i32, %c0_i32_0 : i32, i32
  }
  func.func @transform_12(%arg0: i32) -> (i32, i32) {
    %c0_i32 = arith.constant 0 : i32
    %c0_i32_0 = arith.constant 0 : i32
    %c0_i32_1 = arith.constant 0 : i32
    return %c0_i32, %c0_i32_0 : i32, i32
  }
  func.func @transform_13(%arg0: i32) -> (i32, i32) {
    %c0_i32 = arith.constant 0 : i32
    %c0_i32_0 = arith.constant 0 : i32
    return %arg0, %c0_i32 : i32, i32
  }
}

</mosaic_0001>

<bundles_post_ra>
// kernel: cnn_forward.1
= control target key start
LH: loop header
LB: loop body
LE: loop exit
PB: predicated region body
PF: predicated region fallthrough
CT: control target
= control target key end

     0   :  { %vm313_vm0 = vcmask 1042432   ;;  %vm120_vm1 = vcmask 220160   ;;  %vm9602_vm2 = vmmov 1   ;;  %s14444_s0 = inlined_call_operand.vmem [shape: f32[2,256,27], index: 0, kind: input, shape index: {}]   ;;  %s14445_s1 = inlined_call_operand.vmem [shape: f32[27,32], index: 1, kind: input, shape index: {}]   ;;  %s14446_s2 = inlined_call_operand.vmem [shape: f32[1,32], index: 2, kind: input, shape index: {}]   ;;  %s14447_s3 = inlined_call_operand.vmem [shape: f32[288,32], index: 3, kind: input, shape index: {}]   ;;  %s14448_s4 = inlined_call_operand.vmem [shape: f32[1,32], index: 4, kind: input, shape index: {}]   ;;  %s14449_s5 = inlined_call_operand.vmem [shape: f32[288,64], index: 5, kind: input, shape index: {}]   ;;  %s14450_s6 = inlined_call_operand.vmem [shape: f32[1,64], index: 6, kind: input, shape index: {}]   ;;  %s14451_s7 = inlined_call_operand.vmem [shape: f32[576,64], index: 7, kind: input, shape index: {}]   ;;  %s14452_s8 = inlined_call_operand.vmem [shape: f32[1,64], index: 8, kind: input, shape index: {}]   ;;  %s14453_s9 = inlined_call_operand.vmem [shape: f32[1024,128], index: 9, kind: input, shape index: {}]   ;;  %s14454_s10 = inlined_call_operand.vmem [shape: f32[1,128], index: 10, kind: input, shape index: {}]   ;;  %s14455_s11 = inlined_call_operand.vmem [shape: f32[128,10], index: 11, kind: input, shape index: {}]   ;;  %s14456_s12 = inlined_call_operand.vmem [shape: f32[1,10], index: 12, kind: input, shape index: {}]   ;;  %s14457_s13 = inlined_call_operand.hbm [shape: f32[2,10], index: 13, kind: output, shape index: {}]  }
   0x1   :  { %v109_v0 = vld [vmem:[%s14445_s1] sm:$0xff]  ;;  %v110_v1 = vld [vmem:[%s14445_s1 + $0x8] sm:$0xff]  ;;  %v111_v2 = vld [vmem:[%s14445_s1 + $0x10] sm:$0xff] }
   0x2   :  { %v9192_v3 = vpack.c.bf16 %v110_v1, %v109_v0  ;;  %v112_v4 = vld [vmem:[%s14445_s1 + $0x18] sm:$0x7]  ;;  %v45_v5 = vld [vmem:[%s14444_s0] sm:$0xff]  ;;  %vm9197_vm3 = vmpackc.low %vm313_vm0, %vm9602_vm2 }
   0x3   :  { %v9196_v6 = vpack.c.bf16 %v112_v4, %v111_v2  ;;  %8885 = vmatprep.mubr.msk.f32.mxu0 %vm120_vm1, %v45_v5  ;;  %v46_v7 = vld [vmem:[%s14444_s0 + $0x8] sm:$0xff]  ;;  %v47_v8 = vld [vmem:[%s14444_s0 + $0x10] sm:$0xff] }
   0x4   :  { %9193 = vmatprep.subr.bf16.mxu0 %v9192_v3 }
   0x5   :  { %9195 = vmatpush3.bf16.msra.mxu0 %v9192_v3 }
   0x6   :  { %9198 = vmatprep.subr.msk.bf16.mxu0 %vm9197_vm3, %v9196_v6 }
   0x9   :  { %9201 = vmatpush3.bf16.msk.msra.mxu0 %vm9197_vm3, %v9196_v6 }
   0xa   :  { %18 = vsyncpa [#allocation12], 0  ;;  %v48_v9 = vld [vmem:[%s14444_s0 + $0x18] sm:$0xff]  ;;  %v49_v10 = vld [vmem:[%s14444_s0 + $0x20] sm:$0xff]  ;;  %vm703_vm4 = vcmask 261120   ;;  %vm782_vm5 = vcmask 253952  }
   0xb   :  { %v50_v11 = vld [vmem:[%s14444_s0 + $0x28] sm:$0xff]  ;;  %v51_v12 = vld [vmem:[%s14444_s0 + $0x30] sm:$0xff]  ;;  %v52_v13 = vld [vmem:[%s14444_s0 + $0x38] sm:$0xff]  ;;  %v9603_v30 = vmov 0.0   ;;  %v9604_v41 = vmov 0.0|0.0   ;;  %s9605_s27 = smov 64  }
   0xc   :  { %8886 = vmatmul.mubr.msk.f32.vlgmr.msra.gmra.mrb[0].mxu0 %vm120_vm1, %v46_v7  ;;  %v53_v14 = vld [vmem:[%s14444_s0 + $0x40] sm:$0xff]  ;;  %v54_v15 = vld [vmem:[%s14444_s0 + $0x48] sm:$0xff]  ;;  %v55_v16 = vld [vmem:[%s14444_s0 + $0x50] sm:$0xff]  ;;  %815 = vst.msk [vmem:[#allocation2 + $0x38] sm:$0x1] %vm782_vm5, %v9603_v30  ;;  %9530 = vmatprep.subr.bf16.mxu1 %v9604_v41  ;;  %s9606_s28 = smov 32  }
   0xd   :  { %8888 = vmatprep.mubr.msk.f32.mxu0 %vm120_vm1, %v47_v8  ;;  %v56_v17 = vld [vmem:[%s14444_s0 + $0x58] sm:$0xff]  ;;  %v57_v18 = vld [vmem:[%s14444_s0 + $0x60] sm:$0xff]  ;;  %v58_v19 = vld [vmem:[%s14444_s0 + $0x68] sm:$0xff]  ;;  %768 = vst.msk [vmem:[#allocation2 + $0x7] sm:$0xff] %vm703_vm4, %v9603_v30  ;;  %9202 = vmatprep.subr.bf16.mxu0 %v9604_v41  ;;  %s9607_s20 = smov 96   ;;  %vm1295_vm6 = vcmask 523520  }
   0xe   :  { %v59_v20 = vld [vmem:[%s14444_s0 + $0x70] sm:$0xff]  ;;  %v60_v21 = vld [vmem:[%s14444_s0 + $0x78] sm:$0xff]  ;;  %v61_v22 = vld [vmem:[%s14444_s0 + $0x80] sm:$0xff]  ;;  %769 = vst.msk [vmem:[#allocation2 + $0xf] sm:$0xff] %vm703_vm4, %v9603_v30  ;;  %vm1680_vm7 = vcmask 785920   ;;  %vm2065_vm8 = vcmask 1048320  }
   0xf   :  { %v62_v23 = vld [vmem:[%s14444_s0 + $0x88] sm:$0xff]  ;;  %v63_v24 = vld [vmem:[%s14444_s0 + $0x90] sm:$0xff]  ;;  %v64_v25 = vld [vmem:[%s14444_s0 + $0x98] sm:$0xff]  ;;  %772 = vst.msk [vmem:[#allocation2 + $0x247] sm:$0xff] %vm703_vm4, %v9603_v30  ;;  %vm770_vm9 = vcmask 254976   ;;  %vm6040_vm10 = vcmask 523264  }
  0x10   :  { %8889 = vmatmul.mubr.msk.f32.gmra.mrb[2].mxu0 %vm120_vm1, %v48_v9  ;;  %v65_v26 = vld [vmem:[%s14444_s0 + $0xa0] sm:$0xff]  ;;  %v66_v27 = vld [vmem:[%s14444_s0 + $0xa8] sm:$0xff]  ;;  %v67_v28 = vld [vmem:[%s14444_s0 + $0xb0] sm:$0xff]  ;;  %773 = vst.msk [vmem:[#allocation2 + $0x24f] sm:$0xff] %vm703_vm4, %v9603_v30  ;;  %vm6067_vm11 = vcmask 516096   ;;  %vm6058_vm12 = vcmask 517120  }
  0x11   :  { %8891 = vmatprep.mubr.msk.f32.mxu0 %vm120_vm1, %v49_v10  ;;  %v68_v29 = vld [vmem:[%s14444_s0 + $0xb8] sm:$0xff]  ;;  %776 = vst.msk [vmem:[#allocation2 + $0x227] sm:$0xff] %vm703_vm4, %v9603_v30  ;;  %777 = vst.msk [vmem:[#allocation2 + $0x22f] sm:$0xff] %vm703_vm4, %v9603_v30  ;;  %v69_v31 = vld [vmem:[%s14444_s0 + $0xc0] sm:$0xff]  ;;  %vm6212_vm13 = vcmask 1048064   ;;  %vm7344_vm14 = vcmask 1041409  }
  0x12   :  { %779 = vst.msk [vmem:[#allocation2 + $0x467] sm:$0xff] %vm703_vm4, %v9603_v30  ;;  %780 = vst.msk [vmem:[#allocation2 + $0x46f] sm:$0xff] %vm703_vm4, %v9603_v30  ;;  %v70_v32 = vld [vmem:[%s14444_s0 + $0xc8] sm:$0xff]  ;;  %v71_v33 = vld [vmem:[%s14444_s0 + $0xd0] sm:$0xff]  ;;  %vm7346_vm15 = vcmask 1043459   ;;  %vm7348_vm0 = vcmask 1045509  }
  0x13   :  { %783 = vst.msk [vmem:[#allocation2 + $0x27] sm:$0x1] %vm782_vm5, %v9603_v30  ;;  %784 = vst.msk [vmem:[#allocation2 + $0x47] sm:$0x1] %vm782_vm5, %v9603_v30  ;;  %v72_v34 = vld [vmem:[%s14444_s0 + $0xd8] sm:$0xff]  ;;  %v73_v35 = vld [vmem:[%s14444_s0 + $0xe0] sm:$0xff] }
  0x14   :  { %8892 = vmatmul.mubr.msk.f32.gmra.mrb[4].mxu0 %vm120_vm1, %v50_v11  ;;  %785 = vst.msk [vmem:[#allocation2 + $0x67] sm:$0x1] %vm782_vm5, %v9603_v30  ;;  %786 = vst.msk [vmem:[#allocation2 + $0x87] sm:$0x1] %vm782_vm5, %v9603_v30  ;;  %v74_v36 = vld [vmem:[%s14444_s0 + $0xe8] sm:$0xff]  ;;  %v75_v37 = vld [vmem:[%s14444_s0 + $0xf0] sm:$0xff] }
  0x15   :  { %8894 = vmatprep.mubr.msk.f32.mxu0 %vm120_vm1, %v51_v12  ;;  %787 = vst.msk [vmem:[#allocation2 + $0xa7] sm:$0x1] %vm782_vm5, %v9603_v30  ;;  %788 = vst.msk [vmem:[#allocation2 + $0xc7] sm:$0x1] %vm782_vm5, %v9603_v30  ;;  %v76_v38 = vld [vmem:[%s14444_s0 + $0xf8] sm:$0xff]  ;;  %v3731_v39 = vld [vmem:[%s14447_s3] sm:$0xff] }
  0x16   :  { %789 = vst.msk [vmem:[#allocation2 + $0xe7] sm:$0x1] %vm782_vm5, %v9603_v30  ;;  %790 = vst.msk [vmem:[#allocation2 + $0x107] sm:$0x1] %vm782_vm5, %v9603_v30  ;;  %v3732_v40 = vld [vmem:[%s14447_s3 + $0x8] sm:$0xff]  ;;  %v3733_v43 = vld [vmem:[%s14447_s3 + $0x10] sm:$0xff] }
  0x17   :  { %791 = vst.msk [vmem:[#allocation2 + $0x127] sm:$0x1] %vm782_vm5, %v9603_v30  ;;  %792 = vst.msk [vmem:[#allocation2 + $0x147] sm:$0x1] %vm782_vm5, %v9603_v30  ;;  %v9203_v42 = vpack.c.bf16 %v3732_v40, %v3731_v39  ;;  %v3734_v44 = vld [vmem:[%s14447_s3 + $0x18] sm:$0xff]  ;;  %v3735_v46 = vld [vmem:[%s14447_s3 + $0x20] sm:$0xff] }
  0x18   :  { %8895 = vmatmul.mubr.msk.f32.gmra.mrb[6].mxu0 %vm120_vm1, %v52_v13  ;;  %793 = vst.msk [vmem:[#allocation2 + $0x167] sm:$0x1] %vm782_vm5, %v9603_v30  ;;  %794 = vst.msk [vmem:[#allocation2 + $0x187] sm:$0x1] %vm782_vm5, %v9603_v30  ;;  %v9206_v45 = vpack.c.bf16 %v3734_v44, %v3733_v43  ;;  %v3736_v47 = vld [vmem:[%s14447_s3 + $0x28] sm:$0xff]  ;;  %v3737_v49 = vld [vmem:[%s14447_s3 + $0x30] sm:$0xff] }
  0x19   :  { %8897 = vmatprep.mubr.msk.f32.mxu0 %vm120_vm1, %v53_v14  ;;  %795 = vst.msk [vmem:[#allocation2 + $0x1a7] sm:$0x1] %vm782_vm5, %v9603_v30  ;;  %796 = vst.msk [vmem:[#allocation2 + $0x1c7] sm:$0x1] %vm782_vm5, %v9603_v30  ;;  %9546 = vmatpush1.bf16.msra.mxu1 %v9203_v42  ;;  %v9209_v48 = vpack.c.bf16 %v3736_v47, %v3735_v46  ;;  %v3738_v50 = vld [vmem:[%s14447_s3 + $0x38] sm:$0xff]  ;;  %v3739_v52 = vld [vmem:[%s14447_s3 + $0x40] sm:$0xff] }
  0x1a   :  { %797 = vst.msk [vmem:[#allocation2 + $0x1e7] sm:$0x1] %vm782_vm5, %v9603_v30  ;;  %798 = vst.msk [vmem:[#allocation2 + $0x207] sm:$0x1] %vm782_vm5, %v9603_v30  ;;  %9204 = vmatpush1.bf16.msra.mxu0 %v9203_v42  ;;  %9531 = vmatprep.subr.bf16.mxu1 %v9604_v41  ;;  %v9212_v51 = vpack.c.bf16 %v3738_v50, %v3737_v49  ;;  %v3740_v53 = vld [vmem:[%s14447_s3 + $0x48] sm:$0xff]  ;;  %v3741_v55 = vld [vmem:[%s14447_s3 + $0x50] sm:$0xff] }
  0x1b   :  { %799 = vst.msk [vmem:[#allocation2 + $0x267] sm:$0x1] %vm782_vm5, %v9603_v30  ;;  %800 = vst.msk [vmem:[#allocation2 + $0x287] sm:$0x1] %vm782_vm5, %v9603_v30  ;;  %9205 = vmatprep.subr.bf16.mxu0 %v9604_v41  ;;  %v9215_v54 = vpack.c.bf16 %v3740_v53, %v3739_v52  ;;  %v3742_v56 = vld [vmem:[%s14447_s3 + $0x58] sm:$0xff]  ;;  %v3743_v59 = vld [vmem:[%s14447_s3 + $0x60] sm:$0xff] }
  0x1c   :  { %8898 = vmatmul.mubr.msk.f32.gmra.mrb[8].mxu0 %vm120_vm1, %v54_v15  ;;  %801 = vst.msk [vmem:[#allocation2 + $0x2a7] sm:$0x1] %vm782_vm5, %v9603_v30  ;;  %802 = vst.msk [vmem:[#allocation2 + $0x2c7] sm:$0x1] %vm782_vm5, %v9603_v30  ;;  %v9218_v57 = vpack.c.bf16 %v3742_v56, %v3741_v55  ;;  %v10088_v58 = vld [vmem:[%s14446_s2] ss:$0 sm:$0xff] }
  0x1d   :  { %8900 = vmatprep.mubr.msk.f32.mxu0 %vm120_vm1, %v55_v16  ;;  %803 = vst.msk [vmem:[#allocation2 + $0x2e7] sm:$0x1] %vm782_vm5, %v9603_v30  ;;  %804 = vst.msk [vmem:[#allocation2 + $0x307] sm:$0x1] %vm782_vm5, %v9603_v30  ;;  %9547 = vmatpush1.bf16.msra.mxu1 %v9206_v45  ;;  %v3744_v60 = vld [vmem:[%s14447_s3 + $0x68] sm:$0xff]  ;;  %v3745_v2 = vld [vmem:[%s14447_s3 + $0x70] sm:$0xff] }
  0x1e   :  { %805 = vst.msk [vmem:[#allocation2 + $0x327] sm:$0x1] %vm782_vm5, %v9603_v30  ;;  %806 = vst.msk [vmem:[#allocation2 + $0x347] sm:$0x1] %vm782_vm5, %v9603_v30  ;;  %9207 = vmatpush1.bf16.msra.mxu0 %v9206_v45  ;;  %9532 = vmatprep.subr.bf16.mxu1 %v9604_v41  ;;  %v9221_v62 = vpack.c.bf16 %v3744_v60, %v3743_v59  ;;  %v3746_v3 = vld [vmem:[%s14447_s3 + $0x78] sm:$0xff]  ;;  %v3747_v9 = vld [vmem:[%s14447_s3 + $0x80] sm:$0xff] }
  0x1f   :  { %807 = vst.msk [vmem:[#allocation2 + $0x367] sm:$0x1] %vm782_vm5, %v9603_v30  ;;  %808 = vst.msk [vmem:[#allocation2 + $0x387] sm:$0x1] %vm782_vm5, %v9603_v30  ;;  %9208 = vmatprep.subr.bf16.mxu0 %v9604_v41  ;;  %v9224_v5 = vpack.c.bf16 %v3746_v3, %v3745_v2  ;;  %v3748_v10 = vld [vmem:[%s14447_s3 + $0x88] sm:$0xff]  ;;  %v3753_v49 = vld [vmem:[%s14447_s3 + $0xb0] sm:$0xff] }
  0x20   :  { %8901 = vmatmul.mubr.msk.f32.gmra.mrb[10].mxu0 %vm120_vm1, %v56_v17  ;;  %809 = vst.msk [vmem:[#allocation2 + $0x3a7] sm:$0x1] %vm782_vm5, %v9603_v30  ;;  %810 = vst.msk [vmem:[#allocation2 + $0x3c7] sm:$0x1] %vm782_vm5, %v9603_v30  ;;  %v9227_v12 = vpack.c.bf16 %v3748_v10, %v3747_v9  ;;  %v3754_v50 = vld [vmem:[%s14447_s3 + $0xb8] sm:$0xff]  ;;  %v3756_v2 = vld [vmem:[%s14447_s3 + $0xc8] sm:$0xff] }
  0x21   :  { %8903 = vmatprep.mubr.msk.f32.mxu0 %vm120_vm1, %v57_v18  ;;  %811 = vst.msk [vmem:[#allocation2 + $0x3e7] sm:$0x1] %vm782_vm5, %v9603_v30  ;;  %812 = vst.msk [vmem:[#allocation2 + $0x407] sm:$0x1] %vm782_vm5, %v9603_v30  ;;  %9548 = vmatpush1.bf16.msra.mxu1 %v9209_v48  ;;  %v9236_v53 = vpack.c.bf16 %v3754_v50, %v3753_v49  ;;  %v3762_v49 = vld [vmem:[%s14447_s3 + $0xf8] sm:$0xff]  ;;  %vm7364_vm2 = vcmask 1041920  }
  0x22   :  { %813 = vst.msk [vmem:[#allocation2 + $0x427] sm:$0x1] %vm782_vm5, %v9603_v30  ;;  %814 = vst.msk [vmem:[#allocation2 + $0x447] sm:$0x1] %vm782_vm5, %v9603_v30  ;;  %9210 = vmatpush1.bf16.msra.mxu0 %v9209_v48  ;;  %9533 = vmatprep.subr.bf16.mxu1 %v9604_v41  ;;  %vm9609_vm3 = vmmov 0  }
  0x23   :  { %816 = vst.msk [vmem:[#allocation2 + $0x58] sm:$0x1] %vm782_vm5, %v9603_v30  ;;  %817 = vst.msk [vmem:[#allocation2 + $0x78] sm:$0x1] %vm782_vm5, %v9603_v30  ;;  %9211 = vmatprep.subr.bf16.mxu0 %v9604_v41 }
  0x24   :  { %8904 = vmatmul.mubr.msk.f32.gmra.mrb[12].mxu0 %vm120_vm1, %v58_v19  ;;  %818 = vst.msk [vmem:[#allocation2 + $0x98] sm:$0x1] %vm782_vm5, %v9603_v30  ;;  %819 = vst.msk [vmem:[#allocation2 + $0xb8] sm:$0x1] %vm782_vm5, %v9603_v30  ;;  %v3749_v19 = vld [vmem:[%s14447_s3 + $0x90] sm:$0xff] }
  0x25   :  { %8906 = vmatprep.mubr.msk.f32.mxu0 %vm120_vm1, %v59_v20  ;;  %820 = vst.msk [vmem:[#allocation2 + $0xd8] sm:$0x1] %vm782_vm5, %v9603_v30  ;;  %821 = vst.msk [vmem:[#allocation2 + $0xf8] sm:$0x1] %vm782_vm5, %v9603_v30  ;;  %9549 = vmatpush1.bf16.msra.mxu1 %v9212_v51  ;;  %v3750_v20 = vld [vmem:[%s14447_s3 + $0x98] sm:$0xff] }
  0x26   :  { %822 = vst.msk [vmem:[#allocation2 + $0x118] sm:$0x1] %vm782_vm5, %v9603_v30  ;;  %823 = vst.msk [vmem:[#allocation2 + $0x138] sm:$0x1] %vm782_vm5, %v9603_v30  ;;  %9213 = vmatpush1.bf16.msra.mxu0 %v9212_v51  ;;  %9534 = vmatprep.subr.bf16.mxu1 %v9604_v41 }
  0x27   :  { %824 = vst.msk [vmem:[#allocation2 + $0x158] sm:$0x1] %vm782_vm5, %v9603_v30  ;;  %825 = vst.msk [vmem:[#allocation2 + $0x178] sm:$0x1] %vm782_vm5, %v9603_v30  ;;  %9214 = vmatprep.subr.bf16.mxu0 %v9604_v41 }
  0x28   :  { %8907 = vmatmul.mubr.msk.f32.gmra.mrb[14].mxu0 %vm120_vm1, %v60_v21  ;;  %826 = vst.msk [vmem:[#allocation2 + $0x198] sm:$0x1] %vm782_vm5, %v9603_v30  ;;  %827 = vst.msk [vmem:[#allocation2 + $0x1b8] sm:$0x1] %vm782_vm5, %v9603_v30 }
  0x29   :  { %8909 = vmatprep.mubr.msk.f32.mxu0 %vm120_vm1, %v61_v22  ;;  %828 = vst.msk [vmem:[#allocation2 + $0x1d8] sm:$0x1] %vm782_vm5, %v9603_v30  ;;  %829 = vst.msk [vmem:[#allocation2 + $0x1f8] sm:$0x1] %vm782_vm5, %v9603_v30  ;;  %9550 = vmatpush1.bf16.msra.mxu1 %v9215_v54  ;;  %v9230_v22 = vpack.c.bf16 %v3750_v20, %v3749_v19 }
  0x2a   :  { %830 = vst.msk [vmem:[#allocation2 + $0x218] sm:$0x1] %vm782_vm5, %v9603_v30  ;;  %831 = vst.msk [vmem:[#allocation2 + $0x278] sm:$0x1] %vm782_vm5, %v9603_v30  ;;  %9216 = vmatpush1.bf16.msra.mxu0 %v9215_v54  ;;  %9535 = vmatprep.subr.bf16.mxu1 %v9604_v41 }
  0x2b   :  { %832 = vst.msk [vmem:[#allocation2 + $0x298] sm:$0x1] %vm782_vm5, %v9603_v30  ;;  %833 = vst.msk [vmem:[#allocation2 + $0x2b8] sm:$0x1] %vm782_vm5, %v9603_v30  ;;  %9217 = vmatprep.subr.bf16.mxu0 %v9604_v41 }
  0x2c   :  { %8910 = vmatmul.mubr.msk.f32.gmra.mrb[16].mxu0 %vm120_vm1, %v62_v23  ;;  %834 = vst.msk [vmem:[#allocation2 + $0x2d8] sm:$0x1] %vm782_vm5, %v9603_v30  ;;  %835 = vst.msk [vmem:[#allocation2 + $0x2f8] sm:$0x1] %vm782_vm5, %v9603_v30 }
  0x2d   :  { %8912 = vmatprep.mubr.msk.f32.mxu0 %vm120_vm1, %v63_v24  ;;  %836 = vst.msk [vmem:[#allocation2 + $0x318] sm:$0x1] %vm782_vm5, %v9603_v30  ;;  %837 = vst.msk [vmem:[#allocation2 + $0x338] sm:$0x1] %vm782_vm5, %v9603_v30  ;;  %9551 = vmatpush1.bf16.msra.mxu1 %v9218_v57 }
  0x2e   :  { %838 = vst.msk [vmem:[#allocation2 + $0x358] sm:$0x1] %vm782_vm5, %v9603_v30  ;;  %839 = vst.msk [vmem:[#allocation2 + $0x378] sm:$0x1] %vm782_vm5, %v9603_v30  ;;  %9219 = vmatpush1.bf16.msra.mxu0 %v9218_v57  ;;  %9536 = vmatprep.subr.bf16.mxu1 %v9604_v41 }
  0x2f   :  { %840 = vst.msk [vmem:[#allocation2 + $0x398] sm:$0x1] %vm782_vm5, %v9603_v30  ;;  %841 = vst.msk [vmem:[#allocation2 + $0x3b8] sm:$0x1] %vm782_vm5, %v9603_v30  ;;  %9220 = vmatprep.subr.bf16.mxu0 %v9604_v41 }
  0x30   :  { %8913 = vmatmul.mubr.msk.f32.gmra.mrb[18].mxu0 %vm120_vm1, %v64_v25  ;;  %842 = vst.msk [vmem:[#allocation2 + $0x3d8] sm:$0x1] %vm782_vm5, %v9603_v30  ;;  %843 = vst.msk [vmem:[#allocation2 + $0x3f8] sm:$0x1] %vm782_vm5, %v9603_v30 }
  0x31   :  { %8915 = vmatprep.mubr.msk.f32.mxu0 %vm120_vm1, %v65_v26  ;;  %844 = vst.msk [vmem:[#allocation2 + $0x418] sm:$0x1] %vm782_vm5, %v9603_v30  ;;  %845 = vst.msk [vmem:[#allocation2 + $0x438] sm:$0x1] %vm782_vm5, %v9603_v30  ;;  %9552 = vmatpush1.bf16.msra.mxu1 %v9221_v62 }
  0x32   :  { %846 = vst.msk [vmem:[#allocation2 + $0x458] sm:$0x1] %vm782_vm5, %v9603_v30  ;;  %4905 = vst.msk [vmem:[#allocation3 + $0x1f] sm:$0x1] %vm782_vm5, %v9603_v30  ;;  %9222 = vmatpush1.bf16.msra.mxu0 %v9221_v62  ;;  %9537 = vmatprep.subr.bf16.mxu1 %v9604_v41 }
  0x33   :  { %4896 = vst.msk [vmem:[#allocation3 + $0x7] sm:$0xff] %vm703_vm4, %v9603_v30  ;;  %4898 = vst.msk [vmem:[#allocation3 + $0xf7] sm:$0xff] %vm703_vm4, %v9603_v30  ;;  %9223 = vmatprep.subr.bf16.mxu0 %v9604_v41 }
  0x34   :  { %8916 = vmatmul.mubr.msk.f32.gmra.mrb[20].mxu0 %vm120_vm1, %v66_v27  ;;  %4901 = vst.msk [vmem:[#allocation3 + $0xdf] sm:$0xff] %vm703_vm4, %v9603_v30  ;;  %4903 = vst.msk [vmem:[#allocation3 + $0x1cf] sm:$0xff] %vm703_vm4, %v9603_v30 }
  0x35   :  { %8918 = vmatprep.mubr.msk.f32.mxu0 %vm120_vm1, %v67_v28  ;;  %4906 = vst.msk [vmem:[#allocation3 + $0x37] sm:$0x1] %vm782_vm5, %v9603_v30  ;;  %4907 = vst.msk [vmem:[#allocation3 + $0x4f] sm:$0x1] %vm782_vm5, %v9603_v30  ;;  %9553 = vmatpush1.bf16.msra.mxu1 %v9224_v5 }
  0x36   :  { %4908 = vst.msk [vmem:[#allocation3 + $0x67] sm:$0x1] %vm782_vm5, %v9603_v30  ;;  %4909 = vst.msk [vmem:[#allocation3 + $0x7f] sm:$0x1] %vm782_vm5, %v9603_v30  ;;  %9225 = vmatpush1.bf16.msra.mxu0 %v9224_v5  ;;  %9538 = vmatprep.subr.bf16.mxu1 %v9604_v41 }
  0x37   :  { %4910 = vst.msk [vmem:[#allocation3 + $0x97] sm:$0x1] %vm782_vm5, %v9603_v30  ;;  %4911 = vst.msk [vmem:[#allocation3 + $0xaf] sm:$0x1] %vm782_vm5, %v9603_v30  ;;  %9226 = vmatprep.subr.bf16.mxu0 %v9604_v41 }
  0x38   :  { %8919 = vmatmul.mubr.msk.f32.gmra.mrb[22].mxu0 %vm120_vm1, %v68_v29  ;;  %4912 = vst.msk [vmem:[#allocation3 + $0xc7] sm:$0x1] %vm782_vm5, %v9603_v30  ;;  %4913 = vst.msk [vmem:[#allocation3 + $0x10f] sm:$0x1] %vm782_vm5, %v9603_v30 }
  0x39   :  { %4914 = vst.msk [vmem:[#allocation3 + $0x127] sm:$0x1] %vm782_vm5, %v9603_v30  ;;  %4915 = vst.msk [vmem:[#allocation3 + $0x13f] sm:$0x1] %vm782_vm5, %v9603_v30  ;;  %8921 = vmatprep.mubr.msk.f32.mxu0 %vm120_vm1, %v69_v31  ;;  %9554 = vmatpush1.bf16.msra.mxu1 %v9227_v12 }
  0x3a   :  { %4916 = vst.msk [vmem:[#allocation3 + $0x157] sm:$0x1] %vm782_vm5, %v9603_v30  ;;  %4917 = vst.msk [vmem:[#allocation3 + $0x16f] sm:$0x1] %vm782_vm5, %v9603_v30  ;;  %9228 = vmatpush1.bf16.msra.mxu0 %v9227_v12  ;;  %9539 = vmatprep.subr.bf16.mxu1 %v9604_v41 }
  0x3b   :  { %4918 = vst.msk [vmem:[#allocation3 + $0x187] sm:$0x1] %vm782_vm5, %v9603_v30  ;;  %4919 = vst.msk [vmem:[#allocation3 + $0x19f] sm:$0x1] %vm782_vm5, %v9603_v30  ;;  %9229 = vmatprep.subr.bf16.mxu0 %v9604_v41 }
  0x3c   :  { %4920 = vst.msk [vmem:[#allocation3 + $0x1b7] sm:$0x1] %vm782_vm5, %v9603_v30  ;;  %4921 = vst.msk [vmem:[#allocation3 + $0x28] sm:$0x1] %vm782_vm5, %v9603_v30  ;;  %8922 = vmatmul.mubr.msk.f32.gmra.mrb[24].mxu0 %vm120_vm1, %v70_v32 }
  0x3d   :  { %4922 = vst.msk [vmem:[#allocation3 + $0x40] sm:$0x1] %vm782_vm5, %v9603_v30  ;;  %4923 = vst.msk [vmem:[#allocation3 + $0x58] sm:$0x1] %vm782_vm5, %v9603_v30  ;;  %8924 = vmatprep.mubr.msk.f32.mxu0 %vm120_vm1, %v71_v33  ;;  %9555 = vmatpush1.bf16.msra.mxu1 %v9230_v22 }
  0x3e   :  { %4924 = vst.msk [vmem:[#allocation3 + $0x70] sm:$0x1] %vm782_vm5, %v9603_v30  ;;  %4925 = vst.msk [vmem:[#allocation3 + $0x88] sm:$0x1] %vm782_vm5, %v9603_v30  ;;  %9231 = vmatpush1.bf16.msra.mxu0 %v9230_v22  ;;  %9540 = vmatprep.subr.bf16.mxu1 %v9604_v41 }
  0x3f   :  { %4926 = vst.msk [vmem:[#allocation3 + $0xa0] sm:$0x1] %vm782_vm5, %v9603_v30  ;;  %4927 = vst.msk [vmem:[#allocation3 + $0xb8] sm:$0x1] %vm782_vm5, %v9603_v30  ;;  %9232 = vmatprep.subr.bf16.mxu0 %v9604_v41 }
  0x40   :  { %4928 = vst.msk [vmem:[#allocation3 + $0xd0] sm:$0x1] %vm782_vm5, %v9603_v30  ;;  %4929 = vst.msk [vmem:[#allocation3 + $0x118] sm:$0x1] %vm782_vm5, %v9603_v30  ;;  %8925 = vmatmul.mubr.msk.f32.gmra.mrb[26].mxu0 %vm120_vm1, %v72_v34 }
  0x41   :  { %4930 = vst.msk [vmem:[#allocation3 + $0x130] sm:$0x1] %vm782_vm5, %v9603_v30  ;;  %4931 = vst.msk [vmem:[#allocation3 + $0x148] sm:$0x1] %vm782_vm5, %v9603_v30  ;;  %8927 = vmatprep.mubr.msk.f32.mxu0 %vm120_vm1, %v73_v35 }
  0x42   :  { %4932 = vst.msk [vmem:[#allocation3 + $0x160] sm:$0x1] %vm782_vm5, %v9603_v30  ;;  %4933 = vst.msk [vmem:[#allocation3 + $0x178] sm:$0x1] %vm782_vm5, %v9603_v30 }
  0x43   :  { %4934 = vst.msk [vmem:[#allocation3 + $0x190] sm:$0x1] %vm782_vm5, %v9603_v30  ;;  %4935 = vst.msk [vmem:[#allocation3 + $0x1a8] sm:$0x1] %vm782_vm5, %v9603_v30 }
  0x44   :  { %4936 = vst.msk [vmem:[#allocation3 + $0x1c0] sm:$0x1] %vm782_vm5, %v9603_v30  ;;  %8928 = vmatmul.mubr.msk.f32.gmra.mrb[28].mxu0 %vm120_vm1, %v74_v36  ;;  %v3751_v36 = vld [vmem:[%s14447_s3 + $0xa0] sm:$0xff] }
  0x45   :  { %8930 = vmatprep.mubr.msk.f32.mxu0 %vm120_vm1, %v75_v37  ;;  %v3752_v37 = vld [vmem:[%s14447_s3 + $0xa8] sm:$0xff]  ;;  %771 = vst.msk [vmem:[#allocation2 + $0x17] sm:$0x3] %vm770_vm9, %v9603_v30  ;;  %774 = vst.msk [vmem:[#allocation2 + $0x257] sm:$0x3] %vm770_vm9, %v9603_v30 }
  0x46   :  { %v9233_v40 = vpack.c.bf16 %v3752_v37, %v3751_v36  ;;  %778 = vst.msk [vmem:[#allocation2 + $0x237] sm:$0x3] %vm770_vm9, %v9603_v30  ;;  %781 = vst.msk [vmem:[#allocation2 + $0x477] sm:$0x3] %vm770_vm9, %v9603_v30 }
  0x47   :  { %4897 = vst.msk [vmem:[#allocation3 + $0xf] sm:$0x3] %vm770_vm9, %v9603_v30  ;;  %4899 = vst.msk [vmem:[#allocation3 + $0xff] sm:$0x3] %vm770_vm9, %v9603_v30 }
  0x48   :  { %8931 = vmatmul.mubr.msk.f32.gmra.mrb[30].mxu0 %vm120_vm1, %v76_v38  ;;  %9556 = vmatpush1.bf16.msra.mxu1 %v9233_v40  ;;  %4902 = vst.msk [vmem:[#allocation3 + $0xe7] sm:$0x3] %vm770_vm9, %v9603_v30  ;;  %4904 = vst.msk [vmem:[#allocation3 + $0x1d7] sm:$0x3] %vm770_vm9, %v9603_v30 }
  0x49   :  { %9234 = vmatpush1.bf16.msra.mxu0 %v9233_v40  ;;  %9541 = vmatprep.subr.bf16.mxu1 %v9604_v41  ;;  %6057 = vst.msk [vmem:[#allocation4 + $0x7] sm:$0xff] %vm6040_vm10, %v9603_v30  ;;  %6060 = vst.msk [vmem:[#allocation4 + $0xf7] sm:$0xff] %vm6040_vm10, %v9603_v30 }
  0x4a   :  { %9235 = vmatprep.subr.bf16.mxu0 %v9604_v41  ;;  %6063 = vst.msk [vmem:[#allocation4 + $0xdf] sm:$0xff] %vm6040_vm10, %v9603_v30  ;;  %6065 = vst.msk [vmem:[#allocation4 + $0x1cf] sm:$0xff] %vm6040_vm10, %v9603_v30 }
  0x4b   :  { %6084 = vst.msk [vmem:[#allocation4 + $0x28] sm:$0x1] %vm6067_vm11, %v9603_v30  ;;  %6068 = vst.msk [vmem:[#allocation4 + $0x1f] sm:$0x1] %vm6067_vm11, %v9603_v30 }
  0x4c   :  { %9557 = vmatpush1.bf16.msra.mxu1 %v9236_v53  ;;  %6069 = vst.msk [vmem:[#allocation4 + $0x37] sm:$0x1] %vm6067_vm11, %v9603_v30  ;;  %6070 = vst.msk [vmem:[#allocation4 + $0x4f] sm:$0x1] %vm6067_vm11, %v9603_v30 }
  0x4d   :  { %9237 = vmatpush1.bf16.msra.mxu0 %v9236_v53  ;;  %9542 = vmatprep.subr.bf16.mxu1 %v9604_v41  ;;  %6071 = vst.msk [vmem:[#allocation4 + $0x67] sm:$0x1] %vm6067_vm11, %v9603_v30  ;;  %6072 = vst.msk [vmem:[#allocation4 + $0x7f] sm:$0x1] %vm6067_vm11, %v9603_v30 }
  0x4e   :  { %9238 = vmatprep.subr.bf16.mxu0 %v9604_v41  ;;  %6073 = vst.msk [vmem:[#allocation4 + $0x97] sm:$0x1] %vm6067_vm11, %v9603_v30  ;;  %6074 = vst.msk [vmem:[#allocation4 + $0xaf] sm:$0x1] %vm6067_vm11, %v9603_v30 }
  0x4f   :  { %6075 = vst.msk [vmem:[#allocation4 + $0xc7] sm:$0x1] %vm6067_vm11, %v9603_v30  ;;  %6076 = vst.msk [vmem:[#allocation4 + $0x10f] sm:$0x1] %vm6067_vm11, %v9603_v30 }
  0x50   :  { %6077 = vst.msk [vmem:[#allocation4 + $0x127] sm:$0x1] %vm6067_vm11, %v9603_v30  ;;  %6078 = vst.msk [vmem:[#allocation4 + $0x13f] sm:$0x1] %vm6067_vm11, %v9603_v30 }
  0x51   :  { %6079 = vst.msk [vmem:[#allocation4 + $0x157] sm:$0x1] %vm6067_vm11, %v9603_v30  ;;  %6080 = vst.msk [vmem:[#allocation4 + $0x16f] sm:$0x1] %vm6067_vm11, %v9603_v30 }
  0x52   :  { %6081 = vst.msk [vmem:[#allocation4 + $0x187] sm:$0x1] %vm6067_vm11, %v9603_v30  ;;  %6082 = vst.msk [vmem:[#allocation4 + $0x19f] sm:$0x1] %vm6067_vm11, %v9603_v30 }
  0x53   :  { %6083 = vst.msk [vmem:[#allocation4 + $0x1b7] sm:$0x1] %vm6067_vm11, %v9603_v30  ;;  %6085 = vst.msk [vmem:[#allocation4 + $0x40] sm:$0x1] %vm6067_vm11, %v9603_v30 }
  0x54   :  { %6086 = vst.msk [vmem:[#allocation4 + $0x58] sm:$0x1] %vm6067_vm11, %v9603_v30  ;;  %6087 = vst.msk [vmem:[#allocation4 + $0x70] sm:$0x1] %vm6067_vm11, %v9603_v30 }
  0x55   :  { %6088 = vst.msk [vmem:[#allocation4 + $0x88] sm:$0x1] %vm6067_vm11, %v9603_v30  ;;  %6089 = vst.msk [vmem:[#allocation4 + $0xa0] sm:$0x1] %vm6067_vm11, %v9603_v30 }
  0x56   :  { %6090 = vst.msk [vmem:[#allocation4 + $0xb8] sm:$0x1] %vm6067_vm11, %v9603_v30  ;;  %6091 = vst.msk [vmem:[#allocation4 + $0xd0] sm:$0x1] %vm6067_vm11, %v9603_v30 }
  0x57   :  { %6092 = vst.msk [vmem:[#allocation4 + $0x118] sm:$0x1] %vm6067_vm11, %v9603_v30  ;;  %6093 = vst.msk [vmem:[#allocation4 + $0x130] sm:$0x1] %vm6067_vm11, %v9603_v30 }
  0x58   :  { %6094 = vst.msk [vmem:[#allocation4 + $0x148] sm:$0x1] %vm6067_vm11, %v9603_v30  ;;  %6095 = vst.msk [vmem:[#allocation4 + $0x160] sm:$0x1] %vm6067_vm11, %v9603_v30 }
  0x59   :  { %6096 = vst.msk [vmem:[#allocation4 + $0x178] sm:$0x1] %vm6067_vm11, %v9603_v30  ;;  %6097 = vst.msk [vmem:[#allocation4 + $0x190] sm:$0x1] %vm6067_vm11, %v9603_v30 }
  0x5a   :  { %6098 = vst.msk [vmem:[#allocation4 + $0x1a8] sm:$0x1] %vm6067_vm11, %v9603_v30  ;;  %6099 = vst.msk [vmem:[#allocation4 + $0x1c0] sm:$0x1] %vm6067_vm11, %v9603_v30 }
  0x5b   :  { %6059 = vst.msk [vmem:[#allocation4 + $0xf] sm:$0x3] %vm6058_vm12, %v9603_v30  ;;  %6061 = vst.msk [vmem:[#allocation4 + $0xff] sm:$0x3] %vm6058_vm12, %v9603_v30 }
  0x5c   :  { %6064 = vst.msk [vmem:[#allocation4 + $0xe7] sm:$0x3] %vm6058_vm12, %v9603_v30  ;;  %6066 = vst.msk [vmem:[#allocation4 + $0x1d7] sm:$0x3] %vm6058_vm12, %v9603_v30 }
  0xdf   :  { %v8887_v61 = vpop.f32.mrb[0].mxu0 }
  0xe0   :  { %v389_v63 = vadd.f32 %v8887_v61, %v10088_v58  ;;  %v383_v0 = vpop.f32.mrb[1].mxu0 }
  0xe1   :  { %v384_v1 = vadd.f32 %v10088_v58, %v383_v0 }
  0xe2   :  { %705 = vst.msk [vmem:[#allocation2 + $0x30] sm:$0xff] %vm703_vm4, %v389_v63 }
  0xe3   :  { %704 = vst.msk [vmem:[#allocation2 + $0x28] sm:$0xff] %vm703_vm4, %v384_v1  ;;  %v8890_v4 = vpop.f32.mrb[2].mxu0  ;;  %v3755_v1 = vld [vmem:[%s14447_s3 + $0xc0] sm:$0xff] }
  0xe4   :  { %v399_v6 = vadd.f32 %v8890_v4, %v10088_v58  ;;  %v393_v7 = vpop.f32.mrb[3].mxu0  ;;  %v9239_v5 = vpack.c.bf16 %v3756_v2, %v3755_v1 }
  0xe5   :  { %v394_v8 = vadd.f32 %v10088_v58, %v393_v7 }
  0xe6   :  { %707 = vst.msk [vmem:[#allocation2 + $0x50] sm:$0xff] %vm703_vm4, %v399_v6  ;;  %9558 = vmatpush1.bf16.msra.mxu1 %v9239_v5  ;;  %9240 = vmatpush1.bf16.msra.mxu0 %v9239_v5 }
  0xe7   :  { %706 = vst.msk [vmem:[#allocation2 + $0x48] sm:$0xff] %vm703_vm4, %v394_v8  ;;  %v8893_v11 = vpop.f32.mrb[4].mxu0  ;;  %9543 = vmatprep.subr.bf16.mxu1 %v9604_v41  ;;  %9241 = vmatprep.subr.bf16.mxu0 %v9604_v41 }
  0xe8   :  { %v409_v13 = vadd.f32 %v8893_v11, %v10088_v58  ;;  %v403_v14 = vpop.f32.mrb[5].mxu0 }
  0xe9   :  { %v404_v15 = vadd.f32 %v10088_v58, %v403_v14  ;;  %v1363_v16 = vld [vmem:[#allocation2 + $0x31] sm:$0xff] }
  0xea   :  { %v978_v17 = vld [vmem:[#allocation2 + $0x30] sm:$0xff]  ;;  %709 = vst.msk [vmem:[#allocation2 + $0x70] sm:$0xff] %vm703_vm4, %v409_v13  ;;  %1494 = vrot.lane.b32.xlu1 %v1363_v16, %s9605_s27  ;;  %v10138_v25 = vld [vmem:[#allocation2 + $0x28] sm:$0xff] }
  0xeb   :  { %1109 = vrot.lane.b32.xlu0 %v978_v17, %s9606_s28  ;;  %v850_v18 = vld [vmem:[#allocation2 + $0x2f] sm:$0xff]  ;;  %708 = vst.msk [vmem:[#allocation2 + $0x68] sm:$0xff] %vm703_vm4, %v404_v15  ;;  %v8896_v21 = vpop.f32.mrb[6].mxu0  ;;  %v849_v27 = vld [vmem:[#allocation2 + $0x27] sm:$0xff]  ;;  %2194 = vst.msk [vmem:[#allocation5 + $0x8] sm:$0xff] %vm703_vm4, %v10138_v25 }
  0xec   :  { %914 = vst.msk [vmem:[#allocation5 + $0x48] sm:$0xff] %vm703_vm4, %v850_v18  ;;  %v419_v23 = vadd.f32 %v8896_v21, %v10088_v58  ;;  %v413_v24 = vpop.f32.mrb[7].mxu0  ;;  %v2131_v26 = vld [vmem:[#allocation2 + $0x30] sm:$0xff]  ;;  %913 = vst.msk [vmem:[#allocation5 + $0x30] sm:$0xff] %vm703_vm4, %v849_v27  ;;  %v3758_v18 = vld [vmem:[%s14447_s3 + $0xd8] sm:$0xff] }
  0xed   :  { %v2261_v28 = vld [vmem:[#allocation2 + $0x51] sm:$0xff]  ;;  %v414_v31 = vadd.f32 %v10088_v58, %v413_v24  ;;  %2195 = vst.msk [vmem:[#allocation5 + $0x20] sm:$0xff] %vm703_vm4, %v2131_v26 }
  0xee   :  { %v980_v29 = vld [vmem:[#allocation2 + $0x50] sm:$0xff]  ;;  %711 = vst.msk [vmem:[#allocation2 + $0x90] sm:$0xff] %vm703_vm4, %v419_v23  ;;  %v851_v35 = vld [vmem:[#allocation2 + $0x47] sm:$0xff] }
  0xef   :  { %v10145_v32 = vld [vmem:[#allocation2 + $0x49] sm:$0xff]  ;;  %2392 = vrot.lane.b32.xlu0 %v2261_v28, %s9606_s28  ;;  %1113 = vrot.lane.b32.xlu1 %v980_v29, %s9606_s28  ;;  %2197 = vst.msk [vmem:[#allocation5 + $0x50] sm:$0xff] %vm703_vm4, %v980_v29  ;;  %710 = vst.msk [vmem:[#allocation2 + $0x88] sm:$0xff] %vm703_vm4, %v414_v31  ;;  %v8899_v34 = vpop.f32.mrb[8].mxu0  ;;  %v3412_v59 = vld [vmem:[#allocation2 + $0x51] sm:$0xff] }
  0xf0   :  { %v1748_v33 = vld [vmem:[#allocation2 + $0x4f] sm:$0xff]  ;;  %3475 = vst.msk [vmem:[#allocation5 + $0x10] sm:$0xff] %vm703_vm4, %v10145_v32  ;;  %v429_v38 = vadd.f32 %v8899_v34, %v10088_v58  ;;  %v423_v39 = vpop.f32.mrb[9].mxu0  ;;  %915 = vst.msk [vmem:[#allocation5 + $0x60] sm:$0xff] %vm703_vm4, %v851_v35  ;;  %v3759_v31 = vld [vmem:[%s14447_s3 + $0xe0] sm:$0xff] }
  0xf1   :  { %916 = vst.msk [vmem:[#allocation5 + $0x78] sm:$0xff] %vm703_vm4, %v1748_v33  ;;  %v10165_v42 = vld [vmem:[#allocation2 + $0x70] sm:$0xff]  ;;  %v424_v43 = vadd.f32 %v10088_v58, %v423_v39  ;;  %v2132_v54 = vld [vmem:[#allocation2 + $0x48] sm:$0xff]  ;;  %3476 = vst.msk [vmem:[#allocation5 + $0x28] sm:$0xff] %vm703_vm4, %v3412_v59 }
  0xf2   :  { %v10168_v44 = vld [vmem:[#allocation2 + $0x69] sm:$0xff]  ;;  %713 = vst.msk [vmem:[#allocation2 + $0xb0] sm:$0xff] %vm703_vm4, %v429_v38  ;;  %2199 = vst.msk [vmem:[#allocation5 + $0x80] sm:$0xff] %vm703_vm4, %v10165_v42  ;;  %v10200_v55 = vld [vmem:[#allocation2 + $0x71] sm:$0xff] }
  0xf3   :  { %1498 = vrot.lane.b32.xlu1 %v2261_v28, %s9605_s27  ;;  %3161 = vrot.lane.b32.xlu0 %v10165_v42, %s9607_s20  ;;  %v10174_v45 = vld [vmem:[#allocation2 + $0x6f] sm:$0xff]  ;;  %v10176_v46 = vld [vmem:[#allocation2 + $0x67] sm:$0xff]  ;;  %3477 = vst.msk [vmem:[#allocation5 + $0x40] sm:$0xff] %vm703_vm4, %v10168_v44  ;;  %712 = vst.msk [vmem:[#allocation2 + $0xa8] sm:$0xff] %vm703_vm4, %v424_v43  ;;  %v8902_v48 = vpop.f32.mrb[10].mxu0 }
  0xf4   :  { %v10183_v47 = vld [vmem:[#allocation2 + $0x68] sm:$0xff]  ;;  %918 = vst.msk [vmem:[#allocation5 + $0xa8] sm:$0xff] %vm703_vm4, %v10174_v45  ;;  %917 = vst.msk [vmem:[#allocation5 + $0x90] sm:$0xff] %vm703_vm4, %v10176_v46  ;;  %v439_v51 = vadd.f32 %v8902_v48, %v10088_v58  ;;  %v433_v52 = vpop.f32.mrb[11].mxu0  ;;  %v3414_v6 = vld [vmem:[#allocation2 + $0x71] sm:$0xff] }
  0xf5   :  { %2198 = vst.msk [vmem:[#allocation5 + $0x68] sm:$0xff] %vm703_vm4, %v10183_v47  ;;  %v10202_v56 = vld [vmem:[#allocation2 + $0x90] sm:$0xff]  ;;  %v434_v57 = vadd.f32 %v10088_v58, %v433_v52  ;;  %2196 = vst.msk [vmem:[#allocation5 + $0x38] sm:$0xff] %vm703_vm4, %v2132_v54  ;;  %v979_v8 = vld [vmem:[#allocation2 + $0x48] sm:$0xff] }
  0xf6   :  { %v10206_v60 = vld [vmem:[#allocation2 + $0x89] sm:$0xff]  ;;  %715 = vst.msk [vmem:[#allocation2 + $0xd0] sm:$0xff] %vm703_vm4, %v439_v51  ;;  %2201 = vst.msk [vmem:[#allocation5 + $0xb0] sm:$0xff] %vm703_vm4, %v10202_v56  ;;  %v3416_v7 = vld [vmem:[#allocation2 + $0x91] sm:$0xff] }
  0xf7   :  { %2396 = vrot.lane.b32.xlu0 %v10200_v55, %s9606_s28  ;;  %1879 = vrot.lane.b32.xlu1 %v1748_v33, %s9607_s20  ;;  %v10211_v61 = vld [vmem:[#allocation2 + $0x87] sm:$0xff]  ;;  %3479 = vst.msk [vmem:[#allocation5 + $0x70] sm:$0xff] %vm703_vm4, %v10206_v60  ;;  %v10221_v63 = vld [vmem:[#allocation2 + $0x8f] sm:$0xff]  ;;  %714 = vst.msk [vmem:[#allocation2 + $0xc8] sm:$0xff] %vm703_vm4, %v434_v57  ;;  %v8905_v0 = vpop.f32.mrb[12].mxu0 }
  0xf8   :  { %v10213_v62 = vld [vmem:[#allocation2 + $0x88] sm:$0xff]  ;;  %919 = vst.msk [vmem:[#allocation5 + $0xc0] sm:$0xff] %vm703_vm4, %v10211_v61  ;;  %v449_v3 = vadd.f32 %v8905_v0, %v10088_v58  ;;  %v443_v4 = vpop.f32.mrb[13].mxu0  ;;  %920 = vst.msk [vmem:[#allocation5 + $0xd8] sm:$0xff] %vm703_vm4, %v10221_v63  ;;  %v3757_v17 = vld [vmem:[%s14447_s3 + $0xd0] sm:$0xff] }
  0xf9   :  { %2200 = vst.msk [vmem:[#allocation5 + $0x98] sm:$0xff] %vm703_vm4, %v10213_v62  ;;  %v10239_v9 = vld [vmem:[#allocation2 + $0xb0] sm:$0xff]  ;;  %v444_v10 = vadd.f32 %v10088_v58, %v443_v4  ;;  %3478 = vst.msk [vmem:[#allocation5 + $0x58] sm:$0xff] %vm703_vm4, %v3414_v6  ;;  %v9242_v21 = vpack.c.bf16 %v3758_v18, %v3757_v17  ;;  %v77_v6 = vld [vmem:[%s14444_s0 + $0x100] sm:$0xff] }
  0xfa   :  { %3480 = vst.msk [vmem:[#allocation5 + $0x88] sm:$0xff] %vm703_vm4, %v3416_v7  ;;  %v3418_v11 = vld [vmem:[#allocation2 + $0xb1] sm:$0xff]  ;;  %v10247_v12 = vld [vmem:[#allocation2 + $0xa9] sm:$0xff]  ;;  %717 = vst.msk [vmem:[#allocation2 + $0xf0] sm:$0xff] %vm703_vm4, %v449_v3  ;;  %8933 = vmatprep.mubr.msk.f32.mxu0 %vm120_vm1, %v77_v6 }
  0xfb   :  { %2394 = vrot.lane.b32.xlu0 %v10168_v44, %s9606_s28  ;;  %1111 = vrot.lane.b32.xlu1 %v979_v8, %s9606_s28  ;;  %v10249_v13 = vld [vmem:[#allocation2 + $0xa7] sm:$0xff]  ;;  %2203 = vst.msk [vmem:[#allocation5 + $0xe0] sm:$0xff] %vm703_vm4, %v10239_v9  ;;  %3482 = vst.msk [vmem:[#allocation5 + $0xb8] sm:$0xff] %vm703_vm4, %v3418_v11  ;;  %v10259_v15 = vld [vmem:[#allocation2 + $0xaf] sm:$0xff]  ;;  %v8908_v16 = vpop.f32.mrb[14].mxu0 }
  0xfc   :  { %v10251_v14 = vld [vmem:[#allocation2 + $0xa8] sm:$0xff]  ;;  %3481 = vst.msk [vmem:[#allocation5 + $0xa0] sm:$0xff] %vm703_vm4, %v10247_v12  ;;  %716 = vst.msk [vmem:[#allocation2 + $0xe8] sm:$0xff] %vm703_vm4, %v444_v10  ;;  %v459_v19 = vadd.f32 %v8908_v16, %v10088_v58  ;;  %v453_v20 = vpop.f32.mrb[15].mxu0  ;;  %9559 = vmatpush1.bf16.msra.mxu1 %v9242_v21  ;;  %9243 = vmatpush1.bf16.msra.mxu0 %v9242_v21  ;;  %v10313_v36 = vld [vmem:[#allocation2 + $0x91] sm:$0xff] }
  0xfd   :  { %2202 = vst.msk [vmem:[#allocation5 + $0xc8] sm:$0xff] %vm703_vm4, %v10251_v14  ;;  %921 = vst.msk [vmem:[#allocation5 + $0xf0] sm:$0xff] %vm703_vm4, %v10249_v13  ;;  %v10277_v22 = vld [vmem:[#allocation2 + $0xd0] sm:$0xff]  ;;  %v454_v23 = vadd.f32 %v10088_v58, %v453_v20  ;;  %9544 = vmatprep.subr.bf16.mxu1 %v9604_v41  ;;  %9244 = vmatprep.subr.bf16.mxu0 %v9604_v41  ;;  %v78_v11 = vld [vmem:[%s14444_s0 + $0x108] sm:$0xff] }
  0xfe   :  { %922 = vst.msk [vmem:[#allocation5 + $0x108] sm:$0xff] %vm703_vm4, %v10259_v15  ;;  %v10284_v24 = vld [vmem:[#allocation2 + $0xc9] sm:$0xff]  ;;  %719 = vst.msk [vmem:[#allocation2 + $0x110] sm:$0xff] %vm703_vm4, %v459_v19  ;;  %v3420_v54 = vld [vmem:[#allocation2 + $0xd1] sm:$0xff]  ;;  %8934 = vmatmul.mubr.msk.f32.gmra.mrb[32].mxu0 %vm120_vm1, %v78_v11 }
  0xff   :  { %3165 = vrot.lane.b32.xlu0 %v10202_v56, %s9607_s20  ;;  %1496 = vrot.lane.b32.xlu1 %v10145_v32, %s9605_s27  ;;  %v10286_v26 = vld [vmem:[#allocation2 + $0xc7] sm:$0xff]  ;;  %2205 = vst.msk [vmem:[#allocation5 + $0x110] sm:$0xff] %vm703_vm4, %v10277_v22  ;;  %3483 = vst.msk [vmem:[#allocation5 + $0xd0] sm:$0xff] %vm703_vm4, %v10284_v24  ;;  %v10295_v28 = vld [vmem:[#allocation2 + $0xcf] sm:$0xff]  ;;  %v8911_v29 = vpop.f32.mrb[16].mxu0 }
 0x100   :  { %v10288_v27 = vld [vmem:[#allocation2 + $0xc8] sm:$0xff]  ;;  %718 = vst.msk [vmem:[#allocation2 + $0x108] sm:$0xff] %vm703_vm4, %v454_v23  ;;  %923 = vst.msk [vmem:[#allocation5 + $0x120] sm:$0xff] %vm703_vm4, %v10286_v26  ;;  %v469_v33 = vadd.f32 %v8911_v29, %v10088_v58  ;;  %v463_v34 = vpop.f32.mrb[17].mxu0  ;;  %v79_v18 = vld [vmem:[%s14444_s0 + $0x110] sm:$0xff] }
 0x101   :  { %v3760_v32 = vld [vmem:[%s14447_s3 + $0xe8] sm:$0xff]  ;;  %2204 = vst.msk [vmem:[#allocation5 + $0xf8] sm:$0xff] %vm703_vm4, %v10288_v27  ;;  %924 = vst.msk [vmem:[#allocation5 + $0x138] sm:$0xff] %vm703_vm4, %v10295_v28  ;;  %v10315_v37 = vld [vmem:[#allocation2 + $0xf0] sm:$0xff]  ;;  %v464_v38 = vadd.f32 %v10088_v58, %v463_v34  ;;  %8936 = vmatprep.mubr.msk.f32.mxu0 %vm120_vm1, %v79_v18 }
 0x102   :  { %v9245_v35 = vpack.c.bf16 %v3760_v32, %v3759_v31  ;;  %721 = vst.msk [vmem:[#allocation2 + $0x130] sm:$0xff] %vm703_vm4, %v469_v33  ;;  %2207 = vst.msk [vmem:[#allocation5 + $0x140] sm:$0xff] %vm703_vm4, %v10315_v37  ;;  %v3422_v0 = vld [vmem:[#allocation2 + $0xf1] sm:$0xff] }
 0x103   :  { %2400 = vrot.lane.b32.xlu0 %v10313_v36, %s9606_s28  ;;  %1117 = vrot.lane.b32.xlu1 %v10165_v42, %s9606_s28  ;;  %v10322_v39 = vld [vmem:[#allocation2 + $0xe9] sm:$0xff]  ;;  %720 = vst.msk [vmem:[#allocation2 + $0x128] sm:$0xff] %vm703_vm4, %v464_v38  ;;  %v8914_v48 = vpop.f32.mrb[18].mxu0  ;;  %3484 = vst.msk [vmem:[#allocation5 + $0xe8] sm:$0xff] %vm703_vm4, %v3420_v54  ;;  %v80_v19 = vld [vmem:[%s14444_s0 + $0x118] sm:$0xff] }
 0x104   :  { %v10324_v40 = vld [vmem:[#allocation2 + $0xe8] sm:$0xff]  ;;  %3485 = vst.msk [vmem:[#allocation5 + $0x100] sm:$0xff] %vm703_vm4, %v10322_v39  ;;  %9560 = vmatpush1.bf16.msra.mxu1 %v9245_v35  ;;  %v3761_v42 = vld [vmem:[%s14447_s3 + $0xf0] sm:$0xff]  ;;  %9246 = vmatpush1.bf16.msra.mxu0 %v9245_v35  ;;  %v479_v50 = vadd.f32 %v8914_v48, %v10088_v58  ;;  %v473_v51 = vpop.f32.mrb[19].mxu0  ;;  %3486 = vst.msk [vmem:[#allocation5 + $0x118] sm:$0xff] %vm703_vm4, %v3422_v0 }
 0x105   :  { %v10331_v43 = vld [vmem:[#allocation2 + $0xef] sm:$0xff]  ;;  %2206 = vst.msk [vmem:[#allocation5 + $0x128] sm:$0xff] %vm703_vm4, %v10324_v40  ;;  %9545 = vmatprep.subr.bf16.mxu1 %v9604_v41  ;;  %v9248_v52 = vpack.c.bf16 %v3762_v49, %v3761_v42  ;;  %v861_v53 = vld [vmem:[#allocation2 + $0xe7] sm:$0xff]  ;;  %9247 = vmatprep.subr.bf16.mxu0 %v9604_v41  ;;  %v474_v59 = vadd.f32 %v10088_v58, %v473_v51 }
 0x106   :  { %926 = vst.msk [vmem:[#allocation5 + $0x168] sm:$0xff] %vm703_vm4, %v10331_v43  ;;  %v10347_v57 = vld [vmem:[#allocation2 + $0x110] sm:$0xff]  ;;  %925 = vst.msk [vmem:[#allocation5 + $0x150] sm:$0xff] %vm703_vm4, %v861_v53  ;;  %8937 = vmatmul.mubr.msk.f32.gmra.mrb[34].mxu0 %vm120_vm1, %v80_v19  ;;  %v82_v38 = vld [vmem:[%s14444_s0 + $0x128] sm:$0xff] }
 0x107   :  { %2779 = vrot.lane.b32.xlu0 %v10211_v61, %s9605_s27  ;;  %1502 = vrot.lane.b32.xlu1 %v10200_v55, %s9605_s27  ;;  %v10356_v1 = vld [vmem:[#allocation2 + $0x109] sm:$0xff]  ;;  %723 = vst.msk [vmem:[#allocation2 + $0x150] sm:$0xff] %vm703_vm4, %v479_v50  ;;  %2209 = vst.msk [vmem:[#allocation5 + $0x170] sm:$0xff] %vm703_vm4, %v10347_v57  ;;  %v3424_v4 = vld [vmem:[#allocation2 + $0x111] sm:$0xff]  ;;  %v8917_v33 = vpop.f32.mrb[20].mxu0 }
 0x108   :  { %v10358_v2 = vld [vmem:[#allocation2 + $0x108] sm:$0xff]  ;;  %3487 = vst.msk [vmem:[#allocation5 + $0x130] sm:$0xff] %vm703_vm4, %v10356_v1  ;;  %722 = vst.msk [vmem:[#allocation2 + $0x148] sm:$0xff] %vm703_vm4, %v474_v59  ;;  %9561 = vmatpush1.bf16.msra.mxu1 %v9248_v52  ;;  %9249 = vmatpush1.bf16.msra.mxu0 %v9248_v52  ;;  %v2267_v32 = vld [vmem:[#allocation2 + $0xb1] sm:$0xff]  ;;  %v489_v34 = vadd.f32 %v8917_v33, %v10088_v58  ;;  %v483_v35 = vpop.f32.mrb[21].mxu0 }
 0x109   :  { %v10366_v3 = vld [vmem:[#allocation2 + $0x10f] sm:$0xff]  ;;  %2208 = vst.msk [vmem:[#allocation5 + $0x158] sm:$0xff] %vm703_vm4, %v10358_v2  ;;  %v863_v55 = vld [vmem:[#allocation2 + $0x107] sm:$0xff]  ;;  %3488 = vst.msk [vmem:[#allocation5 + $0x148] sm:$0xff] %vm703_vm4, %v3424_v4 }
 0x10a   :  { %928 = vst.msk [vmem:[#allocation5 + $0x198] sm:$0xff] %vm703_vm4, %v10366_v3  ;;  %927 = vst.msk [vmem:[#allocation5 + $0x180] sm:$0xff] %vm703_vm4, %v863_v55  ;;  %v10374_v5 = vld [vmem:[#allocation2 + $0x130] sm:$0xff]  ;;  %v10386_v8 = vld [vmem:[#allocation2 + $0x128] sm:$0xff] }
 0x10b   :  { %3163 = vrot.lane.b32.xlu0 %v10213_v62, %s9607_s20  ;;  %2777 = vrot.lane.b32.xlu1 %v10174_v45, %s9605_s27  ;;  %v10384_v7 = vld [vmem:[#allocation2 + $0x129] sm:$0xff]  ;;  %2211 = vst.msk [vmem:[#allocation5 + $0x1a0] sm:$0xff] %vm703_vm4, %v10374_v5  ;;  %2210 = vst.msk [vmem:[#allocation5 + $0x188] sm:$0xff] %vm703_vm4, %v10386_v8  ;;  %v3426_v17 = vld [vmem:[#allocation2 + $0x131] sm:$0xff]  ;;  %v8920_v50 = vpop.f32.mrb[22].mxu0 }
 0x10c   :  { %3489 = vst.msk [vmem:[#allocation5 + $0x160] sm:$0xff] %vm703_vm4, %v10384_v7  ;;  %v10392_v10 = vld [vmem:[#allocation2 + $0x12f] sm:$0xff]  ;;  %v865_v16 = vld [vmem:[#allocation2 + $0x127] sm:$0xff]  ;;  %3490 = vst.msk [vmem:[#allocation5 + $0x178] sm:$0xff] %vm703_vm4, %v3426_v17  ;;  %v499_v51 = vadd.f32 %v8920_v50, %v10088_v58  ;;  %v493_v52 = vpop.f32.mrb[23].mxu0 }
 0x10d   :  { %930 = vst.msk [vmem:[#allocation5 + $0x1c8] sm:$0xff] %vm703_vm4, %v10392_v10  ;;  %929 = vst.msk [vmem:[#allocation5 + $0x1b0] sm:$0xff] %vm703_vm4, %v865_v16  ;;  %v2269_v49 = vld [vmem:[#allocation2 + $0xd1] sm:$0xff]  ;;  %v10568_v16 = vld [vmem:[#allocation2 + $0xe7] sm:$0xff] }
 0x10e   :  { %v10410_v20 = vld [vmem:[#allocation2 + $0x150] sm:$0xff]  ;;  %725 = vst.msk [vmem:[#allocation2 + $0x170] sm:$0xff] %vm703_vm4, %v489_v34  ;;  %727 = vst.msk [vmem:[#allocation2 + $0x190] sm:$0xff] %vm703_vm4, %v499_v51  ;;  %v85_v17 = vld [vmem:[%s14444_s0 + $0x140] sm:$0xff] }
 0x10f   :  { %2781 = vrot.lane.b32.xlu0 %v10221_v63, %s9605_s27  ;;  %1881 = vrot.lane.b32.xlu1 %v10176_v46, %s9607_s20  ;;  %v10417_v21 = vld [vmem:[#allocation2 + $0x149] sm:$0xff]  ;;  %2213 = vst.msk [vmem:[#allocation5 + $0x1d0] sm:$0xff] %vm703_vm4, %v10410_v20  ;;  %v3428_v46 = vld [vmem:[#allocation2 + $0x151] sm:$0xff]  ;;  %v8923_v4 = vpop.f32.mrb[24].mxu0 }
 0x110   :  { %v10419_v23 = vld [vmem:[#allocation2 + $0x147] sm:$0xff]  ;;  %3491 = vst.msk [vmem:[#allocation5 + $0x190] sm:$0xff] %vm703_vm4, %v10417_v21  ;;  %v10428_v31 = vld [vmem:[#allocation2 + $0x14f] sm:$0xff]  ;;  %3492 = vst.msk [vmem:[#allocation5 + $0x1a8] sm:$0xff] %vm703_vm4, %v3428_v46  ;;  %v509_v6 = vadd.f32 %v8923_v4, %v10088_v58  ;;  %v503_v11 = vpop.f32.mrb[25].mxu0 }
 0x111   :  { %v10426_v29 = vld [vmem:[#allocation2 + $0x148] sm:$0xff]  ;;  %931 = vst.msk [vmem:[#allocation5 + $0x1e0] sm:$0xff] %vm703_vm4, %v10419_v23  ;;  %932 = vst.msk [vmem:[#allocation5 + $0x1f8] sm:$0xff] %vm703_vm4, %v10428_v31  ;;  %v83_v53 = vld [vmem:[%s14444_s0 + $0x130] sm:$0xff] }
 0x112   :  { %2212 = vst.msk [vmem:[#allocation5 + $0x1b8] sm:$0xff] %vm703_vm4, %v10426_v29  ;;  %729 = vst.msk [vmem:[#allocation2 + $0x1b0] sm:$0xff] %vm703_vm4, %v509_v6  ;;  %v10638_v50 = vld [vmem:[#allocation2 + $0x107] sm:$0xff] }
 0x113   :  { %2398 = vrot.lane.b32.xlu0 %v10206_v60, %s9606_s28  ;;  %1883 = vrot.lane.b32.xlu1 %v10174_v45, %s9607_s20  ;;  %v484_v45 = vadd.f32 %v10088_v58, %v483_v35 }
 0x115   :  { %724 = vst.msk [vmem:[#allocation2 + $0x168] sm:$0xff] %vm703_vm4, %v484_v45  ;;  %v10534_v54 = vld [vmem:[#allocation2 + $0x190] sm:$0xff]  ;;  %v8926_v45 = vpop.f32.mrb[26].mxu0 }
 0x116   :  { %2217 = vst.msk [vmem:[#allocation5 + $0x230] sm:$0xff] %vm703_vm4, %v10534_v54 }
 0x117   :  { %3169 = vrot.lane.b32.xlu0 %v10239_v9, %s9607_s20  ;;  %1115 = vrot.lane.b32.xlu1 %v10183_v47, %s9606_s28  ;;  %v81_v47 = vld [vmem:[%s14444_s0 + $0x120] sm:$0xff] }
 0x118   :  { %8939 = vmatprep.mubr.msk.f32.mxu0 %vm120_vm1, %v81_v47  ;;  %v519_v47 = vadd.f32 %v8926_v45, %v10088_v58 }
 0x119   :  { %8940 = vmatmul.mubr.msk.f32.gmra.mrb[36].mxu0 %vm120_vm1, %v82_v38  ;;  %v10597_v18 = vld [vmem:[#allocation2 + $0x1b0] sm:$0xff] }
 0x11a   :  { %8942 = vmatprep.mubr.msk.f32.mxu0 %vm120_vm1, %v83_v53  ;;  %2219 = vst.msk [vmem:[#allocation5 + $0x260] sm:$0xff] %vm703_vm4, %v10597_v18  ;;  %731 = vst.msk [vmem:[#allocation2 + $0x1d0] sm:$0xff] %vm703_vm4, %v519_v47 }
 0x11b   :  { %2404 = vrot.lane.b32.xlu0 %v2267_v32, %s9606_s28  ;;  %1500 = vrot.lane.b32.xlu1 %v10168_v44, %s9605_s27 }
 0x11c   :  { %v10461_v44 = vld [vmem:[#allocation2 + $0x169] sm:$0xff] }
 0x11d   :  { %3493 = vst.msk [vmem:[#allocation5 + $0x1c0] sm:$0xff] %vm703_vm4, %v10461_v44  ;;  %v10480_v48 = vld [vmem:[#allocation2 + $0x168] sm:$0xff] }
 0x11e   :  { %v10482_v42 = vld [vmem:[#allocation2 + $0x16f] sm:$0xff]  ;;  %2214 = vst.msk [vmem:[#allocation5 + $0x1e8] sm:$0xff] %vm703_vm4, %v10480_v48 }
 0x11f   :  { %2783 = vrot.lane.b32.xlu0 %v10249_v13, %s9605_s27  ;;  %1121 = vrot.lane.b32.xlu1 %v10202_v56, %s9606_s28  ;;  %v10475_v56 = vld [vmem:[#allocation2 + $0x170] sm:$0xff]  ;;  %934 = vst.msk [vmem:[#allocation5 + $0x228] sm:$0xff] %vm703_vm4, %v10482_v42 }
 0x120   :  { %2215 = vst.msk [vmem:[#allocation5 + $0x200] sm:$0xff] %vm703_vm4, %v10475_v56 }
 0x121   :  { %v10652_v53 = vld [vmem:[#allocation2 + $0x1d1] sm:$0xff] }
 0x122   :  { %3500 = vst.msk [vmem:[#allocation5 + $0x268] sm:$0xff] %vm703_vm4, %v10652_v53  ;;  %v10672_v4 = vld [vmem:[#allocation2 + $0x1d0] sm:$0xff] }
 0x123   :  { %3167 = vrot.lane.b32.xlu0 %v10251_v14, %s9607_s20  ;;  %1506 = vrot.lane.b32.xlu1 %v10313_v36, %s9605_s27  ;;  %v10477_v36 = vld [vmem:[#allocation2 + $0x167] sm:$0xff]  ;;  %2221 = vst.msk [vmem:[#allocation5 + $0x290] sm:$0xff] %vm703_vm4, %v10672_v4 }
 0x124   :  { %933 = vst.msk [vmem:[#allocation5 + $0x210] sm:$0xff] %vm703_vm4, %v10477_v36 }
 0x127   :  { %2785 = vrot.lane.b32.xlu0 %v10259_v15, %s9605_s27  ;;  %1885 = vrot.lane.b32.xlu1 %v10211_v61, %s9607_s20  ;;  %v3430_v61 = vld [vmem:[#allocation2 + $0x171] sm:$0xff] }
 0x128   :  { %3494 = vst.msk [vmem:[#allocation5 + $0x1d8] sm:$0xff] %vm703_vm4, %v3430_v61 }
 0x12b   :  { %2402 = vrot.lane.b32.xlu0 %v10247_v12, %s9606_s28  ;;  %1887 = vrot.lane.b32.xlu1 %v10221_v63, %s9607_s20  ;;  %v494_v63 = vadd.f32 %v10088_v58, %v493_v52 }
 0x12d   :  { %726 = vst.msk [vmem:[#allocation2 + $0x188] sm:$0xff] %vm703_vm4, %v494_v63 }
 0x12f   :  { %3173 = vrot.lane.b32.xlu0 %v10277_v22, %s9607_s20  ;;  %1119 = vrot.lane.b32.xlu1 %v10213_v62, %s9606_s28 }
 0x133   :  { %2408 = vrot.lane.b32.xlu0 %v2269_v49, %s9606_s28  ;;  %1504 = vrot.lane.b32.xlu1 %v10206_v60, %s9605_s27  ;;  %v10516_v60 = vld [vmem:[#allocation2 + $0x191] sm:$0xff] }
 0x134   :  { %3496 = vst.msk [vmem:[#allocation5 + $0x208] sm:$0xff] %vm703_vm4, %v10516_v60  ;;  %v10520_v62 = vld [vmem:[#allocation2 + $0x189] sm:$0xff] }
 0x135   :  { %3495 = vst.msk [vmem:[#allocation5 + $0x1f0] sm:$0xff] %vm703_vm4, %v10520_v62  ;;  %v10536_v59 = vld [vmem:[#allocation2 + $0x187] sm:$0xff]  ;;  %v10541_v55 = vld [vmem:[#allocation2 + $0x18f] sm:$0xff] }
 0x136   :  { %v10538_v0 = vld [vmem:[#allocation2 + $0x188] sm:$0xff]  ;;  %935 = vst.msk [vmem:[#allocation5 + $0x240] sm:$0xff] %vm703_vm4, %v10536_v59  ;;  %936 = vst.msk [vmem:[#allocation5 + $0x258] sm:$0xff] %vm703_vm4, %v10541_v55 }
 0x137   :  { %2787 = vrot.lane.b32.xlu0 %v10286_v26, %s9605_s27  ;;  %1125 = vrot.lane.b32.xlu1 %v10239_v9, %s9606_s28  ;;  %v84_v9 = vld [vmem:[%s14444_s0 + $0x138] sm:$0xff]  ;;  %2216 = vst.msk [vmem:[#allocation5 + $0x218] sm:$0xff] %vm703_vm4, %v10538_v0 }
 0x138   :  { %8943 = vmatmul.mubr.msk.f32.gmra.mrb[38].mxu0 %vm120_vm1, %v84_v9  ;;  %v87_v9 = vld [vmem:[%s14444_s0 + $0x150] sm:$0xff] }
 0x139   :  { %8945 = vmatprep.mubr.msk.f32.mxu0 %vm120_vm1, %v85_v17 }
 0x13b   :  { %3171 = vrot.lane.b32.xlu0 %v10288_v27, %s9607_s20  ;;  %1510 = vrot.lane.b32.xlu1 %v2267_v32, %s9605_s27 }
 0x13f   :  { %2789 = vrot.lane.b32.xlu0 %v10295_v28, %s9605_s27  ;;  %1889 = vrot.lane.b32.xlu1 %v10249_v13, %s9607_s20  ;;  %v10560_v13 = vld [vmem:[#allocation2 + $0xf1] sm:$0xff] }
 0x143   :  { %2406 = vrot.lane.b32.xlu0 %v10284_v24, %s9606_s28  ;;  %1891 = vrot.lane.b32.xlu1 %v10259_v15, %s9607_s20  ;;  %v504_v15 = vadd.f32 %v10088_v58, %v503_v11 }
 0x145   :  { %728 = vst.msk [vmem:[#allocation2 + $0x1a8] sm:$0xff] %vm703_vm4, %v504_v15 }
 0x147   :  { %3177 = vrot.lane.b32.xlu0 %v10315_v37, %s9607_s20  ;;  %1123 = vrot.lane.b32.xlu1 %v10251_v14, %s9606_s28 }
 0x14b   :  { %2412 = vrot.lane.b32.xlu0 %v10560_v13, %s9606_s28  ;;  %1508 = vrot.lane.b32.xlu1 %v10247_v12, %s9605_s27  ;;  %v10579_v12 = vld [vmem:[#allocation2 + $0x1b1] sm:$0xff] }
 0x14c   :  { %3498 = vst.msk [vmem:[#allocation5 + $0x238] sm:$0xff] %vm703_vm4, %v10579_v12  ;;  %v10583_v14 = vld [vmem:[#allocation2 + $0x1a9] sm:$0xff] }
 0x14d   :  { %3497 = vst.msk [vmem:[#allocation5 + $0x220] sm:$0xff] %vm703_vm4, %v10583_v14  ;;  %v10599_v19 = vld [vmem:[#allocation2 + $0x1a7] sm:$0xff]  ;;  %v10604_v32 = vld [vmem:[#allocation2 + $0x1af] sm:$0xff] }
 0x14e   :  { %v10601_v46 = vld [vmem:[#allocation2 + $0x1a8] sm:$0xff]  ;;  %937 = vst.msk [vmem:[#allocation5 + $0x270] sm:$0xff] %vm703_vm4, %v10599_v19  ;;  %938 = vst.msk [vmem:[#allocation5 + $0x288] sm:$0xff] %vm703_vm4, %v10604_v32 }
 0x14f   :  { %2791 = vrot.lane.b32.xlu0 %v10568_v16, %s9605_s27  ;;  %1129 = vrot.lane.b32.xlu1 %v10277_v22, %s9606_s28  ;;  %v86_v22 = vld [vmem:[%s14444_s0 + $0x148] sm:$0xff]  ;;  %2218 = vst.msk [vmem:[#allocation5 + $0x248] sm:$0xff] %vm703_vm4, %v10601_v46 }
 0x150   :  { %8946 = vmatmul.mubr.msk.f32.gmra.mrb[40].mxu0 %vm120_vm1, %v86_v22 }
 0x151   :  { %8948 = vmatprep.mubr.msk.f32.mxu0 %vm120_vm1, %v87_v9 }
 0x153   :  { %3175 = vrot.lane.b32.xlu0 %v10324_v40, %s9607_s20  ;;  %1514 = vrot.lane.b32.xlu1 %v2269_v49, %s9605_s27 }
 0x157   :  { %2793 = vrot.lane.b32.xlu0 %v10331_v43, %s9605_s27  ;;  %1893 = vrot.lane.b32.xlu1 %v10286_v26, %s9607_s20 }
 0x15b   :  { %2410 = vrot.lane.b32.xlu0 %v10322_v39, %s9606_s28  ;;  %1895 = vrot.lane.b32.xlu1 %v10295_v28, %s9607_s20  ;;  %v10627_v28 = vld [vmem:[#allocation2 + $0x111] sm:$0xff] }
 0x15c   :  { %v1495_v26 = vpop.permute.xlu1 %1494 }
 0x15d   :  { %v1110_v33 = vpop.permute.xlu0 %1109 }
 0x15e   :  { %1299 = vst.msk [vmem:[#allocation5 + $0x48] sm:$0xff] %vm1295_vm6, %v1110_v33 }
 0x15f   :  { %3181 = vrot.lane.b32.xlu0 %v10347_v57, %s9607_s20  ;;  %1127 = vrot.lane.b32.xlu1 %v10288_v27, %s9606_s28  ;;  %1684 = vst.msk [vmem:[#allocation5 + $0x48] sm:$0xff] %vm1680_vm7, %v1495_v26  ;;  %v513_v27 = vpop.f32.mrb[27].mxu0 }
 0x160   :  { %v514_v49 = vadd.f32 %v10088_v58, %v513_v27 }
 0x161   :  { %v2393_v34 = vpop.permute.xlu0 %2392  ;;  %v1114_v35 = vpop.permute.xlu1 %1113 }
 0x162   :  { %2581 = vst.msk [vmem:[#allocation5 + $0x50] sm:$0xff] %vm1295_vm6, %v2393_v34  ;;  %1301 = vst.msk [vmem:[#allocation5 + $0x78] sm:$0xff] %vm1295_vm6, %v1114_v35  ;;  %v10700_v35 = vld [vmem:[#allocation2 + $0x131] sm:$0xff] }
 0x163   :  { %2416 = vrot.lane.b32.xlu0 %v10627_v28, %s9606_s28  ;;  %1512 = vrot.lane.b32.xlu1 %v10284_v24, %s9605_s27  ;;  %730 = vst.msk [vmem:[#allocation2 + $0x1c8] sm:$0xff] %vm703_vm4, %v514_v49  ;;  %v10710_v49 = vld [vmem:[#allocation2 + $0x127] sm:$0xff] }
 0x165   :  { %v1499_v38 = vpop.permute.xlu1 %1498  ;;  %v10634_v61 = vpop.permute.xlu0 %3161 }
 0x166   :  { %1686 = vst.msk [vmem:[#allocation5 + $0x78] sm:$0xff] %vm1680_vm7, %v1499_v38 }
 0x167   :  { %2795 = vrot.lane.b32.xlu0 %v10638_v50, %s9605_s27  ;;  %1133 = vrot.lane.b32.xlu1 %v10315_v37, %s9606_s28 }
 0x169   :  { %v2397_v24 = vpop.permute.xlu0 %2396  ;;  %v1880_v51 = vpop.permute.xlu1 %1879 }
 0x16a   :  { %2583 = vst.msk [vmem:[#allocation5 + $0x80] sm:$0xff] %vm1295_vm6, %v2397_v24  ;;  %v10658_v37 = vld [vmem:[#allocation2 + $0x1c9] sm:$0xff] }
 0x16b   :  { %2069 = vst.msk [vmem:[#allocation5 + $0x48] sm:$0xff] %vm2065_vm8, %v1880_v51  ;;  %3179 = vrot.lane.b32.xlu0 %v10358_v2, %s9607_s20  ;;  %1518 = vrot.lane.b32.xlu1 %v10560_v13, %s9605_s27  ;;  %v88_v13 = vld [vmem:[%s14444_s0 + $0x158] sm:$0xff]  ;;  %v10674_v6 = vld [vmem:[#allocation2 + $0x1c7] sm:$0xff]  ;;  %v876_v17 = vld [vmem:[#allocation2 + $0x1cf] sm:$0xff] }
 0x16c   :  { %3499 = vst.msk [vmem:[#allocation5 + $0x250] sm:$0xff] %vm703_vm4, %v10658_v37  ;;  %v10676_v11 = vld [vmem:[#allocation2 + $0x1c8] sm:$0xff]  ;;  %939 = vst.msk [vmem:[#allocation5 + $0x2a0] sm:$0xff] %vm703_vm4, %v10674_v6  ;;  %8949 = vmatmul.mubr.msk.f32.gmra.mrb[42].mxu0 %vm120_vm1, %v88_v13 }
 0x16d   :  { %v2395_v52 = vpop.permute.xlu0 %2394  ;;  %v1112_v63 = vpop.permute.xlu1 %1111  ;;  %2220 = vst.msk [vmem:[#allocation5 + $0x278] sm:$0xff] %vm703_vm4, %v10676_v11  ;;  %940 = vst.msk [vmem:[#allocation5 + $0x2b8] sm:$0xff] %vm703_vm4, %v876_v17 }
 0x16e   :  { %2582 = vst.msk [vmem:[#allocation5 + $0x68] sm:$0xff] %vm1295_vm6, %v2395_v52  ;;  %1300 = vst.msk [vmem:[#allocation5 + $0x60] sm:$0xff] %vm1295_vm6, %v1112_v63  ;;  %v89_v63 = vld [vmem:[%s14444_s0 + $0x160] sm:$0xff] }
 0x16f   :  { %2797 = vrot.lane.b32.xlu0 %v10366_v3, %s9605_s27  ;;  %1897 = vrot.lane.b32.xlu1 %v10568_v16, %s9607_s20 }
 0x170   :  { %8951 = vmatprep.mubr.msk.f32.mxu0 %vm120_vm1, %v89_v63 }
 0x171   :  { %v3166_v15 = vpop.permute.xlu0 %3165  ;;  %v1497_v16 = vpop.permute.xlu1 %1496 }
 0x172   :  { %1685 = vst.msk [vmem:[#allocation5 + $0x60] sm:$0xff] %vm1680_vm7, %v1497_v16  ;;  %v3548_v13 = vld [vmem:[#allocation5 + $0x48] sm:$0xff] }
 0x173   :  { %2414 = vrot.lane.b32.xlu0 %v10356_v1, %s9606_s28  ;;  %1899 = vrot.lane.b32.xlu1 %v10331_v43, %s9607_s20  ;;  %v8929_v43 = vpop.f32.mrb[28].mxu0 }
 0x174   :  { %v529_v45 = vadd.f32 %v8929_v43, %v10088_v58  ;;  %v523_v47 = vpop.f32.mrb[29].mxu0 }
 0x175   :  { %v2401_v22 = vpop.permute.xlu0 %2400  ;;  %v1118_v26 = vpop.permute.xlu1 %1117  ;;  %v524_v38 = vadd.f32 %v10088_v58, %v523_v47 }
 0x176   :  { %2585 = vst.msk [vmem:[#allocation5 + $0xb0] sm:$0xff] %vm1295_vm6, %v2401_v22  ;;  %1303 = vst.msk [vmem:[#allocation5 + $0xa8] sm:$0xff] %vm1295_vm6, %v1118_v26  ;;  %v8932_v47 = vpop.f32.mrb[30].mxu0 }
 0x177   :  { %3185 = vrot.lane.b32.xlu0 %v10374_v5, %s9607_s20  ;;  %1131 = vrot.lane.b32.xlu1 %v10324_v40, %s9606_s28  ;;  %733 = vst.msk [vmem:[#allocation2 + $0x1f0] sm:$0xff] %vm703_vm4, %v529_v45  ;;  %732 = vst.msk [vmem:[#allocation2 + $0x1e8] sm:$0xff] %vm703_vm4, %v524_v38 }
 0x179   :  { %v2780_v33 = vpop.permute.xlu0 %2779  ;;  %v1503_v34 = vpop.permute.xlu1 %1502 }
 0x17a   :  { %2967 = vst.msk [vmem:[#allocation5 + $0x68] sm:$0xff] %vm1680_vm7, %v2780_v33  ;;  %1688 = vst.msk [vmem:[#allocation5 + $0xa8] sm:$0xff] %vm1680_vm7, %v1503_v34 }
 0x17b   :  { %2420 = vrot.lane.b32.xlu0 %v10700_v35, %s9606_s28  ;;  %1516 = vrot.lane.b32.xlu1 %v10322_v39, %s9605_s27 }
 0x17d   :  { %v3164_v27 = vpop.permute.xlu0 %3163  ;;  %v2778_v40 = vpop.permute.xlu1 %2777 }
 0x17e   :  { %3351 = vst.msk [vmem:[#allocation5 + $0x68] sm:$0xff] %vm2065_vm8, %v3164_v27  ;;  %v10727_v51 = vld [vmem:[#allocation2 + $0x1f1] sm:$0xff]  ;;  %v10733_v52 = vld [vmem:[#allocation2 + $0x1e9] sm:$0xff] }
 0x17f   :  { %2966 = vst.msk [vmem:[#allocation5 + $0x50] sm:$0xff] %vm1680_vm7, %v2778_v40  ;;  %2799 = vrot.lane.b32.xlu0 %v10710_v49, %s9605_s27  ;;  %1137 = vrot.lane.b32.xlu1 %v10347_v57, %s9606_s28  ;;  %v10747_v9 = vld [vmem:[#allocation2 + $0x1e8] sm:$0xff]  ;;  %v533_v40 = vpop.f32.mrb[31].mxu0 }
 0x180   :  { %3350 = vst.msk [vmem:[#allocation5 + $0x50] sm:$0xff] %vm2065_vm8, %v10634_v61  ;;  %v877_v16 = vld [vmem:[#allocation2 + $0x1e7] sm:$0xff]  ;;  %v878_v26 = vld [vmem:[#allocation2 + $0x1ef] sm:$0xff] }
 0x181   :  { %v2782_v58 = vpop.permute.xlu0 %2781  ;;  %v1882_v39 = vpop.permute.xlu1 %1881  ;;  %3502 = vst.msk [vmem:[#allocation5 + $0x298] sm:$0xff] %vm703_vm4, %v10727_v51  ;;  %3501 = vst.msk [vmem:[#allocation5 + $0x280] sm:$0xff] %vm703_vm4, %v10733_v52 }
 0x182   :  { %2968 = vst.msk [vmem:[#allocation5 + $0x80] sm:$0xff] %vm1680_vm7, %v2782_v58 }
 0x183   :  { %2070 = vst.msk [vmem:[#allocation5 + $0x60] sm:$0xff] %vm2065_vm8, %v1882_v39  ;;  %3352 = vst.msk [vmem:[#allocation5 + $0x80] sm:$0xff] %vm2065_vm8, %v3166_v15  ;;  %3183 = vrot.lane.b32.xlu0 %v10386_v8, %s9607_s20  ;;  %1522 = vrot.lane.b32.xlu1 %v10627_v28, %s9605_s27  ;;  %v90_v28 = vld [vmem:[%s14444_s0 + $0x168] sm:$0xff]  ;;  %v10750_v15 = vld [vmem:[#allocation2 + $0x1f0] sm:$0xff] }
 0x184   :  { %2222 = vst.msk [vmem:[#allocation5 + $0x2a8] sm:$0xff] %vm703_vm4, %v10747_v9  ;;  %8952 = vmatmul.mubr.msk.f32.gmra.mrb[44].mxu0 %vm120_vm1, %v90_v28  ;;  %2223 = vst.msk [vmem:[#allocation5 + $0x2c0] sm:$0xff] %vm703_vm4, %v10750_v15 }
 0x185   :  { %v2399_v61 = vpop.permute.xlu0 %2398  ;;  %v1884_v24 = vpop.permute.xlu1 %1883  ;;  %v3552_v22 = vld [vmem:[#allocation5 + $0x68] sm:$0xff]  ;;  %941 = vst.msk [vmem:[#allocation5 + $0x2d0] sm:$0xff] %vm703_vm4, %v877_v16  ;;  %942 = vst.msk [vmem:[#allocation5 + $0x2e8] sm:$0xff] %vm703_vm4, %v878_v26 }
 0x186   :  { %2584 = vst.msk [vmem:[#allocation5 + $0x98] sm:$0xff] %vm1295_vm6, %v2399_v61 }
 0x187   :  { %2071 = vst.msk [vmem:[#allocation5 + $0x78] sm:$0xff] %vm2065_vm8, %v1884_v24  ;;  %v3549_v57 = vld [vmem:[#allocation5 + $0x50] sm:$0xff]  ;;  %2801 = vrot.lane.b32.xlu0 %v10392_v10, %s9605_s27  ;;  %1901 = vrot.lane.b32.xlu1 %v10638_v50, %s9607_s20 }
 0x188   :  { %4045 = vmatprep.mubr.f32.mxu1 %v3549_v57 }
 0x189   :  { %4046 = vmatmul.mubr.f32.vlgmr.msra.gmra.mrb[0].mxu1 %v3548_v13  ;;  %v3170_v50 = vpop.permute.xlu0 %3169  ;;  %v1116_v17 = vpop.permute.xlu1 %1115 }
 0x18a   :  { %1302 = vst.msk [vmem:[#allocation5 + $0x90] sm:$0xff] %vm1295_vm6, %v1116_v17  ;;  %4050 = vmatprep.mubr.f32.mxu1 %v3552_v22  ;;  %v3551_v33 = vld [vmem:[#allocation5 + $0x60] sm:$0xff] }
 0x18b   :  { %2418 = vrot.lane.b32.xlu0 %v10384_v7, %s9606_s28  ;;  %1903 = vrot.lane.b32.xlu1 %v10366_v3, %s9607_s20  ;;  %v3555_v45 = vld [vmem:[#allocation5 + $0x80] sm:$0xff] }
 0x18c   :  { %v10773_v3 = vld [vmem:[%s14446_s2] ss:$0 sm:$0xff] }
 0x18d   :  { %4051 = vmatmul.mubr.f32.gmra.mrb[2].mxu1 %v3551_v33  ;;  %v2405_v34 = vpop.permute.xlu0 %2404  ;;  %v1501_v43 = vpop.permute.xlu1 %1500  ;;  %v539_v27 = vadd.f32 %v10773_v3, %v8932_v47  ;;  %v534_v58 = vadd.f32 %v10773_v3, %v533_v40 }
 0x18e   :  { %2587 = vst.msk [vmem:[#allocation5 + $0xe0] sm:$0xff] %vm1295_vm6, %v2405_v34  ;;  %4055 = vmatprep.mubr.f32.mxu1 %v3555_v45  ;;  %v3554_v38 = vld [vmem:[#allocation5 + $0x78] sm:$0xff] }
 0x18f   :  { %1687 = vst.msk [vmem:[#allocation5 + $0x90] sm:$0xff] %vm1680_vm7, %v1501_v43  ;;  %3189 = vrot.lane.b32.xlu0 %v10410_v20, %s9607_s20  ;;  %1135 = vrot.lane.b32.xlu1 %v10358_v2, %s9606_s28  ;;  %v10780_v2 = vld [vmem:[#allocation2 + $0x151] sm:$0xff] }
 0x190   :  { %735 = vst.msk [vmem:[#allocation2 + $0x210] sm:$0xff] %vm703_vm4, %v539_v27  ;;  %734 = vst.msk [vmem:[#allocation2 + $0x208] sm:$0xff] %vm703_vm4, %v534_v58 }
 0x191   :  { %4056 = vmatmul.mubr.f32.gmra.mrb[4].mxu1 %v3554_v38  ;;  %v2784_v39 = vpop.permute.xlu0 %2783  ;;  %v1122_v61 = vpop.permute.xlu1 %1121 }
 0x192   :  { %2969 = vst.msk [vmem:[#allocation5 + $0x98] sm:$0xff] %vm1680_vm7, %v2784_v39 }
 0x193   :  { %1305 = vst.msk [vmem:[#allocation5 + $0xd8] sm:$0xff] %vm1295_vm6, %v1122_v61  ;;  %2424 = vrot.lane.b32.xlu0 %v10780_v2, %s9606_s28  ;;  %1520 = vrot.lane.b32.xlu1 %v10356_v1, %s9605_s27 }
 0x195   :  { %v3168_v24 = vpop.permute.xlu0 %3167  ;;  %v1507_v57 = vpop.permute.xlu1 %1506 }
 0x196   :  { %3353 = vst.msk [vmem:[#allocation5 + $0x98] sm:$0xff] %vm2065_vm8, %v3168_v24 }
 0x197   :  { %1690 = vst.msk [vmem:[#allocation5 + $0xd8] sm:$0xff] %vm1680_vm7, %v1507_v57  ;;  %2803 = vrot.lane.b32.xlu0 %v10419_v23, %s9605_s27  ;;  %1141 = vrot.lane.b32.xlu1 %v10374_v5, %s9606_s28  ;;  %v10793_v63 = vld [vmem:[#allocation2 + $0x211] sm:$0xff]  ;;  %v10797_v1 = vld [vmem:[#allocation2 + $0x209] sm:$0xff] }
 0x198   :  { %3504 = vst.msk [vmem:[#allocation5 + $0x2c8] sm:$0xff] %vm703_vm4, %v10793_v63  ;;  %3503 = vst.msk [vmem:[#allocation5 + $0x2b0] sm:$0xff] %vm703_vm4, %v10797_v1  ;;  %v2160_v5 = vld [vmem:[#allocation2 + $0x208] sm:$0xff]  ;;  %v2161_v16 = vld [vmem:[#allocation2 + $0x210] sm:$0xff] }
 0x199   :  { %v2786_v28 = vpop.permute.xlu0 %2785  ;;  %v1886_v13 = vpop.permute.xlu1 %1885  ;;  %2224 = vst.msk [vmem:[#allocation5 + $0x2d8] sm:$0xff] %vm703_vm4, %v2160_v5  ;;  %2225 = vst.msk [vmem:[#allocation5 + $0x2f0] sm:$0xff] %vm703_vm4, %v2161_v16 }
 0x19a   :  { %2970 = vst.msk [vmem:[#allocation5 + $0xb0] sm:$0xff] %vm1680_vm7, %v2786_v28  ;;  %v94_v28 = vld [vmem:[%s14444_s0 + $0x188] sm:$0xff] }
 0x19b   :  { %2072 = vst.msk [vmem:[#allocation5 + $0x90] sm:$0xff] %vm2065_vm8, %v1886_v13  ;;  %3354 = vst.msk [vmem:[#allocation5 + $0xb0] sm:$0xff] %vm2065_vm8, %v3170_v50  ;;  %3187 = vrot.lane.b32.xlu0 %v10426_v29, %s9607_s20  ;;  %1526 = vrot.lane.b32.xlu1 %v10700_v35, %s9605_s27  ;;  %v91_v50 = vld [vmem:[%s14444_s0 + $0x170] sm:$0xff]  ;;  %v92_v35 = vld [vmem:[%s14444_s0 + $0x178] sm:$0xff] }
 0x19c   :  { %8954 = vmatprep.mubr.msk.f32.mxu0 %vm120_vm1, %v91_v50 }
 0x19d   :  { %v2403_v17 = vpop.permute.xlu0 %2402  ;;  %v1888_v22 = vpop.permute.xlu1 %1887  ;;  %v3558_v26 = vld [vmem:[#allocation5 + $0x98] sm:$0xff]  ;;  %8955 = vmatmul.mubr.msk.f32.gmra.mrb[46].mxu0 %vm120_vm1, %v92_v35 }
 0x19e   :  { %2586 = vst.msk [vmem:[#allocation5 + $0xc8] sm:$0xff] %vm1295_vm6, %v2403_v17  ;;  %4060 = vmatprep.mubr.f32.mxu1 %v3558_v26 }
 0x19f   :  { %2073 = vst.msk [vmem:[#allocation5 + $0xa8] sm:$0xff] %vm2065_vm8, %v1888_v22  ;;  %2805 = vrot.lane.b32.xlu0 %v10428_v31, %s9605_s27  ;;  %1905 = vrot.lane.b32.xlu1 %v10710_v49, %s9607_s20 }
 0x1a1   :  { %v3174_v33 = vpop.permute.xlu0 %3173  ;;  %v1120_v34 = vpop.permute.xlu1 %1119 }
 0x1a2   :  { %v3557_v43 = vld [vmem:[#allocation5 + $0x90] sm:$0xff]  ;;  %1304 = vst.msk [vmem:[#allocation5 + $0xc0] sm:$0xff] %vm1295_vm6, %v1120_v34 }
 0x1a3   :  { %4061 = vmatmul.mubr.f32.gmra.mrb[6].mxu1 %v3557_v43  ;;  %v3561_v45 = vld [vmem:[#allocation5 + $0xb0] sm:$0xff]  ;;  %2422 = vrot.lane.b32.xlu0 %v10417_v21, %s9606_s28 }
 0x1a4   :  { %1907 = vrot.lane.b32.xlu1 %v10392_v10, %s9607_s20  ;;  %4065 = vmatprep.mubr.f32.mxu1 %v3561_v45  ;;  %v10837_v10 = vld [vmem:[#allocation2 + $0x171] sm:$0xff] }
 0x1a5   :  { %v2409_v47 = vpop.permute.xlu0 %2408  ;;  %v1505_v49 = vpop.permute.xlu1 %1504  ;;  %v96_v45 = vld [vmem:[%s14444_s0 + $0x198] sm:$0xff] }
 0x1a6   :  { %v3560_v27 = vld [vmem:[#allocation5 + $0xa8] sm:$0xff]  ;;  %2589 = vst.msk [vmem:[#allocation5 + $0x110] sm:$0xff] %vm1295_vm6, %v2409_v47 }
 0x1a7   :  { %1689 = vst.msk [vmem:[#allocation5 + $0xc0] sm:$0xff] %vm1680_vm7, %v1505_v49  ;;  %4066 = vmatmul.mubr.f32.gmra.mrb[8].mxu1 %v3560_v27  ;;  %3193 = vrot.lane.b32.xlu0 %v10475_v56, %s9607_s20 }
 0x1a8   :  { %1139 = vrot.lane.b32.xlu1 %v10386_v8, %s9606_s28 }
 0x1a9   :  { %v2788_v40 = vpop.permute.xlu0 %2787  ;;  %v1126_v38 = vpop.permute.xlu1 %1125 }
 0x1aa   :  { %2971 = vst.msk [vmem:[#allocation5 + $0xc8] sm:$0xff] %vm1680_vm7, %v2788_v40 }
 0x1ab   :  { %1307 = vst.msk [vmem:[#allocation5 + $0x108] sm:$0xff] %vm1295_vm6, %v1126_v38  ;;  %2428 = vrot.lane.b32.xlu0 %v10837_v10, %s9606_s28 }
 0x1ac   :  { %1524 = vrot.lane.b32.xlu1 %v10384_v7, %s9605_s27 }
 0x1ad   :  { %v3172_v58 = vpop.permute.xlu0 %3171  ;;  %v1511_v39 = vpop.permute.xlu1 %1510 }
 0x1ae   :  { %3355 = vst.msk [vmem:[#allocation5 + $0xc8] sm:$0xff] %vm2065_vm8, %v3172_v58 }
 0x1af   :  { %1692 = vst.msk [vmem:[#allocation5 + $0x108] sm:$0xff] %vm1680_vm7, %v1511_v39  ;;  %2807 = vrot.lane.b32.xlu0 %v10477_v36, %s9605_s27 }
 0x1b0   :  { %1145 = vrot.lane.b32.xlu1 %v10410_v20, %s9606_s28  ;;  %v93_v20 = vld [vmem:[%s14444_s0 + $0x180] sm:$0xff] }
 0x1b1   :  { %v2790_v8 = vpop.permute.xlu0 %2789  ;;  %v1890_v61 = vpop.permute.xlu1 %1889  ;;  %8957 = vmatprep.mubr.msk.f32.mxu0 %vm120_vm1, %v93_v20 }
 0x1b2   :  { %2972 = vst.msk [vmem:[#allocation5 + $0xe0] sm:$0xff] %vm1680_vm7, %v2790_v8  ;;  %8958 = vmatmul.mubr.msk.f32.gmra.mrb[48].mxu0 %vm120_vm1, %v94_v28 }
 0x1b3   :  { %2074 = vst.msk [vmem:[#allocation5 + $0xc0] sm:$0xff] %vm2065_vm8, %v1890_v61  ;;  %3356 = vst.msk [vmem:[#allocation5 + $0xe0] sm:$0xff] %vm2065_vm8, %v3174_v33  ;;  %3191 = vrot.lane.b32.xlu0 %v10480_v48, %s9607_s20 }
 0x1b4   :  { %1530 = vrot.lane.b32.xlu1 %v10780_v2, %s9605_s27 }
 0x1b5   :  { %v2407_v7 = vpop.permute.xlu0 %2406  ;;  %v1892_v24 = vpop.permute.xlu1 %1891  ;;  %v3564_v57 = vld [vmem:[#allocation5 + $0xc8] sm:$0xff] }
 0x1b6   :  { %2588 = vst.msk [vmem:[#allocation5 + $0xf8] sm:$0xff] %vm1295_vm6, %v2407_v7  ;;  %4070 = vmatprep.mubr.f32.mxu1 %v3564_v57 }
 0x1b7   :  { %2075 = vst.msk [vmem:[#allocation5 + $0xd8] sm:$0xff] %vm2065_vm8, %v1892_v24  ;;  %2809 = vrot.lane.b32.xlu0 %v10482_v42, %s9605_s27 }
 0x1b8   :  { %1909 = vrot.lane.b32.xlu1 %v10419_v23, %s9607_s20 }
 0x1b9   :  { %v3178_v2 = vpop.permute.xlu0 %3177  ;;  %v1124_v13 = vpop.permute.xlu1 %1123 }
 0x1ba   :  { %v3563_v5 = vld [vmem:[#allocation5 + $0xc0] sm:$0xff]  ;;  %1306 = vst.msk [vmem:[#allocation5 + $0xf0] sm:$0xff] %vm1295_vm6, %v1124_v13 }
 0x1bb   :  { %4071 = vmatmul.mubr.f32.gmra.mrb[10].mxu1 %v3563_v5  ;;  %v3567_v16 = vld [vmem:[#allocation5 + $0xe0] sm:$0xff]  ;;  %2426 = vrot.lane.b32.xlu0 %v10461_v44, %s9606_s28 }
 0x1bc   :  { %1911 = vrot.lane.b32.xlu1 %v10428_v31, %s9607_s20  ;;  %4075 = vmatprep.mubr.f32.mxu1 %v3567_v16  ;;  %v97_v5 = vld [vmem:[%s14444_s0 + $0x1a0] sm:$0xff] }
 0x1bd   :  { %v2413_v23 = vpop.permute.xlu0 %2412  ;;  %v1509_v17 = vpop.permute.xlu1 %1508 }
 0x1be   :  { %v3566_v22 = vld [vmem:[#allocation5 + $0xd8] sm:$0xff]  ;;  %2591 = vst.msk [vmem:[#allocation5 + $0x140] sm:$0xff] %vm1295_vm6, %v2413_v23 }
 0x1bf   :  { %1691 = vst.msk [vmem:[#allocation5 + $0xf0] sm:$0xff] %vm1680_vm7, %v1509_v17  ;;  %4076 = vmatmul.mubr.f32.gmra.mrb[12].mxu1 %v3566_v22  ;;  %3197 = vrot.lane.b32.xlu0 %v10534_v54, %s9607_s20 }
 0x1c0   :  { %1143 = vrot.lane.b32.xlu1 %v10426_v29, %s9606_s28 }
 0x1c1   :  { %v2792_v31 = vpop.permute.xlu0 %2791  ;;  %v1130_v26 = vpop.permute.xlu1 %1129 }
 0x1c2   :  { %2973 = vst.msk [vmem:[#allocation5 + $0xf8] sm:$0xff] %vm1680_vm7, %v2792_v31 }
 0x1c3   :  { %1309 = vst.msk [vmem:[#allocation5 + $0x138] sm:$0xff] %vm1295_vm6, %v1130_v26  ;;  %2432 = vrot.lane.b32.xlu0 %v10516_v60, %s9606_s28 }
 0x1c4   :  { %1528 = vrot.lane.b32.xlu1 %v10417_v21, %s9605_s27 }
 0x1c5   :  { %v3176_v50 = vpop.permute.xlu0 %3175  ;;  %v1515_v35 = vpop.permute.xlu1 %1514 }
 0x1c6   :  { %3357 = vst.msk [vmem:[#allocation5 + $0xf8] sm:$0xff] %vm2065_vm8, %v3176_v50 }
 0x1c7   :  { %1694 = vst.msk [vmem:[#allocation5 + $0x138] sm:$0xff] %vm1680_vm7, %v1515_v35  ;;  %2811 = vrot.lane.b32.xlu0 %v10536_v59, %s9605_s27 }
 0x1c8   :  { %1149 = vrot.lane.b32.xlu1 %v10475_v56, %s9606_s28  ;;  %v95_v56 = vld [vmem:[%s14444_s0 + $0x190] sm:$0xff] }
 0x1c9   :  { %v2794_v29 = vpop.permute.xlu0 %2793  ;;  %v1894_v33 = vpop.permute.xlu1 %1893  ;;  %8960 = vmatprep.mubr.msk.f32.mxu0 %vm120_vm1, %v95_v56 }
 0x1ca   :  { %2974 = vst.msk [vmem:[#allocation5 + $0x110] sm:$0xff] %vm1680_vm7, %v2794_v29  ;;  %8961 = vmatmul.mubr.msk.f32.gmra.mrb[50].mxu0 %vm120_vm1, %v96_v45 }
 0x1cb   :  { %2076 = vst.msk [vmem:[#allocation5 + $0xf0] sm:$0xff] %vm2065_vm8, %v1894_v33  ;;  %3358 = vst.msk [vmem:[#allocation5 + $0x110] sm:$0xff] %vm2065_vm8, %v3178_v2  ;;  %3195 = vrot.lane.b32.xlu0 %v10538_v0, %s9607_s20  ;;  %8963 = vmatprep.mubr.msk.f32.mxu0 %vm120_vm1, %v97_v5 }
 0x1cc   :  { %1534 = vrot.lane.b32.xlu1 %v10837_v10, %s9605_s27 }
 0x1cd   :  { %v2411_v21 = vpop.permute.xlu0 %2410  ;;  %v1896_v34 = vpop.permute.xlu1 %1895  ;;  %v3570_v43 = vld [vmem:[#allocation5 + $0xf8] sm:$0xff] }
 0x1ce   :  { %2590 = vst.msk [vmem:[#allocation5 + $0x128] sm:$0xff] %vm1295_vm6, %v2411_v21  ;;  %4080 = vmatprep.mubr.f32.mxu1 %v3570_v43 }
 0x1cf   :  { %2077 = vst.msk [vmem:[#allocation5 + $0x108] sm:$0xff] %vm2065_vm8, %v1896_v34  ;;  %2813 = vrot.lane.b32.xlu0 %v10541_v55, %s9605_s27 }
 0x1d0   :  { %1913 = vrot.lane.b32.xlu1 %v10477_v36, %s9607_s20 }
 0x1d1   :  { %v3182_v47 = vpop.permute.xlu0 %3181  ;;  %v1128_v49 = vpop.permute.xlu1 %1127 }
 0x1d2   :  { %v3569_v27 = vld [vmem:[#allocation5 + $0xf0] sm:$0xff]  ;;  %1308 = vst.msk [vmem:[#allocation5 + $0x120] sm:$0xff] %vm1295_vm6, %v1128_v49 }
 0x1d3   :  { %4081 = vmatmul.mubr.f32.gmra.mrb[14].mxu1 %v3569_v27  ;;  %v3573_v40 = vld [vmem:[#allocation5 + $0x110] sm:$0xff]  ;;  %2430 = vrot.lane.b32.xlu0 %v10520_v62, %s9606_s28 }
 0x1d4   :  { %1915 = vrot.lane.b32.xlu1 %v10482_v42, %s9607_s20  ;;  %4085 = vmatprep.mubr.f32.mxu1 %v3573_v40 }
 0x1d5   :  { %v2417_v38 = vpop.permute.xlu0 %2416  ;;  %v1513_v36 = vpop.permute.xlu1 %1512 }
 0x1d6   :  { %v3572_v10 = vld [vmem:[#allocation5 + $0x108] sm:$0xff]  ;;  %2593 = vst.msk [vmem:[#allocation5 + $0x170] sm:$0xff] %vm1295_vm6, %v2417_v38 }
 0x1d7   :  { %1693 = vst.msk [vmem:[#allocation5 + $0x120] sm:$0xff] %vm1680_vm7, %v1513_v36  ;;  %4086 = vmatmul.mubr.f32.gmra.mrb[16].mxu1 %v3572_v10  ;;  %3201 = vrot.lane.b32.xlu0 %v10597_v18, %s9607_s20 }
 0x1d8   :  { %1147 = vrot.lane.b32.xlu1 %v10480_v48, %s9606_s28  ;;  %v8935_v48 = vpop.f32.mrb[32].mxu0 }
 0x1d9   :  { %v2796_v58 = vpop.permute.xlu0 %2795  ;;  %v1134_v39 = vpop.permute.xlu1 %1133  ;;  %v549_v24 = vadd.f32 %v10773_v3, %v8935_v48 }
 0x1da   :  { %2975 = vst.msk [vmem:[#allocation5 + $0x128] sm:$0xff] %vm1680_vm7, %v2796_v58  ;;  %v100_v58 = vld [vmem:[%s14444_s0 + $0x1b8] sm:$0xff] }
 0x1db   :  { %1311 = vst.msk [vmem:[#allocation5 + $0x168] sm:$0xff] %vm1295_vm6, %v1134_v39  ;;  %2436 = vrot.lane.b32.xlu0 %v10579_v12, %s9606_s28 }
 0x1dc   :  { %1532 = vrot.lane.b32.xlu1 %v10461_v44, %s9605_s27  ;;  %v543_v44 = vpop.f32.mrb[33].mxu0  ;;  %737 = vst.msk [vmem:[#allocation2 + $0x270] sm:$0xff] %vm703_vm4, %v549_v24 }
 0x1dd   :  { %v3180_v42 = vpop.permute.xlu0 %3179  ;;  %v1519_v8 = vpop.permute.xlu1 %1518 }
 0x1de   :  { %3359 = vst.msk [vmem:[#allocation5 + $0x128] sm:$0xff] %vm2065_vm8, %v3180_v42  ;;  %v8938_v57 = vpop.f32.mrb[34].mxu0 }
 0x1df   :  { %1696 = vst.msk [vmem:[#allocation5 + $0x168] sm:$0xff] %vm1680_vm7, %v1519_v8  ;;  %2815 = vrot.lane.b32.xlu0 %v10599_v19, %s9605_s27  ;;  %v559_v13 = vadd.f32 %v10773_v3, %v8938_v57  ;;  %v553_v16 = vpop.f32.mrb[35].mxu0 }
 0x1e0   :  { %1153 = vrot.lane.b32.xlu1 %v10534_v54, %s9606_s28  ;;  %v544_v54 = vadd.f32 %v10773_v3, %v543_v44  ;;  %v554_v23 = vadd.f32 %v10773_v3, %v553_v16 }
 0x1e1   :  { %v2798_v61 = vpop.permute.xlu0 %2797  ;;  %v1898_v7 = vpop.permute.xlu1 %1897  ;;  %739 = vst.msk [vmem:[#allocation2 + $0x290] sm:$0xff] %vm703_vm4, %v559_v13 }
 0x1e2   :  { %2976 = vst.msk [vmem:[#allocation5 + $0x140] sm:$0xff] %vm1680_vm7, %v2798_v61 }
 0x1e3   :  { %2078 = vst.msk [vmem:[#allocation5 + $0x120] sm:$0xff] %vm2065_vm8, %v1898_v7  ;;  %3360 = vst.msk [vmem:[#allocation5 + $0x140] sm:$0xff] %vm2065_vm8, %v3182_v47  ;;  %3199 = vrot.lane.b32.xlu0 %v10601_v46, %s9607_s20  ;;  %v10985_v21 = vld [vmem:[#allocation2 + $0x270] sm:$0xff] }
 0x1e4   :  { %1538 = vrot.lane.b32.xlu1 %v10516_v60, %s9605_s27  ;;  %736 = vst.msk [vmem:[#allocation2 + $0x268] sm:$0xff] %vm703_vm4, %v544_v54  ;;  %v98_v60 = vld [vmem:[%s14444_s0 + $0x1a8] sm:$0xff]  ;;  %738 = vst.msk [vmem:[#allocation2 + $0x288] sm:$0xff] %vm703_vm4, %v554_v23 }
 0x1e5   :  { %v2415_v20 = vpop.permute.xlu0 %2414  ;;  %v1900_v28 = vpop.permute.xlu1 %1899  ;;  %v3576_v2 = vld [vmem:[#allocation5 + $0x128] sm:$0xff]  ;;  %8964 = vmatmul.mubr.msk.f32.gmra.mrb[52].mxu0 %vm120_vm1, %v98_v60  ;;  %2227 = vst.msk [vmem:[#allocation5 + $0x320] sm:$0xff] %vm703_vm4, %v10985_v21 }
 0x1e6   :  { %2592 = vst.msk [vmem:[#allocation5 + $0x158] sm:$0xff] %vm1295_vm6, %v2415_v20  ;;  %4090 = vmatprep.mubr.f32.mxu1 %v3576_v2 }
 0x1e7   :  { %2079 = vst.msk [vmem:[#allocation5 + $0x138] sm:$0xff] %vm2065_vm8, %v1900_v28  ;;  %2817 = vrot.lane.b32.xlu0 %v10604_v32, %s9605_s27 }
 0x1e8   :  { %1917 = vrot.lane.b32.xlu1 %v10536_v59, %s9607_s20  ;;  %v10983_v33 = vld [vmem:[#allocation2 + $0x291] sm:$0xff] }
 0x1e9   :  { %v3186_v17 = vpop.permute.xlu0 %3185  ;;  %v1132_v22 = vpop.permute.xlu1 %1131  ;;  %3508 = vst.msk [vmem:[#allocation5 + $0x328] sm:$0xff] %vm703_vm4, %v10983_v33  ;;  %v2165_v27 = vld [vmem:[#allocation2 + $0x290] sm:$0xff] }
 0x1ea   :  { %v3575_v31 = vld [vmem:[#allocation5 + $0x120] sm:$0xff]  ;;  %1310 = vst.msk [vmem:[#allocation5 + $0x150] sm:$0xff] %vm1295_vm6, %v1132_v22 }
 0x1eb   :  { %4091 = vmatmul.mubr.f32.gmra.mrb[18].mxu1 %v3575_v31  ;;  %v3579_v26 = vld [vmem:[#allocation5 + $0x140] sm:$0xff]  ;;  %2434 = vrot.lane.b32.xlu0 %v10583_v14, %s9606_s28  ;;  %v10979_v29 = vld [vmem:[#allocation2 + $0x268] sm:$0xff]  ;;  %2229 = vst.msk [vmem:[#allocation5 + $0x350] sm:$0xff] %vm703_vm4, %v2165_v27 }
 0x1ec   :  { %1919 = vrot.lane.b32.xlu1 %v10541_v55, %s9607_s20  ;;  %4095 = vmatprep.mubr.f32.mxu1 %v3579_v26  ;;  %2226 = vst.msk [vmem:[#allocation5 + $0x308] sm:$0xff] %vm703_vm4, %v10979_v29  ;;  %v10997_v55 = vld [vmem:[#allocation2 + $0x289] sm:$0xff]  ;;  %v8941_v10 = vpop.f32.mrb[36].mxu0 }
 0x1ed   :  { %v2421_v59 = vpop.permute.xlu0 %2420  ;;  %v1517_v50 = vpop.permute.xlu1 %1516  ;;  %3507 = vst.msk [vmem:[#allocation5 + $0x310] sm:$0xff] %vm703_vm4, %v10997_v55  ;;  %v881_v56 = vld [vmem:[#allocation2 + $0x267] sm:$0xff]  ;;  %v884_v38 = vld [vmem:[#allocation2 + $0x28f] sm:$0xff]  ;;  %v569_v48 = vadd.f32 %v10773_v3, %v8941_v10 }
 0x1ee   :  { %v3578_v35 = vld [vmem:[#allocation5 + $0x138] sm:$0xff]  ;;  %2595 = vst.msk [vmem:[#allocation5 + $0x1a0] sm:$0xff] %vm1295_vm6, %v2421_v59  ;;  %v2164_v49 = vld [vmem:[#allocation2 + $0x288] sm:$0xff]  ;;  %v563_v61 = vpop.f32.mrb[37].mxu0 }
 0x1ef   :  { %1695 = vst.msk [vmem:[#allocation5 + $0x150] sm:$0xff] %vm1680_vm7, %v1517_v50  ;;  %4096 = vmatmul.mubr.f32.gmra.mrb[20].mxu1 %v3578_v35  ;;  %3205 = vrot.lane.b32.xlu0 %v10672_v4, %s9607_s20  ;;  %v883_v40 = vld [vmem:[#allocation2 + $0x287] sm:$0xff]  ;;  %v564_v7 = vadd.f32 %v10773_v3, %v563_v61  ;;  %v11072_v31 = vld [vmem:[#allocation2 + $0x1ef] sm:$0xff] }
 0x1f0   :  { %1151 = vrot.lane.b32.xlu1 %v10538_v0, %s9606_s28  ;;  %945 = vst.msk [vmem:[#allocation5 + $0x330] sm:$0xff] %vm703_vm4, %v881_v56  ;;  %v882_v0 = vld [vmem:[#allocation2 + $0x26f] sm:$0xff]  ;;  %2228 = vst.msk [vmem:[#allocation5 + $0x338] sm:$0xff] %vm703_vm4, %v2164_v49  ;;  %v11105_v49 = vld [vmem:[#allocation2 + $0x207] sm:$0xff] }
 0x1f1   :  { %v2800_v34 = vpop.permute.xlu0 %2799  ;;  %v1138_v43 = vpop.permute.xlu1 %1137  ;;  %946 = vst.msk [vmem:[#allocation5 + $0x348] sm:$0xff] %vm703_vm4, %v882_v0  ;;  %947 = vst.msk [vmem:[#allocation5 + $0x360] sm:$0xff] %vm703_vm4, %v883_v40  ;;  %v102_v35 = vld [vmem:[%s14444_s0 + $0x1c8] sm:$0xff] }
 0x1f2   :  { %2977 = vst.msk [vmem:[#allocation5 + $0x158] sm:$0xff] %vm1680_vm7, %v2800_v34 }
 0x1f3   :  { %1313 = vst.msk [vmem:[#allocation5 + $0x198] sm:$0xff] %vm1295_vm6, %v1138_v43  ;;  %2440 = vrot.lane.b32.xlu0 %v10652_v53, %s9606_s28 }
 0x1f4   :  { %1536 = vrot.lane.b32.xlu1 %v10520_v62, %s9605_s27  ;;  %948 = vst.msk [vmem:[#allocation5 + $0x378] sm:$0xff] %vm703_vm4, %v884_v38  ;;  %741 = vst.msk [vmem:[#allocation2 + $0x2b0] sm:$0xff] %vm703_vm4, %v569_v48 }
 0x1f5   :  { %v3184_v45 = vpop.permute.xlu0 %3183  ;;  %v1523_v47 = vpop.permute.xlu1 %1522  ;;  %740 = vst.msk [vmem:[#allocation2 + $0x2a8] sm:$0xff] %vm703_vm4, %v564_v7 }
 0x1f6   :  { %3361 = vst.msk [vmem:[#allocation5 + $0x158] sm:$0xff] %vm2065_vm8, %v3184_v45 }
 0x1f7   :  { %1698 = vst.msk [vmem:[#allocation5 + $0x198] sm:$0xff] %vm1680_vm7, %v1523_v47  ;;  %2819 = vrot.lane.b32.xlu0 %v10674_v6, %s9605_s27 }
 0x1f8   :  { %1921 = vrot.lane.b32.xlu1 %v10599_v19, %s9607_s20  ;;  %v99_v19 = vld [vmem:[%s14444_s0 + $0x1b0] sm:$0xff] }
 0x1f9   :  { %v2802_v62 = vpop.permute.xlu0 %2801  ;;  %v1902_v36 = vpop.permute.xlu1 %1901  ;;  %8966 = vmatprep.mubr.msk.f32.mxu0 %vm120_vm1, %v99_v19  ;;  %v3055_v19 = vld [vmem:[#allocation2 + $0x208] sm:$0xff] }
 0x1fa   :  { %2978 = vst.msk [vmem:[#allocation5 + $0x170] sm:$0xff] %vm1680_vm7, %v2802_v62  ;;  %8967 = vmatmul.mubr.msk.f32.gmra.mrb[54].mxu0 %vm120_vm1, %v100_v58 }
 0x1fb   :  { %2080 = vst.msk [vmem:[#allocation5 + $0x150] sm:$0xff] %vm2065_vm8, %v1902_v36  ;;  %3362 = vst.msk [vmem:[#allocation5 + $0x170] sm:$0xff] %vm2065_vm8, %v3186_v17  ;;  %3203 = vrot.lane.b32.xlu0 %v10676_v11, %s9607_s20  ;;  %v11052_v13 = vld [vmem:[#allocation2 + $0x2b1] sm:$0xff] }
 0x1fc   :  { %1923 = vrot.lane.b32.xlu1 %v10604_v32, %s9607_s20  ;;  %v2668_v32 = vld [vmem:[#allocation2 + $0x1cf] sm:$0xff]  ;;  %3510 = vst.msk [vmem:[#allocation5 + $0x358] sm:$0xff] %vm703_vm4, %v11052_v13  ;;  %v885_v22 = vld [vmem:[#allocation2 + $0x2a7] sm:$0xff] }
 0x1fd   :  { %v2419_v39 = vpop.permute.xlu0 %2418  ;;  %v1904_v42 = vpop.permute.xlu1 %1903  ;;  %v3582_v8 = vld [vmem:[#allocation5 + $0x158] sm:$0xff]  ;;  %v2166_v23 = vld [vmem:[#allocation2 + $0x2a8] sm:$0xff]  ;;  %v2167_v17 = vld [vmem:[#allocation2 + $0x2b0] sm:$0xff]  ;;  %949 = vst.msk [vmem:[#allocation5 + $0x390] sm:$0xff] %vm703_vm4, %v885_v22 }
 0x1fe   :  { %2594 = vst.msk [vmem:[#allocation5 + $0x188] sm:$0xff] %vm1295_vm6, %v2419_v39  ;;  %4100 = vmatprep.mubr.f32.mxu1 %v3582_v8  ;;  %v886_v26 = vld [vmem:[#allocation2 + $0x2af] sm:$0xff] }
 0x1ff   :  { %2081 = vst.msk [vmem:[#allocation5 + $0x168] sm:$0xff] %vm2065_vm8, %v1904_v42  ;;  %2821 = vrot.lane.b32.xlu0 %v2668_v32, %s9605_s27 }
 0x200   :  { %1155 = vrot.lane.b32.xlu1 %v10601_v46, %s9606_s28  ;;  %v11048_v46 = vld [vmem:[#allocation2 + $0x1e7] sm:$0xff]  ;;  %2230 = vst.msk [vmem:[#allocation5 + $0x368] sm:$0xff] %vm703_vm4, %v2166_v23  ;;  %2231 = vst.msk [vmem:[#allocation5 + $0x380] sm:$0xff] %vm703_vm4, %v2167_v17 }
 0x201   :  { %v3190_v24 = vpop.permute.xlu0 %3189  ;;  %v1136_v44 = vpop.permute.xlu1 %1135  ;;  %950 = vst.msk [vmem:[#allocation5 + $0x3a8] sm:$0xff] %vm703_vm4, %v886_v26  ;;  %v11172_v26 = vld [vmem:[#allocation2 + $0x47] sm:$0xff] }
 0x202   :  { %v3581_v54 = vld [vmem:[#allocation5 + $0x150] sm:$0xff]  ;;  %1312 = vst.msk [vmem:[#allocation5 + $0x180] sm:$0xff] %vm1295_vm6, %v1136_v44 }
 0x203   :  { %4101 = vmatmul.mubr.f32.gmra.mrb[22].mxu1 %v3581_v54  ;;  %v3585_v57 = vld [vmem:[#allocation5 + $0x170] sm:$0xff]  ;;  %2438 = vrot.lane.b32.xlu0 %v10658_v37, %s9606_s28 }
 0x204   :  { %1540 = vrot.lane.b32.xlu1 %v10583_v14, %s9605_s27  ;;  %4105 = vmatprep.mubr.f32.mxu1 %v3585_v57  ;;  %v11060_v14 = vld [vmem:[#allocation2 + $0x2a9] sm:$0xff] }
 0x205   :  { %v2425_v20 = vpop.permute.xlu0 %2424  ;;  %v1521_v28 = vpop.permute.xlu1 %1520  ;;  %3509 = vst.msk [vmem:[#allocation5 + $0x340] sm:$0xff] %vm703_vm4, %v11060_v14  ;;  %v11135_v44 = vld [vmem:[#allocation2 + $0x20f] sm:$0xff] }
 0x206   :  { %v3584_v2 = vld [vmem:[#allocation5 + $0x168] sm:$0xff]  ;;  %2597 = vst.msk [vmem:[#allocation5 + $0x1d0] sm:$0xff] %vm1295_vm6, %v2425_v20  ;;  %v103_v57 = vld [vmem:[%s14444_s0 + $0x1d0] sm:$0xff] }
 0x207   :  { %1697 = vst.msk [vmem:[#allocation5 + $0x180] sm:$0xff] %vm1680_vm7, %v1521_v28  ;;  %4106 = vmatmul.mubr.f32.gmra.mrb[24].mxu1 %v3584_v2  ;;  %2823 = vrot.lane.b32.xlu0 %v11048_v46, %s9605_s27  ;;  %v11137_v54 = vld [vmem:[#allocation2 + $0x29] sm:$0xff] }
 0x208   :  { %1925 = vrot.lane.b32.xlu1 %v10674_v6, %s9607_s20  ;;  %v975_v20 = vld [vmem:[#allocation2 + $0x8] sm:$0xff] }
 0x209   :  { %v2804_v5 = vpop.permute.xlu0 %2803  ;;  %v1142_v60 = vpop.permute.xlu1 %1141 }
 0x20a   :  { %2979 = vst.msk [vmem:[#allocation5 + $0x188] sm:$0xff] %vm1680_vm7, %v2804_v5  ;;  %v105_v5 = vld [vmem:[%s14444_s0 + $0x1e0] sm:$0xff] }
 0x20b   :  { %1315 = vst.msk [vmem:[#allocation5 + $0x1c8] sm:$0xff] %vm1295_vm6, %v1142_v60  ;;  %3207 = vrot.lane.b32.xlu0 %v10747_v9, %s9607_s20  ;;  %v8944_v50 = vpop.f32.mrb[38].mxu0  ;;  %v106_v60 = vld [vmem:[%s14444_s0 + $0x1e8] sm:$0xff] }
 0x20c   :  { %1157 = vrot.lane.b32.xlu1 %v10597_v18, %s9606_s28  ;;  %v579_v0 = vadd.f32 %v10773_v3, %v8944_v50  ;;  %v573_v45 = vpop.f32.mrb[39].mxu0  ;;  %v107_v50 = vld [vmem:[%s14444_s0 + $0x1f0] sm:$0xff] }
 0x20d   :  { %v3188_v6 = vpop.permute.xlu0 %3187  ;;  %v1527_v16 = vpop.permute.xlu1 %1526  ;;  %v574_v47 = vadd.f32 %v10773_v3, %v573_v45  ;;  %v848_v45 = vld [vmem:[#allocation2 + $0xf] sm:$0xff] }
 0x20e   :  { %3363 = vst.msk [vmem:[#allocation5 + $0x188] sm:$0xff] %vm2065_vm8, %v3188_v6 }
 0x20f   :  { %1700 = vst.msk [vmem:[#allocation5 + $0x1c8] sm:$0xff] %vm1680_vm7, %v1527_v16  ;;  %2825 = vrot.lane.b32.xlu0 %v11072_v31, %s9605_s27 }
 0x210   :  { %1542 = vrot.lane.b32.xlu1 %v10579_v12, %s9605_s27  ;;  %v101_v12 = vld [vmem:[%s14444_s0 + $0x1c0] sm:$0xff]  ;;  %743 = vst.msk [vmem:[#allocation2 + $0x2d0] sm:$0xff] %vm703_vm4, %v579_v0  ;;  %742 = vst.msk [vmem:[#allocation2 + $0x2c8] sm:$0xff] %vm703_vm4, %v574_v47 }
 0x211   :  { %v2806_v18 = vpop.permute.xlu0 %2805  ;;  %v1906_v59 = vpop.permute.xlu1 %1905  ;;  %8969 = vmatprep.mubr.msk.f32.mxu0 %vm120_vm1, %v101_v12  ;;  %v108_v12 = vld [vmem:[%s14444_s0 + $0x1f8] sm:$0xff]  ;;  %912 = vst.msk [vmem:[#allocation5 + $0x18] sm:$0xff] %vm703_vm4, %v848_v45 }
 0x212   :  { %2980 = vst.msk [vmem:[#allocation5 + $0x1a0] sm:$0xff] %vm1680_vm7, %v2806_v18  ;;  %8970 = vmatmul.mubr.msk.f32.gmra.mrb[56].mxu0 %vm120_vm1, %v102_v35  ;;  %v1360_v35 = vld [vmem:[#allocation2 + $0x9] sm:$0xff] }
 0x213   :  { %2082 = vst.msk [vmem:[#allocation5 + $0x180] sm:$0xff] %vm2065_vm8, %v1906_v59  ;;  %3364 = vst.msk [vmem:[#allocation5 + $0x1a0] sm:$0xff] %vm2065_vm8, %v3190_v24  ;;  %3209 = vrot.lane.b32.xlu0 %v10750_v15, %s9607_s20  ;;  %8972 = vmatprep.mubr.msk.f32.mxu0 %vm120_vm1, %v103_v57 }
 0x214   :  { %1927 = vrot.lane.b32.xlu1 %v2668_v32, %s9607_s20 }
 0x215   :  { %v2423_v34 = vpop.permute.xlu0 %2422  ;;  %v3588_v56 = vld [vmem:[#allocation5 + $0x188] sm:$0xff] }
 0x216   :  { %v1908_v43 = vpop.permute.xlu1 %1907  ;;  %2596 = vst.msk [vmem:[#allocation5 + $0x1b8] sm:$0xff] %vm1295_vm6, %v2423_v34  ;;  %4110 = vmatprep.mubr.f32.mxu1 %v3588_v56 }
 0x217   :  { %2083 = vst.msk [vmem:[#allocation5 + $0x198] sm:$0xff] %vm2065_vm8, %v1908_v43  ;;  %2442 = vrot.lane.b32.xlu0 %v10733_v52, %s9606_s28  ;;  %v11115_v58 = vld [vmem:[#allocation2 + $0x2d1] sm:$0xff]  ;;  %v11122_v39 = vld [vmem:[#allocation2 + $0x2c9] sm:$0xff] }
 0x218   :  { %1159 = vrot.lane.b32.xlu1 %v10676_v11, %s9606_s28  ;;  %3512 = vst.msk [vmem:[#allocation5 + $0x388] sm:$0xff] %vm703_vm4, %v11115_v58  ;;  %3511 = vst.msk [vmem:[#allocation5 + $0x370] sm:$0xff] %vm703_vm4, %v11122_v39  ;;  %v2168_v61 = vld [vmem:[#allocation2 + $0x2c8] sm:$0xff]  ;;  %v2169_v7 = vld [vmem:[#allocation2 + $0x2d0] sm:$0xff] }
 0x219   :  { %v3194_v27 = vpop.permute.xlu0 %3193  ;;  %v887_v24 = vld [vmem:[#allocation2 + $0x2c7] sm:$0xff]  ;;  %2232 = vst.msk [vmem:[#allocation5 + $0x398] sm:$0xff] %vm703_vm4, %v2168_v61  ;;  %2233 = vst.msk [vmem:[#allocation5 + $0x3b0] sm:$0xff] %vm703_vm4, %v2169_v7  ;;  %v2259_v61 = vld [vmem:[#allocation2 + $0x31] sm:$0xff] }
 0x21a   :  { %v1140_v40 = vpop.permute.xlu1 %1139  ;;  %v3587_v38 = vld [vmem:[#allocation5 + $0x180] sm:$0xff]  ;;  %951 = vst.msk [vmem:[#allocation5 + $0x3c0] sm:$0xff] %vm703_vm4, %v887_v24 }
 0x21b   :  { %1314 = vst.msk [vmem:[#allocation5 + $0x1b0] sm:$0xff] %vm1295_vm6, %v1140_v40  ;;  %4111 = vmatmul.mubr.f32.gmra.mrb[26].mxu1 %v3587_v38  ;;  %v3591_v62 = vld [vmem:[#allocation5 + $0x1a0] sm:$0xff]  ;;  %2827 = vrot.lane.b32.xlu0 %v11105_v49, %s9605_s27  ;;  %v3027_v38 = vld [vmem:[#allocation2 + $0x48] sm:$0xff] }
 0x21c   :  { %1544 = vrot.lane.b32.xlu1 %v10658_v37, %s9605_s27  ;;  %4115 = vmatprep.mubr.f32.mxu1 %v3591_v62  ;;  %v847_v37 = vld [vmem:[#allocation2 + $0x7] sm:$0xff] }
 0x21d   :  { %v2429_v11 = vpop.permute.xlu0 %2428  ;;  %911 = vst.msk [vmem:[#allocation5] sm:$0xff] %vm703_vm4, %v847_v37  ;;  %v1745_v62 = vld [vmem:[#allocation2 + $0x27] sm:$0xff] }
 0x21e   :  { %v1525_v36 = vpop.permute.xlu1 %1524  ;;  %v3590_v10 = vld [vmem:[#allocation5 + $0x198] sm:$0xff]  ;;  %2599 = vst.msk [vmem:[#allocation5 + $0x200] sm:$0xff] %vm1295_vm6, %v2429_v11 }
 0x21f   :  { %1699 = vst.msk [vmem:[#allocation5 + $0x1b0] sm:$0xff] %vm1680_vm7, %v1525_v36  ;;  %4116 = vmatmul.mubr.f32.gmra.mrb[28].mxu1 %v3590_v10  ;;  %3211 = vrot.lane.b32.xlu0 %v3055_v19, %s9607_s20  ;;  %v2673_v19 = vld [vmem:[#allocation2 + $0x227] sm:$0xff] }
 0x220   :  { %1929 = vrot.lane.b32.xlu1 %v11048_v46, %s9607_s20  ;;  %v104_v46 = vld [vmem:[%s14444_s0 + $0x1d8] sm:$0xff] }
 0x221   :  { %v2808_v42 = vpop.permute.xlu0 %2807  ;;  %8973 = vmatmul.mubr.msk.f32.gmra.mrb[58].mxu0 %vm120_vm1, %v104_v46 }
 0x222   :  { %v1146_v8 = vpop.permute.xlu1 %1145  ;;  %2981 = vst.msk [vmem:[#allocation5 + $0x1b8] sm:$0xff] %vm1680_vm7, %v2808_v42  ;;  %8975 = vmatprep.mubr.msk.f32.mxu0 %vm120_vm1, %v105_v5  ;;  %v2644_v5 = vld [vmem:[#allocation2 + $0x4f] sm:$0xff] }
 0x223   :  { %1317 = vst.msk [vmem:[#allocation5 + $0x1f8] sm:$0xff] %vm1295_vm6, %v1146_v8  ;;  %2444 = vrot.lane.b32.xlu0 %v10727_v51, %s9606_s28  ;;  %v8947_v6 = vpop.f32.mrb[40].mxu0 }
 0x224   :  { %1161 = vrot.lane.b32.xlu1 %v10672_v4, %s9606_s28  ;;  %v888_v4 = vld [vmem:[#allocation2 + $0x2cf] sm:$0xff]  ;;  %v589_v22 = vadd.f32 %v10773_v3, %v8947_v6  ;;  %v583_v18 = vpop.f32.mrb[41].mxu0 }
 0x225   :  { %v3192_v48 = vpop.permute.xlu0 %3191  ;;  %952 = vst.msk [vmem:[#allocation5 + $0x3d8] sm:$0xff] %vm703_vm4, %v888_v4  ;;  %8976 = vmatmul.mubr.msk.f32.gmra.mrb[60].mxu0 %vm120_vm1, %v106_v60  ;;  %v584_v59 = vadd.f32 %v10773_v3, %v583_v18  ;;  %v3057_v4 = vld [vmem:[#allocation2 + $0x228] sm:$0xff]  ;;  %v1361_v6 = vld [vmem:[#allocation2 + $0x11] sm:$0xff] }
 0x226   :  { %v1531_v32 = vpop.permute.xlu1 %1530  ;;  %3365 = vst.msk [vmem:[#allocation5 + $0x1b8] sm:$0xff] %vm2065_vm8, %v3192_v48  ;;  %8978 = vmatprep.mubr.msk.f32.mxu0 %vm120_vm1, %v107_v50  ;;  %v1746_v50 = vld [vmem:[#allocation2 + $0x2f] sm:$0xff] }
 0x227   :  { %1702 = vst.msk [vmem:[#allocation5 + $0x1f8] sm:$0xff] %vm1680_vm7, %v1531_v32  ;;  %2386 = vrot.lane.b32.xlu0 %v11137_v54, %s9606_s28 }
 0x228   :  { %2829 = vrot.lane.b32.xlu1 %v11135_v44, %s9605_s27  ;;  %745 = vst.msk [vmem:[#allocation2 + $0x2f0] sm:$0xff] %vm703_vm4, %v589_v22  ;;  %744 = vst.msk [vmem:[#allocation2 + $0x2e8] sm:$0xff] %vm703_vm4, %v584_v59 }
 0x229   :  { %v2810_v28 = vpop.permute.xlu0 %2809  ;;  %8979 = vmatmul.mubr.msk.f32.gmra.mrb[62].mxu0 %vm120_vm1, %v108_v12  ;;  %vm7350_vm1 = vcmask 1047559  }
 0x22a   :  { %v1910_v2 = vpop.permute.xlu1 %1909  ;;  %2982 = vst.msk [vmem:[#allocation5 + $0x1d0] sm:$0xff] %vm1680_vm7, %v2810_v28 }
 0x22b   :  { %2084 = vst.msk [vmem:[#allocation5 + $0x1b0] sm:$0xff] %vm2065_vm8, %v1910_v2  ;;  %3366 = vst.msk [vmem:[#allocation5 + $0x1d0] sm:$0xff] %vm2065_vm8, %v3194_v27  ;;  %1103 = vrot.lane.b32.xlu0 %v975_v20, %s9606_s28 }
 0x22c   :  { %1546 = vrot.lane.b32.xlu1 %v10652_v53, %s9605_s27  ;;  %v3056_v53 = vld [vmem:[#allocation2 + $0x210] sm:$0xff] }
 0x22d   :  { %v2427_v16 = vpop.permute.xlu0 %2426  ;;  %v3594_v17 = vld [vmem:[#allocation5 + $0x1b8] sm:$0xff] }
 0x22e   :  { %v1912_v23 = vpop.permute.xlu1 %1911  ;;  %2598 = vst.msk [vmem:[#allocation5 + $0x1e8] sm:$0xff] %vm1295_vm6, %v2427_v16  ;;  %4120 = vmatprep.mubr.f32.mxu1 %v3594_v17 }
 0x22f   :  { %2085 = vst.msk [vmem:[#allocation5 + $0x1c8] sm:$0xff] %vm2065_vm8, %v1912_v23  ;;  %2771 = vrot.lane.b32.xlu0 %v11172_v26, %s9605_s27  ;;  %v11195_v11 = vld [vmem:[#allocation2 + $0x2f1] sm:$0xff]  ;;  %v2170_v8 = vld [vmem:[#allocation2 + $0x2e8] sm:$0xff] }
 0x230   :  { %3213 = vrot.lane.b32.xlu1 %v3056_v53, %s9607_s20  ;;  %3514 = vst.msk [vmem:[#allocation5 + $0x3b8] sm:$0xff] %vm703_vm4, %v11195_v11  ;;  %v2171_v48 = vld [vmem:[#allocation2 + $0x2f0] sm:$0xff]  ;;  %v889_v32 = vld [vmem:[#allocation2 + $0x2e7] sm:$0xff]  ;;  %2234 = vst.msk [vmem:[#allocation5 + $0x3c8] sm:$0xff] %vm703_vm4, %v2170_v8 }
 0x231   :  { %v3198_v34 = vpop.permute.xlu0 %3197  ;;  %2235 = vst.msk [vmem:[#allocation5 + $0x3e0] sm:$0xff] %vm703_vm4, %v2171_v48  ;;  %953 = vst.msk [vmem:[#allocation5 + $0x3f0] sm:$0xff] %vm703_vm4, %v889_v32  ;;  %v11275_v48 = vld [vmem:[%s14446_s2] ss:$0 sm:$0xff] }
 0x232   :  { %v1144_v43 = vpop.permute.xlu1 %1143  ;;  %v3593_v56 = vld [vmem:[#allocation5 + $0x1b0] sm:$0xff] }
 0x233   :  { %1316 = vst.msk [vmem:[#allocation5 + $0x1e0] sm:$0xff] %vm1295_vm6, %v1144_v43  ;;  %4121 = vmatmul.mubr.f32.gmra.mrb[30].mxu1 %v3593_v56  ;;  %v3597_v0 = vld [vmem:[#allocation5 + $0x1d0] sm:$0xff]  ;;  %1488 = vrot.lane.b32.xlu0 %v1360_v35, %s9605_s27 }
 0x234   :  { %1931 = vrot.lane.b32.xlu1 %v11072_v31, %s9607_s20  ;;  %4125 = vmatprep.mubr.f32.mxu1 %v3597_v0  ;;  %v11201_v31 = vld [vmem:[#allocation2 + $0x2e9] sm:$0xff] }
 0x235   :  { %v2433_v47 = vpop.permute.xlu0 %2432  ;;  %3513 = vst.msk [vmem:[#allocation5 + $0x3a0] sm:$0xff] %vm703_vm4, %v11201_v31  ;;  %v2674_v43 = vld [vmem:[#allocation2 + $0x22f] sm:$0xff] }
 0x236   :  { %v1529_v27 = vpop.permute.xlu1 %1528  ;;  %v3596_v40 = vld [vmem:[#allocation5 + $0x1c8] sm:$0xff]  ;;  %2601 = vst.msk [vmem:[#allocation5 + $0x230] sm:$0xff] %vm1295_vm6, %v2433_v47 }
 0x237   :  { %1701 = vst.msk [vmem:[#allocation5 + $0x1e0] sm:$0xff] %vm1680_vm7, %v1529_v27  ;;  %4126 = vmatmul.mubr.f32.gmra.mrb[32].mxu1 %v3596_v40  ;;  %3155 = vrot.lane.b32.xlu0 %v3027_v38, %s9607_s20  ;;  %v2260_v40 = vld [vmem:[#allocation2 + $0x49] sm:$0xff] }
 0x238   :  { %1873 = vrot.lane.b32.xlu1 %v1745_v62, %s9607_s20 }
 0x239   :  { %v2812_v36 = vpop.permute.xlu0 %2811 }
 0x23a   :  { %v1150_v10 = vpop.permute.xlu1 %1149  ;;  %2983 = vst.msk [vmem:[#allocation5 + $0x1e8] sm:$0xff] %vm1680_vm7, %v2812_v36  ;;  %v3058_v36 = vld [vmem:[#allocation2 + $0x230] sm:$0xff] }
 0x23b   :  { %1319 = vst.msk [vmem:[#allocation5 + $0x228] sm:$0xff] %vm1295_vm6, %v1150_v10  ;;  %2446 = vrot.lane.b32.xlu0 %v10797_v1, %s9606_s28  ;;  %v890_v1 = vld [vmem:[#allocation2 + $0x2ef] sm:$0xff] }
 0x23c   :  { %1163 = vrot.lane.b32.xlu1 %v10747_v9, %s9606_s28  ;;  %954 = vst.msk [vmem:[#allocation5 + $0x408] sm:$0xff] %vm703_vm4, %v890_v1  ;;  %v976_v9 = vld [vmem:[#allocation2 + $0x10] sm:$0xff] }
 0x23d   :  { %v3196_v37 = vpop.permute.xlu0 %3195 }
 0x23e   :  { %v1535_v42 = vpop.permute.xlu1 %1534  ;;  %3367 = vst.msk [vmem:[#allocation5 + $0x1e8] sm:$0xff] %vm2065_vm8, %v3196_v37 }
 0x23f   :  { %1704 = vst.msk [vmem:[#allocation5 + $0x228] sm:$0xff] %vm1680_vm7, %v1535_v42  ;;  %2388 = vrot.lane.b32.xlu0 %v2259_v61, %s9606_s28  ;;  %v8950_v57 = vpop.f32.mrb[42].mxu0 }
 0x240   :  { %2831 = vrot.lane.b32.xlu1 %v2673_v19, %s9605_s27  ;;  %v599_v2 = vadd.f32 %v10773_v3, %v8950_v57  ;;  %v593_v60 = vpop.f32.mrb[43].mxu0  ;;  %v879_v19 = vld [vmem:[#allocation2 + $0x247] sm:$0xff] }
 0x241   :  { %v2814_v7 = vpop.permute.xlu0 %2813  ;;  %943 = vst.msk [vmem:[#allocation5 + $0x300] sm:$0xff] %vm703_vm4, %v879_v19 }
 0x242   :  { %v1914_v24 = vpop.permute.xlu1 %1913  ;;  %2984 = vst.msk [vmem:[#allocation5 + $0x200] sm:$0xff] %vm1680_vm7, %v2814_v7  ;;  %v3764_v7 = vld [vmem:[%s14447_s3 + $0x108] sm:$0xff] }
 0x243   :  { %2086 = vst.msk [vmem:[#allocation5 + $0x1e0] sm:$0xff] %vm2065_vm8, %v1914_v24  ;;  %3368 = vst.msk [vmem:[#allocation5 + $0x200] sm:$0xff] %vm2065_vm8, %v3198_v34  ;;  %1105 = vrot.lane.b32.xlu0 %v976_v9, %s9606_s28  ;;  %v3763_v9 = vld [vmem:[%s14447_s3 + $0x100] sm:$0xff] }
 0x244   :  { %1548 = vrot.lane.b32.xlu1 %v10733_v52, %s9605_s27  ;;  %747 = vst.msk [vmem:[#allocation2 + $0x310] sm:$0xff] %vm703_vm4, %v599_v2  ;;  %v594_v52 = vadd.f32 %v10773_v3, %v593_v60  ;;  %v3028_v3 = vld [vmem:[#allocation2 + $0x50] sm:$0xff] }
 0x245   :  { %v2431_v46 = vpop.permute.xlu0 %2430  ;;  %v3600_v28 = vld [vmem:[#allocation5 + $0x1e8] sm:$0xff] }
 0x246   :  { %v1916_v20 = vpop.permute.xlu1 %1915  ;;  %2600 = vst.msk [vmem:[#allocation5 + $0x218] sm:$0xff] %vm1295_vm6, %v2431_v46  ;;  %4130 = vmatprep.mubr.f32.mxu1 %v3600_v28 }
 0x247   :  { %2087 = vst.msk [vmem:[#allocation5 + $0x1f8] sm:$0xff] %vm2065_vm8, %v1916_v20  ;;  %2773 = vrot.lane.b32.xlu0 %v2644_v5, %s9605_s27 }
 0x248   :  { %3215 = vrot.lane.b32.xlu1 %v3057_v4, %s9607_s20  ;;  %746 = vst.msk [vmem:[#allocation2 + $0x308] sm:$0xff] %vm703_vm4, %v594_v52  ;;  %v11293_v4 = vpack.c.bf16 %v3764_v7, %v3763_v9 }
 0x249   :  { %v3202_v16 = vpop.permute.xlu0 %3201 }
 0x24a   :  { %v1148_v23 = vpop.permute.xlu1 %1147  ;;  %v3599_v17 = vld [vmem:[#allocation5 + $0x1e0] sm:$0xff]  ;;  %9251 = vmatprep.subr.bf16.mxu0 %v11293_v4 }
 0x24b   :  { %1318 = vst.msk [vmem:[#allocation5 + $0x210] sm:$0xff] %vm1295_vm6, %v1148_v23  ;;  %4131 = vmatmul.mubr.f32.gmra.mrb[34].mxu1 %v3599_v17  ;;  %v3603_v22 = vld [vmem:[#allocation5 + $0x200] sm:$0xff]  ;;  %1490 = vrot.lane.b32.xlu0 %v1361_v6, %s9605_s27  ;;  %v11239_v12 = vld [vmem:[#allocation2 + $0x311] sm:$0xff] }
 0x24c   :  { %1933 = vrot.lane.b32.xlu1 %v11105_v49, %s9607_s20  ;;  %4135 = vmatprep.mubr.f32.mxu1 %v3603_v22  ;;  %3516 = vst.msk [vmem:[#allocation5 + $0x3e8] sm:$0xff] %vm703_vm4, %v11239_v12  ;;  %v2173_v47 = vld [vmem:[#allocation2 + $0x310] sm:$0xff] }
 0x24d   :  { %v2437_v53 = vpop.permute.xlu0 %2436  ;;  %2237 = vst.msk [vmem:[#allocation5 + $0x410] sm:$0xff] %vm703_vm4, %v2173_v47 }
 0x24e   :  { %v1533_v18 = vpop.permute.xlu1 %1532  ;;  %v3602_v59 = vld [vmem:[#allocation5 + $0x1f8] sm:$0xff]  ;;  %2603 = vst.msk [vmem:[#allocation5 + $0x260] sm:$0xff] %vm1295_vm6, %v2437_v53  ;;  %v11315_v53 = vld [vmem:[#allocation2 + $0x269] sm:$0xff] }
 0x24f   :  { %1703 = vst.msk [vmem:[#allocation5 + $0x210] sm:$0xff] %vm1680_vm7, %v1533_v18  ;;  %4136 = vmatmul.mubr.f32.gmra.mrb[36].mxu1 %v3602_v59  ;;  %3157 = vrot.lane.b32.xlu0 %v3028_v3, %s9607_s20  ;;  %v11245_v49 = vld [vmem:[#allocation2 + $0x309] sm:$0xff] }
 0x250   :  { %1875 = vrot.lane.b32.xlu1 %v1746_v50, %s9607_s20  ;;  %3515 = vst.msk [vmem:[#allocation5 + $0x3d0] sm:$0xff] %vm703_vm4, %v11245_v49  ;;  %v2172_v45 = vld [vmem:[#allocation2 + $0x308] sm:$0xff] }
 0x251   :  { %v2816_v35 = vpop.permute.xlu0 %2815  ;;  %v891_v27 = vld [vmem:[#allocation2 + $0x307] sm:$0xff]  ;;  %2236 = vst.msk [vmem:[#allocation5 + $0x3f8] sm:$0xff] %vm703_vm4, %v2172_v45  ;;  %v880_v18 = vld [vmem:[#allocation2 + $0x24f] sm:$0xff] }
 0x252   :  { %v1154_v34 = vpop.permute.xlu1 %1153  ;;  %2985 = vst.msk [vmem:[#allocation5 + $0x218] sm:$0xff] %vm1680_vm7, %v2816_v35  ;;  %v11325_v50 = vld [vmem:[#allocation2 + $0x287] sm:$0xff] }
 0x253   :  { %1321 = vst.msk [vmem:[#allocation5 + $0x258] sm:$0xff] %vm1295_vm6, %v1154_v34  ;;  %2448 = vrot.lane.b32.xlu0 %v10793_v63, %s9606_s28  ;;  %v892_v63 = vld [vmem:[#allocation2 + $0x30f] sm:$0xff] }
 0x254   :  { %1165 = vrot.lane.b32.xlu1 %v10750_v15, %s9606_s28  ;;  %955 = vst.msk [vmem:[#allocation5 + $0x420] sm:$0xff] %vm703_vm4, %v891_v27  ;;  %956 = vst.msk [vmem:[#allocation5 + $0x438] sm:$0xff] %vm703_vm4, %v892_v63  ;;  %v1777_v27 = vld [vmem:[#allocation2 + $0x267] sm:$0xff]  ;;  %v1008_v63 = vld [vmem:[#allocation2 + $0x250] sm:$0xff] }
 0x255   :  { %v3200_v56 = vpop.permute.xlu0 %3199  ;;  %944 = vst.msk [vmem:[#allocation5 + $0x318] sm:$0xff] %vm703_vm4, %v880_v18 }
 0x256   :  { %v1539_v0 = vpop.permute.xlu1 %1538  ;;  %3369 = vst.msk [vmem:[#allocation5 + $0x218] sm:$0xff] %vm2065_vm8, %v3200_v56 }
 0x257   :  { %1706 = vst.msk [vmem:[#allocation5 + $0x258] sm:$0xff] %vm1680_vm7, %v1539_v0  ;;  %2390 = vrot.lane.b32.xlu0 %v2260_v40, %s9606_s28  ;;  %v8953_v10 = vpop.f32.mrb[44].mxu0  ;;  %v11340_v40 = vld [vmem:[#allocation2 + $0x288] sm:$0xff] }
 0x258   :  { %2833 = vrot.lane.b32.xlu1 %v2674_v43, %s9605_s27  ;;  %v609_v32 = vadd.f32 %v11275_v48, %v8953_v10  ;;  %v603_v61 = vpop.f32.mrb[45].mxu0 }
 0x259   :  { %v2818_v15 = vpop.permute.xlu0 %2817  ;;  %v604_v1 = vadd.f32 %v11275_v48, %v603_v61 }
 0x25a   :  { %v1918_v38 = vpop.permute.xlu1 %1917  ;;  %2986 = vst.msk [vmem:[#allocation5 + $0x230] sm:$0xff] %vm1680_vm7, %v2818_v15 }
 0x25b   :  { %2088 = vst.msk [vmem:[#allocation5 + $0x210] sm:$0xff] %vm2065_vm8, %v1918_v38  ;;  %3370 = vst.msk [vmem:[#allocation5 + $0x230] sm:$0xff] %vm2065_vm8, %v3202_v16  ;;  %1107 = vrot.lane.b32.xlu0 %v10138_v25, %s9606_s28 }
 0x25c   :  { %1550 = vrot.lane.b32.xlu1 %v10727_v51, %s9605_s27  ;;  %v11270_v62 = vpop.f32.mrb[0].mxu1  ;;  %v2645_v51 = vld [vmem:[#allocation2 + $0x67] sm:$0xff]  ;;  %749 = vst.msk [vmem:[#allocation2 + $0x330] sm:$0xff] %vm703_vm4, %v609_v32  ;;  %748 = vst.msk [vmem:[#allocation2 + $0x328] sm:$0xff] %vm703_vm4, %v604_v1  ;;  %v11350_v32 = vld [vmem:[#allocation2 + $0x271] sm:$0xff] }
 0x25d   :  { %v4049_v37 = vpop.f32.mrb[1].mxu1  ;;  %v2435_v42 = vpop.permute.xlu0 %2434  ;;  %v3606_v8 = vld [vmem:[#allocation5 + $0x218] sm:$0xff] }
 0x25e   :  { %2602 = vst.msk [vmem:[#allocation5 + $0x248] sm:$0xff] %vm1295_vm6, %v2435_v42  ;;  %v1920_v25 = vpop.permute.xlu1 %1919  ;;  %4140 = vmatprep.mubr.f32.mxu1 %v3606_v8 }
 0x25f   :  { %2089 = vst.msk [vmem:[#allocation5 + $0x228] sm:$0xff] %vm2065_vm8, %v1920_v25  ;;  %2775 = vrot.lane.b32.xlu0 %v2645_v51, %s9605_s27  ;;  %v1393_v51 = vld [vmem:[#allocation2 + $0x251] sm:$0xff] }
 0x260   :  { %3217 = vrot.lane.b32.xlu1 %v3058_v36, %s9607_s20  ;;  %v11291_v24 = vpop.f32.mrb[2].mxu1 }
 0x261   :  { %v4054_v57 = vpop.f32.mrb[3].mxu1  ;;  %v3206_v46 = vpop.permute.xlu0 %3205 }
 0x262   :  { %v3605_v20 = vld [vmem:[#allocation5 + $0x210] sm:$0xff]  ;;  %v1152_v28 = vpop.permute.xlu1 %1151 }
 0x263   :  { %4141 = vmatmul.mubr.f32.gmra.mrb[38].mxu1 %v3605_v20  ;;  %v3609_v2 = vld [vmem:[#allocation5 + $0x230] sm:$0xff]  ;;  %1320 = vst.msk [vmem:[#allocation5 + $0x240] sm:$0xff] %vm1295_vm6, %v1152_v28  ;;  %1492 = vrot.lane.b32.xlu0 %v11137_v54, %s9605_s27  ;;  %v1007_v54 = vld [vmem:[#allocation2 + $0x248] sm:$0xff] }
 0x264   :  { %1935 = vrot.lane.b32.xlu1 %v11135_v44, %s9607_s20  ;;  %v11302_v5 = vpop.f32.mrb[4].mxu1  ;;  %4145 = vmatprep.mubr.f32.mxu1 %v3609_v2  ;;  %v11305_v23 = vld [vmem:[#allocation2 + $0x331] sm:$0xff]  ;;  %v3029_v44 = vld [vmem:[#allocation2 + $0x68] sm:$0xff] }
 0x265   :  { %v4059_v60 = vpop.f32.mrb[5].mxu1  ;;  %v2441_v52 = vpop.permute.xlu0 %2440  ;;  %3518 = vst.msk [vmem:[#allocation5 + $0x418] sm:$0xff] %vm703_vm4, %v11305_v23  ;;  %v11313_v17 = vld [vmem:[#allocation2 + $0x329] sm:$0xff] }
 0x266   :  { %2605 = vst.msk [vmem:[#allocation5 + $0x290] sm:$0xff] %vm1295_vm6, %v2441_v52  ;;  %v1537_v6 = vpop.permute.xlu1 %1536  ;;  %v3608_v16 = vld [vmem:[#allocation5 + $0x228] sm:$0xff]  ;;  %v2175_v43 = vld [vmem:[#allocation2 + $0x330] sm:$0xff] }
 0x267   :  { %1705 = vst.msk [vmem:[#allocation5 + $0x240] sm:$0xff] %vm1680_vm7, %v1537_v6  ;;  %4146 = vmatmul.mubr.f32.gmra.mrb[40].mxu1 %v3608_v16  ;;  %3159 = vrot.lane.b32.xlu0 %v3029_v44, %s9607_s20  ;;  %v2174_v35 = vld [vmem:[#allocation2 + $0x328] sm:$0xff]  ;;  %v11371_v16 = vld [vmem:[#allocation2 + $0x290] sm:$0xff] }
 0x268   :  { %1877 = vrot.lane.b32.xlu1 %v11172_v26, %s9607_s20  ;;  %3517 = vst.msk [vmem:[#allocation5 + $0x400] sm:$0xff] %vm703_vm4, %v11313_v17  ;;  %v1392_v26 = vld [vmem:[#allocation2 + $0x249] sm:$0xff]  ;;  %2238 = vst.msk [vmem:[#allocation5 + $0x428] sm:$0xff] %vm703_vm4, %v2174_v35 }
 0x269   :  { %v2820_v22 = vpop.permute.xlu0 %2819  ;;  %v893_v56 = vld [vmem:[#allocation2 + $0x327] sm:$0xff]  ;;  %v894_v0 = vld [vmem:[#allocation2 + $0x32f] sm:$0xff]  ;;  %2239 = vst.msk [vmem:[#allocation5 + $0x440] sm:$0xff] %vm703_vm4, %v2175_v43 }
 0x26a   :  { %2987 = vst.msk [vmem:[#allocation5 + $0x248] sm:$0xff] %vm1680_vm7, %v2820_v22  ;;  %v1922_v59 = vpop.permute.xlu1 %1921  ;;  %v11362_v20 = vld [vmem:[#allocation2 + $0x28f] sm:$0xff] }
 0x26b   :  { %2090 = vst.msk [vmem:[#allocation5 + $0x240] sm:$0xff] %vm2065_vm8, %v1922_v59  ;;  %2450 = vrot.lane.b32.xlu0 %v11315_v53, %s9606_s28  ;;  %v1778_v52 = vld [vmem:[#allocation2 + $0x26f] sm:$0xff] }
 0x26c   :  { %1167 = vrot.lane.b32.xlu1 %v1007_v54, %s9606_s28  ;;  %957 = vst.msk [vmem:[#allocation5 + $0x450] sm:$0xff] %vm703_vm4, %v893_v56  ;;  %958 = vst.msk [vmem:[#allocation5 + $0x468] sm:$0xff] %vm703_vm4, %v894_v0 }
 0x26d   :  { %v3204_v3 = vpop.permute.xlu0 %3203 }
 0x26e   :  { %3371 = vst.msk [vmem:[#allocation5 + $0x248] sm:$0xff] %vm2065_vm8, %v3204_v3  ;;  %v1924_v34 = vpop.permute.xlu1 %1923 }
 0x26f   :  { %2091 = vst.msk [vmem:[#allocation5 + $0x258] sm:$0xff] %vm2065_vm8, %v1924_v34  ;;  %2835 = vrot.lane.b32.xlu0 %v11325_v50, %s9605_s27 }
 0x270   :  { %1552 = vrot.lane.b32.xlu1 %v1392_v26, %s9605_s27  ;;  %v8956_v15 = vpop.f32.mrb[46].mxu0  ;;  %v11387_v26 = vld [vmem:[#allocation2 + $0x2a7] sm:$0xff] }
 0x271   :  { %v2822_v45 = vpop.permute.xlu0 %2821  ;;  %v619_v19 = vadd.f32 %v11275_v48, %v8956_v15  ;;  %v613_v25 = vpop.f32.mrb[47].mxu0 }
 0x272   :  { %2988 = vst.msk [vmem:[#allocation5 + $0x260] sm:$0xff] %vm1680_vm7, %v2822_v45  ;;  %v1156_v47 = vpop.permute.xlu1 %1155  ;;  %v3611_v8 = vld [vmem:[#allocation5 + $0x240] sm:$0xff]  ;;  %v614_v61 = vadd.f32 %v11275_v48, %v613_v25 }
 0x273   :  { %3372 = vst.msk [vmem:[#allocation5 + $0x260] sm:$0xff] %vm2065_vm8, %v3206_v46  ;;  %3219 = vrot.lane.b32.xlu0 %v11340_v40, %s9607_s20 }
 0x274   :  { %1322 = vst.msk [vmem:[#allocation5 + $0x270] sm:$0xff] %vm1295_vm6, %v1156_v47  ;;  %1937 = vrot.lane.b32.xlu1 %v1777_v27, %s9607_s20 }
 0x275   :  { %v2439_v38 = vpop.permute.xlu0 %2438  ;;  %v3612_v10 = vld [vmem:[#allocation5 + $0x248] sm:$0xff]  ;;  %751 = vst.msk [vmem:[#allocation2 + $0x350] sm:$0xff] %vm703_vm4, %v619_v19  ;;  %750 = vst.msk [vmem:[#allocation2 + $0x348] sm:$0xff] %vm703_vm4, %v614_v61 }
 0x276   :  { %v11344_v36 = vpop.f32.mrb[6].mxu1  ;;  %2604 = vst.msk [vmem:[#allocation5 + $0x278] sm:$0xff] %vm1295_vm6, %v2439_v38  ;;  %v1541_v37 = vpop.permute.xlu1 %1540  ;;  %4150 = vmatprep.mubr.f32.mxu1 %v3612_v10  ;;  %v3614_v28 = vld [vmem:[#allocation5 + $0x258] sm:$0xff] }
 0x277   :  { %v4064_v42 = vpop.f32.mrb[7].mxu1  ;;  %1707 = vst.msk [vmem:[#allocation5 + $0x270] sm:$0xff] %vm1680_vm7, %v1541_v37  ;;  %4151 = vmatmul.mubr.f32.gmra.mrb[42].mxu1 %v3611_v8  ;;  %2452 = vrot.lane.b32.xlu0 %v11350_v32, %s9606_s28 }
 0x278   :  { %1169 = vrot.lane.b32.xlu1 %v1008_v63, %s9606_s28 }
 0x279   :  { %v2824_v1 = vpop.permute.xlu0 %2823 }
 0x27a   :  { %v11356_v9 = vpop.f32.mrb[8].mxu1  ;;  %2989 = vst.msk [vmem:[#allocation5 + $0x278] sm:$0xff] %vm1680_vm7, %v2824_v1  ;;  %v1926_v7 = vpop.permute.xlu1 %1925  ;;  %v3615_v46 = vld [vmem:[#allocation5 + $0x260] sm:$0xff] }
 0x27b   :  { %v4069_v57 = vpop.f32.mrb[9].mxu1  ;;  %2092 = vst.msk [vmem:[#allocation5 + $0x270] sm:$0xff] %vm2065_vm8, %v1926_v7  ;;  %4155 = vmatprep.mubr.f32.mxu1 %v3615_v46  ;;  %2837 = vrot.lane.b32.xlu0 %v11362_v20, %s9605_s27  ;;  %v11435_v46 = vld [vmem:[#allocation2 + $0x2b0] sm:$0xff] }
 0x27c   :  { %1554 = vrot.lane.b32.xlu1 %v1393_v51, %s9605_s27  ;;  %4156 = vmatmul.mubr.f32.gmra.mrb[44].mxu1 %v3614_v28  ;;  %v11367_v6 = vld [vmem:[#allocation2 + $0x351] sm:$0xff]  ;;  %v11377_v54 = vld [vmem:[#allocation2 + $0x349] sm:$0xff] }
 0x27d   :  { %v3208_v2 = vpop.permute.xlu0 %3207  ;;  %3520 = vst.msk [vmem:[#allocation5 + $0x448] sm:$0xff] %vm703_vm4, %v11367_v6  ;;  %3519 = vst.msk [vmem:[#allocation5 + $0x430] sm:$0xff] %vm703_vm4, %v11377_v54  ;;  %v2176_v34 = vld [vmem:[#allocation2 + $0x348] sm:$0xff]  ;;  %v2177_v43 = vld [vmem:[#allocation2 + $0x350] sm:$0xff] }
 0x27e   :  { %3373 = vst.msk [vmem:[#allocation5 + $0x278] sm:$0xff] %vm2065_vm8, %v3208_v2  ;;  %v1158_v60 = vpop.permute.xlu1 %1157  ;;  %v895_v56 = vld [vmem:[#allocation2 + $0x347] sm:$0xff] }
 0x27f   :  { %1323 = vst.msk [vmem:[#allocation5 + $0x288] sm:$0xff] %vm1295_vm6, %v1158_v60  ;;  %3221 = vrot.lane.b32.xlu0 %v11371_v16, %s9607_s20 }
 0x280   :  { %1939 = vrot.lane.b32.xlu1 %v1778_v52, %s9607_s20  ;;  %2240 = vst.msk [vmem:[#allocation5 + $0x458] sm:$0xff] %vm703_vm4, %v2176_v34  ;;  %2241 = vst.msk [vmem:[#allocation5 + $0x470] sm:$0xff] %vm703_vm4, %v2177_v43  ;;  %v3441_v34 = vld [vmem:[#allocation2 + $0x229] sm:$0xff] }
 0x281   :  { %v2826_v44 = vpop.permute.xlu0 %2825  ;;  %959 = vst.msk [vmem:[#allocation5 + $0x480] sm:$0xff] %vm703_vm4, %v895_v56  ;;  %3505 = vst.msk [vmem:[#allocation5 + $0x2e0] sm:$0xff] %vm703_vm4, %v3441_v34  ;;  %v3442_v56 = vld [vmem:[#allocation2 + $0x231] sm:$0xff] }
 0x282   :  { %2990 = vst.msk [vmem:[#allocation5 + $0x290] sm:$0xff] %vm1680_vm7, %v2826_v44  ;;  %v1543_v22 = vpop.permute.xlu1 %1542  ;;  %v3617_v3 = vld [vmem:[#allocation5 + $0x270] sm:$0xff]  ;;  %v11451_v44 = vld [vmem:[#allocation2 + $0x2c7] sm:$0xff] }
 0x283   :  { %1708 = vst.msk [vmem:[#allocation5 + $0x288] sm:$0xff] %vm1680_vm7, %v1543_v22  ;;  %2454 = vrot.lane.b32.xlu0 %v10997_v55, %s9606_s28 }
 0x284   :  { %1171 = vrot.lane.b32.xlu1 %v10979_v29, %s9606_s28  ;;  %v896_v29 = vld [vmem:[#allocation2 + $0x34f] sm:$0xff]  ;;  %3506 = vst.msk [vmem:[#allocation5 + $0x2f8] sm:$0xff] %vm703_vm4, %v3442_v56 }
 0x285   :  { %v3210_v18 = vpop.permute.xlu0 %3209  ;;  %v3618_v59 = vld [vmem:[#allocation5 + $0x278] sm:$0xff]  ;;  %960 = vst.msk [vmem:[#allocation5 + $0x498] sm:$0xff] %vm703_vm4, %v896_v29  ;;  %v8959_v47 = vpop.f32.mrb[48].mxu0 }
 0x286   :  { %3374 = vst.msk [vmem:[#allocation5 + $0x290] sm:$0xff] %vm2065_vm8, %v3210_v18  ;;  %v1928_v35 = vpop.permute.xlu1 %1927  ;;  %4160 = vmatprep.mubr.f32.mxu1 %v3618_v59  ;;  %v629_v38 = vadd.f32 %v11275_v48, %v8959_v47 }
 0x287   :  { %2093 = vst.msk [vmem:[#allocation5 + $0x288] sm:$0xff] %vm2065_vm8, %v1928_v35  ;;  %4161 = vmatmul.mubr.f32.gmra.mrb[46].mxu1 %v3617_v3  ;;  %2839 = vrot.lane.b32.xlu0 %v11387_v26, %s9605_s27 }
 0x288   :  { %1556 = vrot.lane.b32.xlu1 %v11315_v53, %s9605_s27  ;;  %v11403_v53 = vld [vmem:[#allocation2 + $0x2a8] sm:$0xff]  ;;  %753 = vst.msk [vmem:[#allocation2 + $0x370] sm:$0xff] %vm703_vm4, %v629_v38 }
 0x289   :  { %v2443_v0 = vpop.permute.xlu0 %2442 }
 0x28a   :  { %2606 = vst.msk [vmem:[#allocation5 + $0x2a8] sm:$0xff] %vm1295_vm6, %v2443_v0  ;;  %v1160_v45 = vpop.permute.xlu1 %1159 }
 0x28b   :  { %1324 = vst.msk [vmem:[#allocation5 + $0x2a0] sm:$0xff] %vm1295_vm6, %v1160_v45  ;;  %3223 = vrot.lane.b32.xlu0 %v11403_v53, %s9607_s20 }
 0x28c   :  { %1941 = vrot.lane.b32.xlu1 %v11325_v50, %s9607_s20  ;;  %v623_v50 = vpop.f32.mrb[49].mxu0 }
 0x28d   :  { %v2828_v27 = vpop.permute.xlu0 %2827  ;;  %v3621_v15 = vld [vmem:[#allocation5 + $0x290] sm:$0xff]  ;;  %v624_v42 = vadd.f32 %v11275_v48, %v623_v50 }
 0x28e   :  { %v11407_v63 = vpop.f32.mrb[10].mxu1  ;;  %2991 = vst.msk [vmem:[#allocation5 + $0x2a8] sm:$0xff] %vm1680_vm7, %v2828_v27  ;;  %v1545_v10 = vpop.permute.xlu1 %1544  ;;  %4165 = vmatprep.mubr.f32.mxu1 %v3621_v15  ;;  %v3620_v37 = vld [vmem:[#allocation5 + $0x288] sm:$0xff] }
 0x28f   :  { %v4074_v19 = vpop.f32.mrb[11].mxu1  ;;  %1709 = vst.msk [vmem:[#allocation5 + $0x2a0] sm:$0xff] %vm1680_vm7, %v1545_v10  ;;  %4166 = vmatmul.mubr.f32.gmra.mrb[48].mxu1 %v3620_v37  ;;  %2456 = vrot.lane.b32.xlu0 %v10983_v33, %s9606_s28  ;;  %v11430_v57 = vld [vmem:[#allocation2 + $0x371] sm:$0xff] }
 0x290   :  { %1173 = vrot.lane.b32.xlu1 %v10985_v21, %s9606_s28  ;;  %752 = vst.msk [vmem:[#allocation2 + $0x368] sm:$0xff] %vm703_vm4, %v624_v42  ;;  %v11425_v21 = vld [vmem:[#allocation2 + $0x2af] sm:$0xff]  ;;  %3522 = vst.msk [vmem:[#allocation5 + $0x478] sm:$0xff] %vm703_vm4, %v11430_v57 }
 0x291   :  { %v3212_v8 = vpop.permute.xlu0 %3211  ;;  %v11453_v22 = vld [vmem:[#allocation2 + $0x370] sm:$0xff] }
 0x292   :  { %v11418_v25 = vpop.f32.mrb[12].mxu1  ;;  %3375 = vst.msk [vmem:[#allocation5 + $0x2a8] sm:$0xff] %vm2065_vm8, %v3212_v8  ;;  %v1930_v51 = vpop.permute.xlu1 %1929 }
 0x293   :  { %v4079_v61 = vpop.f32.mrb[13].mxu1  ;;  %2094 = vst.msk [vmem:[#allocation5 + $0x2a0] sm:$0xff] %vm2065_vm8, %v1930_v51  ;;  %2841 = vrot.lane.b32.xlu0 %v11425_v21, %s9605_s27  ;;  %v3765_v51 = vld [vmem:[%s14447_s3 + $0x110] sm:$0xff] }
 0x294   :  { %1558 = vrot.lane.b32.xlu1 %v11350_v32, %s9605_s27  ;;  %2243 = vst.msk [vmem:[#allocation5 + $0x4a0] sm:$0xff] %vm703_vm4, %v11453_v22 }
 0x295   :  { %v2445_v1 = vpop.permute.xlu0 %2444 }
 0x296   :  { %2607 = vst.msk [vmem:[#allocation5 + $0x2c0] sm:$0xff] %vm1295_vm6, %v2445_v1  ;;  %v1162_v7 = vpop.permute.xlu1 %1161 }
 0x297   :  { %1325 = vst.msk [vmem:[#allocation5 + $0x2b8] sm:$0xff] %vm1295_vm6, %v1162_v7  ;;  %3225 = vrot.lane.b32.xlu0 %v11435_v46, %s9607_s20  ;;  %v11441_v2 = vld [vmem:[#allocation2 + $0x369] sm:$0xff]  ;;  %v3766_v7 = vld [vmem:[%s14447_s3 + $0x118] sm:$0xff] }
 0x298   :  { %1943 = vrot.lane.b32.xlu1 %v11362_v20, %s9607_s20  ;;  %3521 = vst.msk [vmem:[#allocation5 + $0x460] sm:$0xff] %vm703_vm4, %v11441_v2  ;;  %v2178_v18 = vld [vmem:[#allocation2 + $0x368] sm:$0xff] }
 0x299   :  { %v2387_v32 = vpop.permute.xlu0 %2386  ;;  %v3624_v28 = vld [vmem:[#allocation5 + $0x2a8] sm:$0xff]  ;;  %2242 = vst.msk [vmem:[#allocation5 + $0x488] sm:$0xff] %vm703_vm4, %v2178_v18 }
 0x29a   :  { %v2830_v60 = vpop.permute.xlu1 %2829  ;;  %2578 = vst.msk [vmem:[#allocation5 + $0x8] sm:$0xff] %vm1295_vm6, %v2387_v32  ;;  %4170 = vmatprep.mubr.f32.mxu1 %v3624_v28  ;;  %v3623_v52 = vld [vmem:[#allocation5 + $0x2a0] sm:$0xff] }
 0x29b   :  { %2992 = vst.msk [vmem:[#allocation5 + $0x2c0] sm:$0xff] %vm1680_vm7, %v2830_v60  ;;  %4171 = vmatmul.mubr.f32.gmra.mrb[50].mxu1 %v3623_v52  ;;  %2458 = vrot.lane.b32.xlu0 %v11060_v14, %s9606_s28  ;;  %v897_v3 = vld [vmem:[#allocation2 + $0x367] sm:$0xff]  ;;  %v9254_v52 = vpack.c.bf16 %v3766_v7, %v3765_v51  ;;  %v11571_v51 = vld [vmem:[#allocation2 + $0x2ef] sm:$0xff] }
 0x29c   :  { %1175 = vrot.lane.b32.xlu1 %v11340_v40, %s9606_s28  ;;  %v898_v40 = vld [vmem:[#allocation2 + $0x36f] sm:$0xff]  ;;  %961 = vst.msk [vmem:[#allocation5 + $0x4b0] sm:$0xff] %vm703_vm4, %v897_v3 }
 0x29d   :  { %v1104_v20 = vpop.permute.xlu0 %1103  ;;  %962 = vst.msk [vmem:[#allocation5 + $0x4c8] sm:$0xff] %vm703_vm4, %v898_v40  ;;  %v8962_v29 = vpop.f32.mrb[50].mxu0  ;;  %v11531_v40 = vld [vmem:[#allocation2 + $0x2e7] sm:$0xff] }
 0x29e   :  { %v1547_v59 = vpop.permute.xlu1 %1546  ;;  %1296 = vst.msk [vmem:[#allocation5] sm:$0xff] %vm1295_vm6, %v1104_v20  ;;  %v639_v47 = vadd.f32 %v11275_v48, %v8962_v29  ;;  %v11549_v29 = vld [vmem:[#allocation2 + $0x2e8] sm:$0xff] }
 0x29f   :  { %1710 = vst.msk [vmem:[#allocation5 + $0x2b8] sm:$0xff] %vm1680_vm7, %v1547_v59  ;;  %2843 = vrot.lane.b32.xlu0 %v11451_v44, %s9605_s27 }
 0x2a0   :  { %1560 = vrot.lane.b32.xlu1 %v10997_v55, %s9605_s27  ;;  %v11471_v55 = vld [vmem:[#allocation2 + $0x2c8] sm:$0xff]  ;;  %755 = vst.msk [vmem:[#allocation2 + $0x390] sm:$0xff] %vm703_vm4, %v639_v47 }
 0x2a1   :  { %v2772_v35 = vpop.permute.xlu0 %2771 }
 0x2a2   :  { %v3214_v43 = vpop.permute.xlu1 %3213  ;;  %2963 = vst.msk [vmem:[#allocation5 + $0x8] sm:$0xff] %vm1680_vm7, %v2772_v35 }
 0x2a3   :  { %3376 = vst.msk [vmem:[#allocation5 + $0x2c0] sm:$0xff] %vm2065_vm8, %v3214_v43  ;;  %3227 = vrot.lane.b32.xlu0 %v11471_v55, %s9607_s20 }
 0x2a4   :  { %1945 = vrot.lane.b32.xlu1 %v11387_v26, %s9607_s20  ;;  %v633_v26 = vpop.f32.mrb[51].mxu0 }
 0x2a5   :  { %v1489_v0 = vpop.permute.xlu0 %1488  ;;  %v634_v38 = vadd.f32 %v11275_v48, %v633_v26 }
 0x2a6   :  { %v11476_v45 = vpop.f32.mrb[14].mxu1  ;;  %v1932_v27 = vpop.permute.xlu1 %1931  ;;  %1681 = vst.msk [vmem:[#allocation5] sm:$0xff] %vm1680_vm7, %v1489_v0 }
 0x2a7   :  { %v4084_v15 = vpop.f32.mrb[15].mxu1  ;;  %2095 = vst.msk [vmem:[#allocation5 + $0x2b8] sm:$0xff] %vm2065_vm8, %v1932_v27  ;;  %2460 = vrot.lane.b32.xlu0 %v11052_v13, %s9606_s28  ;;  %v11505_v32 = vld [vmem:[#allocation2 + $0x391] sm:$0xff] }
 0x2a8   :  { %1177 = vrot.lane.b32.xlu1 %v11371_v16, %s9606_s28  ;;  %754 = vst.msk [vmem:[#allocation2 + $0x388] sm:$0xff] %vm703_vm4, %v634_v38  ;;  %v11494_v16 = vld [vmem:[#allocation2 + $0x2cf] sm:$0xff]  ;;  %3524 = vst.msk [vmem:[#allocation5 + $0x4a8] sm:$0xff] %vm703_vm4, %v11505_v32 }
 0x2a9   :  { %v3156_v10 = vpop.permute.xlu0 %3155  ;;  %v11533_v35 = vld [vmem:[#allocation2 + $0x390] sm:$0xff] }
 0x2aa   :  { %v11487_v19 = vpop.f32.mrb[16].mxu1  ;;  %3347 = vst.msk [vmem:[#allocation5 + $0x8] sm:$0xff] %vm2065_vm8, %v3156_v10  ;;  %v1874_v37 = vpop.permute.xlu1 %1873  ;;  %v3627_v42 = vld [vmem:[#allocation5 + $0x2c0] sm:$0xff] }
 0x2ab   :  { %v4089_v50 = vpop.f32.mrb[17].mxu1  ;;  %2066 = vst.msk [vmem:[#allocation5] sm:$0xff] %vm2065_vm8, %v1874_v37  ;;  %4175 = vmatprep.mubr.f32.mxu1 %v3627_v42  ;;  %2845 = vrot.lane.b32.xlu0 %v11494_v16, %s9605_s27 }
 0x2ac   :  { %1562 = vrot.lane.b32.xlu1 %v10983_v33, %s9605_s27  ;;  %v11510_v33 = vld [vmem:[#allocation2 + $0x2d0] sm:$0xff]  ;;  %2245 = vst.msk [vmem:[#allocation5 + $0x4d0] sm:$0xff] %vm703_vm4, %v11533_v35 }
 0x2ad   :  { %v2447_v8 = vpop.permute.xlu0 %2446 }
 0x2ae   :  { %2608 = vst.msk [vmem:[#allocation5 + $0x2d8] sm:$0xff] %vm1295_vm6, %v2447_v8  ;;  %v1164_v61 = vpop.permute.xlu1 %1163  ;;  %v3626_v1 = vld [vmem:[#allocation5 + $0x2b8] sm:$0xff] }
 0x2af   :  { %1326 = vst.msk [vmem:[#allocation5 + $0x2d0] sm:$0xff] %vm1295_vm6, %v1164_v61  ;;  %4176 = vmatmul.mubr.f32.gmra.mrb[52].mxu1 %v3626_v1  ;;  %3229 = vrot.lane.b32.xlu0 %v11510_v33, %s9607_s20  ;;  %v11516_v20 = vld [vmem:[#allocation2 + $0x389] sm:$0xff] }
 0x2b0   :  { %1947 = vrot.lane.b32.xlu1 %v11425_v21, %s9607_s20  ;;  %3523 = vst.msk [vmem:[#allocation5 + $0x490] sm:$0xff] %vm703_vm4, %v11516_v20  ;;  %v11524_v21 = vld [vmem:[#allocation2 + $0x388] sm:$0xff] }
 0x2b1   :  { %v2389_v28 = vpop.permute.xlu0 %2388  ;;  %v3540_v60 = vld [vmem:[#allocation5 + $0x8] sm:$0xff]  ;;  %2244 = vst.msk [vmem:[#allocation5 + $0x4b8] sm:$0xff] %vm703_vm4, %v11524_v21 }
 0x2b2   :  { %2579 = vst.msk [vmem:[#allocation5 + $0x20] sm:$0xff] %vm1295_vm6, %v2389_v28  ;;  %v2832_v18 = vpop.permute.xlu1 %2831  ;;  %4030 = vmatprep.mubr.f32.mxu0 %v3540_v60  ;;  %v3539_v59 = vld [vmem:[#allocation5] sm:$0xff]  ;;  %v900_v43 = vld [vmem:[#allocation2 + $0x38f] sm:$0xff] }
 0x2b3   :  { %2993 = vst.msk [vmem:[#allocation5 + $0x2d8] sm:$0xff] %vm1680_vm7, %v2832_v18  ;;  %4031 = vmatmul.mubr.f32.vlgmr.msra.gmra.mrb[64].mxu0 %v3539_v59  ;;  %2462 = vrot.lane.b32.xlu0 %v11122_v39, %s9606_s28  ;;  %v899_v34 = vld [vmem:[#allocation2 + $0x387] sm:$0xff] }
 0x2b4   :  { %1179 = vrot.lane.b32.xlu1 %v11403_v53, %s9606_s28  ;;  %9253 = vmatpush3.bf16.msra.mxu0 %v11293_v4  ;;  %963 = vst.msk [vmem:[#allocation5 + $0x4e0] sm:$0xff] %vm703_vm4, %v899_v34  ;;  %964 = vst.msk [vmem:[#allocation5 + $0x4f8] sm:$0xff] %vm703_vm4, %v900_v43  ;;  %v11599_v34 = vld [vmem:[#allocation2 + $0x307] sm:$0xff] }
 0x2b5   :  { %v1106_v3 = vpop.permute.xlu0 %1105  ;;  %9255 = vmatprep.subr.bf16.mxu0 %v9254_v52 }
 0x2b6   :  { %1297 = vst.msk [vmem:[#allocation5 + $0x18] sm:$0xff] %vm1295_vm6, %v1106_v3  ;;  %v1549_v53 = vpop.permute.xlu1 %1548 }
 0x2b7   :  { %1711 = vst.msk [vmem:[#allocation5 + $0x2d0] sm:$0xff] %vm1680_vm7, %v1549_v53  ;;  %2847 = vrot.lane.b32.xlu0 %v11531_v40, %s9605_s27 }
 0x2b8   :  { %1564 = vrot.lane.b32.xlu1 %v11060_v14, %s9605_s27  ;;  %9257 = vmatpush3.bf16.msra.mxu0 %v9254_v52  ;;  %v8965_v0 = vpop.f32.mrb[52].mxu0 }
 0x2b9   :  { %v2774_v4 = vpop.permute.xlu0 %2773  ;;  %v649_v14 = vadd.f32 %v11275_v48, %v8965_v0  ;;  %v643_v47 = vpop.f32.mrb[53].mxu0 }
 0x2ba   :  { %2964 = vst.msk [vmem:[#allocation5 + $0x20] sm:$0xff] %vm1680_vm7, %v2774_v4  ;;  %v3216_v56 = vpop.permute.xlu1 %3215  ;;  %v644_v26 = vadd.f32 %v11275_v48, %v643_v47 }
 0x2bb   :  { %3377 = vst.msk [vmem:[#allocation5 + $0x2d8] sm:$0xff] %vm2065_vm8, %v3216_v56  ;;  %3231 = vrot.lane.b32.xlu0 %v11549_v29, %s9607_s20 }
 0x2bc   :  { %1949 = vrot.lane.b32.xlu1 %v11451_v44, %s9607_s20  ;;  %757 = vst.msk [vmem:[#allocation2 + $0x3b0] sm:$0xff] %vm703_vm4, %v649_v14  ;;  %756 = vst.msk [vmem:[#allocation2 + $0x3a8] sm:$0xff] %vm703_vm4, %v644_v26  ;;  %v11620_v26 = vld [vmem:[#allocation2 + $0x308] sm:$0xff] }
 0x2bd   :  { %v1491_v27 = vpop.permute.xlu0 %1490 }
 0x2be   :  { %v11554_v15 = vpop.f32.mrb[18].mxu1  ;;  %1682 = vst.msk [vmem:[#allocation5 + $0x18] sm:$0xff] %vm1680_vm7, %v1491_v27  ;;  %v1934_v38 = vpop.permute.xlu1 %1933 }
 0x2bf   :  { %v4094_v10 = vpop.f32.mrb[19].mxu1  ;;  %2096 = vst.msk [vmem:[#allocation5 + $0x2d0] sm:$0xff] %vm2065_vm8, %v1934_v38  ;;  %2464 = vrot.lane.b32.xlu0 %v11115_v58, %s9606_s28 }
 0x2c0   :  { %1181 = vrot.lane.b32.xlu1 %v11435_v46, %s9606_s28 }
 0x2c1   :  { %v3158_v44 = vpop.permute.xlu0 %3157 }
 0x2c2   :  { %v11565_v37 = vpop.f32.mrb[20].mxu1  ;;  %3348 = vst.msk [vmem:[#allocation5 + $0x20] sm:$0xff] %vm2065_vm8, %v3158_v44  ;;  %v1876_v50 = vpop.permute.xlu1 %1875  ;;  %v3630_v8 = vld [vmem:[#allocation5 + $0x2d8] sm:$0xff] }
 0x2c3   :  { %v4099_v42 = vpop.f32.mrb[21].mxu1  ;;  %2067 = vst.msk [vmem:[#allocation5 + $0x18] sm:$0xff] %vm2065_vm8, %v1876_v50  ;;  %4180 = vmatprep.mubr.f32.mxu1 %v3630_v8  ;;  %2849 = vrot.lane.b32.xlu0 %v11571_v51, %s9605_s27  ;;  %v11575_v61 = vld [vmem:[#allocation2 + $0x3b1] sm:$0xff]  ;;  %v11580_v28 = vld [vmem:[#allocation2 + $0x3a9] sm:$0xff] }
 0x2c4   :  { %1566 = vrot.lane.b32.xlu1 %v11052_v13, %s9605_s27  ;;  %3526 = vst.msk [vmem:[#allocation5 + $0x4d8] sm:$0xff] %vm703_vm4, %v11575_v61  ;;  %v11585_v13 = vld [vmem:[#allocation2 + $0x2f0] sm:$0xff]  ;;  %3525 = vst.msk [vmem:[#allocation5 + $0x4c0] sm:$0xff] %vm703_vm4, %v11580_v28  ;;  %v901_v43 = vld [vmem:[#allocation2 + $0x3a7] sm:$0xff] }
 0x2c5   :  { %v2449_v46 = vpop.permute.xlu0 %2448  ;;  %v11601_v53 = vld [vmem:[#allocation2 + $0x3b0] sm:$0xff]  ;;  %965 = vst.msk [vmem:[#allocation5 + $0x510] sm:$0xff] %vm703_vm4, %v901_v43 }
 0x2c6   :  { %2609 = vst.msk [vmem:[#allocation5 + $0x2f0] sm:$0xff] %vm1295_vm6, %v2449_v46  ;;  %v1166_v1 = vpop.permute.xlu1 %1165  ;;  %v3629_v7 = vld [vmem:[#allocation5 + $0x2d0] sm:$0xff] }
 0x2c7   :  { %1327 = vst.msk [vmem:[#allocation5 + $0x2e8] sm:$0xff] %vm1295_vm6, %v1166_v1  ;;  %4181 = vmatmul.mubr.f32.gmra.mrb[54].mxu1 %v3629_v7  ;;  %3233 = vrot.lane.b32.xlu0 %v11585_v13, %s9607_s20  ;;  %v11641_v7 = vld [vmem:[#allocation2 + $0x30f] sm:$0xff] }
 0x2c8   :  { %1951 = vrot.lane.b32.xlu1 %v11494_v16, %s9607_s20  ;;  %v11597_v16 = vld [vmem:[#allocation2 + $0x3a8] sm:$0xff]  ;;  %2247 = vst.msk [vmem:[#allocation5 + $0x500] sm:$0xff] %vm703_vm4, %v11601_v53 }
 0x2c9   :  { %v2391_v60 = vpop.permute.xlu0 %2390  ;;  %v3543_v52 = vld [vmem:[#allocation5 + $0x20] sm:$0xff]  ;;  %2246 = vst.msk [vmem:[#allocation5 + $0x4e8] sm:$0xff] %vm703_vm4, %v11597_v16 }
 0x2ca   :  { %2580 = vst.msk [vmem:[#allocation5 + $0x38] sm:$0xff] %vm1295_vm6, %v2391_v60  ;;  %v2834_v18 = vpop.permute.xlu1 %2833  ;;  %4035 = vmatprep.mubr.f32.mxu0 %v3543_v52  ;;  %v3542_v59 = vld [vmem:[#allocation5 + $0x18] sm:$0xff] }
 0x2cb   :  { %2994 = vst.msk [vmem:[#allocation5 + $0x2f0] sm:$0xff] %vm1680_vm7, %v2834_v18  ;;  %4036 = vmatmul.mubr.f32.gmra.mrb[66].mxu0 %v3542_v59  ;;  %2466 = vrot.lane.b32.xlu0 %v11201_v31, %s9606_s28 }
 0x2cc   :  { %1183 = vrot.lane.b32.xlu1 %v11471_v55, %s9606_s28  ;;  %v902_v55 = vld [vmem:[#allocation2 + $0x3af] sm:$0xff] }
 0x2cd   :  { %v1108_v3 = vpop.permute.xlu0 %1107  ;;  %966 = vst.msk [vmem:[#allocation5 + $0x528] sm:$0xff] %vm703_vm4, %v902_v55  ;;  %v8968_v0 = vpop.f32.mrb[54].mxu0 }
 0x2ce   :  { %v1551_v4 = vpop.permute.xlu1 %1550  ;;  %1298 = vst.msk [vmem:[#allocation5 + $0x30] sm:$0xff] %vm1295_vm6, %v1108_v3  ;;  %v659_v47 = vadd.f32 %v11275_v48, %v8968_v0  ;;  %v653_v27 = vpop.f32.mrb[55].mxu0  ;;  %v11670_v0 = vld [vmem:[#allocation2 + $0x327] sm:$0xff] }
 0x2cf   :  { %1712 = vst.msk [vmem:[#allocation5 + $0x2e8] sm:$0xff] %vm1680_vm7, %v1551_v4  ;;  %2851 = vrot.lane.b32.xlu0 %v11599_v34, %s9605_s27 }
 0x2d0   :  { %1568 = vrot.lane.b32.xlu1 %v11122_v39, %s9605_s27  ;;  %v654_v39 = vadd.f32 %v11275_v48, %v653_v27  ;;  %759 = vst.msk [vmem:[#allocation2 + $0x3d0] sm:$0xff] %vm703_vm4, %v659_v47 }
 0x2d1   :  { %v2776_v56 = vpop.permute.xlu0 %2775 }
 0x2d2   :  { %v3218_v14 = vpop.permute.xlu1 %3217  ;;  %2965 = vst.msk [vmem:[#allocation5 + $0x38] sm:$0xff] %vm1680_vm7, %v2776_v56 }
 0x2d3   :  { %3378 = vst.msk [vmem:[#allocation5 + $0x2f0] sm:$0xff] %vm2065_vm8, %v3218_v14  ;;  %3235 = vrot.lane.b32.xlu0 %v11620_v26, %s9607_s20 }
 0x2d4   :  { %1953 = vrot.lane.b32.xlu1 %v11531_v40, %s9607_s20  ;;  %758 = vst.msk [vmem:[#allocation2 + $0x3c8] sm:$0xff] %vm703_vm4, %v654_v39 }
 0x2d5   :  { %v1493_v38 = vpop.permute.xlu0 %1492 }
 0x2d6   :  { %v11626_v10 = vpop.f32.mrb[22].mxu1  ;;  %v1936_v44 = vpop.permute.xlu1 %1935  ;;  %1683 = vst.msk [vmem:[#allocation5 + $0x30] sm:$0xff] %vm1680_vm7, %v1493_v38  ;;  %v3544_v38 = vld [vmem:[#allocation5 + $0x28] sm:$0xff] }
 0x2d7   :  { %v4104_v50 = vpop.f32.mrb[23].mxu1  ;;  %2097 = vst.msk [vmem:[#allocation5 + $0x2e8] sm:$0xff] %vm2065_vm8, %v1936_v44  ;;  %2468 = vrot.lane.b32.xlu0 %v11195_v11, %s9606_s28  ;;  %v2185_v14 = vld [vmem:[#allocation2 + $0x3d0] sm:$0xff]  ;;  %v3547_v44 = vld [vmem:[#allocation5 + $0x40] sm:$0xff] }
 0x2d8   :  { %1185 = vrot.lane.b32.xlu1 %v11510_v33, %s9606_s28  ;;  %v11643_v33 = vld [vmem:[#allocation2 + $0x3d1] sm:$0xff]  ;;  %2249 = vst.msk [vmem:[#allocation5 + $0x530] sm:$0xff] %vm703_vm4, %v2185_v14  ;;  %v3559_v14 = vld [vmem:[#allocation5 + $0xa0] sm:$0xff] }
 0x2d9   :  { %v3160_v8 = vpop.permute.xlu0 %3159  ;;  %3528 = vst.msk [vmem:[#allocation5 + $0x508] sm:$0xff] %vm703_vm4, %v11643_v33 }
 0x2da   :  { %v11635_v40 = vpop.f32.mrb[24].mxu1  ;;  %v1878_v42 = vpop.permute.xlu1 %1877  ;;  %v3633_v46 = vld [vmem:[#allocation5 + $0x2f0] sm:$0xff]  ;;  %3349 = vst.msk [vmem:[#allocation5 + $0x38] sm:$0xff] %vm2065_vm8, %v3160_v8 }
 0x2db   :  { %2068 = vst.msk [vmem:[#allocation5 + $0x30] sm:$0xff] %vm2065_vm8, %v1878_v42  ;;  %v4109_v1 = vpop.f32.mrb[25].mxu1  ;;  %4185 = vmatprep.mubr.f32.mxu1 %v3633_v46  ;;  %2853 = vrot.lane.b32.xlu0 %v11641_v7, %s9605_s27  ;;  %v11649_v60 = vld [vmem:[#allocation2 + $0x3c9] sm:$0xff] }
 0x2dc   :  { %1570 = vrot.lane.b32.xlu1 %v11115_v58, %s9605_s27  ;;  %3527 = vst.msk [vmem:[#allocation5 + $0x4f0] sm:$0xff] %vm703_vm4, %v11649_v60  ;;  %v11657_v58 = vld [vmem:[#allocation2 + $0x310] sm:$0xff]  ;;  %v11667_v56 = vld [vmem:[#allocation2 + $0x3c8] sm:$0xff]  ;;  %v3550_v1 = vld [vmem:[#allocation5 + $0x58] sm:$0xff] }
 0x2dd   :  { %v2451_v18 = vpop.permute.xlu0 %2450  ;;  %2248 = vst.msk [vmem:[#allocation5 + $0x518] sm:$0xff] %vm703_vm4, %v11667_v56  ;;  %v904_v39 = vld [vmem:[#allocation2 + $0x3cf] sm:$0xff] }
 0x2de   :  { %v1168_v52 = vpop.permute.xlu1 %1167  ;;  %v3632_v59 = vld [vmem:[#allocation5 + $0x2e8] sm:$0xff]  ;;  %2610 = vst.msk [vmem:[#allocation5 + $0x308] sm:$0xff] %vm1295_vm6, %v2451_v18  ;;  %v3553_v18 = vld [vmem:[#allocation5 + $0x70] sm:$0xff] }
 0x2df   :  { %1328 = vst.msk [vmem:[#allocation5 + $0x300] sm:$0xff] %vm1295_vm6, %v1168_v52  ;;  %4186 = vmatmul.mubr.f32.gmra.mrb[56].mxu1 %v3632_v59  ;;  %3237 = vrot.lane.b32.xlu0 %v11657_v58, %s9607_s20 }
 0x2e0   :  { %1955 = vrot.lane.b32.xlu1 %v11571_v51, %s9607_s20  ;;  %v3541_v51 = vld [vmem:[#allocation5 + $0x10] sm:$0xff]  ;;  %968 = vst.msk [vmem:[#allocation5 + $0x558] sm:$0xff] %vm703_vm4, %v904_v39 }
 0x2e1   :  { %v2836_v43 = vpop.permute.xlu0 %2835  ;;  %v3546_v4 = vld [vmem:[#allocation5 + $0x38] sm:$0xff] }
 0x2e2   :  { %v1553_v3 = vpop.permute.xlu1 %1552  ;;  %v3545_v55 = vld [vmem:[#allocation5 + $0x30] sm:$0xff]  ;;  %2995 = vst.msk [vmem:[#allocation5 + $0x308] sm:$0xff] %vm1680_vm7, %v2836_v43  ;;  %4040 = vmatprep.mubr.f32.mxu0 %v3546_v4 }
 0x2e3   :  { %1713 = vst.msk [vmem:[#allocation5 + $0x300] sm:$0xff] %vm1680_vm7, %v1553_v3  ;;  %2470 = vrot.lane.b32.xlu0 %v11245_v49, %s9606_s28  ;;  %4041 = vmatmul.mubr.f32.gmra.mrb[68].mxu0 %v3545_v55 }
 0x2e4   :  { %1187 = vrot.lane.b32.xlu1 %v11549_v29, %s9606_s28  ;;  %8989 = vmatprep.mubr.msk.f32.mxu0 %vm703_vm4, %v3541_v51  ;;  %v903_v29 = vld [vmem:[#allocation2 + $0x3c7] sm:$0xff] }
 0x2e5   :  { %v3220_v27 = vpop.permute.xlu0 %3219  ;;  %967 = vst.msk [vmem:[#allocation5 + $0x540] sm:$0xff] %vm703_vm4, %v903_v29  ;;  %v8971_v50 = vpop.f32.mrb[56].mxu0 }
 0x2e6   :  { %v1938_v47 = vpop.permute.xlu1 %1937  ;;  %3379 = vst.msk [vmem:[#allocation5 + $0x308] sm:$0xff] %vm2065_vm8, %v3220_v27  ;;  %v669_v46 = vadd.f32 %v11275_v48, %v8971_v50  ;;  %v663_v52 = vpop.f32.mrb[57].mxu0  ;;  %v3565_v50 = vld [vmem:[#allocation5 + $0xd0] sm:$0xff] }
 0x2e7   :  { %2098 = vst.msk [vmem:[#allocation5 + $0x300] sm:$0xff] %vm2065_vm8, %v1938_v47  ;;  %2855 = vrot.lane.b32.xlu0 %v11670_v0, %s9605_s27  ;;  %8990 = vmatmul.mubr.msk.f32.vlgmr.msra.gmra.mrb[70].mxu0 %vm703_vm4, %v3544_v38  ;;  %v664_v59 = vadd.f32 %v11275_v48, %v663_v52  ;;  %v3556_v48 = vld [vmem:[#allocation5 + $0x88] sm:$0xff]  ;;  %v3571_v52 = vld [vmem:[#allocation5 + $0x100] sm:$0xff] }
 0x2e8   :  { %1572 = vrot.lane.b32.xlu1 %v11201_v31, %s9605_s27  ;;  %8992 = vmatprep.mubr.msk.f32.mxu0 %vm703_vm4, %v3547_v44  ;;  %v11690_v31 = vld [vmem:[#allocation2 + $0x328] sm:$0xff]  ;;  %761 = vst.msk [vmem:[#allocation2 + $0x3f0] sm:$0xff] %vm703_vm4, %v669_v46  ;;  %v3562_v44 = vld [vmem:[#allocation5 + $0xb8] sm:$0xff]  ;;  %v11733_v46 = vld [vmem:[#allocation2 + $0x330] sm:$0xff] }
 0x2e9   :  { %v2453_v8 = vpop.permute.xlu0 %2452  ;;  %760 = vst.msk [vmem:[#allocation2 + $0x3e8] sm:$0xff] %vm703_vm4, %v664_v59 }
 0x2ea   :  { %v1170_v42 = vpop.permute.xlu1 %1169  ;;  %2611 = vst.msk [vmem:[#allocation5 + $0x320] sm:$0xff] %vm1295_vm6, %v2453_v8 }
 0x2eb   :  { %1329 = vst.msk [vmem:[#allocation5 + $0x318] sm:$0xff] %vm1295_vm6, %v1170_v42  ;;  %3239 = vrot.lane.b32.xlu0 %v11690_v31, %s9607_s20  ;;  %8993 = vmatmul.mubr.msk.f32.gmra.mrb[72].mxu0 %vm703_vm4, %v3550_v1  ;;  %v3568_v1 = vld [vmem:[#allocation5 + $0xe8] sm:$0xff] }
 0x2ec   :  { %1957 = vrot.lane.b32.xlu1 %v11599_v34, %s9607_s20  ;;  %8995 = vmatprep.mubr.msk.f32.mxu0 %vm703_vm4, %v3553_v18 }
 0x2ed   :  { %v2838_v34 = vpop.permute.xlu0 %2837  ;;  %v3636_v4 = vld [vmem:[#allocation5 + $0x308] sm:$0xff] }
 0x2ee   :  { %v11698_v3 = vpop.f32.mrb[26].mxu1  ;;  %v1555_v43 = vpop.permute.xlu1 %1554  ;;  %v3635_v55 = vld [vmem:[#allocation5 + $0x300] sm:$0xff]  ;;  %2996 = vst.msk [vmem:[#allocation5 + $0x320] sm:$0xff] %vm1680_vm7, %v2838_v34  ;;  %4190 = vmatprep.mubr.f32.mxu1 %v3636_v4  ;;  %v3577_v4 = vld [vmem:[#allocation5 + $0x130] sm:$0xff] }
 0x2ef   :  { %1714 = vst.msk [vmem:[#allocation5 + $0x318] sm:$0xff] %vm1680_vm7, %v1555_v43  ;;  %v4114_v51 = vpop.f32.mrb[27].mxu1  ;;  %2472 = vrot.lane.b32.xlu0 %v11239_v12, %s9606_s28  ;;  %4191 = vmatmul.mubr.f32.gmra.mrb[58].mxu1 %v3635_v55  ;;  %v11717_v38 = vld [vmem:[#allocation2 + $0x3f1] sm:$0xff]  ;;  %v11746_v55 = vld [vmem:[#allocation2 + $0x347] sm:$0xff] }
 0x2f0   :  { %1189 = vrot.lane.b32.xlu1 %v11585_v13, %s9606_s28  ;;  %8996 = vmatmul.mubr.msk.f32.gmra.mrb[74].mxu0 %vm703_vm4, %v3556_v48  ;;  %v11715_v13 = vld [vmem:[#allocation2 + $0x32f] sm:$0xff]  ;;  %3530 = vst.msk [vmem:[#allocation5 + $0x538] sm:$0xff] %vm703_vm4, %v11717_v38 }
 0x2f1   :  { %8998 = vmatprep.mubr.msk.f32.mxu0 %vm703_vm4, %v3559_v14  ;;  %v3222_v29 = vpop.permute.xlu0 %3221  ;;  %v11724_v42 = vld [vmem:[#allocation2 + $0x3e9] sm:$0xff] }
 0x2f2   :  { %v11708_v47 = vpop.f32.mrb[28].mxu1  ;;  %v1940_v27 = vpop.permute.xlu1 %1939  ;;  %3380 = vst.msk [vmem:[#allocation5 + $0x320] sm:$0xff] %vm2065_vm8, %v3222_v29  ;;  %v2186_v14 = vld [vmem:[#allocation2 + $0x3e8] sm:$0xff] }
 0x2f3   :  { %2099 = vst.msk [vmem:[#allocation5 + $0x318] sm:$0xff] %vm2065_vm8, %v1940_v27  ;;  %v4119_v39 = vpop.f32.mrb[29].mxu1  ;;  %2857 = vrot.lane.b32.xlu0 %v11715_v13, %s9605_s27  ;;  %v2187_v27 = vld [vmem:[#allocation2 + $0x3f0] sm:$0xff]  ;;  %v905_v29 = vld [vmem:[#allocation2 + $0x3e7] sm:$0xff] }
 0x2f4   :  { %1574 = vrot.lane.b32.xlu1 %v11195_v11, %s9605_s27  ;;  %8999 = vmatmul.mubr.msk.f32.gmra.mrb[76].mxu0 %vm703_vm4, %v3562_v44  ;;  %3529 = vst.msk [vmem:[#allocation5 + $0x520] sm:$0xff] %vm703_vm4, %v11724_v42  ;;  %2250 = vst.msk [vmem:[#allocation5 + $0x548] sm:$0xff] %vm703_vm4, %v2186_v14  ;;  %v3580_v39 = vld [vmem:[#allocation5 + $0x148] sm:$0xff]  ;;  %v8974_v44 = vpop.f32.mrb[58].mxu0 }
 0x2f5   :  { %9001 = vmatprep.mubr.msk.f32.mxu0 %vm703_vm4, %v3565_v50  ;;  %v2455_v11 = vpop.permute.xlu0 %2454  ;;  %2251 = vst.msk [vmem:[#allocation5 + $0x560] sm:$0xff] %vm703_vm4, %v2187_v27  ;;  %969 = vst.msk [vmem:[#allocation5 + $0x570] sm:$0xff] %vm703_vm4, %v905_v29  ;;  %v3583_v50 = vld [vmem:[#allocation5 + $0x160] sm:$0xff] }
 0x2f6   :  { %v1172_v8 = vpop.permute.xlu1 %1171  ;;  %2612 = vst.msk [vmem:[#allocation5 + $0x338] sm:$0xff] %vm1295_vm6, %v2455_v11  ;;  %v673_v11 = vpop.f32.mrb[59].mxu0 }
 0x2f7   :  { %1330 = vst.msk [vmem:[#allocation5 + $0x330] sm:$0xff] %vm1295_vm6, %v1172_v8  ;;  %3241 = vrot.lane.b32.xlu0 %v11733_v46, %s9607_s20 }
 0x2f8   :  { %1959 = vrot.lane.b32.xlu1 %v11641_v7, %s9607_s20  ;;  %9002 = vmatmul.mubr.msk.f32.gmra.mrb[78].mxu0 %vm703_vm4, %v3568_v1  ;;  %v3574_v7 = vld [vmem:[#allocation5 + $0x118] sm:$0xff] }
 0x2f9   :  { %9004 = vmatprep.mubr.msk.f32.mxu0 %vm703_vm4, %v3571_v52  ;;  %v2840_v59 = vpop.permute.xlu0 %2839  ;;  %v3639_v43 = vld [vmem:[#allocation5 + $0x320] sm:$0xff] }
 0x2fa   :  { %v1557_v18 = vpop.permute.xlu1 %1556  ;;  %v3638_v34 = vld [vmem:[#allocation5 + $0x318] sm:$0xff]  ;;  %2997 = vst.msk [vmem:[#allocation5 + $0x338] sm:$0xff] %vm1680_vm7, %v2840_v59  ;;  %4195 = vmatprep.mubr.f32.mxu1 %v3639_v43  ;;  %v11768_v59 = vld [vmem:[#allocation2 + $0x348] sm:$0xff] }
 0x2fb   :  { %1715 = vst.msk [vmem:[#allocation5 + $0x330] sm:$0xff] %vm1680_vm7, %v1557_v18  ;;  %2474 = vrot.lane.b32.xlu0 %v11313_v17, %s9606_s28  ;;  %4196 = vmatmul.mubr.f32.gmra.mrb[60].mxu1 %v3638_v34  ;;  %v3586_v43 = vld [vmem:[#allocation5 + $0x178] sm:$0xff]  ;;  %v8977_v34 = vpop.f32.mrb[60].mxu0 }
 0x2fc   :  { %1191 = vrot.lane.b32.xlu1 %v11620_v26, %s9606_s28  ;;  %9005 = vmatmul.mubr.msk.f32.gmra.mrb[80].mxu0 %vm703_vm4, %v3574_v7  ;;  %v906_v26 = vld [vmem:[#allocation2 + $0x3ef] sm:$0xff] }
 0x2fd   :  { %9007 = vmatprep.mubr.msk.f32.mxu0 %vm703_vm4, %v3577_v4  ;;  %v3224_v48 = vpop.permute.xlu0 %3223  ;;  %970 = vst.msk [vmem:[#allocation5 + $0x588] sm:$0xff] %vm703_vm4, %v906_v26  ;;  %v3589_v7 = vld [vmem:[#allocation5 + $0x190] sm:$0xff] }
 0x2fe   :  { %v1942_v51 = vpop.permute.xlu1 %1941  ;;  %3381 = vst.msk [vmem:[#allocation5 + $0x338] sm:$0xff] %vm2065_vm8, %v3224_v48  ;;  %v683_v48 = vpop.f32.mrb[61].mxu0 }
 0x2ff   :  { %2100 = vst.msk [vmem:[#allocation5 + $0x330] sm:$0xff] %vm2065_vm8, %v1942_v51  ;;  %2859 = vrot.lane.b32.xlu0 %v11746_v55, %s9605_s27 }
 0x300   :  { %1576 = vrot.lane.b32.xlu1 %v11245_v49, %s9605_s27  ;;  %9008 = vmatmul.mubr.msk.f32.gmra.mrb[82].mxu0 %vm703_vm4, %v3580_v39  ;;  %v9574_v49 = vld [vmem:[%s14446_s2] ss:$0 sm:$0xff] }
 0x301   :  { %v679_v8 = vadd.f32 %v9574_v49, %v8974_v44  ;;  %9010 = vmatprep.mubr.msk.f32.mxu0 %vm703_vm4, %v3583_v50  ;;  %v2457_v52 = vpop.permute.xlu0 %2456  ;;  %v674_v18 = vadd.f32 %v9574_v49, %v673_v11  ;;  %v689_v51 = vadd.f32 %v9574_v49, %v8977_v34  ;;  %v684_v26 = vadd.f32 %v9574_v49, %v683_v48  ;;  %v8980_v44 = vpop.f32.mrb[62].mxu0  ;;  %v3592_v50 = vld [vmem:[#allocation5 + $0x1a8] sm:$0xff]  ;;  %v3598_v48 = vld [vmem:[#allocation5 + $0x1d8] sm:$0xff] }
 0x302   :  { %v1174_v1 = vpop.permute.xlu1 %1173  ;;  %2613 = vst.msk [vmem:[#allocation5 + $0x350] sm:$0xff] %vm1295_vm6, %v2457_v52  ;;  %v693_v11 = vpop.f32.mrb[63].mxu0 }
 0x303   :  { %1331 = vst.msk [vmem:[#allocation5 + $0x348] sm:$0xff] %vm1295_vm6, %v1174_v1  ;;  %3243 = vrot.lane.b32.xlu0 %v11768_v59, %s9607_s20  ;;  %v3595_v1 = vld [vmem:[#allocation5 + $0x1c0] sm:$0xff] }
 0x304   :  { %1961 = vrot.lane.b32.xlu1 %v11670_v0, %s9607_s20  ;;  %763 = vst.msk [vmem:[#allocation2 + $0x410] sm:$0xff] %vm703_vm4, %v679_v8  ;;  %762 = vst.msk [vmem:[#allocation2 + $0x408] sm:$0xff] %vm703_vm4, %v674_v18  ;;  %9011 = vmatmul.mubr.msk.f32.gmra.mrb[84].mxu0 %vm703_vm4, %v3586_v43  ;;  %v699_v8 = vadd.f32 %v9574_v49, %v8980_v44  ;;  %v694_v18 = vadd.f32 %v9574_v49, %v693_v11  ;;  %v3607_v44 = vld [vmem:[#allocation5 + $0x220] sm:$0xff] }
 0x305   :  { %9013 = vmatprep.mubr.msk.f32.mxu0 %vm703_vm4, %v3589_v7  ;;  %v2842_v14 = vpop.permute.xlu0 %2841  ;;  %v3642_v27 = vld [vmem:[#allocation5 + $0x338] sm:$0xff]  ;;  %765 = vst.msk [vmem:[#allocation2 + $0x430] sm:$0xff] %vm703_vm4, %v689_v51  ;;  %764 = vst.msk [vmem:[#allocation2 + $0x428] sm:$0xff] %vm703_vm4, %v684_v26  ;;  %v11797_v51 = vld [vmem:[#allocation2 + $0x34f] sm:$0xff] }
 0x306   :  { %v11775_v4 = vpop.f32.mrb[30].mxu1  ;;  %v1559_v0 = vpop.permute.xlu1 %1558  ;;  %v3641_v29 = vld [vmem:[#allocation5 + $0x330] sm:$0xff]  ;;  %2998 = vst.msk [vmem:[#allocation5 + $0x350] sm:$0xff] %vm1680_vm7, %v2842_v14  ;;  %4200 = vmatprep.mubr.f32.mxu1 %v3642_v27 }
 0x307   :  { %1716 = vst.msk [vmem:[#allocation5 + $0x348] sm:$0xff] %vm1680_vm7, %v1559_v0  ;;  %v4124_v39 = vpop.f32.mrb[31].mxu1  ;;  %2476 = vrot.lane.b32.xlu0 %v11305_v23, %s9606_s28  ;;  %4201 = vmatmul.mubr.f32.gmra.mrb[62].mxu1 %v3641_v29  ;;  %v3601_v0 = vld [vmem:[#allocation5 + $0x1f0] sm:$0xff] }
 0x308   :  { %1193 = vrot.lane.b32.xlu1 %v11657_v58, %s9606_s28  ;;  %9014 = vmatmul.mubr.msk.f32.gmra.mrb[86].mxu0 %vm703_vm4, %v3592_v50  ;;  %767 = vst.msk [vmem:[#allocation2 + $0x450] sm:$0xff] %vm703_vm4, %v699_v8  ;;  %766 = vst.msk [vmem:[#allocation2 + $0x448] sm:$0xff] %vm703_vm4, %v694_v18  ;;  %v11816_v29 = vld [vmem:[#allocation2 + $0x350] sm:$0xff]  ;;  %v3604_v39 = vld [vmem:[#allocation5 + $0x208] sm:$0xff] }
 0x309   :  { %9016 = vmatprep.mubr.msk.f32.mxu0 %vm703_vm4, %v3595_v1  ;;  %v3226_v43 = vpop.permute.xlu0 %3225 }
 0x30a   :  { %v11787_v52 = vpop.f32.mrb[32].mxu1  ;;  %v1944_v58 = vpop.permute.xlu1 %1943  ;;  %3382 = vst.msk [vmem:[#allocation5 + $0x350] sm:$0xff] %vm2065_vm8, %v3226_v43  ;;  %v3613_v43 = vld [vmem:[#allocation5 + $0x250] sm:$0xff] }
 0x30b   :  { %v11790_v34 = vld [vmem:[#allocation2 + $0x411] sm:$0xff]  ;;  %2101 = vst.msk [vmem:[#allocation5 + $0x348] sm:$0xff] %vm2065_vm8, %v1944_v58  ;;  %v4129_v7 = vpop.f32.mrb[33].mxu1  ;;  %v11801_v49 = vld [vmem:[#allocation2 + $0x409] sm:$0xff]  ;;  %2861 = vrot.lane.b32.xlu0 %v11797_v51, %s9605_s27 }
 0x30c   :  { %1578 = vrot.lane.b32.xlu1 %v11239_v12, %s9605_s27  ;;  %3532 = vst.msk [vmem:[#allocation5 + $0x568] sm:$0xff] %vm703_vm4, %v11790_v34  ;;  %3531 = vst.msk [vmem:[#allocation5 + $0x550] sm:$0xff] %vm703_vm4, %v11801_v49  ;;  %9017 = vmatmul.mubr.msk.f32.gmra.mrb[88].mxu0 %vm703_vm4, %v3598_v48  ;;  %v11810_v27 = vld [vmem:[#allocation2 + $0x431] sm:$0xff]  ;;  %v11820_v26 = vld [vmem:[#allocation2 + $0x429] sm:$0xff] }
 0x30d   :  { %9019 = vmatprep.mubr.msk.f32.mxu0 %vm703_vm4, %v3601_v0  ;;  %v2459_v14 = vpop.permute.xlu0 %2458  ;;  %3534 = vst.msk [vmem:[#allocation5 + $0x598] sm:$0xff] %vm703_vm4, %v11810_v27  ;;  %3533 = vst.msk [vmem:[#allocation5 + $0x580] sm:$0xff] %vm703_vm4, %v11820_v26  ;;  %v3610_v58 = vld [vmem:[#allocation5 + $0x238] sm:$0xff]  ;;  %v11843_v7 = vld [vmem:[#allocation2 + $0x367] sm:$0xff] }
 0x30e   :  { %v1176_v12 = vpop.permute.xlu1 %1175  ;;  %2614 = vst.msk [vmem:[#allocation5 + $0x368] sm:$0xff] %vm1295_vm6, %v2459_v14  ;;  %v2188_v48 = vld [vmem:[#allocation2 + $0x408] sm:$0xff] }
 0x30f   :  { %1332 = vst.msk [vmem:[#allocation5 + $0x360] sm:$0xff] %vm1295_vm6, %v1176_v12  ;;  %3245 = vrot.lane.b32.xlu0 %v11816_v29, %s9607_s20  ;;  %v11827_v50 = vld [vmem:[#allocation2 + $0x451] sm:$0xff]  ;;  %v11832_v18 = vld [vmem:[#allocation2 + $0x449] sm:$0xff] }
 0x310   :  { %1963 = vrot.lane.b32.xlu1 %v11715_v13, %s9607_s20  ;;  %9020 = vmatmul.mubr.msk.f32.gmra.mrb[90].mxu0 %vm703_vm4, %v3604_v39  ;;  %3536 = vst.msk [vmem:[#allocation5 + $0x5c8] sm:$0xff] %vm703_vm4, %v11827_v50  ;;  %3535 = vst.msk [vmem:[#allocation5 + $0x5b0] sm:$0xff] %vm703_vm4, %v11832_v18  ;;  %v907_v14 = vld [vmem:[#allocation2 + $0x407] sm:$0xff]  ;;  %v908_v39 = vld [vmem:[#allocation2 + $0x40f] sm:$0xff] }
 0x311   :  { %9022 = vmatprep.mubr.msk.f32.mxu0 %vm703_vm4, %v3607_v44  ;;  %v2844_v8 = vpop.permute.xlu0 %2843  ;;  %v3645_v11 = vld [vmem:[#allocation5 + $0x350] sm:$0xff]  ;;  %2252 = vst.msk [vmem:[#allocation5 + $0x578] sm:$0xff] %vm703_vm4, %v2188_v48  ;;  %971 = vst.msk [vmem:[#allocation5 + $0x5a0] sm:$0xff] %vm703_vm4, %v907_v14  ;;  %v3616_v44 = vld [vmem:[#allocation5 + $0x268] sm:$0xff] }
 0x312   :  { %v1561_v13 = vpop.permute.xlu1 %1560  ;;  %v3644_v1 = vld [vmem:[#allocation5 + $0x348] sm:$0xff]  ;;  %2999 = vst.msk [vmem:[#allocation5 + $0x368] sm:$0xff] %vm1680_vm7, %v2844_v8  ;;  %4205 = vmatprep.mubr.f32.mxu1 %v3645_v11  ;;  %v3631_v14 = vld [vmem:[#allocation5 + $0x2e0] sm:$0xff] }
 0x313   :  { %1717 = vst.msk [vmem:[#allocation5 + $0x360] sm:$0xff] %vm1680_vm7, %v1561_v13  ;;  %2478 = vrot.lane.b32.xlu0 %v11377_v54, %s9606_s28  ;;  %4206 = vmatmul.mubr.f32.gmra.mrb[64].mxu1 %v3644_v1  ;;  %v3619_v13 = vld [vmem:[#allocation5 + $0x280] sm:$0xff]  ;;  %v3622_v1 = vld [vmem:[#allocation5 + $0x298] sm:$0xff] }
 0x314   :  { %1195 = vrot.lane.b32.xlu1 %v11690_v31, %s9606_s28  ;;  %9023 = vmatmul.mubr.msk.f32.gmra.mrb[92].mxu0 %vm703_vm4, %v3610_v58  ;;  %v2189_v31 = vld [vmem:[#allocation2 + $0x410] sm:$0xff]  ;;  %972 = vst.msk [vmem:[#allocation5 + $0x5b8] sm:$0xff] %vm703_vm4, %v908_v39  ;;  %v3628_v39 = vld [vmem:[#allocation5 + $0x2c8] sm:$0xff] }
 0x315   :  { %9025 = vmatprep.mubr.msk.f32.mxu0 %vm703_vm4, %v3613_v43  ;;  %v3228_v12 = vpop.permute.xlu0 %3227  ;;  %2253 = vst.msk [vmem:[#allocation5 + $0x590] sm:$0xff] %vm703_vm4, %v2189_v31  ;;  %v3625_v58 = vld [vmem:[#allocation5 + $0x2b0] sm:$0xff] }
 0x316   :  { %v1946_v0 = vpop.permute.xlu1 %1945  ;;  %3383 = vst.msk [vmem:[#allocation5 + $0x368] sm:$0xff] %vm2065_vm8, %v3228_v12 }
 0x317   :  { %2102 = vst.msk [vmem:[#allocation5 + $0x360] sm:$0xff] %vm2065_vm8, %v1946_v0  ;;  %2863 = vrot.lane.b32.xlu0 %v11843_v7, %s9605_s27 }
 0x318   :  { %1580 = vrot.lane.b32.xlu1 %v11313_v17, %s9605_s27  ;;  %9026 = vmatmul.mubr.msk.f32.gmra.mrb[94].mxu0 %vm703_vm4, %v3616_v44  ;;  %v11862_v17 = vld [vmem:[#allocation2 + $0x368] sm:$0xff] }
 0x319   :  { %9028 = vmatprep.mubr.msk.f32.mxu0 %vm703_vm4, %v3619_v13  ;;  %v2461_v11 = vpop.permute.xlu0 %2460 }
 0x31a   :  { %v1178_v8 = vpop.permute.xlu1 %1177  ;;  %2615 = vst.msk [vmem:[#allocation5 + $0x380] sm:$0xff] %vm1295_vm6, %v2461_v11  ;;  %v3634_v11 = vld [vmem:[#allocation5 + $0x2f8] sm:$0xff] }
 0x31b   :  { %1333 = vst.msk [vmem:[#allocation5 + $0x378] sm:$0xff] %vm1295_vm6, %v1178_v8  ;;  %3247 = vrot.lane.b32.xlu0 %v11862_v17, %s9607_s20 }
 0x31c   :  { %1965 = vrot.lane.b32.xlu1 %v11746_v55, %s9607_s20  ;;  %9029 = vmatmul.mubr.msk.f32.gmra.mrb[96].mxu0 %vm703_vm4, %v3622_v1  ;;  %v11884_v1 = vld [vmem:[#allocation2 + $0x36f] sm:$0xff] }
 0x31d   :  { %9031 = vmatprep.mubr.msk.f32.mxu0 %vm703_vm4, %v3625_v58  ;;  %v2846_v0 = vpop.permute.xlu0 %2845  ;;  %v3648_v12 = vld [vmem:[#allocation5 + $0x368] sm:$0xff]  ;;  %v3637_v58 = vld [vmem:[#allocation5 + $0x310] sm:$0xff] }
 0x31e   :  { %v11867_v43 = vpop.f32.mrb[34].mxu1  ;;  %v1563_v48 = vpop.permute.xlu1 %1562  ;;  %v3647_v31 = vld [vmem:[#allocation5 + $0x360] sm:$0xff]  ;;  %3000 = vst.msk [vmem:[#allocation5 + $0x380] sm:$0xff] %vm1680_vm7, %v2846_v0  ;;  %4210 = vmatprep.mubr.f32.mxu1 %v3648_v12 }
 0x31f   :  { %1718 = vst.msk [vmem:[#allocation5 + $0x378] sm:$0xff] %vm1680_vm7, %v1563_v48  ;;  %v4134_v55 = vpop.f32.mrb[35].mxu1  ;;  %2480 = vrot.lane.b32.xlu0 %v11367_v6, %s9606_s28  ;;  %4211 = vmatmul.mubr.f32.gmra.mrb[66].mxu1 %v3647_v31  ;;  %v3643_v12 = vld [vmem:[#allocation5 + $0x340] sm:$0xff] }
 0x320   :  { %1197 = vrot.lane.b32.xlu1 %v11733_v46, %s9606_s28  ;;  %9032 = vmatmul.mubr.msk.f32.gmra.mrb[98].mxu0 %vm703_vm4, %v3628_v39 }
 0x321   :  { %v3230_v8 = vpop.permute.xlu0 %3229  ;;  %9034 = vmatprep.mubr.msk.f32.mxu0 %vm703_vm4, %v3631_v14 }
 0x322   :  { %v11877_v44 = vpop.f32.mrb[36].mxu1  ;;  %v1948_v13 = vpop.permute.xlu1 %1947  ;;  %3384 = vst.msk [vmem:[#allocation5 + $0x380] sm:$0xff] %vm2065_vm8, %v3230_v8  ;;  %v11905_v8 = vld [vmem:[#allocation2 + $0x387] sm:$0xff] }
 0x323   :  { %2103 = vst.msk [vmem:[#allocation5 + $0x378] sm:$0xff] %vm2065_vm8, %v1948_v13  ;;  %v4139_v46 = vpop.f32.mrb[37].mxu1  ;;  %2865 = vrot.lane.b32.xlu0 %v11884_v1, %s9605_s27  ;;  %v3649_v13 = vld [vmem:[#allocation5 + $0x370] sm:$0xff] }
 0x324   :  { %1582 = vrot.lane.b32.xlu1 %v11305_v23, %s9605_s27  ;;  %9035 = vmatmul.mubr.msk.f32.gmra.mrb[100].mxu0 %vm703_vm4, %v3634_v11  ;;  %v3640_v23 = vld [vmem:[#allocation5 + $0x328] sm:$0xff] }
 0x325   :  { %9037 = vmatprep.mubr.msk.f32.mxu0 %vm703_vm4, %v3637_v58  ;;  %v2463_v0 = vpop.permute.xlu0 %2462  ;;  %v2190_v11 = vld [vmem:[#allocation2 + $0x428] sm:$0xff] }
 0x326   :  { %v1180_v48 = vpop.permute.xlu1 %1179  ;;  %2616 = vst.msk [vmem:[#allocation5 + $0x398] sm:$0xff] %vm1295_vm6, %v2463_v0  ;;  %v909_v0 = vld [vmem:[#allocation2 + $0x427] sm:$0xff] }
 0x327   :  { %1334 = vst.msk [vmem:[#allocation5 + $0x390] sm:$0xff] %vm1295_vm6, %v1180_v48  ;;  %3249 = vrot.lane.b32.xlu0 %v11453_v22, %s9607_s20  ;;  %v2191_v48 = vld [vmem:[#allocation2 + $0x430] sm:$0xff] }
 0x328   :  { %1967 = vrot.lane.b32.xlu1 %v11797_v51, %s9607_s20  ;;  %9038 = vmatmul.mubr.msk.f32.gmra.mrb[102].mxu0 %vm703_vm4, %v3640_v23  ;;  %v3646_v51 = vld [vmem:[#allocation5 + $0x358] sm:$0xff]  ;;  %2254 = vst.msk [vmem:[#allocation5 + $0x5a8] sm:$0xff] %vm703_vm4, %v2190_v11  ;;  %2255 = vst.msk [vmem:[#allocation5 + $0x5c0] sm:$0xff] %vm703_vm4, %v2191_v48  ;;  %v3652_v23 = vld [vmem:[#allocation5 + $0x388] sm:$0xff] }
 0x329   :  { %9040 = vmatprep.mubr.msk.f32.mxu0 %vm703_vm4, %v3643_v12  ;;  %v2848_v55 = vpop.permute.xlu0 %2847  ;;  %v3651_v14 = vld [vmem:[#allocation5 + $0x380] sm:$0xff]  ;;  %973 = vst.msk [vmem:[#allocation5 + $0x5d0] sm:$0xff] %vm703_vm4, %v909_v0 }
 0x32a   :  { %v1565_v31 = vpop.permute.xlu1 %1564  ;;  %v3650_v39 = vld [vmem:[#allocation5 + $0x378] sm:$0xff]  ;;  %3001 = vst.msk [vmem:[#allocation5 + $0x398] sm:$0xff] %vm1680_vm7, %v2848_v55  ;;  %4215 = vmatprep.mubr.f32.mxu1 %v3651_v14  ;;  %v3655_v12 = vld [vmem:[#allocation5 + $0x3a0] sm:$0xff]  ;;  %v3661_v14 = vld [vmem:[#allocation5 + $0x3d0] sm:$0xff] }
 0x32b   :  { %1719 = vst.msk [vmem:[#allocation5 + $0x390] sm:$0xff] %vm1680_vm7, %v1565_v31  ;;  %2482 = vrot.lane.b32.xlu0 %v11441_v2, %s9606_s28  ;;  %4216 = vmatmul.mubr.f32.gmra.mrb[68].mxu1 %v3650_v39  ;;  %v3667_v48 = vld [vmem:[#allocation5 + $0x400] sm:$0xff] }
 0x32c   :  { %1199 = vrot.lane.b32.xlu1 %v11768_v59, %s9606_s28  ;;  %9041 = vmatmul.mubr.msk.f32.gmra.mrb[104].mxu0 %vm703_vm4, %v3646_v51  ;;  %v910_v59 = vld [vmem:[#allocation2 + $0x42f] sm:$0xff] }
 0x32d   :  { %9043 = vmatprep.mubr.msk.f32.mxu0 %vm703_vm4, %v3649_v13  ;;  %v3232_v58 = vpop.permute.xlu0 %3231  ;;  %974 = vst.msk [vmem:[#allocation5 + $0x5e8] sm:$0xff] %vm703_vm4, %v910_v59 }
 0x32e   :  { %v1950_v46 = vpop.permute.xlu1 %1949  ;;  %3385 = vst.msk [vmem:[#allocation5 + $0x398] sm:$0xff] %vm2065_vm8, %v3232_v58  ;;  %v3664_v58 = vld [vmem:[#allocation5 + $0x3e8] sm:$0xff] }
 0x32f   :  { %2104 = vst.msk [vmem:[#allocation5 + $0x390] sm:$0xff] %vm2065_vm8, %v1950_v46  ;;  %2867 = vrot.lane.b32.xlu0 %v11905_v8, %s9605_s27 }
 0x330   :  { %1584 = vrot.lane.b32.xlu1 %v11377_v54, %s9605_s27  ;;  %9044 = vmatmul.mubr.msk.f32.gmra.mrb[106].mxu0 %vm703_vm4, %v3652_v23  ;;  %v3658_v54 = vld [vmem:[#allocation5 + $0x3b8] sm:$0xff] }
 0x331   :  { %9046 = vmatprep.mubr.msk.f32.mxu0 %vm703_vm4, %v3655_v12  ;;  %v2465_v55 = vpop.permute.xlu0 %2464 }
 0x332   :  { %v1182_v31 = vpop.permute.xlu1 %1181  ;;  %2617 = vst.msk [vmem:[#allocation5 + $0x3b0] sm:$0xff] %vm1295_vm6, %v2465_v55  ;;  %v3673_v55 = vld [vmem:[#allocation5 + $0x430] sm:$0xff] }
 0x333   :  { %1335 = vst.msk [vmem:[#allocation5 + $0x3a8] sm:$0xff] %vm1295_vm6, %v1182_v31  ;;  %3251 = vrot.lane.b32.xlu0 %v11524_v21, %s9607_s20  ;;  %v3670_v31 = vld [vmem:[#allocation5 + $0x418] sm:$0xff] }
 0x334   :  { %1969 = vrot.lane.b32.xlu1 %v11843_v7, %s9607_s20  ;;  %9047 = vmatmul.mubr.msk.f32.gmra.mrb[108].mxu0 %vm703_vm4, %v3658_v54 }
 0x335   :  { %9049 = vmatprep.mubr.msk.f32.mxu0 %vm703_vm4, %v3661_v14  ;;  %v2850_v13 = vpop.permute.xlu0 %2849  ;;  %v3654_v11 = vld [vmem:[#allocation5 + $0x398] sm:$0xff] }
 0x336   :  { %v11927_v39 = vpop.f32.mrb[38].mxu1  ;;  %v1567_v51 = vpop.permute.xlu1 %1566  ;;  %v3653_v46 = vld [vmem:[#allocation5 + $0x390] sm:$0xff]  ;;  %3002 = vst.msk [vmem:[#allocation5 + $0x3b0] sm:$0xff] %vm1680_vm7, %v2850_v13  ;;  %4220 = vmatprep.mubr.f32.mxu1 %v3654_v11 }
 0x337   :  { %1720 = vst.msk [vmem:[#allocation5 + $0x3a8] sm:$0xff] %vm1680_vm7, %v1567_v51  ;;  %v4144_v7 = vpop.f32.mrb[39].mxu1  ;;  %2484 = vrot.lane.b32.xlu0 %v11430_v57, %s9606_s28  ;;  %4221 = vmatmul.mubr.f32.gmra.mrb[70].mxu1 %v3653_v46  ;;  %v3679_v51 = vld [vmem:[#allocation5 + $0x460] sm:$0xff] }
 0x338   :  { %1201 = vrot.lane.b32.xlu1 %v11816_v29, %s9606_s28  ;;  %9050 = vmatmul.mubr.msk.f32.gmra.mrb[110].mxu0 %vm703_vm4, %v3664_v58  ;;  %v11944_v29 = vld [vmem:[#allocation2 + $0x38f] sm:$0xff] }
 0x339   :  { %9052 = vmatprep.mubr.msk.f32.mxu0 %vm703_vm4, %v3667_v48  ;;  %v3234_v59 = vpop.permute.xlu0 %3233  ;;  %v3685_v58 = vld [vmem:[#allocation5 + $0x490] sm:$0xff]  ;;  %v11965_v48 = vld [vmem:[#allocation2 + $0x3a7] sm:$0xff] }
 0x33a   :  { %v1952_v0 = vpop.permute.xlu1 %1951  ;;  %3386 = vst.msk [vmem:[#allocation5 + $0x3b0] sm:$0xff] %vm2065_vm8, %v3234_v59  ;;  %v11940_v23 = vpop.f32.mrb[40].mxu1 }
 0x33b   :  { %2105 = vst.msk [vmem:[#allocation5 + $0x3a8] sm:$0xff] %vm2065_vm8, %v1952_v0  ;;  %v4149_v12 = vpop.f32.mrb[41].mxu1  ;;  %2869 = vrot.lane.b32.xlu0 %v11944_v29, %s9605_s27 }
 0x33c   :  { %1586 = vrot.lane.b32.xlu1 %v11367_v6, %s9605_s27  ;;  %9053 = vmatmul.mubr.msk.f32.gmra.mrb[112].mxu0 %vm703_vm4, %v3670_v31  ;;  %v3676_v6 = vld [vmem:[#allocation5 + $0x448] sm:$0xff]  ;;  %v2193_v31 = vld [vmem:[#allocation2 + $0x450] sm:$0xff] }
 0x33d   :  { %9055 = vmatprep.mubr.msk.f32.mxu0 %vm703_vm4, %v3673_v55  ;;  %v2467_v14 = vpop.permute.xlu0 %2466  ;;  %v2192_v12 = vld [vmem:[#allocation2 + $0x448] sm:$0xff]  ;;  %2257 = vst.msk [vmem:[#allocation5 + $0x5f0] sm:$0xff] %vm703_vm4, %v2193_v31 }
 0x33e   :  { %v1184_v54 = vpop.permute.xlu1 %1183  ;;  %2618 = vst.msk [vmem:[#allocation5 + $0x3c8] sm:$0xff] %vm1295_vm6, %v2467_v14  ;;  %v3688_v55 = vld [vmem:[#allocation5 + $0x4a8] sm:$0xff] }
 0x33f   :  { %1336 = vst.msk [vmem:[#allocation5 + $0x3c0] sm:$0xff] %vm1295_vm6, %v1184_v54  ;;  %3253 = vrot.lane.b32.xlu0 %v11533_v35, %s9607_s20 }
 0x340   :  { %1971 = vrot.lane.b32.xlu1 %v11884_v1, %s9607_s20  ;;  %9056 = vmatmul.mubr.msk.f32.gmra.mrb[114].mxu0 %vm703_vm4, %v3676_v6  ;;  %v3682_v1 = vld [vmem:[#allocation5 + $0x478] sm:$0xff]  ;;  %2256 = vst.msk [vmem:[#allocation5 + $0x5d8] sm:$0xff] %vm703_vm4, %v2192_v12 }
 0x341   :  { %9058 = vmatprep.mubr.msk.f32.mxu0 %vm703_vm4, %v3679_v51  ;;  %v2852_v11 = vpop.permute.xlu0 %2851  ;;  %v3657_v46 = vld [vmem:[#allocation5 + $0x3b0] sm:$0xff]  ;;  %v3694_v6 = vld [vmem:[#allocation5 + $0x4d8] sm:$0xff] }
 0x342   :  { %v1569_v13 = vpop.permute.xlu1 %1568  ;;  %v3656_v7 = vld [vmem:[#allocation5 + $0x3a8] sm:$0xff]  ;;  %3003 = vst.msk [vmem:[#allocation5 + $0x3c8] sm:$0xff] %vm1680_vm7, %v2852_v11  ;;  %4225 = vmatprep.mubr.f32.mxu1 %v3657_v46  ;;  %v3697_v51 = vld [vmem:[#allocation5 + $0x4f0] sm:$0xff] }
 0x343   :  { %1721 = vst.msk [vmem:[#allocation5 + $0x3c0] sm:$0xff] %vm1680_vm7, %v1569_v13  ;;  %2486 = vrot.lane.b32.xlu0 %v11516_v20, %s9606_s28  ;;  %4226 = vmatmul.mubr.f32.gmra.mrb[72].mxu1 %v3656_v7 }
 0x344   :  { %1203 = vrot.lane.b32.xlu1 %v11862_v17, %s9606_s28  ;;  %9059 = vmatmul.mubr.msk.f32.gmra.mrb[116].mxu0 %vm703_vm4, %v3682_v1  ;;  %v3691_v17 = vld [vmem:[#allocation5 + $0x4c0] sm:$0xff] }
 0x345   :  { %9061 = vmatprep.mubr.msk.f32.mxu0 %vm703_vm4, %v3685_v58  ;;  %v3236_v59 = vpop.permute.xlu0 %3235  ;;  %v3700_v58 = vld [vmem:[#allocation5 + $0x508] sm:$0xff] }
 0x346   :  { %v1954_v0 = vpop.permute.xlu1 %1953  ;;  %3387 = vst.msk [vmem:[#allocation5 + $0x3c8] sm:$0xff] %vm2065_vm8, %v3236_v59 }
 0x347   :  { %2106 = vst.msk [vmem:[#allocation5 + $0x3c0] sm:$0xff] %vm2065_vm8, %v1954_v0  ;;  %2871 = vrot.lane.b32.xlu0 %v11965_v48, %s9605_s27  ;;  %v3703_v0 = vld [vmem:[#allocation5 + $0x520] sm:$0xff] }
 0x348   :  { %1588 = vrot.lane.b32.xlu1 %v11441_v2, %s9605_s27  ;;  %9062 = vmatmul.mubr.msk.f32.gmra.mrb[118].mxu0 %vm703_vm4, %v3688_v55  ;;  %v3709_v55 = vld [vmem:[#allocation5 + $0x550] sm:$0xff] }
 0x349   :  { %v2469_v14 = vpop.permute.xlu0 %2468  ;;  %9064 = vmatprep.mubr.msk.f32.mxu0 %vm703_vm4, %v3691_v17  ;;  %v3706_v17 = vld [vmem:[#allocation5 + $0x538] sm:$0xff] }
 0x34a   :  { %v1186_v54 = vpop.permute.xlu1 %1185  ;;  %2619 = vst.msk [vmem:[#allocation5 + $0x3e0] sm:$0xff] %vm1295_vm6, %v2469_v14  ;;  %v11980_v2 = vpop.f32.mrb[42].mxu1 }
 0x34b   :  { %1337 = vst.msk [vmem:[#allocation5 + $0x3d8] sm:$0xff] %vm1295_vm6, %v1186_v54  ;;  %3255 = vrot.lane.b32.xlu0 %v11597_v16, %s9607_s20  ;;  %v4154_v13 = vpop.f32.mrb[43].mxu1 }
 0x34c   :  { %1973 = vrot.lane.b32.xlu1 %v11905_v8, %s9607_s20  ;;  %9065 = vmatmul.mubr.msk.f32.gmra.mrb[120].mxu0 %vm703_vm4, %v3694_v6  ;;  %v3712_v6 = vld [vmem:[#allocation5 + $0x568] sm:$0xff] }
 0x34d   :  { %v2854_v46 = vpop.permute.xlu0 %2853  ;;  %v3660_v7 = vld [vmem:[#allocation5 + $0x3c8] sm:$0xff]  ;;  %9067 = vmatprep.mubr.msk.f32.mxu0 %vm703_vm4, %v3697_v51 }
 0x34e   :  { %v1571_v11 = vpop.permute.xlu1 %1570  ;;  %v3659_v1 = vld [vmem:[#allocation5 + $0x3c0] sm:$0xff]  ;;  %3004 = vst.msk [vmem:[#allocation5 + $0x3e0] sm:$0xff] %vm1680_vm7, %v2854_v46  ;;  %4230 = vmatprep.mubr.f32.mxu1 %v3660_v7  ;;  %v3718_v7 = vld [vmem:[#allocation5 + $0x598] sm:$0xff] }
 0x34f   :  { %1722 = vst.msk [vmem:[#allocation5 + $0x3d8] sm:$0xff] %vm1680_vm7, %v1571_v11  ;;  %v11992_v8 = vpop.f32.mrb[44].mxu1  ;;  %2488 = vrot.lane.b32.xlu0 %v11505_v32, %s9606_s28  ;;  %4231 = vmatmul.mubr.f32.gmra.mrb[74].mxu1 %v3659_v1 }
 0x350   :  { %1205 = vrot.lane.b32.xlu1 %v11453_v22, %s9606_s28  ;;  %v4159_v59 = vpop.f32.mrb[45].mxu1  ;;  %9068 = vmatmul.mubr.msk.f32.gmra.mrb[122].mxu0 %vm703_vm4, %v3700_v58  ;;  %v12002_v22 = vld [vmem:[#allocation2 + $0x3af] sm:$0xff] }
 0x351   :  { %v3238_v31 = vpop.permute.xlu0 %3237  ;;  %9070 = vmatprep.mubr.msk.f32.mxu0 %vm703_vm4, %v3703_v0  ;;  %v12024_v0 = vld [vmem:[#allocation2 + $0x3c7] sm:$0xff] }
 0x352   :  { %v1956_v12 = vpop.permute.xlu1 %1955  ;;  %3388 = vst.msk [vmem:[#allocation5 + $0x3e0] sm:$0xff] %vm2065_vm8, %v3238_v31  ;;  %v3724_v31 = vld [vmem:[#allocation5 + $0x5c8] sm:$0xff] }
 0x353   :  { %2107 = vst.msk [vmem:[#allocation5 + $0x3d8] sm:$0xff] %vm2065_vm8, %v1956_v12  ;;  %2873 = vrot.lane.b32.xlu0 %v12002_v22, %s9605_s27 }
 0x354   :  { %1590 = vrot.lane.b32.xlu1 %v11430_v57, %s9605_s27  ;;  %9071 = vmatmul.mubr.msk.f32.gmra.mrb[124].mxu0 %vm703_vm4, %v3706_v17  ;;  %v3715_v57 = vld [vmem:[#allocation5 + $0x580] sm:$0xff] }
 0x355   :  { %v2471_v14 = vpop.permute.xlu0 %2470  ;;  %9073 = vmatprep.mubr.msk.f32.mxu0 %vm703_vm4, %v3709_v55 }
 0x356   :  { %v1188_v54 = vpop.permute.xlu1 %1187  ;;  %2620 = vst.msk [vmem:[#allocation5 + $0x3f8] sm:$0xff] %vm1295_vm6, %v2471_v14 }
 0x357   :  { %1338 = vst.msk [vmem:[#allocation5 + $0x3f0] sm:$0xff] %vm1295_vm6, %v1188_v54  ;;  %3257 = vrot.lane.b32.xlu0 %v11601_v53, %s9607_s20 }
 0x358   :  { %1975 = vrot.lane.b32.xlu1 %v11944_v29, %s9607_s20  ;;  %9074 = vmatmul.mubr.msk.f32.gmra.mrb[126].mxu0 %vm703_vm4, %v3712_v6  ;;  %v3721_v29 = vld [vmem:[#allocation5 + $0x5b0] sm:$0xff] }
 0x359   :  { %v2856_v13 = vpop.permute.xlu0 %2855  ;;  %v3663_v11 = vld [vmem:[#allocation5 + $0x3e0] sm:$0xff]  ;;  %9076 = vmatprep.mubr.msk.f32.mxu0 %vm703_vm4, %v3715_v57 }
 0x35a   :  { %v1573_v51 = vpop.permute.xlu1 %1572  ;;  %v3662_v46 = vld [vmem:[#allocation5 + $0x3d8] sm:$0xff]  ;;  %3005 = vst.msk [vmem:[#allocation5 + $0x3f8] sm:$0xff] %vm1680_vm7, %v2856_v13  ;;  %v12018_v1 = vpop.f32.mrb[46].mxu1  ;;  %4235 = vmatprep.mubr.f32.mxu1 %v3663_v11  ;;  %v2696_v13 = vld [vmem:[#allocation2 + $0x3cf] sm:$0xff] }
 0x35b   :  { %1723 = vst.msk [vmem:[#allocation5 + $0x3f0] sm:$0xff] %vm1680_vm7, %v1573_v51  ;;  %2490 = vrot.lane.b32.xlu0 %v11580_v28, %s9606_s28  ;;  %v4164_v58 = vpop.f32.mrb[47].mxu1  ;;  %4236 = vmatmul.mubr.f32.gmra.mrb[76].mxu1 %v3662_v46 }
 0x35c   :  { %1207 = vrot.lane.b32.xlu1 %v11524_v21, %s9606_s28  ;;  %9077 = vmatmul.mubr.msk.f32.gmra.mrb[128].mxu0 %vm703_vm4, %v3718_v7  ;;  %v12060_v7 = vld [vmem:[#allocation2 + $0x3d0] sm:$0xff] }
 0x35d   :  { %v3240_v12 = vpop.permute.xlu0 %3239  ;;  %9079 = vmatprep.mubr.msk.f32.mxu0 %vm703_vm4, %v3721_v29 }
 0x35e   :  { %v1958_v59 = vpop.permute.xlu1 %1957  ;;  %3389 = vst.msk [vmem:[#allocation5 + $0x3f8] sm:$0xff] %vm2065_vm8, %v3240_v12 }
 0x35f   :  { %2108 = vst.msk [vmem:[#allocation5 + $0x3f0] sm:$0xff] %vm2065_vm8, %v1958_v59  ;;  %2875 = vrot.lane.b32.xlu0 %v12024_v0, %s9605_s27 }
 0x360   :  { %1592 = vrot.lane.b32.xlu1 %v11516_v20, %s9605_s27  ;;  %9080 = vmatmul.mubr.msk.f32.gmra.mrb[130].mxu0 %vm703_vm4, %v3724_v31 }
 0x361   :  { %v2473_v17 = vpop.permute.xlu0 %2472 }
 0x362   :  { %v1190_v21 = vpop.permute.xlu1 %1189  ;;  %2621 = vst.msk [vmem:[#allocation5 + $0x410] sm:$0xff] %vm1295_vm6, %v2473_v17  ;;  %v12037_v55 = vpop.f32.mrb[48].mxu1 }
 0x363   :  { %1339 = vst.msk [vmem:[#allocation5 + $0x408] sm:$0xff] %vm1295_vm6, %v1190_v21  ;;  %3259 = vrot.lane.b32.xlu0 %v11667_v56, %s9607_s20  ;;  %v4169_v20 = vpop.f32.mrb[49].mxu1 }
 0x364   :  { %1977 = vrot.lane.b32.xlu1 %v11965_v48, %s9607_s20  ;;  %v12082_v20 = vld [vmem:[#allocation2 + $0x3e8] sm:$0xff] }
 0x365   :  { %v2858_v14 = vpop.permute.xlu0 %2857  ;;  %v3666_v6 = vld [vmem:[#allocation5 + $0x3f8] sm:$0xff] }
 0x366   :  { %v1575_v54 = vpop.permute.xlu1 %1574  ;;  %v3665_v57 = vld [vmem:[#allocation5 + $0x3f0] sm:$0xff]  ;;  %3006 = vst.msk [vmem:[#allocation5 + $0x410] sm:$0xff] %vm1680_vm7, %v2858_v14  ;;  %4240 = vmatprep.mubr.f32.mxu1 %v3666_v6 }
 0x367   :  { %1724 = vst.msk [vmem:[#allocation5 + $0x408] sm:$0xff] %vm1680_vm7, %v1575_v54  ;;  %2492 = vrot.lane.b32.xlu0 %v11575_v61, %s9606_s28  ;;  %4241 = vmatmul.mubr.f32.gmra.mrb[78].mxu1 %v3665_v57 }
 0x368   :  { %1209 = vrot.lane.b32.xlu1 %v11533_v35, %s9606_s28 }
 0x369   :  { %v3242_v51 = vpop.permute.xlu0 %3241 }
 0x36a   :  { %v1960_v48 = vpop.permute.xlu1 %1959  ;;  %3390 = vst.msk [vmem:[#allocation5 + $0x410] sm:$0xff] %vm2065_vm8, %v3242_v51  ;;  %v2698_v51 = vld [vmem:[#allocation2 + $0x3ef] sm:$0xff] }
 0x36b   :  { %2109 = vst.msk [vmem:[#allocation5 + $0x408] sm:$0xff] %vm2065_vm8, %v1960_v48  ;;  %2877 = vrot.lane.b32.xlu0 %v2696_v13, %s9605_s27 }
 0x36c   :  { %1594 = vrot.lane.b32.xlu1 %v11505_v32, %s9605_s27 }
 0x36d   :  { %v2475_v46 = vpop.permute.xlu0 %2474 }
 0x36e   :  { %v1192_v11 = vpop.permute.xlu1 %1191  ;;  %2622 = vst.msk [vmem:[#allocation5 + $0x428] sm:$0xff] %vm1295_vm6, %v2475_v46  ;;  %v12056_v35 = vpop.f32.mrb[50].mxu1 }
 0x36f   :  { %1340 = vst.msk [vmem:[#allocation5 + $0x420] sm:$0xff] %vm1295_vm6, %v1192_v11  ;;  %3261 = vrot.lane.b32.xlu0 %v12060_v7, %s9607_s20  ;;  %v4174_v32 = vpop.f32.mrb[51].mxu1 }
 0x370   :  { %1979 = vrot.lane.b32.xlu1 %v12002_v22, %s9607_s20  ;;  %v12070_v22 = vld [vmem:[#allocation2 + $0x3e7] sm:$0xff] }
 0x371   :  { %v2860_v58 = vpop.permute.xlu0 %2859  ;;  %v3669_v59 = vld [vmem:[#allocation5 + $0x410] sm:$0xff] }
 0x372   :  { %v1577_v29 = vpop.permute.xlu1 %1576  ;;  %v3668_v12 = vld [vmem:[#allocation5 + $0x408] sm:$0xff]  ;;  %3007 = vst.msk [vmem:[#allocation5 + $0x428] sm:$0xff] %vm1680_vm7, %v2860_v58  ;;  %4245 = vmatprep.mubr.f32.mxu1 %v3669_v59 }
 0x373   :  { %1725 = vst.msk [vmem:[#allocation5 + $0x420] sm:$0xff] %vm1680_vm7, %v1577_v29  ;;  %2494 = vrot.lane.b32.xlu0 %v11649_v60, %s9606_s28  ;;  %4246 = vmatmul.mubr.f32.gmra.mrb[80].mxu1 %v3668_v12  ;;  %v12104_v29 = vld [vmem:[#allocation2 + $0x3f0] sm:$0xff] }
 0x374   :  { %1211 = vrot.lane.b32.xlu1 %v11597_v16, %s9606_s28 }
 0x375   :  { %v3244_v21 = vpop.permute.xlu0 %3243 }
 0x376   :  { %v1962_v31 = vpop.permute.xlu1 %1961  ;;  %3391 = vst.msk [vmem:[#allocation5 + $0x428] sm:$0xff] %vm2065_vm8, %v3244_v21 }
 0x377   :  { %2110 = vst.msk [vmem:[#allocation5 + $0x420] sm:$0xff] %vm2065_vm8, %v1962_v31  ;;  %2879 = vrot.lane.b32.xlu0 %v12070_v22, %s9605_s27 }
 0x378   :  { %1596 = vrot.lane.b32.xlu1 %v11580_v28, %s9605_s27 }
 0x379   :  { %v2477_v16 = vpop.permute.xlu0 %2476 }
 0x37a   :  { %v1194_v17 = vpop.permute.xlu1 %1193  ;;  %2623 = vst.msk [vmem:[#allocation5 + $0x440] sm:$0xff] %vm1295_vm6, %v2477_v16 }
 0x37b   :  { %1341 = vst.msk [vmem:[#allocation5 + $0x438] sm:$0xff] %vm1295_vm6, %v1194_v17  ;;  %3263 = vrot.lane.b32.xlu0 %v12082_v20, %s9607_s20 }
 0x37c   :  { %1981 = vrot.lane.b32.xlu1 %v12024_v0, %s9607_s20 }
 0x37d   :  { %v2862_v14 = vpop.permute.xlu0 %2861  ;;  %v3672_v28 = vld [vmem:[#allocation5 + $0x428] sm:$0xff] }
 0x37e   :  { %v1579_v54 = vpop.permute.xlu1 %1578  ;;  %v3671_v6 = vld [vmem:[#allocation5 + $0x420] sm:$0xff]  ;;  %3008 = vst.msk [vmem:[#allocation5 + $0x440] sm:$0xff] %vm1680_vm7, %v2862_v14  ;;  %4250 = vmatprep.mubr.f32.mxu1 %v3672_v28 }
 0x37f   :  { %1726 = vst.msk [vmem:[#allocation5 + $0x438] sm:$0xff] %vm1680_vm7, %v1579_v54  ;;  %2496 = vrot.lane.b32.xlu0 %v11643_v33, %s9606_s28  ;;  %4251 = vmatmul.mubr.f32.gmra.mrb[82].mxu1 %v3671_v6  ;;  %v12126_v54 = vld [vmem:[#allocation2 + $0x408] sm:$0xff] }
 0x380   :  { %1213 = vrot.lane.b32.xlu1 %v11601_v53, %s9606_s28 }
 0x381   :  { %v3246_v57 = vpop.permute.xlu0 %3245 }
 0x382   :  { %v1964_v0 = vpop.permute.xlu1 %1963  ;;  %3392 = vst.msk [vmem:[#allocation5 + $0x440] sm:$0xff] %vm2065_vm8, %v3246_v57  ;;  %v12094_v48 = vpop.f32.mrb[52].mxu1 }
 0x383   :  { %2111 = vst.msk [vmem:[#allocation5 + $0x438] sm:$0xff] %vm2065_vm8, %v1964_v0  ;;  %v4179_v11 = vpop.f32.mrb[53].mxu1  ;;  %2881 = vrot.lane.b32.xlu0 %v2698_v51, %s9605_s27 }
 0x384   :  { %1598 = vrot.lane.b32.xlu1 %v11575_v61, %s9605_s27  ;;  %v2700_v11 = vld [vmem:[#allocation2 + $0x40f] sm:$0xff] }
 0x385   :  { %v2479_v46 = vpop.permute.xlu0 %2478 }
 0x386   :  { %v1196_v53 = vpop.permute.xlu1 %1195  ;;  %2624 = vst.msk [vmem:[#allocation5 + $0x458] sm:$0xff] %vm1295_vm6, %v2479_v46  ;;  %v12101_v32 = vpop.f32.mrb[64].mxu0 }
 0x387   :  { %1342 = vst.msk [vmem:[#allocation5 + $0x450] sm:$0xff] %vm1295_vm6, %v1196_v53  ;;  %v4034_v58 = vpop.f32.mrb[65].mxu0  ;;  %3265 = vrot.lane.b32.xlu0 %v12104_v29, %s9607_s20 }
 0x388   :  { %1983 = vrot.lane.b32.xlu1 %v2696_v13, %s9607_s20  ;;  %v12114_v13 = vld [vmem:[#allocation2 + $0x407] sm:$0xff] }
 0x389   :  { %v2864_v59 = vpop.permute.xlu0 %2863  ;;  %v3675_v12 = vld [vmem:[#allocation5 + $0x440] sm:$0xff] }
 0x38a   :  { %v1581_v61 = vpop.permute.xlu1 %1580  ;;  %v3674_v31 = vld [vmem:[#allocation5 + $0x438] sm:$0xff]  ;;  %3009 = vst.msk [vmem:[#allocation5 + $0x458] sm:$0xff] %vm1680_vm7, %v2864_v59  ;;  %4255 = vmatprep.mubr.f32.mxu1 %v3675_v12 }
 0x38b   :  { %1727 = vst.msk [vmem:[#allocation5 + $0x450] sm:$0xff] %vm1680_vm7, %v1581_v61  ;;  %2498 = vrot.lane.b32.xlu0 %v11724_v42, %s9606_s28  ;;  %4256 = vmatmul.mubr.f32.gmra.mrb[84].mxu1 %v3674_v31  ;;  %v12146_v61 = vld [vmem:[#allocation2 + $0x410] sm:$0xff] }
 0x38c   :  { %1215 = vrot.lane.b32.xlu1 %v11667_v56, %s9606_s28 }
 0x38d   :  { %v3248_v17 = vpop.permute.xlu0 %3247 }
 0x38e   :  { %v1966_v21 = vpop.permute.xlu1 %1965  ;;  %3393 = vst.msk [vmem:[#allocation5 + $0x458] sm:$0xff] %vm2065_vm8, %v3248_v17 }
 0x38f   :  { %2112 = vst.msk [vmem:[#allocation5 + $0x450] sm:$0xff] %vm2065_vm8, %v1966_v21  ;;  %2883 = vrot.lane.b32.xlu0 %v12114_v13, %s9605_s27 }
 0x390   :  { %1600 = vrot.lane.b32.xlu1 %v11649_v60, %s9605_s27 }
 0x391   :  { %v2481_v56 = vpop.permute.xlu0 %2480 }
 0x392   :  { %v1198_v16 = vpop.permute.xlu1 %1197  ;;  %2625 = vst.msk [vmem:[#allocation5 + $0x470] sm:$0xff] %vm1295_vm6, %v2481_v56 }
 0x393   :  { %1343 = vst.msk [vmem:[#allocation5 + $0x468] sm:$0xff] %vm1295_vm6, %v1198_v16  ;;  %3267 = vrot.lane.b32.xlu0 %v12126_v54, %s9607_s20 }
 0x394   :  { %1985 = vrot.lane.b32.xlu1 %v12070_v22, %s9607_s20 }
 0x395   :  { %v2866_v28 = vpop.permute.xlu0 %2865  ;;  %v3678_v60 = vld [vmem:[#allocation5 + $0x458] sm:$0xff] }
 0x396   :  { %v1583_v14 = vpop.permute.xlu1 %1582  ;;  %v3677_v6 = vld [vmem:[#allocation5 + $0x450] sm:$0xff]  ;;  %3010 = vst.msk [vmem:[#allocation5 + $0x470] sm:$0xff] %vm1680_vm7, %v2866_v28  ;;  %4260 = vmatprep.mubr.f32.mxu1 %v3678_v60 }
 0x397   :  { %1728 = vst.msk [vmem:[#allocation5 + $0x468] sm:$0xff] %vm1680_vm7, %v1583_v14  ;;  %2500 = vrot.lane.b32.xlu0 %v11717_v38, %s9606_s28  ;;  %4261 = vmatmul.mubr.f32.gmra.mrb[86].mxu1 %v3677_v6  ;;  %v12168_v14 = vld [vmem:[#allocation2 + $0x428] sm:$0xff] }
 0x398   :  { %1217 = vrot.lane.b32.xlu1 %v12060_v7, %s9606_s28 }
 0x399   :  { %v3250_v0 = vpop.permute.xlu0 %3249 }
 0x39a   :  { %v1968_v22 = vpop.permute.xlu1 %1967  ;;  %3394 = vst.msk [vmem:[#allocation5 + $0x470] sm:$0xff] %vm2065_vm8, %v3250_v0  ;;  %v12138_v57 = vpop.f32.mrb[54].mxu1 }
 0x39b   :  { %2113 = vst.msk [vmem:[#allocation5 + $0x468] sm:$0xff] %vm2065_vm8, %v1968_v22  ;;  %v4184_v53 = vpop.f32.mrb[55].mxu1  ;;  %2885 = vrot.lane.b32.xlu0 %v2700_v11, %s9605_s27 }
 0x39c   :  { %1602 = vrot.lane.b32.xlu1 %v11643_v33, %s9605_s27  ;;  %v12184_v53 = vld [vmem:[#allocation2 + $0x42f] sm:$0xff] }
 0x39d   :  { %v2483_v46 = vpop.permute.xlu0 %2482 }
 0x39e   :  { %v1200_v7 = vpop.permute.xlu1 %1199  ;;  %2626 = vst.msk [vmem:[#allocation5 + $0x488] sm:$0xff] %vm1295_vm6, %v2483_v46  ;;  %v4037_v58 = vpop.f32.mrb[66].mxu0 }
 0x39f   :  { %1344 = vst.msk [vmem:[#allocation5 + $0x480] sm:$0xff] %vm1295_vm6, %v1200_v7  ;;  %v4039_v59 = vpop.f32.mrb[67].mxu0  ;;  %3269 = vrot.lane.b32.xlu0 %v12146_v61, %s9607_s20 }
 0x3a0   :  { %1987 = vrot.lane.b32.xlu1 %v2698_v51, %s9607_s20  ;;  %v12156_v51 = vld [vmem:[#allocation2 + $0x427] sm:$0xff] }
 0x3a1   :  { %v2868_v12 = vpop.permute.xlu0 %2867  ;;  %v3681_v31 = vld [vmem:[#allocation5 + $0x470] sm:$0xff] }
 0x3a2   :  { %v1585_v33 = vpop.permute.xlu1 %1584  ;;  %v3680_v21 = vld [vmem:[#allocation5 + $0x468] sm:$0xff]  ;;  %3011 = vst.msk [vmem:[#allocation5 + $0x488] sm:$0xff] %vm1680_vm7, %v2868_v12  ;;  %4265 = vmatprep.mubr.f32.mxu1 %v3681_v31  ;;  %v12198_v12 = vld [vmem:[%s14448_s4] ss:$0 sm:$0xff] }
 0x3a3   :  { %1729 = vst.msk [vmem:[#allocation5 + $0x480] sm:$0xff] %vm1680_vm7, %v1585_v33  ;;  %2502 = vrot.lane.b32.xlu0 %v11801_v49, %s9606_s28  ;;  %4266 = vmatmul.mubr.f32.gmra.mrb[88].mxu1 %v3680_v21  ;;  %v12191_v33 = vld [vmem:[#allocation2 + $0x430] sm:$0xff]  ;;  %v4038_v31 = vadd.f32 %v12198_v12, %v4037_v58 }
 0x3a4   :  { %1219 = vrot.lane.b32.xlu1 %v12082_v20, %s9606_s28 }
 0x3a5   :  { %v3252_v16 = vpop.permute.xlu0 %3251 }
 0x3a6   :  { %v1970_v17 = vpop.permute.xlu1 %1969  ;;  %3395 = vst.msk [vmem:[#allocation5 + $0x488] sm:$0xff] %vm2065_vm8, %v3252_v16 }
 0x3a7   :  { %2114 = vst.msk [vmem:[#allocation5 + $0x480] sm:$0xff] %vm2065_vm8, %v1970_v17  ;;  %2887 = vrot.lane.b32.xlu0 %v12156_v51, %s9605_s27 }
 0x3a8   :  { %1604 = vrot.lane.b32.xlu1 %v11724_v42, %s9605_s27 }
 0x3a9   :  { %v2485_v20 = vpop.permute.xlu0 %2484 }
 0x3aa   :  { %v1202_v56 = vpop.permute.xlu1 %1201  ;;  %2627 = vst.msk [vmem:[#allocation5 + $0x4a0] sm:$0xff] %vm1295_vm6, %v2485_v20 }
 0x3ab   :  { %1345 = vst.msk [vmem:[#allocation5 + $0x498] sm:$0xff] %vm1295_vm6, %v1202_v56  ;;  %3271 = vrot.lane.b32.xlu0 %v12168_v14, %s9607_s20 }
 0x3ac   :  { %1989 = vrot.lane.b32.xlu1 %v12114_v13, %s9607_s20 }
 0x3ad   :  { %v2870_v60 = vpop.permute.xlu0 %2869  ;;  %v3684_v42 = vld [vmem:[#allocation5 + $0x488] sm:$0xff] }
 0x3ae   :  { %v1587_v28 = vpop.permute.xlu1 %1586  ;;  %v3683_v6 = vld [vmem:[#allocation5 + $0x480] sm:$0xff]  ;;  %3012 = vst.msk [vmem:[#allocation5 + $0x4a0] sm:$0xff] %vm1680_vm7, %v2870_v60  ;;  %4270 = vmatprep.mubr.f32.mxu1 %v3684_v42 }
 0x3af   :  { %1730 = vst.msk [vmem:[#allocation5 + $0x498] sm:$0xff] %vm1680_vm7, %v1587_v28  ;;  %2504 = vrot.lane.b32.xlu0 %v11790_v34, %s9606_s28  ;;  %4271 = vmatmul.mubr.f32.gmra.mrb[90].mxu1 %v3683_v6  ;;  %v12209_v42 = vld [vmem:[#allocation2 + $0x447] sm:$0xff] }
 0x3b0   :  { %1221 = vrot.lane.b32.xlu1 %v12104_v29, %s9606_s28 }
 0x3b1   :  { %v3254_v22 = vpop.permute.xlu0 %3253 }
 0x3b2   :  { %v1972_v13 = vpop.permute.xlu1 %1971  ;;  %3396 = vst.msk [vmem:[#allocation5 + $0x4a0] sm:$0xff] %vm2065_vm8, %v3254_v22  ;;  %v12180_v0 = vpop.f32.mrb[56].mxu1 }
 0x3b3   :  { %2115 = vst.msk [vmem:[#allocation5 + $0x498] sm:$0xff] %vm2065_vm8, %v1972_v13  ;;  %v4189_v7 = vpop.f32.mrb[57].mxu1  ;;  %2889 = vrot.lane.b32.xlu0 %v12184_v53, %s9605_s27 }
 0x3b4   :  { %1606 = vrot.lane.b32.xlu1 %v11717_v38, %s9605_s27 }
 0x3b5   :  { %v2487_v46 = vpop.permute.xlu0 %2486 }
 0x3b6   :  { %v1204_v29 = vpop.permute.xlu1 %1203  ;;  %2628 = vst.msk [vmem:[#allocation5 + $0x4b8] sm:$0xff] %vm1295_vm6, %v2487_v46  ;;  %v4042_v59 = vpop.f32.mrb[68].mxu0 }
 0x3b7   :  { %1346 = vst.msk [vmem:[#allocation5 + $0x4b0] sm:$0xff] %vm1295_vm6, %v1204_v29  ;;  %3273 = vrot.lane.b32.xlu0 %v12191_v33, %s9607_s20  ;;  %v4044_v38 = vpop.f32.mrb[69].mxu0  ;;  %v4043_v22 = vadd.f32 %v12198_v12, %v4042_v59  ;;  %v4058_v59 = vadd.f32 %v12198_v12, %v11302_v5 }
 0x3b8   :  { %1991 = vrot.lane.b32.xlu1 %v2700_v11, %s9607_s20  ;;  %v4033_v11 = vadd.f32 %v12198_v12, %v12101_v32  ;;  %v4048_v32 = vadd.f32 %v12198_v12, %v11270_v62 }
 0x3b9   :  { %v2872_v17 = vpop.permute.xlu0 %2871  ;;  %v3687_v16 = vld [vmem:[#allocation5 + $0x4a0] sm:$0xff] }
 0x3ba   :  { %v1589_v21 = vpop.permute.xlu1 %1588  ;;  %v3686_v56 = vld [vmem:[#allocation5 + $0x498] sm:$0xff]  ;;  %3013 = vst.msk [vmem:[#allocation5 + $0x4b8] sm:$0xff] %vm1680_vm7, %v2872_v17  ;;  %4275 = vmatprep.mubr.f32.mxu1 %v3687_v16  ;;  %v8991_v20 = vpop.f32.mrb[70].mxu0  ;;  %v4053_v16 = vadd.f32 %v12198_v12, %v11291_v24  ;;  %v4063_v24 = vadd.f32 %v12198_v12, %v11344_v36  ;;  %v12249_v36 = vld [vmem:[#allocation2 + $0x44f] sm:$0xff] }
 0x3bb   :  { %1731 = vst.msk [vmem:[#allocation5 + $0x4b0] sm:$0xff] %vm1680_vm7, %v1589_v21  ;;  %v4423_v28 = vadd.f32 %v8991_v20, %v4038_v31  ;;  %2506 = vrot.lane.b32.xlu0 %v11820_v26, %s9606_s28  ;;  %4276 = vmatmul.mubr.f32.gmra.mrb[92].mxu1 %v3686_v56  ;;  %v4417_v58 = vpop.f32.mrb[71].mxu0 }
 0x3bc   :  { %1223 = vrot.lane.b32.xlu1 %v12126_v54, %s9606_s28  ;;  %v4418_v60 = vadd.f32 %v4417_v58, %v4033_v11 }
 0x3bd   :  { %v3256_v13 = vpop.permute.xlu0 %3255 }
 0x3be   :  { %v1974_v6 = vpop.permute.xlu1 %1973  ;;  %3397 = vst.msk [vmem:[#allocation5 + $0x4b8] sm:$0xff] %vm2065_vm8, %v3256_v13  ;;  %v8994_v54 = vpop.f32.mrb[72].mxu0 }
 0x3bf   :  { %2116 = vst.msk [vmem:[#allocation5 + $0x4b0] sm:$0xff] %vm2065_vm8, %v1974_v6  ;;  %v4433_v7 = vadd.f32 %v8994_v54, %v4048_v32  ;;  %2891 = vrot.lane.b32.xlu0 %v12209_v42, %s9605_s27  ;;  %v4427_v29 = vpop.f32.mrb[73].mxu0 }
 0x3c0   :  { %1608 = vrot.lane.b32.xlu1 %v11801_v49, %s9605_s27  ;;  %v4428_v46 = vadd.f32 %v4427_v29, %v4043_v22  ;;  %v3087_v49 = vld [vmem:[#allocation2 + $0x448] sm:$0xff] }
 0x3c1   :  { %v4737_v38 = vmax.f32 %v4423_v28, %v4433_v7  ;;  %v2489_v31 = vpop.permute.xlu0 %2488 }
 0x3c2   :  { %v1206_v62 = vpop.permute.xlu1 %1205  ;;  %v4736_v21 = vmax.f32 %v4418_v60, %v4428_v46  ;;  %2629 = vst.msk [vmem:[#allocation5 + $0x4d0] sm:$0xff] %vm1295_vm6, %v2489_v31  ;;  %v12224_v17 = vpop.f32.mrb[58].mxu1  ;;  %v4078_v46 = vadd.f32 %v12198_v12, %v11418_v25 }
 0x3c3   :  { %1347 = vst.msk [vmem:[#allocation5 + $0x4c8] sm:$0xff] %vm1295_vm6, %v1206_v62  ;;  %v8997_v56 = vpop.f32.mrb[74].mxu0  ;;  %3275 = vrot.lane.b32.xlu0 %v3087_v49, %s9607_s20  ;;  %v4194_v5 = vpop.f32.mrb[59].mxu1 }
 0x3c4   :  { %1993 = vrot.lane.b32.xlu1 %v12156_v51, %s9607_s20  ;;  %4769 = vst.msk [vmem:[#allocation8 + $0x8] sm:$0xff] %vm703_vm4, %v4737_v38  ;;  %4768 = vst.msk [vmem:[#allocation8] sm:$0xff] %vm703_vm4, %v4736_v21  ;;  %v4443_v11 = vadd.f32 %v8997_v56, %v4058_v59  ;;  %v4437_v20 = vpop.f32.mrb[75].mxu0  ;;  %v4068_v51 = vadd.f32 %v12198_v12, %v11356_v9 }
 0x3c5   :  { %v4438_v28 = vadd.f32 %v4437_v20, %v4053_v16  ;;  %v2874_v60 = vpop.permute.xlu0 %2873  ;;  %v3690_v32 = vld [vmem:[#allocation5 + $0x4b8] sm:$0xff]  ;;  %v3088_v20 = vld [vmem:[#allocation2 + $0x450] sm:$0xff] }
 0x3c6   :  { %v1591_v58 = vpop.permute.xlu1 %1590  ;;  %v3689_v6 = vld [vmem:[#allocation5 + $0x4b0] sm:$0xff]  ;;  %3014 = vst.msk [vmem:[#allocation5 + $0x4d0] sm:$0xff] %vm1680_vm7, %v2874_v60  ;;  %4280 = vmatprep.mubr.f32.mxu1 %v3690_v32 }
 0x3c7   :  { %1732 = vst.msk [vmem:[#allocation5 + $0x4c8] sm:$0xff] %vm1680_vm7, %v1591_v58  ;;  %v9000_v13 = vpop.f32.mrb[76].mxu0  ;;  %2508 = vrot.lane.b32.xlu0 %v11810_v27, %s9606_s28  ;;  %4281 = vmatmul.mubr.f32.gmra.mrb[94].mxu1 %v3689_v6  ;;  %v4083_v58 = vadd.f32 %v12198_v12, %v11476_v45 }
 0x3c8   :  { %1225 = vrot.lane.b32.xlu1 %v12146_v61, %s9606_s28  ;;  %v4453_v22 = vadd.f32 %v9000_v13, %v4068_v51  ;;  %v4447_v54 = vpop.f32.mrb[77].mxu0  ;;  %v4073_v61 = vadd.f32 %v12198_v12, %v11407_v63  ;;  %v4088_v63 = vadd.f32 %v12198_v12, %v11487_v19  ;;  %v5675_v19 = vld [vmem:[%s14449_s5 + $0x88] sm:$0xff] }
 0x3c9   :  { %v4448_v7 = vadd.f32 %v4447_v54, %v4063_v24  ;;  %v3258_v29 = vpop.permute.xlu0 %3257  ;;  %v5659_v51 = vld [vmem:[%s14449_s5 + $0x8] sm:$0xff] }
 0x3ca   :  { %v1976_v9 = vpop.permute.xlu1 %1975  ;;  %v4739_v38 = vmax.f32 %v4443_v11, %v4453_v22  ;;  %3398 = vst.msk [vmem:[#allocation5 + $0x4d0] sm:$0xff] %vm2065_vm8, %v3258_v29 }
 0x3cb   :  { %2117 = vst.msk [vmem:[#allocation5 + $0x4c8] sm:$0xff] %vm2065_vm8, %v1976_v9  ;;  %v4800_v62 = vld [vmem:[#allocation8] ss:$2 sm:$0xff]  ;;  %v4832_v31 = vld [vmem:[#allocation8 + $0x1] ss:$2 sm:$0xff]  ;;  %v4738_v59 = vmax.f32 %v4438_v28, %v4448_v7  ;;  %v9003_v21 = vpop.f32.mrb[78].mxu0  ;;  %2893 = vrot.lane.b32.xlu0 %v12249_v36, %s9605_s27 }
 0x3cc   :  { %1610 = vrot.lane.b32.xlu1 %v11790_v34, %s9605_s27  ;;  %4771 = vst.msk [vmem:[#allocation8 + $0x18] sm:$0xff] %vm703_vm4, %v4739_v38  ;;  %v4463_v25 = vadd.f32 %v9003_v21, %v4078_v46  ;;  %v4457_v49 = vpop.f32.mrb[79].mxu0  ;;  %v4863_v16 = vmax.f32 %v4800_v62, %v4832_v31  ;;  %v5674_v28 = vld [vmem:[%s14449_s5 + $0x80] sm:$0xff]  ;;  %v4098_v46 = vadd.f32 %v12198_v12, %v11565_v37 }
 0x3cd   :  { %4770 = vst.msk [vmem:[#allocation8 + $0x10] sm:$0xff] %vm703_vm4, %v4738_v59  ;;  %v4458_v34 = vadd.f32 %v4457_v49, %v4073_v61  ;;  %v2491_v5 = vpop.permute.xlu0 %2490  ;;  %v9258_v6 = vpack.c.bf16 %v5675_v19, %v5674_v28  ;;  %v4093_v61 = vadd.f32 %v12198_v12, %v11554_v15  ;;  %v2705_v49 = vld [vmem:[#allocation2 + $0x467] sm:$0xff]  ;;  %v5660_v28 = vld [vmem:[%s14449_s5 + $0x10] sm:$0xff] }
 0x3ce   :  { %v1208_v56 = vpop.permute.xlu1 %1207  ;;  %2630 = vst.msk [vmem:[#allocation5 + $0x4e8] sm:$0xff] %vm1295_vm6, %v2491_v5  ;;  %v12261_v11 = vpop.f32.mrb[60].mxu1 }
 0x3cf   :  { %1348 = vst.msk [vmem:[#allocation5 + $0x4e0] sm:$0xff] %vm1295_vm6, %v1208_v56  ;;  %v9006_v60 = vpop.f32.mrb[80].mxu0  ;;  %3277 = vrot.lane.b32.xlu0 %v3088_v20, %s9607_s20  ;;  %v4199_v32 = vpop.f32.mrb[61].mxu1  ;;  %9259 = vmatprep.subr.bf16.mxu0 %v9258_v6  ;;  %v5677_v20 = vld [vmem:[%s14449_s5 + $0x98] sm:$0xff] }
 0x3d0   :  { %1995 = vrot.lane.b32.xlu1 %v12184_v53, %s9607_s20  ;;  %4880 = vst.msk [vmem:[#allocation3 + $0x20] sm:$0xff] %vm703_vm4, %v4863_v16  ;;  %v5658_v53 = vld [vmem:[%s14449_s5] sm:$0xff]  ;;  %v4473_v24 = vadd.f32 %v9006_v60, %v4088_v63  ;;  %v4467_v13 = vpop.f32.mrb[81].mxu0  ;;  %v5676_v63 = vld [vmem:[%s14449_s5 + $0x90] sm:$0xff] }
 0x3d1   :  { %v9260_v22 = vpack.c.bf16 %v5659_v51, %v5658_v53  ;;  %v4468_v54 = vadd.f32 %v4467_v13, %v4083_v58  ;;  %v2876_v9 = vpop.permute.xlu0 %2875  ;;  %v3693_v45 = vld [vmem:[#allocation5 + $0x4d0] sm:$0xff]  ;;  %v9262_v19 = vpack.c.bf16 %v5677_v20, %v5676_v63  ;;  %v5661_v58 = vld [vmem:[%s14449_s5 + $0x18] sm:$0xff]  ;;  %v5678_v32 = vld [vmem:[%s14449_s5 + $0xa0] sm:$0xff] }
 0x3d2   :  { %v1593_v7 = vpop.permute.xlu1 %1592  ;;  %v3692_v29 = vld [vmem:[#allocation5 + $0x4c8] sm:$0xff]  ;;  %v4741_v38 = vmax.f32 %v4463_v25, %v4473_v24  ;;  %3015 = vst.msk [vmem:[#allocation5 + $0x4e8] sm:$0xff] %vm1680_vm7, %v2876_v9  ;;  %4285 = vmatprep.mubr.f32.mxu1 %v3693_v45  ;;  %v9264_v24 = vpack.c.bf16 %v5661_v58, %v5660_v28  ;;  %v3474_v13 = vld [vmem:[#allocation2 + $0x471] sm:$0xff]  ;;  %v5662_v45 = vld [vmem:[%s14449_s5 + $0x20] sm:$0xff]  ;;  %v4128_v58 = vadd.f32 %v12198_v12, %v11787_v52 }
 0x3d3   :  { %1733 = vst.msk [vmem:[#allocation5 + $0x4e0] sm:$0xff] %vm1680_vm7, %v1593_v7  ;;  %v4740_v62 = vmax.f32 %v4458_v34, %v4468_v54  ;;  %v9009_v31 = vpop.f32.mrb[82].mxu0  ;;  %2510 = vrot.lane.b32.xlu0 %v11832_v18, %s9606_s28  ;;  %4286 = vmatmul.mubr.f32.gmra.mrb[96].mxu1 %v3692_v29  ;;  %v4108_v18 = vadd.f32 %v12198_v12, %v11635_v40  ;;  %v3473_v60 = vld [vmem:[#allocation2 + $0x469] sm:$0xff] }
 0x3d4   :  { %1227 = vrot.lane.b32.xlu1 %v12168_v14, %s9606_s28  ;;  %v4802_v59 = vld [vmem:[#allocation8 + $0x10] ss:$2 sm:$0xff]  ;;  %v4834_v37 = vld [vmem:[#allocation8 + $0x11] ss:$2 sm:$0xff]  ;;  %4773 = vst.msk [vmem:[#allocation8 + $0x28] sm:$0xff] %vm703_vm4, %v4741_v38  ;;  %v4483_v21 = vadd.f32 %v9009_v31, %v4098_v46  ;;  %v4477_v25 = vpop.f32.mrb[83].mxu0  ;;  %9261 = vmatpush3.bf16.msra.mxu0 %v9260_v22  ;;  %v4103_v40 = vadd.f32 %v12198_v12, %v11626_v10 }
 0x3d5   :  { %4772 = vst.msk [vmem:[#allocation8 + $0x20] sm:$0xff] %vm703_vm4, %v4740_v62  ;;  %v12293_v14 = vadd.f32 %v4477_v25, %v4093_v61  ;;  %v3260_v15 = vpop.permute.xlu0 %3259  ;;  %v4864_v34 = vmax.f32 %v4802_v59, %v4834_v37  ;;  %v3089_v51 = vld [vmem:[#allocation2 + $0x468] sm:$0xff]  ;;  %3537 = vst.msk [vmem:[#allocation5 + $0x5e0] sm:$0xff] %vm703_vm4, %v3473_v60  ;;  %9263 = vmatprep.subr.bf16.mxu0 %v9262_v19  ;;  %v4118_v46 = vadd.f32 %v12198_v12, %v11708_v47  ;;  %v5680_v62 = vld [vmem:[%s14449_s5 + $0xb0] sm:$0xff] }
 0x3d6   :  { %v1978_v16 = vpop.permute.xlu1 %1977  ;;  %3399 = vst.msk [vmem:[#allocation5 + $0x4e8] sm:$0xff] %vm2065_vm8, %v3260_v15  ;;  %v5679_v10 = vld [vmem:[%s14449_s5 + $0xa8] sm:$0xff]  ;;  %v5681_v31 = vld [vmem:[%s14449_s5 + $0xb8] sm:$0xff]  ;;  %v4113_v47 = vadd.f32 %v12198_v12, %v11698_v3  ;;  %v12363_v3 = vld [vmem:[%s14449_s5 + $0x30] sm:$0xff] }
 0x3d7   :  { %v12295_v56 = vld [vmem:[#allocation3 + $0x1f] sm:$0xff]  ;;  %2118 = vst.msk [vmem:[#allocation5 + $0x4e0] sm:$0xff] %vm2065_vm8, %v1978_v16  ;;  %2895 = vrot.lane.b32.xlu0 %v2705_v49, %s9605_s27  ;;  %v9266_v9 = vpack.c.bf16 %v5679_v10, %v5678_v32  ;;  %v5663_v29 = vld [vmem:[%s14449_s5 + $0x28] sm:$0xff] }
 0x3d8   :  { %v12297_v5 = vld [vmem:[#allocation3 + $0x20] sm:$0xff]  ;;  %1612 = vrot.lane.b32.xlu1 %v11820_v26, %s9605_s27  ;;  %4954 = vst.msk [vmem:[#allocation6 + $0x18] sm:$0xff] %vm703_vm4, %v12295_v56  ;;  %v9012_v26 = vpop.f32.mrb[84].mxu0  ;;  %4881 = vst.msk [vmem:[#allocation3 + $0x38] sm:$0xff] %vm703_vm4, %v4864_v34  ;;  %9265 = vmatpush3.bf16.msra.mxu0 %v9264_v24  ;;  %v9268_v34 = vpack.c.bf16 %v5663_v29, %v5662_v45  ;;  %v5665_v19 = vld [vmem:[%s14449_s5 + $0x38] sm:$0xff]  ;;  %v4138_v29 = vadd.f32 %v12198_v12, %v11877_v44 }
 0x3d9   :  { %5273 = vst.msk [vmem:[#allocation6 + $0x8] sm:$0xff] %vm703_vm4, %v12297_v5  ;;  %v4493_v6 = vadd.f32 %v9012_v26, %v4108_v18  ;;  %v4487_v53 = vpop.f32.mrb[85].mxu0  ;;  %v2493_v7 = vpop.permute.xlu0 %2492  ;;  %3538 = vst.msk [vmem:[#allocation5 + $0x5f8] sm:$0xff] %vm703_vm4, %v3474_v13  ;;  %9267 = vmatprep.subr.bf16.mxu0 %v9266_v9  ;;  %v9270_v26 = vpack.c.bf16 %v5681_v31, %v5680_v62  ;;  %v2706_v10 = vld [vmem:[#allocation2 + $0x46f] sm:$0xff]  ;;  %v5690_v45 = vld [vmem:[%s14449_s5 + $0x100] sm:$0xff] }
 0x3da   :  { %v4488_v22 = vadd.f32 %v4487_v53, %v4103_v40  ;;  %v1210_v54 = vpop.permute.xlu1 %1209  ;;  %2631 = vst.msk [vmem:[#allocation5 + $0x500] sm:$0xff] %vm1295_vm6, %v2493_v7  ;;  %v12343_v61 = vpop.f32.mrb[62].mxu1  ;;  %v5682_v7 = vld [vmem:[%s14449_s5 + $0xc0] sm:$0xff]  ;;  %v5683_v9 = vld [vmem:[%s14449_s5 + $0xc8] sm:$0xff] }
 0x3db   :  { %v4743_v38 = vmax.f32 %v4483_v21, %v4493_v6  ;;  %1349 = vst.msk [vmem:[#allocation5 + $0x4f8] sm:$0xff] %vm1295_vm6, %v1210_v54  ;;  %v9015_v37 = vpop.f32.mrb[86].mxu0  ;;  %3279 = vrot.lane.b32.xlu0 %v3089_v51, %s9607_s20  ;;  %v4204_v21 = vpop.f32.mrb[63].mxu1  ;;  %v4123_v6 = vadd.f32 %v12198_v12, %v11775_v4  ;;  %v9274_v62 = vpack.c.bf16 %v5683_v9, %v5682_v7  ;;  %v5691_v31 = vld [vmem:[%s14449_s5 + $0x108] sm:$0xff] }
 0x3dc   :  { %1997 = vrot.lane.b32.xlu1 %v12209_v42, %s9607_s20  ;;  %v4742_v59 = vmax.f32 %v12293_v14, %v4488_v22  ;;  %v4937_v42 = vld [vmem:[#allocation3 + $0x7] sm:$0xff]  ;;  %v12358_v16 = vadd.f32 %v9015_v37, %v4118_v46  ;;  %v4497_v15 = vpop.f32.mrb[87].mxu0  ;;  %9269 = vmatpush3.bf16.msra.mxu0 %v9268_v34  ;;  %v9290_v21 = vpack.c.bf16 %v5691_v31, %v5690_v45 }
 0x3dd   :  { %v4804_v25 = vld [vmem:[#allocation8 + $0x20] ss:$2 sm:$0xff]  ;;  %v4836_v49 = vld [vmem:[#allocation8 + $0x21] ss:$2 sm:$0xff]  ;;  %4775 = vst.msk [vmem:[#allocation8 + $0x38] sm:$0xff] %vm703_vm4, %v4743_v38  ;;  %4953 = vst.msk [vmem:[#allocation6] sm:$0xff] %vm703_vm4, %v4937_v42  ;;  %v12367_v14 = vadd.f32 %v4497_v15, %v4113_v47  ;;  %v2878_v63 = vpop.permute.xlu0 %2877  ;;  %9271 = vmatprep.subr.bf16.mxu0 %v9270_v26  ;;  %v4158_v31 = vadd.f32 %v12198_v12, %v11992_v8 }
 0x3de   :  { %4774 = vst.msk [vmem:[#allocation8 + $0x30] sm:$0xff] %vm703_vm4, %v4742_v59  ;;  %v1595_v18 = vpop.permute.xlu1 %1594  ;;  %v3696_v20 = vld [vmem:[#allocation5 + $0x4e8] sm:$0xff]  ;;  %v3695_v28 = vld [vmem:[#allocation5 + $0x4e0] sm:$0xff]  ;;  %v4865_v40 = vmax.f32 %v4804_v25, %v4836_v49  ;;  %v3090_v38 = vld [vmem:[#allocation2 + $0x470] sm:$0xff]  ;;  %v4133_v59 = vadd.f32 %v12198_v12, %v11867_v43  ;;  %9291 = vmatprep.subr.bf16.mxu1 %v9290_v21 }
 0x3df   :  { %1734 = vst.msk [vmem:[#allocation5 + $0x4f8] sm:$0xff] %vm1680_vm7, %v1595_v18  ;;  %3016 = vst.msk [vmem:[#allocation5 + $0x500] sm:$0xff] %vm1680_vm7, %v2878_v63  ;;  %4290 = vmatprep.mubr.f32.mxu1 %v3696_v20  ;;  %v12378_v60 = vld [vmem:[#allocation3 + $0x38] sm:$0xff]  ;;  %v9018_v53 = vpop.f32.mrb[88].mxu0  ;;  %2512 = vrot.lane.b32.xlu0 %v11827_v50, %s9606_s28  ;;  %v3727_v52 = vld [vmem:[#allocation5 + $0x5e0] sm:$0xff]  ;;  %v9272_v50 = vpack.c.bf16 %v5665_v19, %v12363_v3 }
 0x3e0   :  { %1229 = vrot.lane.b32.xlu1 %v12191_v33, %s9606_s28  ;;  %v12380_v32 = vld [vmem:[#allocation3 + $0x39] sm:$0xff]  ;;  %4291 = vmatmul.mubr.f32.gmra.mrb[98].mxu1 %v3695_v28  ;;  %4882 = vst.msk [vmem:[#allocation3 + $0x50] sm:$0xff] %vm703_vm4, %v4865_v40  ;;  %5274 = vst.msk [vmem:[#allocation6 + $0x20] sm:$0xff] %vm703_vm4, %v12378_v60  ;;  %v4513_v51 = vadd.f32 %v9018_v53, %v4128_v58  ;;  %v4507_v24 = vpop.f32.mrb[89].mxu0  ;;  %v5667_v44 = vld [vmem:[%s14449_s5 + $0x48] sm:$0xff] }
 0x3e1   :  { %5594 = vst.msk [vmem:[#allocation6 + $0x10] sm:$0xff] %vm703_vm4, %v12380_v32  ;;  %v4939_v33 = vld [vmem:[#allocation3 + $0x37] sm:$0xff]  ;;  %9082 = vmatprep.mubr.msk.f32.mxu0 %vm703_vm4, %v3727_v52  ;;  %v4508_v13 = vadd.f32 %v4507_v24, %v4123_v6  ;;  %v3262_v54 = vpop.permute.xlu0 %3261  ;;  %v5666_v47 = vld [vmem:[%s14449_s5 + $0x40] sm:$0xff]  ;;  %9273 = vmatpush3.bf16.msra.mxu0 %v9272_v50  ;;  %v4148_v6 = vadd.f32 %v12198_v12, %v11940_v23  ;;  %v5065_v8 = vld [vmem:[#allocation3 + $0x9] sm:$0xff] }
 0x3e2   :  { %v3730_v4 = vld [vmem:[#allocation5 + $0x5f8] sm:$0xff]  ;;  %4955 = vst.msk [vmem:[#allocation6 + $0x30] sm:$0xff] %vm703_vm4, %v4939_v33  ;;  %v1980_v22 = vpop.permute.xlu1 %1979  ;;  %v4745_v46 = vmax.f32 %v12358_v16, %v4513_v51  ;;  %v5684_v42 = vld [vmem:[%s14449_s5 + $0xd0] sm:$0xff]  ;;  %v9276_v3 = vpack.c.bf16 %v5667_v44, %v5666_v47  ;;  %9275 = vmatprep.subr.bf16.mxu0 %v9274_v62  ;;  %9293 = vmatpush3.bf16.msra.mxu1 %v9290_v21  ;;  %v5671_v62 = vld [vmem:[%s14449_s5 + $0x68] sm:$0xff] }
 0x3e3   :  { %9083 = vmatmul.mubr.msk.f32.gmra.mrb[132].mxu0 %vm703_vm4, %v3730_v4  ;;  %2119 = vst.msk [vmem:[#allocation5 + $0x4f8] sm:$0xff] %vm2065_vm8, %v1980_v22  ;;  %3400 = vst.msk [vmem:[#allocation5 + $0x500] sm:$0xff] %vm2065_vm8, %v3262_v54  ;;  %v4744_v37 = vmax.f32 %v12367_v14, %v4508_v13  ;;  %2897 = vrot.lane.b32.xlu0 %v2706_v10, %s9605_s27  ;;  %v5685_v25 = vld [vmem:[%s14449_s5 + $0xd8] sm:$0xff]  ;;  %v5692_v49 = vld [vmem:[%s14449_s5 + $0x110] sm:$0xff]  ;;  %v4143_v51 = vadd.f32 %v12198_v12, %v11927_v39 }
 0x3e4   :  { %1614 = vrot.lane.b32.xlu1 %v11810_v27, %s9605_s27  ;;  %v9021_v27 = vpop.f32.mrb[90].mxu0  ;;  %4777 = vst.msk [vmem:[#allocation8 + $0x48] sm:$0xff] %vm703_vm4, %v4745_v46  ;;  %v9278_v14 = vpack.c.bf16 %v5685_v25, %v5684_v42  ;;  %v5693_v18 = vld [vmem:[%s14449_s5 + $0x118] sm:$0xff]  ;;  %v5668_v19 = vld [vmem:[%s14449_s5 + $0x50] sm:$0xff]  ;;  %v4969_v10 = vld [vmem:[#allocation3 + $0x8] sm:$0xff] }
 0x3e5   :  { %v4806_v16 = vld [vmem:[#allocation8 + $0x30] ss:$2 sm:$0xff]  ;;  %v4838_v43 = vld [vmem:[#allocation8 + $0x31] ss:$2 sm:$0xff]  ;;  %v12434_v15 = vadd.f32 %v9021_v27, %v4138_v29  ;;  %v4517_v34 = vpop.f32.mrb[91].mxu0  ;;  %4776 = vst.msk [vmem:[#allocation8 + $0x40] sm:$0xff] %vm703_vm4, %v4744_v37  ;;  %v2495_v28 = vpop.permute.xlu0 %2494  ;;  %v9294_v26 = vpack.c.bf16 %v5693_v18, %v5692_v49  ;;  %9277 = vmatpush3.bf16.msra.mxu0 %v9276_v3  ;;  %v4168_v3 = vadd.f32 %v12198_v12, %v12037_v55 }
 0x3e6   :  { %v12440_v63 = vadd.f32 %v4517_v34, %v4133_v59  ;;  %v1212_v20 = vpop.permute.xlu1 %1211  ;;  %v4866_v40 = vmax.f32 %v4806_v16, %v4838_v43  ;;  %v5669_v58 = vld [vmem:[%s14449_s5 + $0x58] sm:$0xff]  ;;  %2632 = vst.msk [vmem:[#allocation5 + $0x518] sm:$0xff] %vm1295_vm6, %v2495_v28  ;;  %v12452_v53 = vpop.f32.mrb[64].mxu1  ;;  %v5687_v4 = vld [vmem:[%s14449_s5 + $0xe8] sm:$0xff]  ;;  %v5670_v22 = vld [vmem:[%s14449_s5 + $0x60] sm:$0xff]  ;;  %9279 = vmatprep.subr.bf16.mxu0 %v9278_v14  ;;  %v4153_v59 = vadd.f32 %v12198_v12, %v11980_v2 }
 0x3e7   :  { %1350 = vst.msk [vmem:[#allocation5 + $0x510] sm:$0xff] %vm1295_vm6, %v1212_v20  ;;  %v12456_v52 = vld [vmem:[#allocation3 + $0x50] sm:$0xff]  ;;  %v9024_v24 = vpop.f32.mrb[92].mxu0  ;;  %3281 = vrot.lane.b32.xlu0 %v3090_v38, %s9607_s20  ;;  %v4209_v23 = vpop.f32.mrb[65].mxu1  ;;  %9295 = vmatprep.subr.bf16.mxu1 %v9294_v26  ;;  %v9280_v13 = vpack.c.bf16 %v5669_v58, %v5668_v19  ;;  %v12487_v44 = vld [vmem:[#allocation3 + $0x21] sm:$0xff]  ;;  %v9284_v16 = vpack.c.bf16 %v5671_v62, %v5670_v22 }
 0x3e8   :  { %1999 = vrot.lane.b32.xlu1 %v12249_v36, %s9607_s20  ;;  %v12458_v33 = vld [vmem:[#allocation3 + $0x51] sm:$0xff]  ;;  %4883 = vst.msk [vmem:[#allocation3 + $0x68] sm:$0xff] %vm703_vm4, %v4866_v40  ;;  %v5686_v36 = vld [vmem:[%s14449_s5 + $0xe0] sm:$0xff]  ;;  %5275 = vst.msk [vmem:[#allocation6 + $0x38] sm:$0xff] %vm703_vm4, %v12456_v52  ;;  %v4533_v39 = vadd.f32 %v9024_v24, %v4148_v6  ;;  %v4527_v50 = vpop.f32.mrb[93].mxu0  ;;  %9297 = vmatpush3.bf16.msra.mxu1 %v9294_v26  ;;  %v4163_v20 = vadd.f32 %v12198_v12, %v12018_v1 }
 0x3e9   :  { %5595 = vst.msk [vmem:[#allocation6 + $0x28] sm:$0xff] %vm703_vm4, %v12458_v33  ;;  %v4940_v54 = vld [vmem:[#allocation3 + $0x4f] sm:$0xff]  ;;  %v4528_v7 = vadd.f32 %v4527_v50, %v4143_v51  ;;  %v2880_v45 = vpop.permute.xlu0 %2879  ;;  %v9282_v38 = vpack.c.bf16 %v5687_v4, %v5686_v36  ;;  %9281 = vmatpush3.bf16.msra.mxu0 %v9280_v13  ;;  %v12501_v14 = vld [vmem:[#allocation3 + $0x37] sm:$0xff]  ;;  %v5585_v4 = vld [vmem:[#allocation3 + $0xe1] sm:$0xff]  ;;  %v4173_v22 = vadd.f32 %v12198_v12, %v12056_v35 }
 0x3ea   :  { %v1597_v9 = vpop.permute.xlu1 %1596  ;;  %v3699_v29 = vld [vmem:[#allocation5 + $0x500] sm:$0xff]  ;;  %v3698_v46 = vld [vmem:[#allocation5 + $0x4f8] sm:$0xff]  ;;  %4956 = vst.msk [vmem:[#allocation6 + $0x48] sm:$0xff] %vm703_vm4, %v4940_v54  ;;  %v4747_v47 = vmax.f32 %v12434_v15, %v4533_v39  ;;  %v5688_v55 = vld [vmem:[%s14449_s5 + $0xf0] sm:$0xff]  ;;  %v4178_v39 = vadd.f32 %v12198_v12, %v12094_v48 }
 0x3eb   :  { %1735 = vst.msk [vmem:[#allocation5 + $0x510] sm:$0xff] %vm1680_vm7, %v1597_v9  ;;  %3017 = vst.msk [vmem:[#allocation5 + $0x518] sm:$0xff] %vm1680_vm7, %v2880_v45  ;;  %4295 = vmatprep.mubr.f32.mxu1 %v3699_v29  ;;  %v4746_v37 = vmax.f32 %v12440_v63, %v4528_v7  ;;  %v9027_v27 = vpop.f32.mrb[94].mxu0  ;;  %5321 = vrot.lane.b32.xlu0 %v12487_v44, %s9606_s28  ;;  %v5689_v40 = vld [vmem:[%s14449_s5 + $0xf8] sm:$0xff]  ;;  %v5672_v58 = vld [vmem:[%s14449_s5 + $0x70] sm:$0xff] }
 0x3ec   :  { %5001 = vrot.lane.b32.xlu1 %v4969_v10, %s9606_s28  ;;  %4296 = vmatmul.mubr.f32.gmra.mrb[100].mxu1 %v3698_v46  ;;  %v4808_v21 = vld [vmem:[#allocation8 + $0x40] ss:$2 sm:$0xff]  ;;  %v4840_v42 = vld [vmem:[#allocation8 + $0x41] ss:$2 sm:$0xff]  ;;  %4779 = vst.msk [vmem:[#allocation8 + $0x58] sm:$0xff] %vm703_vm4, %v4747_v47  ;;  %v4543_v25 = vadd.f32 %v9027_v27, %v4158_v31  ;;  %v4537_v49 = vpop.f32.mrb[95].mxu0  ;;  %v9286_v19 = vpack.c.bf16 %v5689_v40, %v5688_v55 }
 0x3ed   :  { %4778 = vst.msk [vmem:[#allocation8 + $0x50] sm:$0xff] %vm703_vm4, %v4746_v37  ;;  %v4538_v2 = vadd.f32 %v4537_v49, %v4153_v59  ;;  %v3264_v15 = vpop.permute.xlu0 %3263  ;;  %v4867_v34 = vmax.f32 %v4808_v21, %v4840_v42  ;;  %9283 = vmatprep.subr.bf16.mxu0 %v9282_v38  ;;  %v5673_v6 = vld [vmem:[%s14449_s5 + $0x78] sm:$0xff]  ;;  %5601 = vst.msk [vmem:[#allocation6 + $0xb8] sm:$0xff] %vm703_vm4, %v5585_v4  ;;  %v4188_v59 = vadd.f32 %v12198_v12, %v12180_v0 }
 0x3ee   :  { %v1982_v43 = vpop.permute.xlu1 %1981  ;;  %3401 = vst.msk [vmem:[#allocation5 + $0x518] sm:$0xff] %vm2065_vm8, %v3264_v15  ;;  %9285 = vmatpush3.bf16.msra.mxu0 %v9284_v16  ;;  %v9288_v36 = vpack.c.bf16 %v5673_v6, %v5672_v58  ;;  %v4198_v16 = vadd.f32 %v12198_v12, %v12261_v11  ;;  %v4193_v15 = vadd.f32 %v12198_v12, %v12224_v17 }
 0x3ef   :  { %2120 = vst.msk [vmem:[#allocation5 + $0x510] sm:$0xff] %vm2065_vm8, %v1982_v43  ;;  %v12503_v18 = vld [vmem:[#allocation3 + $0x68] sm:$0xff]  ;;  %v9030_v28 = vpop.f32.mrb[96].mxu0  ;;  %5418 = vrot.lane.b32.xlu0 %v12501_v14, %s9605_s27  ;;  %9287 = vmatprep.subr.bf16.mxu0 %v9286_v19  ;;  %v4208_v17 = vadd.f32 %v12198_v12, %v12452_v53 }
 0x3f0   :  { %5097 = vrot.lane.b32.xlu1 %v5065_v8, %s9605_s27  ;;  %v12505_v63 = vld [vmem:[#allocation3 + $0x69] sm:$0xff]  ;;  %4884 = vst.msk [vmem:[#allocation3 + $0x80] sm:$0xff] %vm703_vm4, %v4867_v34  ;;  %5276 = vst.msk [vmem:[#allocation6 + $0x50] sm:$0xff] %vm703_vm4, %v12503_v18  ;;  %v4553_v1 = vadd.f32 %v9030_v28, %v4168_v3  ;;  %v4547_v26 = vpop.f32.mrb[97].mxu0  ;;  %v4183_v8 = vadd.f32 %v12198_v12, %v12138_v57 }
 0x3f1   :  { %5596 = vst.msk [vmem:[#allocation6 + $0x40] sm:$0xff] %vm703_vm4, %v12505_v63  ;;  %v4941_v51 = vld [vmem:[#allocation3 + $0x67] sm:$0xff]  ;;  %v4548_v24 = vadd.f32 %v4547_v26, %v4163_v20  ;;  %v2497_v10 = vpop.permute.xlu0 %2496  ;;  %v12568_v43 = vld [vmem:[#allocation3 + $0x4f] sm:$0xff] }
 0x3f2   :  { %v1214_v23 = vpop.permute.xlu1 %1213  ;;  %4957 = vst.msk [vmem:[#allocation6 + $0x60] sm:$0xff] %vm703_vm4, %v4941_v51  ;;  %v4749_v50 = vmax.f32 %v4543_v25, %v4553_v1  ;;  %v12533_v13 = vpop.f32.mrb[66].mxu1  ;;  %9289 = vmatpush3.bf16.msra.mxu0 %v9288_v36  ;;  %v4203_v51 = vadd.f32 %v12198_v12, %v12343_v61 }
 0x3f3   :  { %1351 = vst.msk [vmem:[#allocation5 + $0x528] sm:$0xff] %vm1295_vm6, %v1214_v23  ;;  %2633 = vst.msk [vmem:[#allocation5 + $0x530] sm:$0xff] %vm1295_vm6, %v2497_v10  ;;  %v4748_v54 = vmax.f32 %v4538_v2, %v4548_v24  ;;  %v9033_v7 = vpop.f32.mrb[98].mxu0  ;;  %v4214_v9 = vpop.f32.mrb[67].mxu1  ;;  %5514 = vrot.lane.b32.xlu0 %v12378_v60, %s9607_s20 }
 0x3f4   :  { %5193 = vrot.lane.b32.xlu1 %v12295_v56, %s9607_s20  ;;  %v4810_v48 = vld [vmem:[#allocation8 + $0x50] ss:$2 sm:$0xff]  ;;  %v4842_v45 = vld [vmem:[#allocation8 + $0x51] ss:$2 sm:$0xff]  ;;  %4781 = vst.msk [vmem:[#allocation8 + $0x68] sm:$0xff] %vm703_vm4, %v4749_v50  ;;  %v4563_v29 = vadd.f32 %v9033_v7, %v4178_v39  ;;  %v4557_v46 = vpop.f32.mrb[99].mxu0  ;;  %v4213_v7 = vadd.f32 %v12198_v12, %v12533_v13 }
 0x3f5   :  { %4780 = vst.msk [vmem:[#allocation8 + $0x60] sm:$0xff] %vm703_vm4, %v4748_v54  ;;  %v4558_v56 = vadd.f32 %v4557_v46, %v4173_v22  ;;  %v2882_v62 = vpop.permute.xlu0 %2881  ;;  %v3702_v31 = vld [vmem:[#allocation5 + $0x518] sm:$0xff]  ;;  %v4868_v47 = vmax.f32 %v4810_v48, %v4842_v45 }
 0x3f6   :  { %v1599_v38 = vpop.permute.xlu1 %1598  ;;  %v3701_v35 = vld [vmem:[#allocation5 + $0x510] sm:$0xff]  ;;  %3018 = vst.msk [vmem:[#allocation5 + $0x530] sm:$0xff] %vm1680_vm7, %v2882_v62  ;;  %4300 = vmatprep.mubr.f32.mxu1 %v3702_v31  ;;  %v5388_v31 = vld [vmem:[#allocation3 + $0x67] sm:$0xff] }
 0x3f7   :  { %1736 = vst.msk [vmem:[#allocation5 + $0x528] sm:$0xff] %vm1680_vm7, %v1599_v38  ;;  %v12550_v37 = vld [vmem:[#allocation3 + $0x80] sm:$0xff]  ;;  %v9036_v21 = vpop.f32.mrb[100].mxu0  ;;  %4301 = vmatmul.mubr.f32.gmra.mrb[102].mxu1 %v3701_v35  ;;  %5323 = vrot.lane.b32.xlu0 %v12380_v32, %s9606_s28 }
 0x3f8   :  { %5003 = vrot.lane.b32.xlu1 %v12297_v5, %s9606_s28  ;;  %v12552_v27 = vld [vmem:[#allocation3 + $0x81] sm:$0xff]  ;;  %4885 = vst.msk [vmem:[#allocation3 + $0x98] sm:$0xff] %vm703_vm4, %v4868_v47  ;;  %5277 = vst.msk [vmem:[#allocation6 + $0x68] sm:$0xff] %vm703_vm4, %v12550_v37  ;;  %v4573_v5 = vadd.f32 %v9036_v21, %v4188_v59  ;;  %v4567_v42 = vpop.f32.mrb[101].mxu0 }
 0x3f9   :  { %5597 = vst.msk [vmem:[#allocation6 + $0x58] sm:$0xff] %vm703_vm4, %v12552_v27  ;;  %v4942_v0 = vld [vmem:[#allocation3 + $0x7f] sm:$0xff]  ;;  %v4568_v25 = vadd.f32 %v4567_v42, %v4183_v8  ;;  %v3266_v49 = vpop.permute.xlu0 %3265 }
 0x3fa   :  { %4958 = vst.msk [vmem:[#allocation6 + $0x78] sm:$0xff] %vm703_vm4, %v4942_v0  ;;  %v1984_v57 = vpop.permute.xlu1 %1983  ;;  %v4751_v2 = vmax.f32 %v4563_v29, %v4573_v5 }
 0x3fb   :  { %2121 = vst.msk [vmem:[#allocation5 + $0x528] sm:$0xff] %vm2065_vm8, %v1984_v57  ;;  %3402 = vst.msk [vmem:[#allocation5 + $0x530] sm:$0xff] %vm2065_vm8, %v3266_v49  ;;  %v4750_v34 = vmax.f32 %v4558_v56, %v4568_v25  ;;  %v9039_v3 = vpop.f32.mrb[102].mxu0  ;;  %5420 = vrot.lane.b32.xlu0 %v12568_v43, %s9605_s27 }
 0x3fc   :  { %5099 = vrot.lane.b32.xlu1 %v12487_v44, %s9605_s27  ;;  %v4812_v20 = vld [vmem:[#allocation8 + $0x60] ss:$2 sm:$0xff]  ;;  %v4844_v11 = vld [vmem:[#allocation8 + $0x61] ss:$2 sm:$0xff]  ;;  %4783 = vst.msk [vmem:[#allocation8 + $0x78] sm:$0xff] %vm703_vm4, %v4751_v2  ;;  %v4583_v28 = vadd.f32 %v9039_v3, %v4198_v16  ;;  %v4577_v55 = vpop.f32.mrb[103].mxu0 }
 0x3fd   :  { %4782 = vst.msk [vmem:[#allocation8 + $0x70] sm:$0xff] %vm703_vm4, %v4750_v34  ;;  %v4578_v40 = vadd.f32 %v4577_v55, %v4193_v15  ;;  %v2499_v26 = vpop.permute.xlu0 %2498  ;;  %v4869_v44 = vmax.f32 %v4812_v20, %v4844_v11 }
 0x3fe   :  { %v1216_v1 = vpop.permute.xlu1 %1215  ;;  %2634 = vst.msk [vmem:[#allocation5 + $0x548] sm:$0xff] %vm1295_vm6, %v2499_v26  ;;  %v4217_v19 = vpop.f32.mrb[68].mxu1 }
 0x3ff   :  { %1352 = vst.msk [vmem:[#allocation5 + $0x540] sm:$0xff] %vm1295_vm6, %v1216_v1  ;;  %v12584_v58 = vld [vmem:[#allocation3 + $0x98] sm:$0xff]  ;;  %v9042_v24 = vpop.f32.mrb[104].mxu0  ;;  %v4219_v23 = vpop.f32.mrb[69].mxu1  ;;  %5516 = vrot.lane.b32.xlu0 %v12456_v52, %s9607_s20  ;;  %v4218_v22 = vadd.f32 %v12198_v12, %v4217_v19 }
 0x400   :  { %5195 = vrot.lane.b32.xlu1 %v12501_v14, %s9607_s20  ;;  %v12586_v6 = vld [vmem:[#allocation3 + $0x99] sm:$0xff]  ;;  %4886 = vst.msk [vmem:[#allocation3 + $0xb0] sm:$0xff] %vm703_vm4, %v4869_v44  ;;  %5278 = vst.msk [vmem:[#allocation6 + $0x80] sm:$0xff] %vm703_vm4, %v12584_v58  ;;  %v4593_v14 = vadd.f32 %v9042_v24, %v4208_v17  ;;  %v4587_v10 = vpop.f32.mrb[105].mxu0 }
 0x401   :  { %5598 = vst.msk [vmem:[#allocation6 + $0x70] sm:$0xff] %vm703_vm4, %v12586_v6  ;;  %v4943_v53 = vld [vmem:[#allocation3 + $0x97] sm:$0xff]  ;;  %v4588_v36 = vadd.f32 %v4587_v10, %v4203_v51  ;;  %v2884_v4 = vpop.permute.xlu0 %2883  ;;  %v5389_v44 = vld [vmem:[#allocation3 + $0x7f] sm:$0xff] }
 0x402   :  { %4959 = vst.msk [vmem:[#allocation6 + $0x90] sm:$0xff] %vm703_vm4, %v4943_v53  ;;  %v1601_v61 = vpop.permute.xlu1 %1600  ;;  %v3705_v39 = vld [vmem:[#allocation5 + $0x530] sm:$0xff]  ;;  %v3704_v50 = vld [vmem:[#allocation5 + $0x528] sm:$0xff]  ;;  %v4753_v54 = vmax.f32 %v4583_v28, %v4593_v14 }
 0x403   :  { %1737 = vst.msk [vmem:[#allocation5 + $0x540] sm:$0xff] %vm1680_vm7, %v1601_v61  ;;  %3019 = vst.msk [vmem:[#allocation5 + $0x548] sm:$0xff] %vm1680_vm7, %v2884_v4  ;;  %4305 = vmatprep.mubr.f32.mxu1 %v3705_v39  ;;  %v4752_v9 = vmax.f32 %v4578_v40, %v4588_v36  ;;  %v9045_v48 = vpop.f32.mrb[106].mxu0  ;;  %5325 = vrot.lane.b32.xlu0 %v12458_v33, %s9606_s28 }
 0x404   :  { %5005 = vrot.lane.b32.xlu1 %v12378_v60, %s9606_s28  ;;  %4306 = vmatmul.mubr.f32.gmra.mrb[104].mxu1 %v3704_v50  ;;  %v4814_v45 = vld [vmem:[#allocation8 + $0x70] ss:$2 sm:$0xff]  ;;  %v4846_v29 = vld [vmem:[#allocation8 + $0x71] ss:$2 sm:$0xff]  ;;  %4785 = vst.msk [vmem:[#allocation8 + $0x88] sm:$0xff] %vm703_vm4, %v4753_v54  ;;  %v12608_v46 = vadd.f32 %v9045_v48, %v4218_v22  ;;  %v4597_v56 = vpop.f32.mrb[107].mxu0 }
 0x405   :  { %4784 = vst.msk [vmem:[#allocation8 + $0x80] sm:$0xff] %vm703_vm4, %v4752_v9  ;;  %v4598_v38 = vadd.f32 %v4597_v56, %v4213_v7  ;;  %v3268_v62 = vpop.permute.xlu0 %3267  ;;  %v4870_v13 = vmax.f32 %v4814_v45, %v4846_v29 }
 0x406   :  { %v1986_v60 = vpop.permute.xlu1 %1985  ;;  %3403 = vst.msk [vmem:[#allocation5 + $0x548] sm:$0xff] %vm2065_vm8, %v3268_v62 }
 0x407   :  { %2122 = vst.msk [vmem:[#allocation5 + $0x540] sm:$0xff] %vm2065_vm8, %v1986_v60  ;;  %v12615_v35 = vld [vmem:[#allocation3 + $0xaf] sm:$0xff]  ;;  %v12621_v8 = vpop.f32.mrb[108].mxu0  ;;  %5422 = vrot.lane.b32.xlu0 %v5388_v31, %s9605_s27 }
 0x408   :  { %5101 = vrot.lane.b32.xlu1 %v12380_v32, %s9605_s27  ;;  %v12617_v47 = vld [vmem:[#allocation3 + $0xb0] sm:$0xff]  ;;  %4887 = vst.msk [vmem:[#allocation3 + $0xc8] sm:$0xff] %vm703_vm4, %v4870_v13  ;;  %4960 = vst.msk [vmem:[#allocation6 + $0xa8] sm:$0xff] %vm703_vm4, %v12615_v35  ;;  %v4607_v32 = vpop.f32.mrb[109].mxu0 }
 0x409   :  { %v12619_v59 = vld [vmem:[#allocation3 + $0xb1] sm:$0xff]  ;;  %5279 = vst.msk [vmem:[#allocation6 + $0x98] sm:$0xff] %vm703_vm4, %v12617_v47  ;;  %v2501_v0 = vpop.permute.xlu0 %2500 }
 0x40a   :  { %5599 = vst.msk [vmem:[#allocation6 + $0x88] sm:$0xff] %vm703_vm4, %v12619_v59  ;;  %v1218_v21 = vpop.permute.xlu1 %1217  ;;  %v4222_v5 = vpop.f32.mrb[70].mxu1 }
 0x40b   :  { %1353 = vst.msk [vmem:[#allocation5 + $0x558] sm:$0xff] %vm1295_vm6, %v1218_v21  ;;  %2635 = vst.msk [vmem:[#allocation5 + $0x560] sm:$0xff] %vm1295_vm6, %v2501_v0  ;;  %v4223_v42 = vadd.f32 %v12198_v12, %v4222_v5  ;;  %v12636_v25 = vpop.f32.mrb[110].mxu0  ;;  %v4224_v57 = vpop.f32.mrb[71].mxu1  ;;  %5518 = vrot.lane.b32.xlu0 %v12503_v18, %s9607_s20 }
 0x40c   :  { %5197 = vrot.lane.b32.xlu1 %v12568_v43, %s9607_s20  ;;  %v4816_v49 = vld [vmem:[#allocation8 + $0x80] ss:$2 sm:$0xff]  ;;  %v4848_v16 = vld [vmem:[#allocation8 + $0x81] ss:$2 sm:$0xff]  ;;  %v12640_v2 = vpop.f32.mrb[111].mxu0 }
 0x40d   :  { %v4608_v15 = vadd.f32 %v4607_v32, %v4223_v42  ;;  %v2886_v3 = vpop.permute.xlu0 %2885  ;;  %v3708_v20 = vld [vmem:[#allocation5 + $0x548] sm:$0xff]  ;;  %v4871_v28 = vmax.f32 %v4816_v49, %v4848_v16 }
 0x40e   :  { %v1603_v34 = vpop.permute.xlu1 %1602  ;;  %v3707_v11 = vld [vmem:[#allocation5 + $0x540] sm:$0xff]  ;;  %3020 = vst.msk [vmem:[#allocation5 + $0x560] sm:$0xff] %vm1680_vm7, %v2886_v3  ;;  %4310 = vmatprep.mubr.f32.mxu1 %v3708_v20 }
 0x40f   :  { %1738 = vst.msk [vmem:[#allocation5 + $0x558] sm:$0xff] %vm1680_vm7, %v1603_v34  ;;  %v12646_v12 = vld [vmem:[#allocation3 + $0xc8] sm:$0xff]  ;;  %v4754_v55 = vmax.f32 %v4598_v38, %v4608_v15  ;;  %v12650_v40 = vpop.f32.mrb[112].mxu0  ;;  %4311 = vmatmul.mubr.f32.gmra.mrb[106].mxu1 %v3707_v11  ;;  %5327 = vrot.lane.b32.xlu0 %v12505_v63, %s9606_s28  ;;  %v5390_v38 = vld [vmem:[#allocation3 + $0x97] sm:$0xff] }
 0x410   :  { %5007 = vrot.lane.b32.xlu1 %v12456_v52, %s9606_s28  ;;  %v12648_v43 = vld [vmem:[#allocation3 + $0xc9] sm:$0xff]  ;;  %4888 = vst.msk [vmem:[#allocation3 + $0x110] sm:$0xff] %vm703_vm4, %v4871_v28  ;;  %5280 = vst.msk [vmem:[#allocation6 + $0xb0] sm:$0xff] %vm703_vm4, %v12646_v12  ;;  %v12659_v52 = vpop.f32.mrb[113].mxu0 }
 0x411   :  { %5600 = vst.msk [vmem:[#allocation6 + $0xa0] sm:$0xff] %vm703_vm4, %v12648_v43  ;;  %4786 = vst.msk [vmem:[#allocation8 + $0x90] sm:$0xff] %vm703_vm4, %v4754_v55  ;;  %v3270_v26 = vpop.permute.xlu0 %3269 }
 0x412   :  { %v1988_v1 = vpop.permute.xlu1 %1987  ;;  %3404 = vst.msk [vmem:[#allocation5 + $0x560] sm:$0xff] %vm2065_vm8, %v3270_v26 }
 0x413   :  { %2123 = vst.msk [vmem:[#allocation5 + $0x558] sm:$0xff] %vm2065_vm8, %v1988_v1  ;;  %v12666_v17 = vpop.f32.mrb[114].mxu0  ;;  %5424 = vrot.lane.b32.xlu0 %v5389_v44, %s9605_s27 }
 0x414   :  { %5103 = vrot.lane.b32.xlu1 %v12458_v33, %s9605_s27  ;;  %v12669_v19 = vpop.f32.mrb[115].mxu0  ;;  %v12681_v33 = vld [vmem:[%s14448_s4] ss:$0 sm:$0xff] }
 0x415   :  { %v2503_v24 = vpop.permute.xlu0 %2502 }
 0x416   :  { %v1220_v51 = vpop.permute.xlu1 %1219  ;;  %2636 = vst.msk [vmem:[#allocation5 + $0x578] sm:$0xff] %vm1295_vm6, %v2503_v24  ;;  %v4227_v23 = vpop.f32.mrb[72].mxu1 }
 0x417   :  { %1354 = vst.msk [vmem:[#allocation5 + $0x570] sm:$0xff] %vm1295_vm6, %v1220_v51  ;;  %v12674_v53 = vld [vmem:[#allocation3 + $0x10f] sm:$0xff]  ;;  %v4228_v10 = vadd.f32 %v12681_v33, %v4227_v23  ;;  %v12684_v36 = vpop.f32.mrb[116].mxu0  ;;  %v4229_v61 = vpop.f32.mrb[73].mxu1  ;;  %5520 = vrot.lane.b32.xlu0 %v12550_v37, %s9607_s20 }
 0x418   :  { %5199 = vrot.lane.b32.xlu1 %v5388_v31, %s9607_s20  ;;  %v12676_v14 = vld [vmem:[#allocation3 + $0x110] sm:$0xff]  ;;  %4962 = vst.msk [vmem:[#allocation6 + $0xd8] sm:$0xff] %vm703_vm4, %v12674_v53  ;;  %v12692_v4 = vpop.f32.mrb[117].mxu0 }
 0x419   :  { %5281 = vst.msk [vmem:[#allocation6 + $0xc8] sm:$0xff] %vm703_vm4, %v12676_v14  ;;  %v4613_v39 = vadd.f32 %v12621_v8, %v4228_v10  ;;  %v2888_v22 = vpop.permute.xlu0 %2887  ;;  %v3711_v54 = vld [vmem:[#allocation5 + $0x560] sm:$0xff] }
 0x41a   :  { %v1605_v50 = vpop.permute.xlu1 %1604  ;;  %v3710_v7 = vld [vmem:[#allocation5 + $0x558] sm:$0xff]  ;;  %3021 = vst.msk [vmem:[#allocation5 + $0x578] sm:$0xff] %vm1680_vm7, %v2888_v22  ;;  %4315 = vmatprep.mubr.f32.mxu1 %v3711_v54 }
 0x41b   :  { %1739 = vst.msk [vmem:[#allocation5 + $0x570] sm:$0xff] %vm1680_vm7, %v1605_v50  ;;  %v4755_v9 = vmax.f32 %v12608_v46, %v4613_v39  ;;  %v12700_v48 = vpop.f32.mrb[118].mxu0  ;;  %4316 = vmatmul.mubr.f32.gmra.mrb[108].mxu1 %v3710_v7  ;;  %5329 = vrot.lane.b32.xlu0 %v12552_v27, %s9606_s28 }
 0x41c   :  { %5009 = vrot.lane.b32.xlu1 %v12503_v18, %s9606_s28  ;;  %v12704_v45 = vpop.f32.mrb[119].mxu0 }
 0x41d   :  { %4787 = vst.msk [vmem:[#allocation8 + $0x98] sm:$0xff] %vm703_vm4, %v4755_v9  ;;  %v3272_v56 = vpop.permute.xlu0 %3271 }
 0x41e   :  { %v1990_v29 = vpop.permute.xlu1 %1989  ;;  %3405 = vst.msk [vmem:[#allocation5 + $0x578] sm:$0xff] %vm2065_vm8, %v3272_v56  ;;  %v5392_v56 = vld [vmem:[#allocation3 + $0xc7] sm:$0xff] }
 0x41f   :  { %2124 = vst.msk [vmem:[#allocation5 + $0x570] sm:$0xff] %vm2065_vm8, %v1990_v29  ;;  %5426 = vrot.lane.b32.xlu0 %v5390_v38, %s9605_s27  ;;  %v12712_v18 = vpop.f32.mrb[120].mxu0 }
 0x420   :  { %5105 = vrot.lane.b32.xlu1 %v12505_v63, %s9605_s27  ;;  %v12714_v46 = vpop.f32.mrb[121].mxu0 }
 0x421   :  { %v2505_v62 = vpop.permute.xlu0 %2504 }
 0x422   :  { %v1222_v60 = vpop.permute.xlu1 %1221  ;;  %2637 = vst.msk [vmem:[#allocation5 + $0x590] sm:$0xff] %vm1295_vm6, %v2505_v62  ;;  %v4232_v31 = vpop.f32.mrb[74].mxu1 }
 0x423   :  { %1355 = vst.msk [vmem:[#allocation5 + $0x588] sm:$0xff] %vm1295_vm6, %v1222_v60  ;;  %v4233_v13 = vadd.f32 %v12681_v33, %v4232_v31  ;;  %v4234_v8 = vpop.f32.mrb[75].mxu1  ;;  %5522 = vrot.lane.b32.xlu0 %v12584_v58, %s9607_s20  ;;  %v12722_v63 = vpop.f32.mrb[122].mxu0 }
 0x424   :  { %5201 = vrot.lane.b32.xlu1 %v5389_v44, %s9607_s20  ;;  %v12724_v32 = vpop.f32.mrb[123].mxu0  ;;  %v4818_v21 = vld [vmem:[#allocation8 + $0x90] ss:$2 sm:$0xff]  ;;  %v4850_v0 = vld [vmem:[#allocation8 + $0x91] ss:$2 sm:$0xff] }
 0x425   :  { %v12727_v5 = vadd.f32 %v12640_v2, %v4233_v13  ;;  %v2890_v57 = vpop.permute.xlu0 %2889  ;;  %v3714_v49 = vld [vmem:[#allocation5 + $0x578] sm:$0xff]  ;;  %v4872_v15 = vmax.f32 %v4818_v21, %v4850_v0 }
 0x426   :  { %v1607_v42 = vpop.permute.xlu1 %1606  ;;  %v3713_v16 = vld [vmem:[#allocation5 + $0x570] sm:$0xff]  ;;  %3022 = vst.msk [vmem:[#allocation5 + $0x590] sm:$0xff] %vm1680_vm7, %v2890_v57  ;;  %4320 = vmatprep.mubr.f32.mxu1 %v3714_v49 }
 0x427   :  { %1740 = vst.msk [vmem:[#allocation5 + $0x588] sm:$0xff] %vm1680_vm7, %v1607_v42  ;;  %4321 = vmatmul.mubr.f32.gmra.mrb[110].mxu1 %v3713_v16  ;;  %5331 = vrot.lane.b32.xlu0 %v12586_v6, %s9606_s28  ;;  %v12736_v2 = vpop.f32.mrb[124].mxu0 }
 0x428   :  { %5011 = vrot.lane.b32.xlu1 %v12550_v37, %s9606_s28  ;;  %4889 = vst.msk [vmem:[#allocation3 + $0x128] sm:$0xff] %vm703_vm4, %v4872_v15  ;;  %v12738_v34 = vpop.f32.mrb[125].mxu0 }
 0x429   :  { %v3274_v20 = vpop.permute.xlu0 %3273 }
 0x42a   :  { %v1992_v3 = vpop.permute.xlu1 %1991  ;;  %3406 = vst.msk [vmem:[#allocation5 + $0x590] sm:$0xff] %vm2065_vm8, %v3274_v20 }
 0x42b   :  { %2125 = vst.msk [vmem:[#allocation5 + $0x588] sm:$0xff] %vm2065_vm8, %v1992_v3  ;;  %5428 = vrot.lane.b32.xlu0 %v12615_v35, %s9605_s27  ;;  %v12746_v37 = vpop.f32.mrb[126].mxu0  ;;  %v4977_v3 = vld [vmem:[#allocation3 + $0xf8] sm:$0xff] }
 0x42c   :  { %5107 = vrot.lane.b32.xlu1 %v12552_v27, %s9605_s27  ;;  %v12748_v11 = vpop.f32.mrb[127].mxu0 }
 0x42d   :  { %v2507_v55 = vpop.permute.xlu0 %2506 }
 0x42e   :  { %v1224_v28 = vpop.permute.xlu1 %1223  ;;  %2638 = vst.msk [vmem:[#allocation5 + $0x5a8] sm:$0xff] %vm1295_vm6, %v2507_v55  ;;  %v4237_v1 = vpop.f32.mrb[76].mxu1 }
 0x42f   :  { %1356 = vst.msk [vmem:[#allocation5 + $0x5a0] sm:$0xff] %vm1295_vm6, %v1224_v28  ;;  %v12753_v26 = vld [vmem:[#allocation3 + $0x127] sm:$0xff]  ;;  %v4238_v51 = vadd.f32 %v12681_v33, %v4237_v1  ;;  %v4239_v24 = vpop.f32.mrb[77].mxu1  ;;  %5524 = vrot.lane.b32.xlu0 %v12617_v47, %s9607_s20  ;;  %v12764_v23 = vpop.f32.mrb[128].mxu0 }
 0x430   :  { %5203 = vrot.lane.b32.xlu1 %v5390_v38, %s9607_s20  ;;  %v12755_v44 = vld [vmem:[#allocation3 + $0x128] sm:$0xff]  ;;  %4963 = vst.msk [vmem:[#allocation6 + $0xf0] sm:$0xff] %vm703_vm4, %v12753_v26  ;;  %v12770_v10 = vpop.f32.mrb[129].mxu0 }
 0x431   :  { %v12757_v27 = vld [vmem:[#allocation3 + $0x129] sm:$0xff]  ;;  %5282 = vst.msk [vmem:[#allocation6 + $0xe0] sm:$0xff] %vm703_vm4, %v12755_v44  ;;  %v12773_v61 = vadd.f32 %v12636_v25, %v4238_v51  ;;  %v2892_v50 = vpop.permute.xlu0 %2891  ;;  %v5297_v51 = vld [vmem:[#allocation3 + $0x111] sm:$0xff] }
 0x432   :  { %5602 = vst.msk [vmem:[#allocation6 + $0xd0] sm:$0xff] %vm703_vm4, %v12757_v27  ;;  %v1609_v39 = vpop.permute.xlu1 %1608  ;;  %v3717_v22 = vld [vmem:[#allocation5 + $0x590] sm:$0xff]  ;;  %v3716_v54 = vld [vmem:[#allocation5 + $0x588] sm:$0xff] }
 0x433   :  { %1741 = vst.msk [vmem:[#allocation5 + $0x5a0] sm:$0xff] %vm1680_vm7, %v1609_v39  ;;  %3023 = vst.msk [vmem:[#allocation5 + $0x5a8] sm:$0xff] %vm1680_vm7, %v2892_v50  ;;  %4325 = vmatprep.mubr.f32.mxu1 %v3717_v22  ;;  %5333 = vrot.lane.b32.xlu0 %v12619_v59, %s9606_s28  ;;  %v12781_v7 = vpop.f32.mrb[130].mxu0  ;;  %v5073_v39 = vld [vmem:[#allocation3 + $0xf9] sm:$0xff] }
 0x434   :  { %5013 = vrot.lane.b32.xlu1 %v12584_v58, %s9606_s28  ;;  %4326 = vmatmul.mubr.f32.gmra.mrb[112].mxu1 %v3716_v54  ;;  %v12783_v25 = vpop.f32.mrb[131].mxu0 }
 0x435   :  { %v3276_v29 = vpop.permute.xlu0 %3275 }
 0x436   :  { %v1994_v9 = vpop.permute.xlu1 %1993  ;;  %3407 = vst.msk [vmem:[#allocation5 + $0x5a8] sm:$0xff] %vm2065_vm8, %v3276_v29 }
 0x437   :  { %2126 = vst.msk [vmem:[#allocation5 + $0x5a0] sm:$0xff] %vm2065_vm8, %v1994_v9  ;;  %5430 = vrot.lane.b32.xlu0 %v5392_v56, %s9605_s27 }
 0x438   :  { %5109 = vrot.lane.b32.xlu1 %v12586_v6, %s9605_s27 }
 0x439   :  { %v2509_v38 = vpop.permute.xlu0 %2508 }
 0x43a   :  { %v1226_v58 = vpop.permute.xlu1 %1225  ;;  %2639 = vst.msk [vmem:[#allocation5 + $0x5c0] sm:$0xff] %vm1295_vm6, %v2509_v38  ;;  %v4242_v60 = vpop.f32.mrb[78].mxu1 }
 0x43b   :  { %1357 = vst.msk [vmem:[#allocation5 + $0x5b8] sm:$0xff] %vm1295_vm6, %v1226_v58  ;;  %v4243_v62 = vadd.f32 %v12681_v33, %v4242_v60  ;;  %v4244_v31 = vpop.f32.mrb[79].mxu1  ;;  %5526 = vrot.lane.b32.xlu0 %v12646_v12, %s9607_s20  ;;  %v5393_v12 = vld [vmem:[#allocation3 + $0xdf] sm:$0xff] }
 0x43c   :  { %5205 = vrot.lane.b32.xlu1 %v12615_v35, %s9607_s20  ;;  %v4945_v35 = vld [vmem:[#allocation3 + $0xf7] sm:$0xff] }
 0x43d   :  { %v4628_v6 = vadd.f32 %v12659_v52, %v4243_v62  ;;  %v2894_v8 = vpop.permute.xlu0 %2893  ;;  %v3720_v21 = vld [vmem:[#allocation5 + $0x5a8] sm:$0xff]  ;;  %4961 = vst.msk [vmem:[#allocation6 + $0xc0] sm:$0xff] %vm703_vm4, %v4945_v35 }
 0x43e   :  { %v1611_v13 = vpop.permute.xlu1 %1610  ;;  %v3719_v0 = vld [vmem:[#allocation5 + $0x5a0] sm:$0xff]  ;;  %3024 = vst.msk [vmem:[#allocation5 + $0x5c0] sm:$0xff] %vm1680_vm7, %v2894_v8  ;;  %4330 = vmatprep.mubr.f32.mxu1 %v3720_v21 }
 0x43f   :  { %1742 = vst.msk [vmem:[#allocation5 + $0x5b8] sm:$0xff] %vm1680_vm7, %v1611_v13  ;;  %v4756_v42 = vmax.f32 %v12727_v5, %v4628_v6  ;;  %4331 = vmatmul.mubr.f32.gmra.mrb[114].mxu1 %v3719_v0  ;;  %5335 = vrot.lane.b32.xlu0 %v12648_v43, %s9606_s28 }
 0x440   :  { %5015 = vrot.lane.b32.xlu1 %v12617_v47, %s9606_s28  ;;  %v5489_v47 = vld [vmem:[#allocation3 + $0xe0] sm:$0xff] }
 0x441   :  { %4788 = vst.msk [vmem:[#allocation8 + $0xa0] sm:$0xff] %vm703_vm4, %v4756_v42  ;;  %v3278_v57 = vpop.permute.xlu0 %3277 }
 0x442   :  { %v1996_v52 = vpop.permute.xlu1 %1995  ;;  %3408 = vst.msk [vmem:[#allocation5 + $0x5c0] sm:$0xff] %vm2065_vm8, %v3278_v57 }
 0x443   :  { %2127 = vst.msk [vmem:[#allocation5 + $0x5b8] sm:$0xff] %vm2065_vm8, %v1996_v52  ;;  %5432 = vrot.lane.b32.xlu0 %v5393_v12, %s9605_s27 }
 0x444   :  { %5111 = vrot.lane.b32.xlu1 %v12619_v59, %s9605_s27 }
 0x445   :  { %v2511_v49 = vpop.permute.xlu0 %2510 }
 0x446   :  { %v1228_v5 = vpop.permute.xlu1 %1227  ;;  %2640 = vst.msk [vmem:[#allocation5 + $0x5d8] sm:$0xff] %vm1295_vm6, %v2511_v49  ;;  %v4247_v43 = vpop.f32.mrb[80].mxu1 }
 0x447   :  { %1358 = vst.msk [vmem:[#allocation5 + $0x5d0] sm:$0xff] %vm1295_vm6, %v1228_v5  ;;  %v4248_v16 = vadd.f32 %v12681_v33, %v4247_v43  ;;  %v4249_v15 = vpop.f32.mrb[81].mxu1  ;;  %5528 = vrot.lane.b32.xlu0 %v5489_v47, %s9607_s20  ;;  %v5612_v43 = vld [vmem:[#allocation6 + $0x10] sm:$0xff] }
 0x448   :  { %5207 = vrot.lane.b32.xlu1 %v5392_v56, %s9607_s20  ;;  %v5615_v15 = vld [vmem:[#allocation6 + $0x28] sm:$0xff] }
 0x449   :  { %v4633_v59 = vadd.f32 %v12650_v40, %v4248_v16  ;;  %v2896_v28 = vpop.permute.xlu0 %2895  ;;  %v3723_v55 = vld [vmem:[#allocation5 + $0x5c0] sm:$0xff] }
 0x44a   :  { %v1613_v20 = vpop.permute.xlu1 %1612  ;;  %v3722_v1 = vld [vmem:[#allocation5 + $0x5b8] sm:$0xff]  ;;  %3025 = vst.msk [vmem:[#allocation5 + $0x5d8] sm:$0xff] %vm1680_vm7, %v2896_v28  ;;  %4335 = vmatprep.mubr.f32.mxu1 %v3723_v55 }
 0x44b   :  { %1743 = vst.msk [vmem:[#allocation5 + $0x5d0] sm:$0xff] %vm1680_vm7, %v1613_v20  ;;  %v4757_v24 = vmax.f32 %v12773_v61, %v4633_v59  ;;  %4336 = vmatmul.mubr.f32.gmra.mrb[116].mxu1 %v3722_v1  ;;  %5337 = vrot.lane.b32.xlu0 %v5297_v51, %s9606_s28  ;;  %v5621_v28 = vld [vmem:[#allocation6 + $0x58] sm:$0xff]  ;;  %v5624_v1 = vld [vmem:[#allocation6 + $0x70] sm:$0xff] }
 0x44c   :  { %5017 = vrot.lane.b32.xlu1 %v4977_v3, %s9606_s28 }
 0x44d   :  { %4789 = vst.msk [vmem:[#allocation8 + $0xa8] sm:$0xff] %vm703_vm4, %v4757_v24  ;;  %v3280_v50 = vpop.permute.xlu0 %3279 }
 0x44e   :  { %v1998_v40 = vpop.permute.xlu1 %1997  ;;  %3409 = vst.msk [vmem:[#allocation5 + $0x5d8] sm:$0xff] %vm2065_vm8, %v3280_v50 }
 0x44f   :  { %2128 = vst.msk [vmem:[#allocation5 + $0x5d0] sm:$0xff] %vm2065_vm8, %v1998_v40  ;;  %5434 = vrot.lane.b32.xlu0 %v12753_v26, %s9605_s27 }
 0x450   :  { %5113 = vrot.lane.b32.xlu1 %v5073_v39, %s9605_s27 }
 0x451   :  { %v2513_v54 = vpop.permute.xlu0 %2512 }
 0x452   :  { %v1230_v22 = vpop.permute.xlu1 %1229  ;;  %2641 = vst.msk [vmem:[#allocation5 + $0x5f0] sm:$0xff] %vm1295_vm6, %v2513_v54  ;;  %v4252_v61 = vpop.f32.mrb[82].mxu1 }
 0x453   :  { %1359 = vst.msk [vmem:[#allocation5 + $0x5e8] sm:$0xff] %vm1295_vm6, %v1230_v22  ;;  %v4253_v9 = vadd.f32 %v12681_v33, %v4252_v61  ;;  %v4254_v29 = vpop.f32.mrb[83].mxu1  ;;  %5530 = vrot.lane.b32.xlu0 %v12755_v44, %s9607_s20  ;;  %v5627_v22 = vld [vmem:[#allocation6 + $0x88] sm:$0xff]  ;;  %v5630_v61 = vld [vmem:[#allocation6 + $0xa0] sm:$0xff] }
 0x454   :  { %5209 = vrot.lane.b32.xlu1 %v12674_v53, %s9607_s20  ;;  %v4820_v56 = vld [vmem:[#allocation8 + $0xa0] ss:$2 sm:$0xff]  ;;  %v4852_v58 = vld [vmem:[#allocation8 + $0xa1] ss:$2 sm:$0xff] }
 0x455   :  { %v12837_v38 = vadd.f32 %v12669_v19, %v4253_v9  ;;  %v2898_v62 = vpop.permute.xlu0 %2897  ;;  %v3726_v31 = vld [vmem:[#allocation5 + $0x5d8] sm:$0xff]  ;;  %v4873_v13 = vmax.f32 %v4820_v56, %v4852_v58  ;;  %v5636_v56 = vld [vmem:[#allocation6 + $0xd0] sm:$0xff] }
 0x456   :  { %v1615_v60 = vpop.permute.xlu1 %1614  ;;  %v3725_v6 = vld [vmem:[#allocation5 + $0x5d0] sm:$0xff]  ;;  %3026 = vst.msk [vmem:[#allocation5 + $0x5f0] sm:$0xff] %vm1680_vm7, %v2898_v62  ;;  %4340 = vmatprep.mubr.f32.mxu1 %v3726_v31 }
 0x457   :  { %1744 = vst.msk [vmem:[#allocation5 + $0x5e8] sm:$0xff] %vm1680_vm7, %v1615_v60  ;;  %4341 = vmatmul.mubr.f32.gmra.mrb[118].mxu1 %v3725_v6  ;;  %5339 = vrot.lane.b32.xlu0 %v12757_v27, %s9606_s28 }
 0x458   :  { %5019 = vrot.lane.b32.xlu1 %v12676_v14, %s9606_s28  ;;  %4890 = vst.msk [vmem:[#allocation3 + $0x140] sm:$0xff] %vm703_vm4, %v4873_v13 }
 0x459   :  { %v3282_v53 = vpop.permute.xlu0 %3281 }
 0x45a   :  { %v2000_v19 = vpop.permute.xlu1 %1999  ;;  %3410 = vst.msk [vmem:[#allocation5 + $0x5f0] sm:$0xff] %vm2065_vm8, %v3282_v53 }
 0x45b   :  { %2129 = vst.msk [vmem:[#allocation5 + $0x5e8] sm:$0xff] %vm2065_vm8, %v2000_v19 }
 0x45c   :  { %5115 = vrot.lane.b32.xlu1 %v5297_v51, %s9605_s27 }
 0x45d   :  { %v5322_v21 = vpop.permute.xlu0 %5321 }
 0x45e   :  { %v5002_v8 = vpop.permute.xlu1 %5001  ;;  %5369 = vst.msk [vmem:[#allocation6 + $0x8] sm:$0xff] %vm1295_vm6, %v5322_v21  ;;  %v4257_v14 = vpop.f32.mrb[84].mxu1 }
 0x45f   :  { %5049 = vst.msk [vmem:[#allocation6] sm:$0xff] %vm1295_vm6, %v5002_v8  ;;  %v5395_v0 = vld [vmem:[#allocation3 + $0x13f] sm:$0xff]  ;;  %v4258_v12 = vadd.f32 %v12681_v33, %v4257_v14  ;;  %v4259_v52 = vpop.f32.mrb[85].mxu1 }
 0x460   :  { %5211 = vrot.lane.b32.xlu1 %v12753_v26, %s9607_s20  ;;  %v5491_v35 = vld [vmem:[#allocation3 + $0x140] sm:$0xff]  ;;  %5436 = vrot.lane.b32.xlu0 %v5395_v0, %s9605_s27  ;;  %4964 = vst.msk [vmem:[#allocation6 + $0x108] sm:$0xff] %vm703_vm4, %v5395_v0 }
 0x461   :  { %v12853_v42 = vld [vmem:[#allocation3 + $0x141] sm:$0xff]  ;;  %5283 = vst.msk [vmem:[#allocation6 + $0xf8] sm:$0xff] %vm703_vm4, %v5491_v35  ;;  %v12862_v57 = vadd.f32 %v12666_v17, %v4258_v12  ;;  %v5419_v26 = vpop.permute.xlu0 %5418  ;;  %v3729_v5 = vld [vmem:[#allocation5 + $0x5f0] sm:$0xff] }
 0x462   :  { %5603 = vst.msk [vmem:[#allocation6 + $0xe8] sm:$0xff] %vm703_vm4, %v12853_v42  ;;  %v5098_v47 = vpop.permute.xlu1 %5097  ;;  %v3728_v49 = vld [vmem:[#allocation5 + $0x5e8] sm:$0xff]  ;;  %4345 = vmatprep.mubr.f32.mxu1 %v3729_v5 }
 0x463   :  { %5145 = vst.msk [vmem:[#allocation6] sm:$0xff] %vm1680_vm7, %v5098_v47  ;;  %5466 = vst.msk [vmem:[#allocation6 + $0x8] sm:$0xff] %vm1680_vm7, %v5419_v26  ;;  %4346 = vmatmul.mubr.f32.gmra.mrb[120].mxu1 %v3728_v49 }
 0x464   :  { %5021 = vrot.lane.b32.xlu1 %v12755_v44, %s9606_s28  ;;  %5532 = vrot.lane.b32.xlu0 %v5491_v35, %s9607_s20  ;;  %v5618_v44 = vld [vmem:[#allocation6 + $0x40] sm:$0xff] }
 0x465   :  { %9093 = vmatprep.mubr.msk.f32.mxu1 %vm703_vm4, %v5612_v43  ;;  %v5515_v17 = vpop.permute.xlu0 %5514 }
 0x466   :  { %v5194_v16 = vpop.permute.xlu1 %5193  ;;  %5562 = vst.msk [vmem:[#allocation6 + $0x8] sm:$0xff] %vm2065_vm8, %v5515_v17 }
 0x467   :  { %5241 = vst.msk [vmem:[#allocation6] sm:$0xff] %vm2065_vm8, %v5194_v16  ;;  %9094 = vmatmul.mubr.msk.f32.vlgmr.msra.gmra.mrb[122].mxu1 %vm703_vm4, %v5615_v15 }
 0x468   :  { %5117 = vrot.lane.b32.xlu1 %v12757_v27, %s9605_s27  ;;  %5341 = vrot.lane.b32.xlu0 %v12853_v42, %s9606_s28 }
 0x469   :  { %9096 = vmatprep.mubr.msk.f32.mxu1 %vm703_vm4, %v5618_v44  ;;  %v5324_v3 = vpop.permute.xlu0 %5323  ;;  %v5639_v62 = vld [vmem:[#allocation6 + $0xe8] sm:$0xff] }
 0x46a   :  { %v5004_v59 = vpop.permute.xlu1 %5003  ;;  %5370 = vst.msk [vmem:[#allocation6 + $0x20] sm:$0xff] %vm1295_vm6, %v5324_v3  ;;  %v4262_v20 = vpop.f32.mrb[86].mxu1 }
 0x46b   :  { %5050 = vst.msk [vmem:[#allocation6 + $0x18] sm:$0xff] %vm1295_vm6, %v5004_v59  ;;  %v4263_v27 = vadd.f32 %v12681_v33, %v4262_v20  ;;  %v4264_v55 = vpop.f32.mrb[87].mxu1  ;;  %9097 = vmatmul.mubr.msk.f32.gmra.mrb[124].mxu1 %vm703_vm4, %v5621_v28 }
 0x46c   :  { %5213 = vrot.lane.b32.xlu1 %v5395_v0, %s9607_s20  ;;  %9099 = vmatprep.mubr.msk.f32.mxu1 %vm703_vm4, %v5624_v1 }
 0x46d   :  { %v4648_v51 = vadd.f32 %v12692_v4, %v4263_v27  ;;  %v5421_v24 = vpop.permute.xlu0 %5420  ;;  %v5611_v40 = vld [vmem:[#allocation6 + $0x8] sm:$0xff]  ;;  %v5633_v4 = vld [vmem:[#allocation6 + $0xb8] sm:$0xff] }
 0x46e   :  { %v5100_v39 = vpop.permute.xlu1 %5099  ;;  %v5610_v50 = vld [vmem:[#allocation6] sm:$0xff]  ;;  %5467 = vst.msk [vmem:[#allocation6 + $0x20] sm:$0xff] %vm1680_vm7, %v5421_v24  ;;  %5813 = vmatprep.mubr.f32.mxu0 %v5611_v40 }
 0x46f   :  { %5146 = vst.msk [vmem:[#allocation6 + $0x18] sm:$0xff] %vm1680_vm7, %v5100_v39  ;;  %v4758_v54 = vmax.f32 %v12837_v38, %v4648_v51  ;;  %5814 = vmatmul.mubr.f32.vlgmr.msra.gmra.mrb[134].mxu0 %v5610_v50  ;;  %9100 = vmatmul.mubr.msk.f32.gmra.mrb[126].mxu1 %vm703_vm4, %v5627_v22 }
 0x470   :  { %5023 = vrot.lane.b32.xlu1 %v5491_v35, %s9606_s28  ;;  %9102 = vmatprep.mubr.msk.f32.mxu1 %vm703_vm4, %v5630_v61 }
 0x471   :  { %4790 = vst.msk [vmem:[#allocation8 + $0xb0] sm:$0xff] %vm703_vm4, %v4758_v54  ;;  %v5517_v9 = vpop.permute.xlu0 %5516 }
 0x472   :  { %v5196_v29 = vpop.permute.xlu1 %5195  ;;  %5563 = vst.msk [vmem:[#allocation6 + $0x20] sm:$0xff] %vm2065_vm8, %v5517_v9 }
 0x473   :  { %5242 = vst.msk [vmem:[#allocation6 + $0x18] sm:$0xff] %vm2065_vm8, %v5196_v29  ;;  %9103 = vmatmul.mubr.msk.f32.gmra.mrb[128].mxu1 %vm703_vm4, %v5633_v4 }
 0x474   :  { %5119 = vrot.lane.b32.xlu1 %v12853_v42, %s9605_s27  ;;  %9105 = vmatprep.mubr.msk.f32.mxu1 %vm703_vm4, %v5636_v56 }
 0x475   :  { %v5326_v58 = vpop.permute.xlu0 %5325 }
 0x476   :  { %v5006_v38 = vpop.permute.xlu1 %5005  ;;  %5371 = vst.msk [vmem:[#allocation6 + $0x38] sm:$0xff] %vm1295_vm6, %v5326_v58  ;;  %v4267_v60 = vpop.f32.mrb[88].mxu1 }
 0x477   :  { %5051 = vst.msk [vmem:[#allocation6 + $0x30] sm:$0xff] %vm1295_vm6, %v5006_v38  ;;  %v4268_v31 = vadd.f32 %v12681_v33, %v4267_v60  ;;  %v4269_v6 = vpop.f32.mrb[89].mxu1  ;;  %9106 = vmatmul.mubr.msk.f32.gmra.mrb[130].mxu1 %vm703_vm4, %v5639_v62 }
 0x479   :  { %v4653_v13 = vadd.f32 %v12684_v36, %v4268_v31  ;;  %v5423_v19 = vpop.permute.xlu0 %5422  ;;  %v5614_v8 = vld [vmem:[#allocation6 + $0x20] sm:$0xff] }
 0x47a   :  { %v5102_v53 = vpop.permute.xlu1 %5101  ;;  %v5613_v21 = vld [vmem:[#allocation6 + $0x18] sm:$0xff]  ;;  %5468 = vst.msk [vmem:[#allocation6 + $0x38] sm:$0xff] %vm1680_vm7, %v5423_v19  ;;  %5818 = vmatprep.mubr.f32.mxu0 %v5614_v8 }
 0x47b   :  { %5147 = vst.msk [vmem:[#allocation6 + $0x30] sm:$0xff] %vm1680_vm7, %v5102_v53  ;;  %v4759_v14 = vmax.f32 %v12862_v57, %v4653_v13  ;;  %5819 = vmatmul.mubr.f32.gmra.mrb[136].mxu0 %v5613_v21 }
 0x47d   :  { %4791 = vst.msk [vmem:[#allocation8 + $0xb8] sm:$0xff] %vm703_vm4, %v4759_v14  ;;  %v5519_v0 = vpop.permute.xlu0 %5518 }
 0x47e   :  { %v5198_v35 = vpop.permute.xlu1 %5197  ;;  %5564 = vst.msk [vmem:[#allocation6 + $0x38] sm:$0xff] %vm2065_vm8, %v5519_v0 }
 0x47f   :  { %5243 = vst.msk [vmem:[#allocation6 + $0x30] sm:$0xff] %vm2065_vm8, %v5198_v35 }
 0x481   :  { %v5328_v36 = vpop.permute.xlu0 %5327 }
 0x482   :  { %v5008_v42 = vpop.permute.xlu1 %5007  ;;  %5372 = vst.msk [vmem:[#allocation6 + $0x50] sm:$0xff] %vm1295_vm6, %v5328_v36  ;;  %v4272_v12 = vpop.f32.mrb[90].mxu1 }
 0x483   :  { %5052 = vst.msk [vmem:[#allocation6 + $0x48] sm:$0xff] %vm1295_vm6, %v5008_v42  ;;  %v4273_v52 = vadd.f32 %v12681_v33, %v4272_v12  ;;  %v4274_v47 = vpop.f32.mrb[91].mxu1 }
 0x484   :  { %v4822_v57 = vld [vmem:[#allocation8 + $0xb0] ss:$2 sm:$0xff]  ;;  %v4854_v26 = vld [vmem:[#allocation8 + $0xb1] ss:$2 sm:$0xff] }
 0x485   :  { %v12913_v5 = vadd.f32 %v12704_v45, %v4273_v52  ;;  %v5425_v49 = vpop.permute.xlu0 %5424  ;;  %v5617_v17 = vld [vmem:[#allocation6 + $0x38] sm:$0xff]  ;;  %v4874_v15 = vmax.f32 %v4822_v57, %v4854_v26 }
 0x486   :  { %v5104_v43 = vpop.permute.xlu1 %5103  ;;  %v5616_v16 = vld [vmem:[#allocation6 + $0x30] sm:$0xff]  ;;  %5469 = vst.msk [vmem:[#allocation6 + $0x50] sm:$0xff] %vm1680_vm7, %v5425_v49  ;;  %5823 = vmatprep.mubr.f32.mxu0 %v5617_v17 }
 0x487   :  { %5148 = vst.msk [vmem:[#allocation6 + $0x48] sm:$0xff] %vm1680_vm7, %v5104_v43  ;;  %5824 = vmatmul.mubr.f32.gmra.mrb[138].mxu0 %v5616_v16 }
 0x488   :  { %4891 = vst.msk [vmem:[#allocation3 + $0x158] sm:$0xff] %vm703_vm4, %v4874_v15 }
 0x489   :  { %v5521_v44 = vpop.permute.xlu0 %5520 }
 0x48a   :  { %v5200_v3 = vpop.permute.xlu1 %5199  ;;  %5565 = vst.msk [vmem:[#allocation6 + $0x50] sm:$0xff] %vm2065_vm8, %v5521_v44 }
 0x48b   :  { %5244 = vst.msk [vmem:[#allocation6 + $0x48] sm:$0xff] %vm2065_vm8, %v5200_v3 }
 0x48d   :  { %v5330_v45 = vpop.permute.xlu0 %5329 }
 0x48e   :  { %v5010_v59 = vpop.permute.xlu1 %5009  ;;  %5373 = vst.msk [vmem:[#allocation6 + $0x68] sm:$0xff] %vm1295_vm6, %v5330_v45  ;;  %v4277_v20 = vpop.f32.mrb[92].mxu1 }
 0x48f   :  { %5053 = vst.msk [vmem:[#allocation6 + $0x60] sm:$0xff] %vm1295_vm6, %v5010_v59  ;;  %v5396_v28 = vld [vmem:[#allocation3 + $0x157] sm:$0xff]  ;;  %v4278_v1 = vadd.f32 %v12681_v33, %v4277_v20  ;;  %v4279_v51 = vpop.f32.mrb[93].mxu1 }
 0x490   :  { %v5492_v27 = vld [vmem:[#allocation3 + $0x158] sm:$0xff]  ;;  %5438 = vrot.lane.b32.xlu0 %v5396_v28, %s9605_s27  ;;  %5215 = vrot.lane.b32.xlu1 %v5396_v28, %s9607_s20  ;;  %4965 = vst.msk [vmem:[#allocation6 + $0x120] sm:$0xff] %vm703_vm4, %v5396_v28 }
 0x491   :  { %v5588_v55 = vld [vmem:[#allocation3 + $0x159] sm:$0xff]  ;;  %5284 = vst.msk [vmem:[#allocation6 + $0x110] sm:$0xff] %vm703_vm4, %v5492_v27  ;;  %v4663_v24 = vadd.f32 %v12700_v48, %v4278_v1  ;;  %v5427_v39 = vpop.permute.xlu0 %5426  ;;  %v5620_v50 = vld [vmem:[#allocation6 + $0x50] sm:$0xff] }
 0x492   :  { %5604 = vst.msk [vmem:[#allocation6 + $0x100] sm:$0xff] %vm703_vm4, %v5588_v55  ;;  %v5106_v40 = vpop.permute.xlu1 %5105  ;;  %v5619_v22 = vld [vmem:[#allocation6 + $0x48] sm:$0xff]  ;;  %5828 = vmatprep.mubr.f32.mxu0 %v5620_v50 }
 0x493   :  { %5470 = vst.msk [vmem:[#allocation6 + $0x68] sm:$0xff] %vm1680_vm7, %v5427_v39  ;;  %5149 = vst.msk [vmem:[#allocation6 + $0x60] sm:$0xff] %vm1680_vm7, %v5106_v40  ;;  %5829 = vmatmul.mubr.f32.gmra.mrb[140].mxu0 %v5619_v22 }
 0x494   :  { %5534 = vrot.lane.b32.xlu0 %v5492_v27, %s9607_s20  ;;  %5025 = vrot.lane.b32.xlu1 %v5492_v27, %s9606_s28 }
 0x495   :  { %v5523_v54 = vpop.permute.xlu0 %5522 }
 0x496   :  { %v5202_v61 = vpop.permute.xlu1 %5201  ;;  %5566 = vst.msk [vmem:[#allocation6 + $0x68] sm:$0xff] %vm2065_vm8, %v5523_v54 }
 0x497   :  { %5245 = vst.msk [vmem:[#allocation6 + $0x60] sm:$0xff] %vm2065_vm8, %v5202_v61 }
 0x498   :  { %5343 = vrot.lane.b32.xlu0 %v5588_v55, %s9606_s28  ;;  %5121 = vrot.lane.b32.xlu1 %v5588_v55, %s9605_s27 }
 0x499   :  { %v5642_v48 = vld [vmem:[#allocation6 + $0x100] sm:$0xff]  ;;  %v5332_v4 = vpop.permute.xlu0 %5331 }
 0x49a   :  { %9108 = vmatprep.mubr.msk.f32.mxu1 %vm703_vm4, %v5642_v48  ;;  %v5012_v9 = vpop.permute.xlu1 %5011  ;;  %5374 = vst.msk [vmem:[#allocation6 + $0x80] sm:$0xff] %vm1295_vm6, %v5332_v4  ;;  %v4282_v29 = vpop.f32.mrb[94].mxu1 }
 0x49b   :  { %5054 = vst.msk [vmem:[#allocation6 + $0x78] sm:$0xff] %vm1295_vm6, %v5012_v9  ;;  %v4283_v56 = vadd.f32 %v12681_v33, %v4282_v29  ;;  %v4284_v58 = vpop.f32.mrb[95].mxu1 }
 0x49d   :  { %v4668_v38 = vadd.f32 %v12714_v46, %v4283_v56  ;;  %v5429_v60 = vpop.permute.xlu0 %5428  ;;  %v5623_v31 = vld [vmem:[#allocation6 + $0x68] sm:$0xff] }
 0x49e   :  { %v5108_v62 = vpop.permute.xlu1 %5107  ;;  %v5622_v6 = vld [vmem:[#allocation6 + $0x60] sm:$0xff]  ;;  %5471 = vst.msk [vmem:[#allocation6 + $0x80] sm:$0xff] %vm1680_vm7, %v5429_v60  ;;  %5833 = vmatprep.mubr.f32.mxu0 %v5623_v31 }
 0x49f   :  { %5150 = vst.msk [vmem:[#allocation6 + $0x78] sm:$0xff] %vm1680_vm7, %v5108_v62  ;;  %v4760_v13 = vmax.f32 %v12913_v5, %v4668_v38  ;;  %5834 = vmatmul.mubr.f32.gmra.mrb[142].mxu0 %v5622_v6 }
 0x4a1   :  { %4792 = vst.msk [vmem:[#allocation8 + $0xc0] sm:$0xff] %vm703_vm4, %v4760_v13  ;;  %v5525_v19 = vpop.permute.xlu0 %5524 }
 0x4a2   :  { %v5204_v53 = vpop.permute.xlu1 %5203  ;;  %5567 = vst.msk [vmem:[#allocation6 + $0x80] sm:$0xff] %vm2065_vm8, %v5525_v19 }
 0x4a3   :  { %5246 = vst.msk [vmem:[#allocation6 + $0x78] sm:$0xff] %vm2065_vm8, %v5204_v53 }
 0x4a5   :  { %v5334_v46 = vpop.permute.xlu0 %5333 }
 0x4a6   :  { %v5014_v8 = vpop.permute.xlu1 %5013  ;;  %5375 = vst.msk [vmem:[#allocation6 + $0x98] sm:$0xff] %vm1295_vm6, %v5334_v46  ;;  %v4287_v21 = vpop.f32.mrb[96].mxu1 }
 0x4a7   :  { %5055 = vst.msk [vmem:[#allocation6 + $0x90] sm:$0xff] %vm1295_vm6, %v5014_v8  ;;  %v4288_v14 = vadd.f32 %v12681_v33, %v4287_v21  ;;  %v4289_v0 = vpop.f32.mrb[97].mxu1 }
 0x4a9   :  { %v4673_v35 = vadd.f32 %v12712_v18, %v4288_v14  ;;  %v5431_v36 = vpop.permute.xlu0 %5430  ;;  %v5626_v12 = vld [vmem:[#allocation6 + $0x80] sm:$0xff] }
 0x4aa   :  { %v5110_v42 = vpop.permute.xlu1 %5109  ;;  %v5625_v52 = vld [vmem:[#allocation6 + $0x78] sm:$0xff]  ;;  %5472 = vst.msk [vmem:[#allocation6 + $0x98] sm:$0xff] %vm1680_vm7, %v5431_v36  ;;  %5838 = vmatprep.mubr.f32.mxu0 %v5626_v12  ;;  %v13086_v36 = vld [vmem:[%s14448_s4] ss:$0 sm:$0xff] }
 0x4ab   :  { %5151 = vst.msk [vmem:[#allocation6 + $0x90] sm:$0xff] %vm1680_vm7, %v5110_v42  ;;  %v4761_v47 = vmax.f32 %v4663_v24, %v4673_v35  ;;  %5839 = vmatmul.mubr.f32.gmra.mrb[144].mxu0 %v5625_v52 }
 0x4ad   :  { %4793 = vst.msk [vmem:[#allocation8 + $0xc8] sm:$0xff] %vm703_vm4, %v4761_v47  ;;  %v5527_v57 = vpop.permute.xlu0 %5526 }
 0x4ae   :  { %v5206_v26 = vpop.permute.xlu1 %5205  ;;  %5568 = vst.msk [vmem:[#allocation6 + $0x98] sm:$0xff] %vm2065_vm8, %v5527_v57 }
 0x4af   :  { %5247 = vst.msk [vmem:[#allocation6 + $0x90] sm:$0xff] %vm2065_vm8, %v5206_v26 }
 0x4b1   :  { %v5336_v18 = vpop.permute.xlu0 %5335 }
 0x4b2   :  { %v5016_v5 = vpop.permute.xlu1 %5015  ;;  %5376 = vst.msk [vmem:[#allocation6 + $0xb0] sm:$0xff] %vm1295_vm6, %v5336_v18 }
 0x4b3   :  { %5056 = vst.msk [vmem:[#allocation6 + $0xa8] sm:$0xff] %vm1295_vm6, %v5016_v5  ;;  %v4292_v49 = vpop.f32.mrb[98].mxu1 }
 0x4b4   :  { %v4293_v43 = vadd.f32 %v12681_v33, %v4292_v49  ;;  %v4294_v17 = vpop.f32.mrb[99].mxu1  ;;  %v4824_v16 = vld [vmem:[#allocation8 + $0xc0] ss:$2 sm:$0xff]  ;;  %v4856_v15 = vld [vmem:[#allocation8 + $0xc1] ss:$2 sm:$0xff] }
 0x4b5   :  { %v5433_v45 = vpop.permute.xlu0 %5432  ;;  %v5629_v20 = vld [vmem:[#allocation6 + $0x98] sm:$0xff]  ;;  %v4875_v27 = vmax.f32 %v4824_v16, %v4856_v15 }
 0x4b6   :  { %v12960_v44 = vpop.f32.mrb[132].mxu0  ;;  %v12963_v3 = vadd.f32 %v12724_v32, %v4293_v43  ;;  %v5112_v59 = vpop.permute.xlu1 %5111  ;;  %v5628_v28 = vld [vmem:[#allocation6 + $0x90] sm:$0xff]  ;;  %5473 = vst.msk [vmem:[#allocation6 + $0xb0] sm:$0xff] %vm1680_vm7, %v5433_v45  ;;  %5843 = vmatprep.mubr.f32.mxu0 %v5629_v20 }
 0x4b7   :  { %5152 = vst.msk [vmem:[#allocation6 + $0xa8] sm:$0xff] %vm1680_vm7, %v5112_v59  ;;  %v12967_v55 = vpop.f32.mrb[133].mxu0  ;;  %5844 = vmatmul.mubr.f32.gmra.mrb[146].mxu0 %v5628_v28 }
 0x4b8   :  { %4892 = vst.msk [vmem:[#allocation3 + $0x170] sm:$0xff] %vm703_vm4, %v4875_v27 }
 0x4b9   :  { %v5529_v1 = vpop.permute.xlu0 %5528 }
 0x4ba   :  { %v5208_v51 = vpop.permute.xlu1 %5207  ;;  %5569 = vst.msk [vmem:[#allocation6 + $0xb0] sm:$0xff] %vm2065_vm8, %v5529_v1 }
 0x4bb   :  { %5248 = vst.msk [vmem:[#allocation6 + $0xa8] sm:$0xff] %vm2065_vm8, %v5208_v51 }
 0x4bd   :  { %v5338_v32 = vpop.permute.xlu0 %5337 }
 0x4be   :  { %v5018_v24 = vpop.permute.xlu1 %5017  ;;  %5377 = vst.msk [vmem:[#allocation6 + $0xc8] sm:$0xff] %vm1295_vm6, %v5338_v32 }
 0x4bf   :  { %5057 = vst.msk [vmem:[#allocation6 + $0xc0] sm:$0xff] %vm1295_vm6, %v5018_v24  ;;  %v4297_v39 = vpop.f32.mrb[100].mxu1  ;;  %v5397_v40 = vld [vmem:[#allocation3 + $0x16f] sm:$0xff] }
 0x4c0   :  { %v5493_v50 = vld [vmem:[#allocation3 + $0x170] sm:$0xff]  ;;  %v4298_v54 = vadd.f32 %v12681_v33, %v4297_v39  ;;  %v4299_v61 = vpop.f32.mrb[101].mxu1  ;;  %5440 = vrot.lane.b32.xlu0 %v5397_v40, %s9605_s27  ;;  %5217 = vrot.lane.b32.xlu1 %v5397_v40, %s9607_s20  ;;  %4966 = vst.msk [vmem:[#allocation6 + $0x138] sm:$0xff] %vm703_vm4, %v5397_v40 }
 0x4c1   :  { %v5589_v22 = vld [vmem:[#allocation3 + $0x171] sm:$0xff]  ;;  %5285 = vst.msk [vmem:[#allocation6 + $0x128] sm:$0xff] %vm703_vm4, %v5493_v50  ;;  %v5435_v4 = vpop.permute.xlu0 %5434 }
 0x4c2   :  { %5605 = vst.msk [vmem:[#allocation6 + $0x118] sm:$0xff] %vm703_vm4, %v5589_v22  ;;  %v12981_v48 = vadd.f32 %v12722_v63, %v4298_v54  ;;  %v5114_v9 = vpop.permute.xlu1 %5113  ;;  %v5632_v29 = vld [vmem:[#allocation6 + $0xb0] sm:$0xff]  ;;  %v5631_v56 = vld [vmem:[#allocation6 + $0xa8] sm:$0xff] }
 0x4c3   :  { %5474 = vst.msk [vmem:[#allocation6 + $0xc8] sm:$0xff] %vm1680_vm7, %v5435_v4  ;;  %5153 = vst.msk [vmem:[#allocation6 + $0xc0] sm:$0xff] %vm1680_vm7, %v5114_v9  ;;  %5848 = vmatprep.mubr.f32.mxu0 %v5632_v29 }
 0x4c4   :  { %5536 = vrot.lane.b32.xlu0 %v5493_v50, %s9607_s20  ;;  %5027 = vrot.lane.b32.xlu1 %v5493_v50, %s9606_s28 }
 0x4c5   :  { %5849 = vmatmul.mubr.f32.gmra.mrb[148].mxu0 %v5631_v56  ;;  %v5531_v58 = vpop.permute.xlu0 %5530 }
 0x4c6   :  { %v5210_v38 = vpop.permute.xlu1 %5209  ;;  %5570 = vst.msk [vmem:[#allocation6 + $0xc8] sm:$0xff] %vm2065_vm8, %v5531_v58 }
 0x4c7   :  { %5249 = vst.msk [vmem:[#allocation6 + $0xc0] sm:$0xff] %vm2065_vm8, %v5210_v38 }
 0x4c8   :  { %5345 = vrot.lane.b32.xlu0 %v5589_v22, %s9606_s28  ;;  %5123 = vrot.lane.b32.xlu1 %v5589_v22, %s9605_s27 }
 0x4c9   :  { %v5645_v63 = vld [vmem:[#allocation6 + $0x118] sm:$0xff]  ;;  %v5340_v60 = vpop.permute.xlu0 %5339 }
 0x4ca   :  { %9109 = vmatmul.mubr.msk.f32.gmra.mrb[132].mxu1 %vm703_vm4, %v5645_v63  ;;  %v5020_v62 = vpop.permute.xlu1 %5019  ;;  %5378 = vst.msk [vmem:[#allocation6 + $0xe0] sm:$0xff] %vm1295_vm6, %v5340_v60  ;;  %v4302_v31 = vpop.f32.mrb[102].mxu1 }
 0x4cb   :  { %5058 = vst.msk [vmem:[#allocation6 + $0xd8] sm:$0xff] %vm1295_vm6, %v5020_v62  ;;  %v4303_v6 = vadd.f32 %v12681_v33, %v4302_v31  ;;  %v4304_v13 = vpop.f32.mrb[103].mxu1 }
 0x4cd   :  { %v4688_v19 = vadd.f32 %v12738_v34, %v4303_v6  ;;  %v5635_v46 = vld [vmem:[#allocation6 + $0xc8] sm:$0xff] }
 0x4ce   :  { %v5116_v53 = vpop.permute.xlu1 %5115  ;;  %v5634_v8 = vld [vmem:[#allocation6 + $0xc0] sm:$0xff]  ;;  %5853 = vmatprep.mubr.f32.mxu0 %v5635_v46 }
 0x4cf   :  { %5154 = vst.msk [vmem:[#allocation6 + $0xd8] sm:$0xff] %vm1680_vm7, %v5116_v53  ;;  %v4762_v21 = vmax.f32 %v12963_v3, %v4688_v19  ;;  %5854 = vmatmul.mubr.f32.gmra.mrb[150].mxu0 %v5634_v8 }
 0x4d1   :  { %4794 = vst.msk [vmem:[#allocation8 + $0xd0] sm:$0xff] %vm703_vm4, %v4762_v21 }
 0x4d2   :  { %v5437_v14 = vpop.permute.xlu0 %5436  ;;  %v5212_v0 = vpop.permute.xlu1 %5211 }
 0x4d3   :  { %5475 = vst.msk [vmem:[#allocation6 + $0xe0] sm:$0xff] %vm1680_vm7, %v5437_v14 }
 0x4d4   :  { %5250 = vst.msk [vmem:[#allocation6 + $0xd8] sm:$0xff] %vm2065_vm8, %v5212_v0 }
 0x4d6   :  { %v5533_v33 = vpop.permute.xlu0 %5532  ;;  %v5022_v34 = vpop.permute.xlu1 %5021 }
 0x4d7   :  { %5571 = vst.msk [vmem:[#allocation6 + $0xe0] sm:$0xff] %vm2065_vm8, %v5533_v33  ;;  %v4307_v35 = vpop.f32.mrb[104].mxu1 }
 0x4d8   :  { %5059 = vst.msk [vmem:[#allocation6 + $0xf0] sm:$0xff] %vm1295_vm6, %v5022_v34  ;;  %v4308_v42 = vadd.f32 %v13086_v36, %v4307_v35  ;;  %v4309_v12 = vpop.f32.mrb[105].mxu1 }
 0x4da   :  { %v4693_v52 = vadd.f32 %v12736_v2, %v4308_v42  ;;  %v5342_v47 = vpop.permute.xlu0 %5341  ;;  %v5118_v57 = vpop.permute.xlu1 %5117 }
 0x4db   :  { %5379 = vst.msk [vmem:[#allocation6 + $0xf8] sm:$0xff] %vm1295_vm6, %v5342_v47  ;;  %v5637_v49 = vld [vmem:[#allocation6 + $0xd8] sm:$0xff] }
 0x4dc   :  { %5155 = vst.msk [vmem:[#allocation6 + $0xf0] sm:$0xff] %vm1680_vm7, %v5118_v57  ;;  %v4763_v26 = vmax.f32 %v12981_v48, %v4693_v52 }
 0x4de   :  { %4795 = vst.msk [vmem:[#allocation8 + $0xd8] sm:$0xff] %vm703_vm4, %v4763_v26  ;;  %v5214_v18 = vpop.permute.xlu1 %5213  ;;  %v5638_v5 = vld [vmem:[#allocation6 + $0xe0] sm:$0xff] }
 0x4df   :  { %5251 = vst.msk [vmem:[#allocation6 + $0xf0] sm:$0xff] %vm2065_vm8, %v5214_v18  ;;  %5858 = vmatprep.mubr.f32.mxu0 %v5638_v5 }
 0x4e0   :  { %5859 = vmatmul.mubr.f32.gmra.mrb[152].mxu0 %v5637_v49 }
 0x4e2   :  { %v5024_v43 = vpop.permute.xlu1 %5023  ;;  %v4312_v2 = vpop.f32.mrb[106].mxu1 }
 0x4e3   :  { %5060 = vst.msk [vmem:[#allocation6 + $0x108] sm:$0xff] %vm1295_vm6, %v5024_v43  ;;  %v4313_v17 = vadd.f32 %v13086_v36, %v4312_v2  ;;  %v4314_v16 = vpop.f32.mrb[107].mxu1 }
 0x4e5   :  { %v4826_v15 = vld [vmem:[#allocation8 + $0xd0] ss:$2 sm:$0xff]  ;;  %v4858_v3 = vld [vmem:[#allocation8 + $0xd1] ss:$2 sm:$0xff]  ;;  %v4698_v45 = vadd.f32 %v12748_v11, %v4313_v17 }
 0x4e6   :  { %v5120_v59 = vpop.permute.xlu1 %5119  ;;  %v4876_v20 = vmax.f32 %v4826_v15, %v4858_v3  ;;  %v5640_v31 = vld [vmem:[#allocation6 + $0xf0] sm:$0xff] }
 0x4e7   :  { %5156 = vst.msk [vmem:[#allocation6 + $0x108] sm:$0xff] %vm1680_vm7, %v5120_v59 }
 0x4e8   :  { %4893 = vst.msk [vmem:[#allocation3 + $0x188] sm:$0xff] %vm703_vm4, %v4876_v20 }
 0x4ee   :  { %v4317_v28 = vpop.f32.mrb[108].mxu1 }
 0x4ef   :  { %v5398_v27 = vld [vmem:[#allocation3 + $0x187] sm:$0xff]  ;;  %v4318_v32 = vadd.f32 %v13086_v36, %v4317_v28  ;;  %v4319_v24 = vpop.f32.mrb[109].mxu1 }
 0x4f0   :  { %v5494_v1 = vld [vmem:[#allocation3 + $0x188] sm:$0xff]  ;;  %5442 = vrot.lane.b32.xlu0 %v5398_v27, %s9605_s27  ;;  %5219 = vrot.lane.b32.xlu1 %v5398_v27, %s9607_s20  ;;  %4967 = vst.msk [vmem:[#allocation6 + $0x150] sm:$0xff] %vm703_vm4, %v5398_v27 }
 0x4f1   :  { %v5590_v51 = vld [vmem:[#allocation3 + $0x189] sm:$0xff]  ;;  %5286 = vst.msk [vmem:[#allocation6 + $0x140] sm:$0xff] %vm703_vm4, %v5494_v1  ;;  %v4703_v11 = vadd.f32 %v12746_v37, %v4318_v32 }
 0x4f2   :  { %5606 = vst.msk [vmem:[#allocation6 + $0x130] sm:$0xff] %vm703_vm4, %v5590_v51  ;;  %v6727_v24 = vld [vmem:[%s14451_s7 + $0x8] sm:$0xff] }
 0x4f4   :  { %5538 = vrot.lane.b32.xlu0 %v5494_v1, %s9607_s20  ;;  %5029 = vrot.lane.b32.xlu1 %v5494_v1, %s9606_s28  ;;  %v6726_v1 = vld [vmem:[%s14451_s7] sm:$0xff] }
 0x4f8   :  { %5347 = vrot.lane.b32.xlu0 %v5590_v51, %s9606_s28  ;;  %5125 = vrot.lane.b32.xlu1 %v5590_v51, %s9605_s27 }
 0x4f9   :  { %v5648_v39 = vld [vmem:[#allocation6 + $0x130] sm:$0xff] }
 0x4fa   :  { %9111 = vmatprep.mubr.msk.f32.mxu1 %vm703_vm4, %v5648_v39  ;;  %v4322_v40 = vpop.f32.mrb[110].mxu1  ;;  %v13172_v39 = vld [vmem:[%s14450_s6] ss:$0 sm:$0xff] }
 0x4fb   :  { %v4323_v50 = vadd.f32 %v13086_v36, %v4322_v40  ;;  %v4324_v22 = vpop.f32.mrb[111].mxu1 }
 0x4fc   :  { %v6744_v22 = vld [vmem:[%s14451_s7 + $0x90] sm:$0xff] }
 0x4fd   :  { %v4708_v54 = vadd.f32 %v12770_v10, %v4323_v50 }
 0x4ff   :  { %v4764_v61 = vmax.f32 %v4698_v45, %v4708_v54  ;;  %v6745_v54 = vld [vmem:[%s14451_s7 + $0x98] sm:$0xff] }
 0x501   :  { %4796 = vst.msk [vmem:[#allocation8 + $0xe0] sm:$0xff] %vm703_vm4, %v4764_v61  ;;  %v6774_v61 = vld [vmem:[%s14451_s7 + $0x180] sm:$0xff] }
 0x502   :  { %v5439_v37 = vpop.permute.xlu0 %5438  ;;  %v5216_v48 = vpop.permute.xlu1 %5215 }
 0x503   :  { %5476 = vst.msk [vmem:[#allocation6 + $0xf8] sm:$0xff] %vm1680_vm7, %v5439_v37 }
 0x504   :  { %5252 = vst.msk [vmem:[#allocation6 + $0x108] sm:$0xff] %vm2065_vm8, %v5216_v48 }
 0x506   :  { %v5535_v4 = vpop.permute.xlu0 %5534  ;;  %v5026_v9 = vpop.permute.xlu1 %5025 }
 0x507   :  { %5572 = vst.msk [vmem:[#allocation6 + $0xf8] sm:$0xff] %vm2065_vm8, %v5535_v4  ;;  %v4327_v29 = vpop.f32.mrb[112].mxu1  ;;  %v9302_v4 = vpack.c.bf16 %v6745_v54, %v6744_v22  ;;  %v6751_v22 = vld [vmem:[%s14451_s7 + $0xc8] sm:$0xff] }
 0x508   :  { %5061 = vst.msk [vmem:[#allocation6 + $0x120] sm:$0xff] %vm1295_vm6, %v5026_v9  ;;  %v4328_v56 = vadd.f32 %v13086_v36, %v4327_v29  ;;  %v4329_v58 = vpop.f32.mrb[113].mxu1  ;;  %v6775_v9 = vld [vmem:[%s14451_s7 + $0x188] sm:$0xff]  ;;  %v6728_v29 = vld [vmem:[%s14451_s7 + $0x10] sm:$0xff] }
 0x50a   :  { %v4713_v10 = vadd.f32 %v12764_v23, %v4328_v56  ;;  %v5344_v38 = vpop.permute.xlu0 %5343  ;;  %v5122_v63 = vpop.permute.xlu1 %5121  ;;  %v6729_v56 = vld [vmem:[%s14451_s7 + $0x18] sm:$0xff] }
 0x50b   :  { %5380 = vst.msk [vmem:[#allocation6 + $0x110] sm:$0xff] %vm1295_vm6, %v5344_v38  ;;  %v5643_v28 = vld [vmem:[#allocation6 + $0x108] sm:$0xff] }
 0x50c   :  { %v4765_v60 = vmax.f32 %v4703_v11, %v4713_v10  ;;  %5157 = vst.msk [vmem:[#allocation6 + $0x120] sm:$0xff] %vm1680_vm7, %v5122_v63  ;;  %v9300_v11 = vpack.c.bf16 %v6727_v24, %v6726_v1  ;;  %v9330_v63 = vpack.c.bf16 %v6775_v9, %v6774_v61  ;;  %v6734_v9 = vld [vmem:[%s14451_s7 + $0x40] sm:$0xff] }
 0x50e   :  { %4797 = vst.msk [vmem:[#allocation8 + $0xe8] sm:$0xff] %vm703_vm4, %v4765_v60  ;;  %v5641_v62 = vld [vmem:[#allocation6 + $0xf8] sm:$0xff]  ;;  %v9304_v60 = vpack.c.bf16 %v6729_v56, %v6728_v29  ;;  %9331 = vmatprep.subr.bf16.mxu1 %v9330_v63  ;;  %v6735_v63 = vld [vmem:[%s14451_s7 + $0x48] sm:$0xff] }
 0x50f   :  { %5863 = vmatprep.mubr.f32.mxu0 %v5641_v62  ;;  %v6758_v62 = vld [vmem:[%s14451_s7 + $0x100] sm:$0xff] }
 0x510   :  { %5864 = vmatmul.mubr.f32.gmra.mrb[154].mxu0 %v5640_v31 }
 0x512   :  { %v4332_v6 = vpop.f32.mrb[114].mxu1 }
 0x513   :  { %v4333_v13 = vadd.f32 %v13086_v36, %v4332_v6  ;;  %v4334_v19 = vpop.f32.mrb[115].mxu1  ;;  %v6759_v6 = vld [vmem:[%s14451_s7 + $0x108] sm:$0xff] }
 0x515   :  { %v4828_v53 = vld [vmem:[#allocation8 + $0xe0] ss:$2 sm:$0xff]  ;;  %v4860_v46 = vld [vmem:[#allocation8 + $0xe1] ss:$2 sm:$0xff]  ;;  %v4718_v23 = vadd.f32 %v12783_v25, %v4333_v13 }
 0x516   :  { %v4877_v8 = vmax.f32 %v4828_v53, %v4860_v46  ;;  %v9332_v53 = vpack.c.bf16 %v6759_v6, %v6758_v62  ;;  %v6100_v46 = vld [vmem:[#allocation4 + $0x7] sm:$0xff]  ;;  %v6765_v62 = vld [vmem:[%s14451_s7 + $0x138] sm:$0xff]  ;;  %v9316_v6 = vpack.c.bf16 %v6735_v63, %v6734_v9 }
 0x517   :  { %6116 = vst.msk [vmem:[#allocation7] sm:$0xff] %vm6040_vm10, %v6100_v46  ;;  %v6752_v46 = vld [vmem:[%s14451_s7 + $0xd0] sm:$0xff]  ;;  %v6741_v63 = vld [vmem:[%s14451_s7 + $0x78] sm:$0xff] }
 0x518   :  { %4894 = vst.msk [vmem:[#allocation3 + $0x1a0] sm:$0xff] %vm703_vm4, %v4877_v8  ;;  %v6747_v8 = vld [vmem:[%s14451_s7 + $0xa8] sm:$0xff]  ;;  %9333 = vmatpush3.bf16.msra.mxu1 %v9332_v53  ;;  %v5593_v53 = vld [vmem:[#allocation3 + $0x1d1] sm:$0xff] }
 0x519   :  { %5609 = vst.msk [vmem:[#allocation6 + $0x178] sm:$0xff] %vm703_vm4, %v5593_v53  ;;  %v6789_v53 = vld [vmem:[%s14451_s7 + $0x1f8] sm:$0xff] }
 0x51e   :  { %v4337_v21 = vpop.f32.mrb[116].mxu1 }
 0x51f   :  { %v5399_v14 = vld [vmem:[#allocation3 + $0x19f] sm:$0xff]  ;;  %v4338_v34 = vadd.f32 %v13086_v36, %v4337_v21  ;;  %v4339_v35 = vpop.f32.mrb[117].mxu1 }
 0x520   :  { %v5495_v0 = vld [vmem:[#allocation3 + $0x1a0] sm:$0xff]  ;;  %5444 = vrot.lane.b32.xlu0 %v5399_v14, %s9605_s27  ;;  %5221 = vrot.lane.b32.xlu1 %v5399_v14, %s9607_s20  ;;  %4968 = vst.msk [vmem:[#allocation6 + $0x168] sm:$0xff] %vm703_vm4, %v5399_v14 }
 0x521   :  { %v5591_v33 = vld [vmem:[#allocation3 + $0x1a1] sm:$0xff]  ;;  %5287 = vst.msk [vmem:[#allocation6 + $0x158] sm:$0xff] %vm703_vm4, %v5495_v0  ;;  %v4723_v25 = vadd.f32 %v12781_v7, %v4338_v34 }
 0x522   :  { %5607 = vst.msk [vmem:[#allocation6 + $0x148] sm:$0xff] %vm703_vm4, %v5591_v33  ;;  %v6730_v34 = vld [vmem:[%s14451_s7 + $0x20] sm:$0xff] }
 0x524   :  { %5540 = vrot.lane.b32.xlu0 %v5495_v0, %s9607_s20  ;;  %5031 = vrot.lane.b32.xlu1 %v5495_v0, %s9606_s28  ;;  %v6776_v0 = vld [vmem:[%s14451_s7 + $0x190] sm:$0xff] }
 0x528   :  { %5349 = vrot.lane.b32.xlu0 %v5591_v33, %s9606_s28  ;;  %5127 = vrot.lane.b32.xlu1 %v5591_v33, %s9605_s27  ;;  %v6777_v33 = vld [vmem:[%s14451_s7 + $0x198] sm:$0xff] }
 0x529   :  { %v5651_v42 = vld [vmem:[#allocation6 + $0x148] sm:$0xff] }
 0x52a   :  { %9112 = vmatmul.mubr.msk.f32.gmra.mrb[134].mxu1 %vm703_vm4, %v5651_v42  ;;  %v4342_v12 = vpop.f32.mrb[118].mxu1  ;;  %v6731_v42 = vld [vmem:[%s14451_s7 + $0x28] sm:$0xff] }
 0x52b   :  { %v4343_v52 = vadd.f32 %v13086_v36, %v4342_v12  ;;  %v4344_v47 = vpop.f32.mrb[119].mxu1  ;;  %v6760_v12 = vld [vmem:[%s14451_s7 + $0x110] sm:$0xff] }
 0x52c   :  { %v9308_v47 = vpack.c.bf16 %v6731_v42, %v6730_v34  ;;  %v6736_v34 = vld [vmem:[%s14451_s7 + $0x50] sm:$0xff]  ;;  %v6767_v42 = vld [vmem:[%s14451_s7 + $0x148] sm:$0xff] }
 0x52d   :  { %v4728_v57 = vadd.f32 %v12967_v55, %v4343_v52  ;;  %v6761_v52 = vld [vmem:[%s14451_s7 + $0x118] sm:$0xff] }
 0x52f   :  { %v4766_v26 = vmax.f32 %v4718_v23, %v4728_v57  ;;  %v6746_v23 = vld [vmem:[%s14451_s7 + $0xa0] sm:$0xff]  ;;  %v9336_v57 = vpack.c.bf16 %v6761_v52, %v6760_v12  ;;  %v5401_v52 = vld [vmem:[#allocation3 + $0x1cf] sm:$0xff] }
 0x530   :  { %v9306_v14 = vpack.c.bf16 %v6747_v8, %v6746_v23  ;;  %v6753_v23 = vld [vmem:[%s14451_s7 + $0xd8] sm:$0xff] }
 0x531   :  { %4798 = vst.msk [vmem:[#allocation8 + $0xf0] sm:$0xff] %vm703_vm4, %v4766_v26 }
 0x532   :  { %v5441_v7 = vpop.permute.xlu0 %5440  ;;  %v5218_v18 = vpop.permute.xlu1 %5217 }
 0x533   :  { %5477 = vst.msk [vmem:[#allocation6 + $0x110] sm:$0xff] %vm1680_vm7, %v5441_v7  ;;  %v6108_v7 = vld [vmem:[#allocation4 + $0xf7] sm:$0xff] }
 0x534   :  { %5253 = vst.msk [vmem:[#allocation6 + $0x120] sm:$0xff] %vm2065_vm8, %v5218_v18 }
 0x535   :  { %6124 = vst.msk [vmem:[#allocation7 + $0x140] sm:$0xff] %vm6040_vm10, %v6108_v7  ;;  %v6229_v7 = vld [vmem:[#allocation4 + $0x9] sm:$0xff] }
 0x536   :  { %v5537_v5 = vpop.permute.xlu0 %5536  ;;  %v5028_v49 = vpop.permute.xlu1 %5027  ;;  %6245 = vst.msk [vmem:[#allocation7 + $0x8] sm:$0xff] %vm6040_vm10, %v6229_v7 }
 0x537   :  { %5573 = vst.msk [vmem:[#allocation6 + $0x110] sm:$0xff] %vm2065_vm8, %v5537_v5  ;;  %v4347_v43 = vpop.f32.mrb[120].mxu1  ;;  %v6748_v5 = vld [vmem:[%s14451_s7 + $0xb0] sm:$0xff] }
 0x538   :  { %5062 = vst.msk [vmem:[#allocation6 + $0x138] sm:$0xff] %vm1295_vm6, %v5028_v49  ;;  %v4348_v2 = vadd.f32 %v13086_v36, %v4347_v43  ;;  %v4349_v17 = vpop.f32.mrb[121].mxu1  ;;  %v6743_v36 = vld [vmem:[%s14451_s7 + $0x88] sm:$0xff]  ;;  %v6749_v49 = vld [vmem:[%s14451_s7 + $0xb8] sm:$0xff]  ;;  %v6778_v43 = vld [vmem:[%s14451_s7 + $0x1a0] sm:$0xff] }
 0x539   :  { %v6779_v17 = vld [vmem:[%s14451_s7 + $0x1a8] sm:$0xff] }
 0x53a   :  { %v4733_v55 = vadd.f32 %v12960_v44, %v4348_v2  ;;  %v5346_v16 = vpop.permute.xlu0 %5345  ;;  %v5124_v15 = vpop.permute.xlu1 %5123  ;;  %v6742_v44 = vld [vmem:[%s14451_s7 + $0x80] sm:$0xff]  ;;  %v9310_v2 = vpack.c.bf16 %v6749_v49, %v6748_v5  ;;  %v6755_v49 = vld [vmem:[%s14451_s7 + $0xe8] sm:$0xff] }
 0x53b   :  { %5381 = vst.msk [vmem:[#allocation6 + $0x128] sm:$0xff] %vm1295_vm6, %v5346_v16  ;;  %v13149_v3 = vpop.f32.mrb[122].mxu1  ;;  %v9298_v32 = vpack.c.bf16 %v6743_v36, %v6742_v44  ;;  %v6733_v16 = vld [vmem:[%s14451_s7 + $0x38] sm:$0xff]  ;;  %v6754_v5 = vld [vmem:[%s14451_s7 + $0xe0] sm:$0xff] }
 0x53c   :  { %v4767_v45 = vmax.f32 %v4723_v25, %v4733_v55  ;;  %5158 = vst.msk [vmem:[#allocation6 + $0x138] sm:$0xff] %vm1680_vm7, %v5124_v15  ;;  %v5960_v59 = vpop.f32.mrb[123].mxu1  ;;  %v9334_v25 = vpack.c.bf16 %v6777_v33, %v6776_v0  ;;  %v6732_v55 = vld [vmem:[%s14451_s7 + $0x30] sm:$0xff]  ;;  %v9338_v15 = vpack.c.bf16 %v6779_v17, %v6778_v43  ;;  %v6782_v0 = vld [vmem:[%s14451_s7 + $0x1c0] sm:$0xff]  ;;  %v6783_v33 = vld [vmem:[%s14451_s7 + $0x1c8] sm:$0xff] }
 0x53d   :  { %9299 = vmatprep.subr.bf16.mxu0 %v9298_v32  ;;  %v6784_v43 = vld [vmem:[%s14451_s7 + $0x1d0] sm:$0xff]  ;;  %v6785_v17 = vld [vmem:[%s14451_s7 + $0x1d8] sm:$0xff] }
 0x53e   :  { %4799 = vst.msk [vmem:[#allocation8 + $0xf8] sm:$0xff] %vm703_vm4, %v4767_v45  ;;  %v5644_v20 = vld [vmem:[#allocation6 + $0x110] sm:$0xff]  ;;  %v13153_v27 = vpop.f32.mrb[124].mxu1  ;;  %9301 = vmatpush3.bf16.msra.mxu0 %v9300_v11  ;;  %9335 = vmatprep.subr.bf16.mxu1 %v9334_v25  ;;  %v9312_v45 = vpack.c.bf16 %v6733_v16, %v6732_v55  ;;  %v6132_v11 = vld [vmem:[#allocation4 + $0x8] sm:$0xff]  ;;  %v6766_v25 = vld [vmem:[%s14451_s7 + $0x140] sm:$0xff] }
 0x53f   :  { %5868 = vmatprep.mubr.f32.mxu0 %v5644_v20  ;;  %v13164_v51 = vpop.f32.mrb[125].mxu1  ;;  %9303 = vmatprep.subr.bf16.mxu0 %v9302_v4  ;;  %v6763_v20 = vld [vmem:[%s14451_s7 + $0x128] sm:$0xff]  ;;  %v6781_v4 = vld [vmem:[%s14451_s7 + $0x1b8] sm:$0xff]  ;;  %v6738_v55 = vld [vmem:[%s14451_s7 + $0x60] sm:$0xff] }
 0x540   :  { %5869 = vmatmul.mubr.f32.gmra.mrb[156].mxu0 %v5643_v28  ;;  %9337 = vmatpush3.bf16.msra.mxu1 %v9336_v57  ;;  %v9348_v57 = vpack.c.bf16 %v6767_v42, %v6766_v25  ;;  %v6739_v16 = vld [vmem:[%s14451_s7 + $0x68] sm:$0xff] }
 0x541   :  { %9339 = vmatprep.subr.bf16.mxu1 %v9338_v15  ;;  %v9350_v15 = vpack.c.bf16 %v6785_v17, %v6784_v43 }
 0x542   :  { %v8468_v40 = vpop.f32.mrb[134].mxu0  ;;  %v13174_v50 = vpop.f32.mrb[126].mxu1  ;;  %9305 = vmatpush3.bf16.msra.mxu0 %v9304_v60  ;;  %v6764_v60 = vld [vmem:[%s14451_s7 + $0x130] sm:$0xff] }
 0x543   :  { %v8469_v37 = vpop.f32.mrb[135].mxu0  ;;  %v13185_v48 = vpop.f32.mrb[127].mxu1  ;;  %9307 = vmatprep.subr.bf16.mxu0 %v9306_v14  ;;  %v9318_v14 = vpack.c.bf16 %v6753_v23, %v6752_v46  ;;  %v6772_v46 = vld [vmem:[%s14451_s7 + $0x170] sm:$0xff] }
 0x544   :  { %v8470_v58 = vadd.f32 %v8469_v37, %v8468_v40  ;;  %v6750_v40 = vld [vmem:[%s14451_s7 + $0xc0] sm:$0xff]  ;;  %v6780_v37 = vld [vmem:[%s14451_s7 + $0x1b0] sm:$0xff] }
 0x545   :  { %v4830_v10 = vld [vmem:[#allocation8 + $0xf0] ss:$2 sm:$0xff]  ;;  %v4862_v38 = vld [vmem:[#allocation8 + $0xf1] ss:$2 sm:$0xff]  ;;  %v9314_v61 = vpack.c.bf16 %v6751_v22, %v6750_v40 }
 0x546   :  { %v4878_v31 = vmax.f32 %v4830_v10, %v4862_v38  ;;  %v5816_v13 = vadd.f32 %v8470_v58, %v13172_v39  ;;  %v13203_v19 = vpop.f32.mrb[128].mxu1  ;;  %9309 = vmatpush3.bf16.msra.mxu0 %v9308_v47  ;;  %v9342_v10 = vpack.c.bf16 %v6781_v4, %v6780_v37  ;;  %v6740_v37 = vld [vmem:[%s14451_s7 + $0x70] sm:$0xff] }
 0x547   :  { %v13211_v21 = vpop.f32.mrb[129].mxu1  ;;  %9311 = vmatprep.subr.bf16.mxu0 %v9310_v2  ;;  %v9322_v2 = vpack.c.bf16 %v6755_v49, %v6754_v5 }
 0x548   :  { %4895 = vst.msk [vmem:[#allocation3 + $0x1b8] sm:$0xff] %vm703_vm4, %v4878_v31  ;;  %v5961_v35 = vadd.f32 %v5960_v59, %v5816_v13  ;;  %v6762_v59 = vld [vmem:[%s14451_s7 + $0x120] sm:$0xff]  ;;  %v6140_v31 = vld [vmem:[#allocation4 + $0xf8] sm:$0xff]  ;;  %v9344_v13 = vpack.c.bf16 %v6765_v62, %v6764_v60  ;;  %v6771_v62 = vld [vmem:[%s14451_s7 + $0x168] sm:$0xff] }
 0x549   :  { %v9340_v32 = vpack.c.bf16 %v6763_v20, %v6762_v59  ;;  %v6768_v59 = vld [vmem:[%s14451_s7 + $0x150] sm:$0xff]  ;;  %v6769_v20 = vld [vmem:[%s14451_s7 + $0x158] sm:$0xff]  ;;  %v6770_v60 = vld [vmem:[%s14451_s7 + $0x160] sm:$0xff] }
 0x54a   :  { %6041 = vst.msk [vmem:[#allocation4 + $0x20] sm:$0xff] %vm6040_vm10, %v5961_v35  ;;  %v13234_v26 = vpop.f32.mrb[130].mxu1  ;;  %9313 = vmatpush3.bf16.msra.mxu0 %v9312_v45  ;;  %v9346_v35 = vpack.c.bf16 %v6783_v33, %v6782_v0  ;;  %v9324_v45 = vpack.c.bf16 %v6739_v16, %v6738_v55 }
 0x54b   :  { %v13236_v18 = vpop.f32.mrb[131].mxu1  ;;  %9341 = vmatpush3.bf16.msra.mxu1 %v9340_v32  ;;  %9315 = vmatprep.subr.bf16.mxu0 %v9314_v61  ;;  %v5657_v32 = vld [vmem:[#allocation6 + $0x178] sm:$0xff]  ;;  %v6787_v61 = vld [vmem:[%s14451_s7 + $0x1e8] sm:$0xff] }
 0x54c   :  { %9343 = vmatprep.subr.bf16.mxu1 %v9342_v10 }
 0x54e   :  { %v8471_v28 = vpop.f32.mrb[136].mxu0  ;;  %9317 = vmatpush3.bf16.msra.mxu0 %v9316_v6  ;;  %v9356_v6 = vpack.c.bf16 %v6771_v62, %v6770_v60 }
 0x54f   :  { %v5400_v44 = vld [vmem:[#allocation3 + $0x1b7] sm:$0xff]  ;;  %v8472_v24 = vpop.f32.mrb[137].mxu0  ;;  %9345 = vmatpush3.bf16.msra.mxu1 %v9344_v13  ;;  %9319 = vmatprep.subr.bf16.mxu0 %v9318_v14 }
 0x550   :  { %v5496_v36 = vld [vmem:[#allocation3 + $0x1b8] sm:$0xff]  ;;  %5446 = vrot.lane.b32.xlu0 %v5400_v44, %s9605_s27  ;;  %5223 = vrot.lane.b32.xlu1 %v5400_v44, %s9607_s20  ;;  %v8473_v54 = vadd.f32 %v8472_v24, %v8471_v28  ;;  %v5497_v44 = vld [vmem:[#allocation3 + $0x1d0] sm:$0xff] }
 0x551   :  { %v5592_v1 = vld [vmem:[#allocation3 + $0x1b9] sm:$0xff]  ;;  %5288 = vst.msk [vmem:[#allocation6 + $0x170] sm:$0xff] %vm703_vm4, %v5496_v36  ;;  %v13284_v56 = vld [vmem:[#allocation4 + $0x21] sm:$0xff]  ;;  %9347 = vmatprep.subr.bf16.mxu1 %v9346_v35  ;;  %v6756_v24 = vld [vmem:[%s14451_s7 + $0xf0] sm:$0xff] }
 0x552   :  { %5608 = vst.msk [vmem:[#allocation6 + $0x160] sm:$0xff] %vm703_vm4, %v5592_v1  ;;  %v13282_v29 = vld [vmem:[#allocation4 + $0x20] sm:$0xff]  ;;  %v5821_v38 = vadd.f32 %v8473_v54, %v13172_v39  ;;  %v6788_v13 = vld [vmem:[%s14451_s7 + $0x1f0] sm:$0xff]  ;;  %v6773_v14 = vld [vmem:[%s14451_s7 + $0x178] sm:$0xff] }
 0x553   :  { %v13286_v58 = vld [vmem:[#allocation4 + $0x1f] sm:$0xff]  ;;  %6373 = vst.msk [vmem:[#allocation7 + $0x10] sm:$0xff] %vm6040_vm10, %v13282_v29  ;;  %6246 = vst.msk [vmem:[#allocation7 + $0x30] sm:$0xff] %vm6040_vm10, %v13284_v56  ;;  %9349 = vmatpush3.bf16.msra.mxu1 %v9348_v57  ;;  %v9360_v35 = vpack.c.bf16 %v6773_v14, %v6772_v46 }
 0x554   :  { %6117 = vst.msk [vmem:[#allocation7 + $0x28] sm:$0xff] %vm6040_vm10, %v13286_v58  ;;  %5542 = vrot.lane.b32.xlu0 %v5496_v36, %s9607_s20  ;;  %6164 = vrot.lane.b32.xlu1 %v6132_v11, %s9605_s27  ;;  %v5966_v8 = vadd.f32 %v13149_v3, %v5821_v38  ;;  %v6737_v3 = vld [vmem:[%s14451_s7 + $0x58] sm:$0xff]  ;;  %v9352_v36 = vpack.c.bf16 %v6769_v20, %v6768_v59  ;;  %v6786_v54 = vld [vmem:[%s14451_s7 + $0x1e0] sm:$0xff] }
 0x555   :  { %v9320_v47 = vpack.c.bf16 %v6737_v3, %v6736_v34  ;;  %9351 = vmatprep.subr.bf16.mxu1 %v9350_v15  ;;  %v6757_v11 = vld [vmem:[%s14451_s7 + $0xf8] sm:$0xff] }
 0x556   :  { %6042 = vst.msk [vmem:[#allocation4 + $0x38] sm:$0xff] %vm6040_vm10, %v5966_v8  ;;  %v9326_v22 = vpack.c.bf16 %v6757_v11, %v6756_v24  ;;  %v9358_v8 = vpack.c.bf16 %v6789_v53, %v6788_v13 }
 0x557   :  { %9321 = vmatpush3.bf16.msra.mxu0 %v9320_v47  ;;  %9353 = vmatpush3.bf16.msra.mxu1 %v9352_v36 }
 0x558   :  { %5351 = vrot.lane.b32.xlu0 %v5592_v1, %s9606_s28  ;;  %6180 = vrot.lane.b32.xlu1 %v6140_v31, %s9605_s27  ;;  %v9328_v31 = vpack.c.bf16 %v6741_v63, %v6740_v37 }
 0x559   :  { %v5654_v12 = vld [vmem:[#allocation6 + $0x160] sm:$0xff]  ;;  %9323 = vmatprep.subr.bf16.mxu0 %v9322_v2 }
 0x55a   :  { %9114 = vmatprep.mubr.msk.f32.mxu1 %vm703_vm4, %v5654_v12  ;;  %v8474_v28 = vpop.f32.mrb[138].mxu0  ;;  %v5646_v2 = vld [vmem:[#allocation6 + $0x120] sm:$0xff] }
 0x55b   :  { %v8475_v1 = vpop.f32.mrb[139].mxu0  ;;  %9115 = vmatmul.mubr.msk.f32.gmra.mrb[136].mxu1 %vm703_vm4, %v5657_v32  ;;  %9325 = vmatpush3.bf16.msra.mxu0 %v9324_v45  ;;  %vm8117_vm4 = vcmask 74752  }
 0x55c   :  { %5448 = vrot.lane.b32.xlu0 %v5401_v52, %s9605_s27  ;;  %6166 = vrot.lane.b32.xlu1 %v13282_v29, %s9605_s27  ;;  %v8476_v40 = vadd.f32 %v8475_v1, %v8474_v28  ;;  %v9354_v29 = vpack.c.bf16 %v6787_v61, %v6786_v54 }
 0x55d   :  { %v6134_v4 = vld [vmem:[#allocation4 + $0x38] sm:$0xff]  ;;  %9327 = vmatprep.subr.bf16.mxu0 %v9326_v22 }
 0x55e   :  { %v6262_v9 = vld [vmem:[#allocation4 + $0x37] sm:$0xff]  ;;  %v5826_v38 = vadd.f32 %v8476_v40, %v13172_v39  ;;  %6374 = vst.msk [vmem:[#allocation7 + $0x38] sm:$0xff] %vm6040_vm10, %v6134_v4  ;;  %9355 = vmatprep.subr.bf16.mxu1 %v9354_v29 }
 0x55f   :  { %v6390_v10 = vld [vmem:[#allocation4 + $0x39] sm:$0xff]  ;;  %6118 = vst.msk [vmem:[#allocation7 + $0x50] sm:$0xff] %vm6040_vm10, %v6262_v9  ;;  %6502 = vst.msk [vmem:[#allocation7 + $0x18] sm:$0xff] %vm6040_vm10, %v6262_v9  ;;  %9329 = vmatpush3.bf16.msra.mxu0 %v9328_v31  ;;  %9357 = vmatpush3.bf16.msra.mxu1 %v9356_v6 }
 0x560   :  { %6247 = vst.msk [vmem:[#allocation7 + $0x58] sm:$0xff] %vm6040_vm10, %v6390_v10  ;;  %5544 = vrot.lane.b32.xlu0 %v5497_v44, %s9607_s20  ;;  %v5971_v23 = vadd.f32 %v13164_v51, %v5826_v38  ;;  %6421 = vrot.lane.b32.xlu1 %v13284_v56, %s9605_s27  ;;  %v6614_v0 = vld [vmem:[#allocation4 + $0x39] sm:$0xff] }
 0x561   :  { %6630 = vst.msk [vmem:[#allocation7 + $0x20] sm:$0xff] %vm6040_vm10, %v6614_v0  ;;  %9359 = vmatprep.subr.bf16.mxu1 %v9358_v8 }
 0x562   :  { %v5443_v33 = vpop.permute.xlu0 %5442  ;;  %v5220_v34 = vpop.permute.xlu1 %5219  ;;  %6043 = vst.msk [vmem:[#allocation4 + $0x50] sm:$0xff] %vm6040_vm10, %v5971_v23 }
 0x563   :  { %5478 = vst.msk [vmem:[#allocation6 + $0x128] sm:$0xff] %vm1680_vm7, %v5443_v33  ;;  %9361 = vmatpush3.bf16.msra.mxu1 %v9360_v35 }
 0x564   :  { %5254 = vst.msk [vmem:[#allocation6 + $0x138] sm:$0xff] %vm2065_vm8, %v5220_v34  ;;  %6293 = vrot.lane.b32.xlu0 %v13286_v58, %s9605_s27  ;;  %6168 = vrot.lane.b32.xlu1 %v6134_v4, %s9605_s27 }
 0x566   :  { %v5539_v51 = vpop.permute.xlu0 %5538  ;;  %v5030_v56 = vpop.permute.xlu1 %5029 }
 0x567   :  { %5574 = vst.msk [vmem:[#allocation6 + $0x128] sm:$0xff] %vm2065_vm8, %v5539_v51  ;;  %v8477_v3 = vpop.f32.mrb[140].mxu0 }
 0x568   :  { %5063 = vst.msk [vmem:[#allocation6 + $0x150] sm:$0xff] %vm1295_vm6, %v5030_v56  ;;  %6295 = vrot.lane.b32.xlu0 %v6262_v9, %s9605_s27  ;;  %v8478_v25 = vpop.f32.mrb[141].mxu0  ;;  %6550 = vrot.lane.b32.xlu1 %v6134_v4, %s9605_s27 }
 0x569   :  { %v8479_v42 = vadd.f32 %v8478_v25, %v8477_v3  ;;  %v6263_v52 = vld [vmem:[#allocation4 + $0x4f] sm:$0xff] }
 0x56a   :  { %v5348_v12 = vpop.permute.xlu0 %5347  ;;  %v6135_v47 = vld [vmem:[#allocation4 + $0x50] sm:$0xff]  ;;  %v5126_v57 = vpop.permute.xlu1 %5125  ;;  %6119 = vst.msk [vmem:[#allocation7 + $0x78] sm:$0xff] %vm6040_vm10, %v6263_v52  ;;  %6503 = vst.msk [vmem:[#allocation7 + $0x40] sm:$0xff] %vm6040_vm10, %v6263_v52 }
 0x56b   :  { %v6391_v58 = vld [vmem:[#allocation4 + $0x51] sm:$0xff]  ;;  %5382 = vst.msk [vmem:[#allocation6 + $0x140] sm:$0xff] %vm1295_vm6, %v5348_v12  ;;  %v5831_v5 = vadd.f32 %v8479_v42, %v13172_v39  ;;  %v6237_v12 = vld [vmem:[#allocation4 + $0xf9] sm:$0xff] }
 0x56c   :  { %6248 = vst.msk [vmem:[#allocation7 + $0x80] sm:$0xff] %vm6040_vm10, %v6391_v58  ;;  %6375 = vst.msk [vmem:[#allocation7 + $0x60] sm:$0xff] %vm6040_vm10, %v6135_v47  ;;  %v6615_v7 = vld [vmem:[#allocation4 + $0x51] sm:$0xff]  ;;  %6297 = vrot.lane.b32.xlu0 %v6263_v52, %s9605_s27  ;;  %6423 = vrot.lane.b32.xlu1 %v6390_v10, %s9605_s27 }
 0x56d   :  { %5159 = vst.msk [vmem:[#allocation6 + $0x150] sm:$0xff] %vm1680_vm7, %v5126_v57  ;;  %v5976_v49 = vadd.f32 %v13153_v27, %v5831_v5  ;;  %v5649_v3 = vld [vmem:[#allocation6 + $0x138] sm:$0xff] }
 0x56e   :  { %6631 = vst.msk [vmem:[#allocation7 + $0x48] sm:$0xff] %vm6040_vm10, %v6615_v7  ;;  %v5647_v43 = vld [vmem:[#allocation6 + $0x128] sm:$0xff]  ;;  %6253 = vst.msk [vmem:[#allocation7 + $0x148] sm:$0xff] %vm6040_vm10, %v6237_v12 }
 0x56f   :  { %5873 = vmatprep.mubr.f32.mxu0 %v5647_v43  ;;  %6044 = vst.msk [vmem:[#allocation4 + $0x68] sm:$0xff] %vm6040_vm10, %v5976_v49 }
 0x570   :  { %5874 = vmatmul.mubr.f32.gmra.mrb[158].mxu0 %v5646_v2  ;;  %6170 = vrot.lane.b32.xlu1 %v6135_v47, %s9605_s27 }
 0x572   :  { %v8480_v17 = vpop.f32.mrb[142].mxu0 }
 0x573   :  { %v8481_v55 = vpop.f32.mrb[143].mxu0 }
 0x574   :  { %v8482_v16 = vadd.f32 %v8481_v55, %v8480_v17  ;;  %6552 = vrot.lane.b32.xlu1 %v6135_v47, %s9605_s27 }
 0x576   :  { %v5836_v15 = vadd.f32 %v8482_v16, %v13172_v39  ;;  %v6264_v45 = vld [vmem:[#allocation4 + $0x67] sm:$0xff] }
 0x577   :  { %v6136_v59 = vld [vmem:[#allocation4 + $0x68] sm:$0xff]  ;;  %6299 = vrot.lane.b32.xlu0 %v6264_v45, %s9605_s27  ;;  %6120 = vst.msk [vmem:[#allocation7 + $0xa0] sm:$0xff] %vm6040_vm10, %v6264_v45  ;;  %6504 = vst.msk [vmem:[#allocation7 + $0x68] sm:$0xff] %vm6040_vm10, %v6264_v45 }
 0x578   :  { %v13436_v20 = vld [vmem:[#allocation4 + $0x69] sm:$0xff]  ;;  %6376 = vst.msk [vmem:[#allocation7 + $0x88] sm:$0xff] %vm6040_vm10, %v6136_v59  ;;  %v5981_v28 = vadd.f32 %v13185_v48, %v5836_v15  ;;  %6425 = vrot.lane.b32.xlu1 %v6391_v58, %s9605_s27 }
 0x579   :  { %6249 = vst.msk [vmem:[#allocation7 + $0xa8] sm:$0xff] %vm6040_vm10, %v13436_v20  ;;  %v6616_v27 = vld [vmem:[#allocation4 + $0x69] sm:$0xff] }
 0x57a   :  { %6632 = vst.msk [vmem:[#allocation7 + $0x70] sm:$0xff] %vm6040_vm10, %v6616_v27  ;;  %6045 = vst.msk [vmem:[#allocation4 + $0x80] sm:$0xff] %vm6040_vm10, %v5981_v28 }
 0x57c   :  { %6172 = vrot.lane.b32.xlu1 %v6136_v59, %s9605_s27 }
 0x57e   :  { %v8483_v44 = vpop.f32.mrb[144].mxu0 }
 0x57f   :  { %v8484_v36 = vpop.f32.mrb[145].mxu0 }
 0x580   :  { %v8485_v1 = vadd.f32 %v8484_v36, %v8483_v44  ;;  %6554 = vrot.lane.b32.xlu1 %v6136_v59, %s9605_s27 }
 0x581   :  { %v6265_v32 = vld [vmem:[#allocation4 + $0x7f] sm:$0xff] }
 0x582   :  { %v6137_v24 = vld [vmem:[#allocation4 + $0x80] sm:$0xff]  ;;  %v5841_v40 = vadd.f32 %v8485_v1, %v13172_v39  ;;  %6301 = vrot.lane.b32.xlu0 %v6265_v32, %s9605_s27  ;;  %6121 = vst.msk [vmem:[#allocation7 + $0xc8] sm:$0xff] %vm6040_vm10, %v6265_v32  ;;  %6505 = vst.msk [vmem:[#allocation7 + $0x90] sm:$0xff] %vm6040_vm10, %v6265_v32 }
 0x583   :  { %v13450_v11 = vld [vmem:[#allocation4 + $0x81] sm:$0xff]  ;;  %6377 = vst.msk [vmem:[#allocation7 + $0xb0] sm:$0xff] %vm6040_vm10, %v6137_v24 }
 0x584   :  { %6250 = vst.msk [vmem:[#allocation7 + $0xd0] sm:$0xff] %vm6040_vm10, %v13450_v11  ;;  %v6617_v48 = vld [vmem:[#allocation4 + $0x81] sm:$0xff]  ;;  %v5986_v22 = vadd.f32 %v13174_v50, %v5841_v40  ;;  %6174 = vrot.lane.b32.xlu1 %v6137_v24, %s9605_s27 }
 0x585   :  { %6633 = vst.msk [vmem:[#allocation7 + $0x98] sm:$0xff] %vm6040_vm10, %v6617_v48 }
 0x586   :  { %6046 = vst.msk [vmem:[#allocation4 + $0x98] sm:$0xff] %vm6040_vm10, %v5986_v22 }
 0x58a   :  { %v8486_v54 = vpop.f32.mrb[146].mxu0 }
 0x58b   :  { %v8487_v61 = vpop.f32.mrb[147].mxu0 }
 0x58c   :  { %v8488_v37 = vadd.f32 %v8487_v61, %v8486_v54 }
 0x58d   :  { %v6266_v4 = vld [vmem:[#allocation4 + $0x97] sm:$0xff] }
 0x58e   :  { %v6138_v9 = vld [vmem:[#allocation4 + $0x98] sm:$0xff]  ;;  %v5846_v29 = vadd.f32 %v8488_v37, %v13172_v39  ;;  %6303 = vrot.lane.b32.xlu0 %v6266_v4, %s9605_s27  ;;  %6122 = vst.msk [vmem:[#allocation7 + $0xf0] sm:$0xff] %vm6040_vm10, %v6266_v4  ;;  %6506 = vst.msk [vmem:[#allocation7 + $0xb8] sm:$0xff] %vm6040_vm10, %v6266_v4 }
 0x58f   :  { %v13463_v10 = vld [vmem:[#allocation4 + $0x99] sm:$0xff]  ;;  %6176 = vrot.lane.b32.xlu1 %v6138_v9, %s9605_s27  ;;  %6378 = vst.msk [vmem:[#allocation7 + $0xd8] sm:$0xff] %vm6040_vm10, %v6138_v9 }
 0x590   :  { %6251 = vst.msk [vmem:[#allocation7 + $0xf8] sm:$0xff] %vm6040_vm10, %v13463_v10  ;;  %v6618_v50 = vld [vmem:[#allocation4 + $0x99] sm:$0xff]  ;;  %v5991_v38 = vadd.f32 %v13211_v21, %v5846_v29 }
 0x591   :  { %6634 = vst.msk [vmem:[#allocation7 + $0xc0] sm:$0xff] %vm6040_vm10, %v6618_v50 }
 0x592   :  { %v5445_v63 = vpop.permute.xlu0 %5444  ;;  %v5222_v60 = vpop.permute.xlu1 %5221  ;;  %6047 = vst.msk [vmem:[#allocation4 + $0xb0] sm:$0xff] %vm6040_vm10, %v5991_v38 }
 0x593   :  { %5479 = vst.msk [vmem:[#allocation6 + $0x140] sm:$0xff] %vm1680_vm7, %v5445_v63 }
 0x594   :  { %5255 = vst.msk [vmem:[#allocation6 + $0x150] sm:$0xff] %vm2065_vm8, %v5222_v60 }
 0x596   :  { %v5541_v62 = vpop.permute.xlu0 %5540  ;;  %v5032_v31 = vpop.permute.xlu1 %5031 }
 0x597   :  { %5575 = vst.msk [vmem:[#allocation6 + $0x140] sm:$0xff] %vm2065_vm8, %v5541_v62 }
 0x598   :  { %5064 = vst.msk [vmem:[#allocation6 + $0x168] sm:$0xff] %vm1295_vm6, %v5032_v31  ;;  %v8489_v6 = vpop.f32.mrb[148].mxu0 }
 0x599   :  { %v8490_v13 = vpop.f32.mrb[149].mxu0  ;;  %v6267_v23 = vld [vmem:[#allocation4 + $0xaf] sm:$0xff] }
 0x59a   :  { %v8491_v53 = vadd.f32 %v8490_v13, %v8489_v6  ;;  %v5350_v46 = vpop.permute.xlu0 %5349  ;;  %v6139_v21 = vld [vmem:[#allocation4 + $0xb0] sm:$0xff]  ;;  %v5128_v14 = vpop.permute.xlu1 %5127  ;;  %6305 = vrot.lane.b32.xlu0 %v6267_v23, %s9605_s27  ;;  %6123 = vst.msk [vmem:[#allocation7 + $0x118] sm:$0xff] %vm6040_vm10, %v6267_v23  ;;  %6507 = vst.msk [vmem:[#allocation7 + $0xe0] sm:$0xff] %vm6040_vm10, %v6267_v23 }
 0x59b   :  { %v6395_v8 = vld [vmem:[#allocation4 + $0xb1] sm:$0xff]  ;;  %5383 = vst.msk [vmem:[#allocation6 + $0x158] sm:$0xff] %vm1295_vm6, %v5350_v46  ;;  %6178 = vrot.lane.b32.xlu1 %v6139_v21, %s9605_s27 }
 0x59c   :  { %6252 = vst.msk [vmem:[#allocation7 + $0x120] sm:$0xff] %vm6040_vm10, %v6395_v8  ;;  %6379 = vst.msk [vmem:[#allocation7 + $0x100] sm:$0xff] %vm6040_vm10, %v6139_v21  ;;  %v6619_v33 = vld [vmem:[#allocation4 + $0xb1] sm:$0xff]  ;;  %v5851_v34 = vadd.f32 %v8491_v53, %v13172_v39 }
 0x59d   :  { %v13481_v0 = vpop.f32.mrb[132].mxu1  ;;  %5160 = vst.msk [vmem:[#allocation6 + $0x168] sm:$0xff] %vm1680_vm7, %v5128_v14  ;;  %v5652_v22 = vld [vmem:[#allocation6 + $0x150] sm:$0xff] }
 0x59e   :  { %v13491_v35 = vpop.f32.mrb[133].mxu1  ;;  %6635 = vst.msk [vmem:[#allocation7 + $0xe8] sm:$0xff] %vm6040_vm10, %v6619_v33  ;;  %v5996_v51 = vadd.f32 %v13203_v19, %v5851_v34  ;;  %v5650_v56 = vld [vmem:[#allocation6 + $0x140] sm:$0xff] }
 0x59f   :  { %5878 = vmatprep.mubr.f32.mxu0 %v5650_v56  ;;  %6556 = vrot.lane.b32.xlu1 %v6137_v24, %s9605_s27 }
 0x5a0   :  { %6048 = vst.msk [vmem:[#allocation4 + $0xc8] sm:$0xff] %vm6040_vm10, %v5996_v51  ;;  %5879 = vmatmul.mubr.f32.gmra.mrb[160].mxu0 %v5649_v3 }
 0x5a2   :  { %v8492_v25 = vpop.f32.mrb[150].mxu0 }
 0x5a3   :  { %6427 = vrot.lane.b32.xlu1 %v13436_v20, %s9605_s27  ;;  %v8493_v42 = vpop.f32.mrb[151].mxu0 }
 0x5a4   :  { %v8494_v52 = vadd.f32 %v8493_v42, %v8492_v25 }
 0x5a6   :  { %v5856_v47 = vadd.f32 %v8494_v52, %v13172_v39 }
 0x5a7   :  { %v6268_v19 = vld [vmem:[#allocation4 + $0xc7] sm:$0xff]  ;;  %6558 = vrot.lane.b32.xlu1 %v6138_v9, %s9605_s27 }
 0x5a8   :  { %v6524_v58 = vld [vmem:[#allocation4 + $0xc8] sm:$0xff]  ;;  %6307 = vrot.lane.b32.xlu0 %v6268_v19, %s9605_s27  ;;  %6508 = vst.msk [vmem:[#allocation7 + $0x108] sm:$0xff] %vm6040_vm10, %v6268_v19  ;;  %v6001_v7 = vadd.f32 %v13236_v18, %v5856_v47 }
 0x5a9   :  { %6380 = vst.msk [vmem:[#allocation7 + $0x128] sm:$0xff] %vm6040_vm10, %v6524_v58  ;;  %v6620_v57 = vld [vmem:[#allocation4 + $0xc9] sm:$0xff] }
 0x5aa   :  { %6636 = vst.msk [vmem:[#allocation7 + $0x110] sm:$0xff] %vm6040_vm10, %v6620_v57  ;;  %6049 = vst.msk [vmem:[#allocation4 + $0x110] sm:$0xff] %vm6040_vm10, %v6001_v7  ;;  %v6396_v15 = vld [vmem:[#allocation4 + $0xc9] sm:$0xff] }
 0x5ab   :  { %6429 = vrot.lane.b32.xlu1 %v13450_v11, %s9605_s27 }
 0x5af   :  { %6431 = vrot.lane.b32.xlu1 %v13463_v10, %s9605_s27 }
 0x5b1   :  { %v6269_v5 = vld [vmem:[#allocation4 + $0x10f] sm:$0xff] }
 0x5b2   :  { %v6141_v49 = vld [vmem:[#allocation4 + $0x110] sm:$0xff]  ;;  %6309 = vrot.lane.b32.xlu0 %v6269_v5, %s9605_s27  ;;  %6125 = vst.msk [vmem:[#allocation7 + $0x168] sm:$0xff] %vm6040_vm10, %v6269_v5 }
 0x5b3   :  { %v6397_v43 = vld [vmem:[#allocation4 + $0x111] sm:$0xff]  ;;  %v8495_v2 = vpop.f32.mrb[152].mxu0  ;;  %6560 = vrot.lane.b32.xlu1 %v6139_v21, %s9605_s27  ;;  %6381 = vst.msk [vmem:[#allocation7 + $0x150] sm:$0xff] %vm6040_vm10, %v6141_v49 }
 0x5b4   :  { %6254 = vst.msk [vmem:[#allocation7 + $0x170] sm:$0xff] %vm6040_vm10, %v6397_v43  ;;  %v8496_v18 = vpop.f32.mrb[153].mxu0 }
 0x5b5   :  { %v8497_v17 = vadd.f32 %v8496_v18, %v8495_v2 }
 0x5b6   :  { %6182 = vrot.lane.b32.xlu0 %v6141_v49, %s9605_s27 }
 0x5b7   :  { %v5861_v55 = vadd.f32 %v8497_v17, %v13172_v39  ;;  %6562 = vrot.lane.b32.xlu1 %v6524_v58, %s9605_s27 }
 0x5b9   :  { %v6006_v16 = vadd.f32 %v13234_v26, %v5861_v55 }
 0x5bb   :  { %6050 = vst.msk [vmem:[#allocation4 + $0x128] sm:$0xff] %vm6040_vm10, %v6006_v16  ;;  %6433 = vrot.lane.b32.xlu1 %v6395_v8, %s9605_s27 }
 0x5bf   :  { %6435 = vrot.lane.b32.xlu1 %v6396_v15, %s9605_s27 }
 0x5c2   :  { %v5447_v45 = vpop.permute.xlu0 %5446  ;;  %v5224_v59 = vpop.permute.xlu1 %5223  ;;  %v6270_v20 = vld [vmem:[#allocation4 + $0x127] sm:$0xff] }
 0x5c3   :  { %v13524_v27 = vld [vmem:[#allocation4 + $0x128] sm:$0xff]  ;;  %5480 = vst.msk [vmem:[#allocation6 + $0x158] sm:$0xff] %vm1680_vm7, %v5447_v45  ;;  %6311 = vrot.lane.b32.xlu0 %v6270_v20, %s9605_s27  ;;  %6437 = vrot.lane.b32.xlu1 %v6397_v43, %s9605_s27 }
 0x5c4   :  { %v6398_v28 = vld [vmem:[#allocation4 + $0x129] sm:$0xff]  ;;  %5256 = vst.msk [vmem:[#allocation6 + $0x168] sm:$0xff] %vm2065_vm8, %v5224_v59 }
 0x5c5   :  { %6126 = vst.msk [vmem:[#allocation7 + $0x190] sm:$0xff] %vm6040_vm10, %v6270_v20  ;;  %6382 = vst.msk [vmem:[#allocation7 + $0x178] sm:$0xff] %vm6040_vm10, %v13524_v27  ;;  %v6494_v26 = vld [vmem:[#allocation4 + $0x127] sm:$0xff] }
 0x5c6   :  { %6255 = vst.msk [vmem:[#allocation7 + $0x198] sm:$0xff] %vm6040_vm10, %v6398_v28  ;;  %v6622_v44 = vld [vmem:[#allocation4 + $0x129] sm:$0xff]  ;;  %6510 = vst.msk [vmem:[#allocation7 + $0x158] sm:$0xff] %vm6040_vm10, %v6494_v26  ;;  %v5543_v36 = vpop.permute.xlu0 %5542  ;;  %v6165_v1 = vpop.permute.xlu1 %6164 }
 0x5c7   :  { %6638 = vst.msk [vmem:[#allocation7 + $0x160] sm:$0xff] %vm6040_vm10, %v6622_v44  ;;  %6184 = vrot.lane.b32.xlu0 %v13524_v27, %s9605_s27  ;;  %6439 = vrot.lane.b32.xlu1 %v6398_v28, %s9605_s27 }
 0x5c8   :  { %5576 = vst.msk [vmem:[#allocation6 + $0x158] sm:$0xff] %vm2065_vm8, %v5543_v36 }
 0x5c9   :  { %6213 = vst.msk [vmem:[#allocation7] sm:$0xff] %vm6212_vm13, %v6165_v1 }
 0x5ca   :  { %v5352_v32 = vpop.permute.xlu0 %5351  ;;  %v6181_v24 = vpop.permute.xlu1 %6180 }
 0x5cb   :  { %5384 = vst.msk [vmem:[#allocation6 + $0x170] sm:$0xff] %vm1295_vm6, %v5352_v32  ;;  %v5655_v50 = vld [vmem:[#allocation6 + $0x168] sm:$0xff] }
 0x5cc   :  { %6221 = vst.msk [vmem:[#allocation7 + $0x140] sm:$0xff] %vm6212_vm13, %v6181_v24 }
 0x5ce   :  { %v5449_v11 = vpop.permute.xlu0 %5448  ;;  %v6167_v48 = vpop.permute.xlu1 %6166 }
 0x5cf   :  { %v5653_v40 = vld [vmem:[#allocation6 + $0x158] sm:$0xff]  ;;  %5481 = vst.msk [vmem:[#allocation6 + $0x170] sm:$0xff] %vm1680_vm7, %v5449_v11 }
 0x5d0   :  { %5883 = vmatprep.mubr.f32.mxu0 %v5653_v40  ;;  %6214 = vst.msk [vmem:[#allocation7 + $0x28] sm:$0xff] %vm6212_vm13, %v6167_v48  ;;  %v6646_v38 = vld [vmem:[#allocation7] sm:$0xff] }
 0x5d1   :  { %5884 = vmatmul.mubr.f32.gmra.mrb[162].mxu0 %v5652_v22 }
 0x5d2   :  { %v5545_v54 = vpop.permute.xlu0 %5544  ;;  %v6422_v61 = vpop.permute.xlu1 %6421 }
 0x5d3   :  { %5577 = vst.msk [vmem:[#allocation6 + $0x170] sm:$0xff] %vm2065_vm8, %v5545_v54 }
 0x5d4   :  { %6469 = vst.msk [vmem:[#allocation7 + $0x10] sm:$0xff] %vm6212_vm13, %v6422_v61 }
 0x5d6   :  { %v6294_v37 = vpop.permute.xlu0 %6293  ;;  %v6169_v4 = vpop.permute.xlu1 %6168 }
 0x5d7   :  { %6341 = vst.msk [vmem:[#allocation7 + $0x8] sm:$0xff] %vm6212_vm13, %v6294_v37  ;;  %6215 = vst.msk [vmem:[#allocation7 + $0x50] sm:$0xff] %vm6212_vm13, %v6169_v4  ;;  %v6651_v46 = vld [vmem:[#allocation7 + $0x28] sm:$0xff] }
 0x5da   :  { %v6296_v9 = vpop.permute.xlu0 %6295  ;;  %v5656_v10 = vld [vmem:[#allocation6 + $0x170] sm:$0xff]  ;;  %v6551_v29 = vpop.permute.xlu1 %6550 }
 0x5db   :  { %6342 = vst.msk [vmem:[#allocation7 + $0x30] sm:$0xff] %vm6212_vm13, %v6296_v9  ;;  %5888 = vmatprep.mubr.f32.mxu0 %v5656_v10  ;;  %6598 = vst.msk [vmem:[#allocation7 + $0x18] sm:$0xff] %vm6212_vm13, %v6551_v29  ;;  %v6648_v21 = vld [vmem:[#allocation7 + $0x10] sm:$0xff] }
 0x5dc   :  { %5889 = vmatmul.mubr.f32.gmra.mrb[164].mxu0 %v5655_v50 }
 0x5de   :  { %v6298_v63 = vpop.permute.xlu0 %6297  ;;  %v6647_v60 = vld [vmem:[#allocation7 + $0x8] sm:$0xff]  ;;  %v6424_v62 = vpop.permute.xlu1 %6423  ;;  %v6656_v51 = vld [vmem:[#allocation7 + $0x50] sm:$0xff] }
 0x5df   :  { %6343 = vst.msk [vmem:[#allocation7 + $0x58] sm:$0xff] %vm6212_vm13, %v6298_v63  ;;  %6917 = vmatprep.mubr.f32.mxu0 %v6647_v60  ;;  %6470 = vst.msk [vmem:[#allocation7 + $0x38] sm:$0xff] %vm6212_vm13, %v6424_v62 }
 0x5e0   :  { %6918 = vmatmul.mubr.f32.vlgmr.msra.gmra.mrb[166].mxu0 %v6646_v38 }
 0x5e2   :  { %v6652_v31 = vld [vmem:[#allocation7 + $0x30] sm:$0xff]  ;;  %v6171_v6 = vpop.permute.xlu1 %6170  ;;  %v6649_v53 = vld [vmem:[#allocation7 + $0x18] sm:$0xff] }
 0x5e3   :  { %v8498_v13 = vpop.f32.mrb[154].mxu0  ;;  %6922 = vmatprep.mubr.f32.mxu0 %v6652_v31  ;;  %6216 = vst.msk [vmem:[#allocation7 + $0x78] sm:$0xff] %vm6212_vm13, %v6171_v6  ;;  %7062 = vmatprep.mubr.f32.mxu1 %v6649_v53  ;;  %v6686_v53 = vld [vmem:[#allocation7 + $0x140] sm:$0xff] }
 0x5e4   :  { %v8499_v23 = vpop.f32.mrb[155].mxu0  ;;  %6923 = vmatmul.mubr.f32.gmra.mrb[168].mxu0 %v6651_v46  ;;  %7063 = vmatmul.mubr.f32.vlgmr.msra.gmra.mrb[138].mxu1 %v6648_v21 }
 0x5e5   :  { %v8500_v8 = vadd.f32 %v8499_v23, %v8498_v13 }
 0x5e6   :  { %v6657_v14 = vld [vmem:[#allocation7 + $0x58] sm:$0xff]  ;;  %v6553_v34 = vpop.permute.xlu1 %6552 }
 0x5e7   :  { %v5866_v33 = vadd.f32 %v8500_v8, %v13172_v39  ;;  %6927 = vmatprep.mubr.f32.mxu0 %v6657_v14  ;;  %6599 = vst.msk [vmem:[#allocation7 + $0x40] sm:$0xff] %vm6212_vm13, %v6553_v34  ;;  %v6653_v52 = vld [vmem:[#allocation7 + $0x38] sm:$0xff] }
 0x5e8   :  { %6928 = vmatmul.mubr.f32.gmra.mrb[170].mxu0 %v6656_v51 }
 0x5e9   :  { %v6011_v56 = vadd.f32 %v13491_v35, %v5866_v33  ;;  %v6300_v3 = vpop.permute.xlu0 %6299 }
 0x5ea   :  { %6344 = vst.msk [vmem:[#allocation7 + $0x80] sm:$0xff] %vm6212_vm13, %v6300_v3  ;;  %v6426_v25 = vpop.permute.xlu1 %6425  ;;  %v6661_v35 = vld [vmem:[#allocation7 + $0x78] sm:$0xff] }
 0x5eb   :  { %6051 = vst.msk [vmem:[#allocation4 + $0x140] sm:$0xff] %vm6040_vm10, %v6011_v56 }
 0x5ec   :  { %6471 = vst.msk [vmem:[#allocation7 + $0x60] sm:$0xff] %vm6212_vm13, %v6426_v25 }
 0x5ee   :  { %v6173_v42 = vpop.permute.xlu1 %6172  ;;  %v6654_v12 = vld [vmem:[#allocation7 + $0x40] sm:$0xff] }
 0x5ef   :  { %6217 = vst.msk [vmem:[#allocation7 + $0xa0] sm:$0xff] %vm6212_vm13, %v6173_v42  ;;  %7067 = vmatprep.mubr.f32.mxu1 %v6654_v12 }
 0x5f0   :  { %7068 = vmatmul.mubr.f32.gmra.mrb[140].mxu1 %v6653_v52 }
 0x5f1   :  { %v6662_v47 = vld [vmem:[#allocation7 + $0x80] sm:$0xff] }
 0x5f2   :  { %v6271_v19 = vld [vmem:[#allocation4 + $0x13f] sm:$0xff]  ;;  %v6555_v57 = vpop.permute.xlu1 %6554  ;;  %6932 = vmatprep.mubr.f32.mxu0 %v6662_v47 }
 0x5f3   :  { %v6399_v58 = vld [vmem:[#allocation4 + $0x141] sm:$0xff]  ;;  %6313 = vrot.lane.b32.xlu0 %v6271_v19, %s9605_s27  ;;  %6127 = vst.msk [vmem:[#allocation7 + $0x1b8] sm:$0xff] %vm6040_vm10, %v6271_v19  ;;  %6511 = vst.msk [vmem:[#allocation7 + $0x180] sm:$0xff] %vm6040_vm10, %v6271_v19  ;;  %6933 = vmatmul.mubr.f32.gmra.mrb[172].mxu0 %v6661_v35  ;;  %v13622_v35 = vld [vmem:[%s14450_s6] ss:$0 sm:$0xff] }
 0x5f4   :  { %v13562_v7 = vld [vmem:[#allocation4 + $0x140] sm:$0xff]  ;;  %6256 = vst.msk [vmem:[#allocation7 + $0x1c0] sm:$0xff] %vm6040_vm10, %v6399_v58  ;;  %6639 = vst.msk [vmem:[#allocation7 + $0x188] sm:$0xff] %vm6040_vm10, %v6399_v58  ;;  %6441 = vrot.lane.b32.xlu1 %v6399_v58, %s9605_s27  ;;  %v6302_v5 = vpop.permute.xlu0 %6301 }
 0x5f5   :  { %6600 = vst.msk [vmem:[#allocation7 + $0x68] sm:$0xff] %vm6212_vm13, %v6555_v57  ;;  %6345 = vst.msk [vmem:[#allocation7 + $0xa8] sm:$0xff] %vm6212_vm13, %v6302_v5  ;;  %v6658_v17 = vld [vmem:[#allocation7 + $0x60] sm:$0xff] }
 0x5f6   :  { %6383 = vst.msk [vmem:[#allocation7 + $0x1a0] sm:$0xff] %vm6040_vm10, %v13562_v7  ;;  %v6175_v49 = vpop.permute.xlu1 %6174  ;;  %v6666_v16 = vld [vmem:[#allocation7 + $0xa0] sm:$0xff] }
 0x5f7   :  { %6186 = vrot.lane.b32.xlu0 %v13562_v7, %s9605_s27  ;;  %6218 = vst.msk [vmem:[#allocation7 + $0xc8] sm:$0xff] %vm6212_vm13, %v6175_v49 }
 0x5fc   :  { %v6659_v2 = vld [vmem:[#allocation7 + $0x68] sm:$0xff] }
 0x5fd   :  { %v13576_v43 = vpop.f32.mrb[134].mxu1  ;;  %7072 = vmatprep.mubr.f32.mxu1 %v6659_v2  ;;  %v6667_v55 = vld [vmem:[#allocation7 + $0xa8] sm:$0xff] }
 0x5fe   :  { %v13578_v18 = vpop.f32.mrb[135].mxu1  ;;  %7073 = vmatmul.mubr.f32.gmra.mrb[142].mxu1 %v6658_v17  ;;  %6937 = vmatprep.mubr.f32.mxu0 %v6667_v55  ;;  %v6671_v20 = vld [vmem:[#allocation7 + $0xc8] sm:$0xff] }
 0x5ff   :  { %6938 = vmatmul.mubr.f32.gmra.mrb[174].mxu0 %v6666_v16 }
 0x600   :  { %v6304_v15 = vpop.permute.xlu0 %6303 }
 0x601   :  { %v6177_v45 = vpop.permute.xlu1 %6176  ;;  %6346 = vst.msk [vmem:[#allocation7 + $0xd0] sm:$0xff] %vm6212_vm13, %v6304_v15 }
 0x602   :  { %6219 = vst.msk [vmem:[#allocation7 + $0xf0] sm:$0xff] %vm6212_vm13, %v6177_v45 }
 0x608   :  { %v6672_v59 = vld [vmem:[#allocation7 + $0xd0] sm:$0xff] }
 0x609   :  { %6942 = vmatprep.mubr.f32.mxu0 %v6672_v59  ;;  %v6676_v40 = vld [vmem:[#allocation7 + $0xf0] sm:$0xff] }
 0x60a   :  { %6943 = vmatmul.mubr.f32.gmra.mrb[176].mxu0 %v6671_v20 }
 0x60c   :  { %v6306_v28 = vpop.permute.xlu0 %6305 }
 0x60d   :  { %v6179_v26 = vpop.permute.xlu1 %6178  ;;  %6347 = vst.msk [vmem:[#allocation7 + $0xf8] sm:$0xff] %vm6212_vm13, %v6306_v28 }
 0x60e   :  { %6220 = vst.msk [vmem:[#allocation7 + $0x118] sm:$0xff] %vm6212_vm13, %v6179_v26 }
 0x611   :  { %v6557_v44 = vpop.permute.xlu1 %6556 }
 0x612   :  { %6601 = vst.msk [vmem:[#allocation7 + $0x90] sm:$0xff] %vm6212_vm13, %v6557_v44 }
 0x613   :  { %v8501_v36 = vpop.f32.mrb[156].mxu0 }
 0x614   :  { %v8502_v1 = vpop.f32.mrb[157].mxu0  ;;  %v6677_v11 = vld [vmem:[#allocation7 + $0xf8] sm:$0xff] }
 0x615   :  { %v8503_v32 = vadd.f32 %v8502_v1, %v8501_v36  ;;  %v6428_v24 = vpop.permute.xlu1 %6427  ;;  %6947 = vmatprep.mubr.f32.mxu0 %v6677_v11  ;;  %v6681_v38 = vld [vmem:[#allocation7 + $0x118] sm:$0xff]  ;;  %v6790_v1 = vld [vmem:[%s14451_s7 + $0x200] sm:$0xff] }
 0x616   :  { %6472 = vst.msk [vmem:[#allocation7 + $0x88] sm:$0xff] %vm6212_vm13, %v6428_v24  ;;  %6948 = vmatmul.mubr.f32.gmra.mrb[178].mxu0 %v6676_v40 }
 0x617   :  { %v5871_v48 = vadd.f32 %v8503_v32, %v13172_v39  ;;  %v6791_v32 = vld [vmem:[%s14451_s7 + $0x208] sm:$0xff] }
 0x618   :  { %v9362_v24 = vpack.c.bf16 %v6791_v32, %v6790_v1 }
 0x619   :  { %v6016_v22 = vadd.f32 %v13481_v0, %v5871_v48  ;;  %v6559_v54 = vpop.permute.xlu1 %6558  ;;  %v6664_v61 = vld [vmem:[#allocation7 + $0x90] sm:$0xff] }
 0x61a   :  { %v6308_v37 = vpop.permute.xlu0 %6307  ;;  %6602 = vst.msk [vmem:[#allocation7 + $0xb8] sm:$0xff] %vm6212_vm13, %v6559_v54  ;;  %7077 = vmatprep.mubr.f32.mxu1 %v6664_v61  ;;  %9363 = vmatprep.subr.bf16.mxu0 %v9362_v24 }
 0x61b   :  { %6052 = vst.msk [vmem:[#allocation4 + $0x158] sm:$0xff] %vm6040_vm10, %v6016_v22  ;;  %9365 = vmatpush3.bf16.msra.mxu0 %v9362_v24  ;;  %v6793_v22 = vld [vmem:[%s14451_s7 + $0x218] sm:$0xff] }
 0x61c   :  { %6348 = vst.msk [vmem:[#allocation7 + $0x120] sm:$0xff] %vm6212_vm13, %v6308_v37 }
 0x61d   :  { %v6430_v4 = vpop.permute.xlu1 %6429  ;;  %v6663_v9 = vld [vmem:[#allocation7 + $0x88] sm:$0xff] }
 0x61e   :  { %6473 = vst.msk [vmem:[#allocation7 + $0xb0] sm:$0xff] %vm6212_vm13, %v6430_v4  ;;  %7078 = vmatmul.mubr.f32.gmra.mrb[144].mxu1 %v6663_v9  ;;  %v6794_v4 = vld [vmem:[%s14451_s7 + $0x220] sm:$0xff]  ;;  %v6795_v9 = vld [vmem:[%s14451_s7 + $0x228] sm:$0xff] }
 0x621   :  { %v6432_v10 = vpop.permute.xlu1 %6431  ;;  %v6669_v39 = vld [vmem:[#allocation7 + $0xb8] sm:$0xff] }
 0x622   :  { %6474 = vst.msk [vmem:[#allocation7 + $0xd8] sm:$0xff] %vm6212_vm13, %v6432_v10  ;;  %7082 = vmatprep.mubr.f32.mxu1 %v6669_v39  ;;  %v6272_v29 = vld [vmem:[#allocation4 + $0x157] sm:$0xff]  ;;  %v9370_v10 = vpack.c.bf16 %v6795_v9, %v6794_v4 }
 0x623   :  { %v6682_v0 = vld [vmem:[#allocation7 + $0x120] sm:$0xff]  ;;  %6315 = vrot.lane.b32.xlu0 %v6272_v29, %s9605_s27  ;;  %v13594_v63 = vld [vmem:[#allocation4 + $0x158] sm:$0xff]  ;;  %6128 = vst.msk [vmem:[#allocation7 + $0x1e0] sm:$0xff] %vm6040_vm10, %v6272_v29  ;;  %6512 = vst.msk [vmem:[#allocation7 + $0x1a8] sm:$0xff] %vm6040_vm10, %v6272_v29 }
 0x624   :  { %v6400_v50 = vld [vmem:[#allocation4 + $0x159] sm:$0xff]  ;;  %6952 = vmatprep.mubr.f32.mxu0 %v6682_v0  ;;  %6384 = vst.msk [vmem:[#allocation7 + $0x1c8] sm:$0xff] %vm6040_vm10, %v13594_v63  ;;  %v6310_v60 = vpop.permute.xlu0 %6309 }
 0x625   :  { %6257 = vst.msk [vmem:[#allocation7 + $0x1e8] sm:$0xff] %vm6040_vm10, %v6400_v50  ;;  %6640 = vst.msk [vmem:[#allocation7 + $0x1b0] sm:$0xff] %vm6040_vm10, %v6400_v50  ;;  %6443 = vrot.lane.b32.xlu1 %v6400_v50, %s9605_s27  ;;  %6953 = vmatmul.mubr.f32.gmra.mrb[180].mxu0 %v6681_v38  ;;  %v6561_v62 = vpop.permute.xlu1 %6560  ;;  %v6668_v31 = vld [vmem:[#allocation7 + $0xb0] sm:$0xff] }
 0x626   :  { %6349 = vst.msk [vmem:[#allocation7 + $0x148] sm:$0xff] %vm6212_vm13, %v6310_v60  ;;  %6603 = vst.msk [vmem:[#allocation7 + $0xe0] sm:$0xff] %vm6212_vm13, %v6561_v62  ;;  %7083 = vmatmul.mubr.f32.gmra.mrb[146].mxu1 %v6668_v31 }
 0x627   :  { %6188 = vrot.lane.b32.xlu0 %v13594_v63, %s9605_s27 }
 0x628   :  { %v6183_v6 = vpop.permute.xlu0 %6182 }
 0x629   :  { %v6563_v13 = vpop.permute.xlu1 %6562  ;;  %6222 = vst.msk [vmem:[#allocation7 + $0x168] sm:$0xff] %vm6212_vm13, %v6183_v6  ;;  %v6673_v8 = vld [vmem:[#allocation7 + $0xd8] sm:$0xff]  ;;  %v6796_v6 = vld [vmem:[%s14451_s7 + $0x230] sm:$0xff] }
 0x62a   :  { %6604 = vst.msk [vmem:[#allocation7 + $0x108] sm:$0xff] %vm6212_vm13, %v6563_v13  ;;  %v6797_v13 = vld [vmem:[%s14451_s7 + $0x238] sm:$0xff] }
 0x62d   :  { %v6434_v46 = vpop.permute.xlu1 %6433  ;;  %v6687_v23 = vld [vmem:[#allocation7 + $0x148] sm:$0xff]  ;;  %v6674_v21 = vld [vmem:[#allocation7 + $0xe0] sm:$0xff] }
 0x62e   :  { %6475 = vst.msk [vmem:[#allocation7 + $0x100] sm:$0xff] %vm6212_vm13, %v6434_v46  ;;  %6957 = vmatprep.mubr.f32.mxu0 %v6687_v23  ;;  %7087 = vmatprep.mubr.f32.mxu1 %v6674_v21  ;;  %v13610_v14 = vpop.f32.mrb[136].mxu1  ;;  %v9374_v46 = vpack.c.bf16 %v6797_v13, %v6796_v6 }
 0x62f   :  { %7088 = vmatmul.mubr.f32.gmra.mrb[148].mxu1 %v6673_v8  ;;  %6958 = vmatmul.mubr.f32.gmra.mrb[182].mxu0 %v6686_v53  ;;  %v13612_v51 = vpop.f32.mrb[137].mxu1 }
 0x630   :  { %v6691_v47 = vld [vmem:[#allocation7 + $0x168] sm:$0xff] }
 0x631   :  { %v6436_v33 = vpop.permute.xlu1 %6435  ;;  %v6679_v34 = vld [vmem:[#allocation7 + $0x108] sm:$0xff] }
 0x632   :  { %6476 = vst.msk [vmem:[#allocation7 + $0x128] sm:$0xff] %vm6212_vm13, %v6436_v33  ;;  %7092 = vmatprep.mubr.f32.mxu1 %v6679_v34 }
 0x635   :  { %v6312_v56 = vpop.permute.xlu0 %6311  ;;  %v6438_v3 = vpop.permute.xlu1 %6437  ;;  %v6678_v25 = vld [vmem:[#allocation7 + $0x100] sm:$0xff] }
 0x636   :  { %6350 = vst.msk [vmem:[#allocation7 + $0x170] sm:$0xff] %vm6212_vm13, %v6312_v56  ;;  %6477 = vst.msk [vmem:[#allocation7 + $0x150] sm:$0xff] %vm6212_vm13, %v6438_v3  ;;  %7093 = vmatmul.mubr.f32.gmra.mrb[150].mxu1 %v6678_v25  ;;  %v6493_v3 = vld [vmem:[#allocation4 + $0xdf] sm:$0xff] }
 0x637   :  { %6509 = vst.msk [vmem:[#allocation7 + $0x130] sm:$0xff] %vm6040_vm10, %v6493_v3 }
 0x639   :  { %v6185_v42 = vpop.permute.xlu0 %6184  ;;  %v6440_v12 = vpop.permute.xlu1 %6439 }
 0x63a   :  { %6223 = vst.msk [vmem:[#allocation7 + $0x190] sm:$0xff] %vm6212_vm13, %v6185_v42  ;;  %6478 = vst.msk [vmem:[#allocation7 + $0x178] sm:$0xff] %vm6212_vm13, %v6440_v12  ;;  %v13703_v12 = vld [vmem:[%s14452_s8] ss:$0 sm:$0xff] }
 0x63d   :  { %v6692_v52 = vld [vmem:[#allocation7 + $0x170] sm:$0xff] }
 0x63e   :  { %6962 = vmatprep.mubr.f32.mxu0 %v6692_v52 }
 0x63f   :  { %6963 = vmatmul.mubr.f32.gmra.mrb[184].mxu0 %v6691_v47 }
 0x641   :  { %v6696_v59 = vld [vmem:[#allocation7 + $0x190] sm:$0xff] }
 0x643   :  { %v8504_v19 = vpop.f32.mrb[158].mxu0 }
 0x644   :  { %v8505_v58 = vpop.f32.mrb[159].mxu0 }
 0x645   :  { %v8506_v57 = vadd.f32 %v8505_v58, %v8504_v19 }
 0x647   :  { %v5876_v5 = vadd.f32 %v13622_v35, %v8506_v57 }
 0x649   :  { %v6021_v49 = vadd.f32 %v13578_v18, %v5876_v5 }
 0x64b   :  { %6053 = vst.msk [vmem:[#allocation4 + $0x170] sm:$0xff] %vm6040_vm10, %v6021_v49 }
 0x652   :  { %v6273_v2 = vld [vmem:[#allocation4 + $0x16f] sm:$0xff] }
 0x653   :  { %v6401_v17 = vld [vmem:[#allocation4 + $0x171] sm:$0xff]  ;;  %6317 = vrot.lane.b32.xlu0 %v6273_v2, %s9605_s27  ;;  %6129 = vst.msk [vmem:[#allocation7 + $0x208] sm:$0xff] %vm6040_vm10, %v6273_v2  ;;  %6513 = vst.msk [vmem:[#allocation7 + $0x1d0] sm:$0xff] %vm6040_vm10, %v6273_v2 }
 0x654   :  { %v13627_v55 = vld [vmem:[#allocation4 + $0x170] sm:$0xff]  ;;  %6445 = vrot.lane.b32.xlu1 %v6401_v17, %s9605_s27  ;;  %6258 = vst.msk [vmem:[#allocation7 + $0x210] sm:$0xff] %vm6040_vm10, %v6401_v17  ;;  %6641 = vst.msk [vmem:[#allocation7 + $0x1d8] sm:$0xff] %vm6040_vm10, %v6401_v17 }
 0x655   :  { %6385 = vst.msk [vmem:[#allocation7 + $0x1f0] sm:$0xff] %vm6040_vm10, %v13627_v55 }
 0x657   :  { %6190 = vrot.lane.b32.xlu0 %v13627_v55, %s9605_s27 }
 0x665   :  { %v6314_v18 = vpop.permute.xlu0 %6313 }
 0x666   :  { %6351 = vst.msk [vmem:[#allocation7 + $0x198] sm:$0xff] %vm6212_vm13, %v6314_v18  ;;  %v6442_v16 = vpop.permute.xlu1 %6441 }
 0x667   :  { %6479 = vst.msk [vmem:[#allocation7 + $0x1a0] sm:$0xff] %vm6212_vm13, %v6442_v16 }
 0x669   :  { %v6187_v15 = vpop.permute.xlu0 %6186 }
 0x66a   :  { %6224 = vst.msk [vmem:[#allocation7 + $0x1b8] sm:$0xff] %vm6212_vm13, %v6187_v15 }
 0x66d   :  { %v6697_v45 = vld [vmem:[#allocation7 + $0x198] sm:$0xff] }
 0x66e   :  { %6967 = vmatprep.mubr.f32.mxu0 %v6697_v45 }
 0x66f   :  { %6968 = vmatmul.mubr.f32.gmra.mrb[186].mxu0 %v6696_v59  ;;  %v6525_v59 = vld [vmem:[#allocation4 + $0xe0] sm:$0xff] }
 0x671   :  { %v6701_v29 = vld [vmem:[#allocation7 + $0x1b8] sm:$0xff] }
 0x673   :  { %v8507_v20 = vpop.f32.mrb[160].mxu0 }
 0x674   :  { %v8508_v28 = vpop.f32.mrb[161].mxu0 }
 0x675   :  { %v8509_v26 = vadd.f32 %v8508_v28, %v8507_v20 }
 0x677   :  { %v5881_v44 = vadd.f32 %v13622_v35, %v8509_v26 }
 0x679   :  { %v6026_v36 = vadd.f32 %v13576_v43, %v5881_v44  ;;  %v6792_v43 = vld [vmem:[%s14451_s7 + $0x210] sm:$0xff] }
 0x67a   :  { %v9366_v54 = vpack.c.bf16 %v6793_v22, %v6792_v43  ;;  %v6621_v22 = vld [vmem:[#allocation4 + $0xe1] sm:$0xff] }
 0x67b   :  { %6054 = vst.msk [vmem:[#allocation4 + $0x188] sm:$0xff] %vm6040_vm10, %v6026_v36  ;;  %6637 = vst.msk [vmem:[#allocation7 + $0x138] sm:$0xff] %vm6040_vm10, %v6621_v22 }
 0x67c   :  { %9367 = vmatprep.subr.bf16.mxu0 %v9366_v54 }
 0x67d   :  { %9369 = vmatpush3.bf16.msra.mxu0 %v9366_v54 }
 0x67e   :  { %9371 = vmatprep.subr.bf16.mxu0 %v9370_v10 }
 0x681   :  { %9373 = vmatpush3.bf16.msra.mxu0 %v9370_v10 }
 0x682   :  { %v6274_v11 = vld [vmem:[#allocation4 + $0x187] sm:$0xff]  ;;  %9375 = vmatprep.subr.bf16.mxu0 %v9374_v46 }
 0x683   :  { %v6402_v40 = vld [vmem:[#allocation4 + $0x189] sm:$0xff]  ;;  %6319 = vrot.lane.b32.xlu0 %v6274_v11, %s9605_s27  ;;  %6130 = vst.msk [vmem:[#allocation7 + $0x230] sm:$0xff] %vm6040_vm10, %v6274_v11  ;;  %6514 = vst.msk [vmem:[#allocation7 + $0x1f8] sm:$0xff] %vm6040_vm10, %v6274_v11 }
 0x684   :  { %v13651_v48 = vld [vmem:[#allocation4 + $0x188] sm:$0xff]  ;;  %6447 = vrot.lane.b32.xlu1 %v6402_v40, %s9605_s27  ;;  %6259 = vst.msk [vmem:[#allocation7 + $0x238] sm:$0xff] %vm6040_vm10, %v6402_v40  ;;  %6642 = vst.msk [vmem:[#allocation7 + $0x200] sm:$0xff] %vm6040_vm10, %v6402_v40 }
 0x685   :  { %6386 = vst.msk [vmem:[#allocation7 + $0x218] sm:$0xff] %vm6040_vm10, %v13651_v48  ;;  %9377 = vmatpush3.bf16.msra.mxu0 %v9374_v46 }
 0x687   :  { %6192 = vrot.lane.b32.xlu0 %v13651_v48, %s9605_s27 }
 0x695   :  { %v6316_v61 = vpop.permute.xlu0 %6315 }
 0x696   :  { %6352 = vst.msk [vmem:[#allocation7 + $0x1c0] sm:$0xff] %vm6212_vm13, %v6316_v61 }
 0x697   :  { %v6444_v37 = vpop.permute.xlu1 %6443 }
 0x698   :  { %6480 = vst.msk [vmem:[#allocation7 + $0x1c8] sm:$0xff] %vm6212_vm13, %v6444_v37 }
 0x699   :  { %v6189_v39 = vpop.permute.xlu0 %6188 }
 0x69a   :  { %6225 = vst.msk [vmem:[#allocation7 + $0x1e0] sm:$0xff] %vm6212_vm13, %v6189_v39 }
 0x69d   :  { %v6702_v0 = vld [vmem:[#allocation7 + $0x1c0] sm:$0xff] }
 0x69e   :  { %6972 = vmatprep.mubr.f32.mxu0 %v6702_v0 }
 0x69f   :  { %6973 = vmatmul.mubr.f32.gmra.mrb[188].mxu0 %v6701_v29  ;;  %v6501_v29 = vld [vmem:[#allocation4 + $0x1cf] sm:$0xff] }
 0x6a0   :  { %6517 = vst.msk [vmem:[#allocation7 + $0x270] sm:$0xff] %vm6040_vm10, %v6501_v29  ;;  %v6655_v29 = vld [vmem:[#allocation7 + $0x48] sm:$0xff] }
 0x6a1   :  { %v6706_v61 = vld [vmem:[#allocation7 + $0x1e0] sm:$0xff] }
 0x6a4   :  { %v8510_v50 = vpop.f32.mrb[162].mxu0 }
 0x6a5   :  { %v8511_v38 = vpop.f32.mrb[163].mxu0 }
 0x6a6   :  { %v8512_v60 = vadd.f32 %v8511_v38, %v8510_v50 }
 0x6a8   :  { %v5886_v62 = vadd.f32 %v13622_v35, %v8512_v60  ;;  %v6533_v60 = vld [vmem:[#allocation4 + $0x1d0] sm:$0xff] }
 0x6aa   :  { %v6031_v31 = vadd.f32 %v13612_v51, %v5886_v62 }
 0x6ac   :  { %6055 = vst.msk [vmem:[#allocation4 + $0x1a0] sm:$0xff] %vm6040_vm10, %v6031_v31 }
 0x6af   :  { %v8513_v53 = vpop.f32.mrb[164].mxu0 }
 0x6b0   :  { %v8514_v23 = vpop.f32.mrb[165].mxu0 }
 0x6b1   :  { %v8515_v21 = vadd.f32 %v8514_v23, %v8513_v53 }
 0x6b3   :  { %v6627_v8 = vld [vmem:[#allocation4 + $0x1a1] sm:$0xff]  ;;  %v5891_v51 = vadd.f32 %v13622_v35, %v8515_v21  ;;  %v8568_v56 = vpop.f32.mrb[166].mxu0 }
 0x6b4   :  { %v6275_v33 = vld [vmem:[#allocation4 + $0x19f] sm:$0xff]  ;;  %6643 = vst.msk [vmem:[#allocation7 + $0x228] sm:$0xff] %vm6040_vm10, %v6627_v8  ;;  %6449 = vrot.lane.b32.xlu1 %v6627_v8, %s9605_s27  ;;  %6260 = vst.msk [vmem:[#allocation7 + $0x260] sm:$0xff] %vm6040_vm10, %v6627_v8  ;;  %v8569_v25 = vpop.f32.mrb[167].mxu0 }
 0x6b5   :  { %v13687_v34 = vld [vmem:[#allocation4 + $0x1a0] sm:$0xff]  ;;  %6321 = vrot.lane.b32.xlu0 %v6275_v33, %s9605_s27  ;;  %6131 = vst.msk [vmem:[#allocation7 + $0x258] sm:$0xff] %vm6040_vm10, %v6275_v33  ;;  %6515 = vst.msk [vmem:[#allocation7 + $0x220] sm:$0xff] %vm6040_vm10, %v6275_v33  ;;  %v6036_v42 = vadd.f32 %v13610_v14, %v5891_v51  ;;  %v8570_v52 = vadd.f32 %v8569_v25, %v8568_v56 }
 0x6b6   :  { %6387 = vst.msk [vmem:[#allocation7 + $0x240] sm:$0xff] %vm6040_vm10, %v13687_v34 }
 0x6b7   :  { %6056 = vst.msk [vmem:[#allocation4 + $0x1b8] sm:$0xff] %vm6040_vm10, %v6036_v42  ;;  %v8571_v47 = vpop.f32.mrb[168].mxu0  ;;  %v6920_v19 = vadd.f32 %v8570_v52, %v13703_v12  ;;  %v8648_v58 = vpop.f32.mrb[138].mxu1 }
 0x6b8   :  { %v8572_v57 = vpop.f32.mrb[169].mxu0  ;;  %v8649_v5 = vpop.f32.mrb[139].mxu1 }
 0x6b9   :  { %6194 = vrot.lane.b32.xlu0 %v13687_v34, %s9605_s27  ;;  %v8573_v35 = vadd.f32 %v8572_v57, %v8571_v47  ;;  %v8650_v49 = vadd.f32 %v8649_v5, %v8648_v58 }
 0x6bb   :  { %v8574_v14 = vpop.f32.mrb[170].mxu0  ;;  %v13709_v17 = vadd.f32 %v8650_v49, %v6920_v19  ;;  %v6925_v44 = vadd.f32 %v8573_v35, %v13703_v12 }
 0x6bc   :  { %v8575_v2 = vpop.f32.mrb[171].mxu0 }
 0x6bd   :  { %v8576_v18 = vadd.f32 %v8575_v2, %v8574_v14 }
 0x6be   :  { %v6276_v16 = vld [vmem:[#allocation4 + $0x1b7] sm:$0xff] }
 0x6bf   :  { %v6404_v15 = vld [vmem:[#allocation4 + $0x1b9] sm:$0xff]  ;;  %6323 = vrot.lane.b32.xlu0 %v6276_v16, %s9605_s27  ;;  %6516 = vst.msk [vmem:[#allocation7 + $0x248] sm:$0xff] %vm6040_vm10, %v6276_v16  ;;  %v6930_v4 = vadd.f32 %v8576_v18, %v13703_v12 }
 0x6c0   :  { %v6532_v45 = vld [vmem:[#allocation4 + $0x1b8] sm:$0xff]  ;;  %6451 = vrot.lane.b32.xlu1 %v6404_v15, %s9605_s27  ;;  %6644 = vst.msk [vmem:[#allocation7 + $0x250] sm:$0xff] %vm6040_vm10, %v6404_v15 }
 0x6c1   :  { %6388 = vst.msk [vmem:[#allocation7 + $0x268] sm:$0xff] %vm6040_vm10, %v6532_v45 }
 0x6c3   :  { %6564 = vrot.lane.b32.xlu0 %v6525_v59, %s9605_s27  ;;  %v8651_v20 = vpop.f32.mrb[140].mxu1 }
 0x6c4   :  { %v8652_v28 = vpop.f32.mrb[141].mxu1 }
 0x6c5   :  { %v6318_v26 = vpop.permute.xlu0 %6317  ;;  %v8653_v36 = vadd.f32 %v8652_v28, %v8651_v20 }
 0x6c6   :  { %6353 = vst.msk [vmem:[#allocation7 + $0x1e8] sm:$0xff] %vm6212_vm13, %v6318_v26  ;;  %v6446_v1 = vpop.permute.xlu1 %6445  ;;  %v8577_v32 = vpop.f32.mrb[172].mxu0 }
 0x6c7   :  { %6481 = vst.msk [vmem:[#allocation7 + $0x1f0] sm:$0xff] %vm6212_vm13, %v6446_v1  ;;  %6566 = vrot.lane.b32.xlu0 %v13524_v27, %s9605_s27  ;;  %v8578_v24 = vpop.f32.mrb[173].mxu0  ;;  %v13722_v11 = vadd.f32 %v8653_v36, %v6925_v44 }
 0x6c8   :  { %v8579_v40 = vadd.f32 %v8578_v24, %v8577_v32 }
 0x6c9   :  { %v6191_v43 = vpop.permute.xlu0 %6190 }
 0x6ca   :  { %6226 = vst.msk [vmem:[#allocation7 + $0x208] sm:$0xff] %vm6212_vm13, %v6191_v43 }
 0x6cb   :  { %6568 = vrot.lane.b32.xlu0 %v13562_v7, %s9605_s27 }
 0x6cd   :  { %v6707_v54 = vld [vmem:[#allocation7 + $0x1e8] sm:$0xff] }
 0x6ce   :  { %6977 = vmatprep.mubr.f32.mxu0 %v6707_v54 }
 0x6cf   :  { %6570 = vrot.lane.b32.xlu0 %v13594_v63, %s9605_s27  ;;  %6978 = vmatmul.mubr.f32.gmra.mrb[190].mxu0 %v6706_v61  ;;  %v6629_v63 = vld [vmem:[#allocation4 + $0x1d1] sm:$0xff] }
 0x6d0   :  { %6645 = vst.msk [vmem:[#allocation7 + $0x278] sm:$0xff] %vm6040_vm10, %v6629_v63  ;;  %v6660_v63 = vld [vmem:[#allocation7 + $0x70] sm:$0xff] }
 0x6d1   :  { %v8654_v27 = vpop.f32.mrb[142].mxu1  ;;  %v6711_v58 = vld [vmem:[#allocation7 + $0x208] sm:$0xff] }
 0x6d2   :  { %v8655_v37 = vpop.f32.mrb[143].mxu1  ;;  %v8580_v10 = vpop.f32.mrb[174].mxu0 }
 0x6d3   :  { %v8656_v9 = vadd.f32 %v8655_v37, %v8654_v27  ;;  %6572 = vrot.lane.b32.xlu0 %v13627_v55, %s9605_s27  ;;  %v8581_v39 = vpop.f32.mrb[175].mxu0 }
 0x6d4   :  { %v8582_v0 = vadd.f32 %v8581_v39, %v8580_v10 }
 0x6d5   :  { %v13733_v7 = vadd.f32 %v8656_v9, %v6930_v4  ;;  %v6650_v9 = vld [vmem:[#allocation7 + $0x20] sm:$0xff] }
 0x6d6   :  { %v6940_v42 = vadd.f32 %v8582_v0, %v13703_v12  ;;  %v6683_v0 = vld [vmem:[#allocation7 + $0x128] sm:$0xff] }
 0x6d7   :  { %6574 = vrot.lane.b32.xlu0 %v13651_v48, %s9605_s27  ;;  %v6935_v48 = vadd.f32 %v8579_v40, %v13703_v12 }
 0x6db   :  { %6576 = vrot.lane.b32.xlu0 %v13687_v34, %s9605_s27 }
 0x6dd   :  { %v8583_v50 = vpop.f32.mrb[176].mxu0 }
 0x6de   :  { %v8584_v55 = vpop.f32.mrb[177].mxu0 }
 0x6df   :  { %6578 = vrot.lane.b32.xlu0 %v6532_v45, %s9605_s27  ;;  %v8585_v38 = vadd.f32 %v8584_v55, %v8583_v50 }
 0x6e1   :  { %v6945_v14 = vadd.f32 %v8585_v38, %v13703_v12 }
 0x6e3   :  { %6580 = vrot.lane.b32.xlu0 %v6533_v60, %s9605_s27  ;;  %v6688_v60 = vld [vmem:[#allocation7 + $0x150] sm:$0xff] }
 0x6e9   :  { %v8586_v62 = vpop.f32.mrb[178].mxu0 }
 0x6ea   :  { %v8587_v31 = vpop.f32.mrb[179].mxu0 }
 0x6eb   :  { %v8588_v6 = vadd.f32 %v8587_v31, %v8586_v62  ;;  %v6665_v62 = vld [vmem:[#allocation7 + $0x98] sm:$0xff] }
 0x6ed   :  { %v6950_v59 = vadd.f32 %v8588_v6, %v13703_v12  ;;  %v6670_v6 = vld [vmem:[#allocation7 + $0xc0] sm:$0xff] }
 0x6f1   :  { %v8657_v13 = vpop.f32.mrb[144].mxu1 }
 0x6f2   :  { %v8658_v53 = vpop.f32.mrb[145].mxu1 }
 0x6f3   :  { %v8659_v46 = vadd.f32 %v8658_v53, %v8657_v13 }
 0x6f5   :  { %v6320_v23 = vpop.permute.xlu0 %6319  ;;  %v13744_v8 = vadd.f32 %v8659_v46, %v6935_v48  ;;  %v6693_v46 = vld [vmem:[#allocation7 + $0x178] sm:$0xff] }
 0x6f6   :  { %v6448_v21 = vpop.permute.xlu1 %6447  ;;  %6354 = vst.msk [vmem:[#allocation7 + $0x210] sm:$0xff] %vm6212_vm13, %v6320_v23  ;;  %v6675_v23 = vld [vmem:[#allocation7 + $0xe8] sm:$0xff] }
 0x6f7   :  { %6482 = vst.msk [vmem:[#allocation7 + $0x218] sm:$0xff] %vm6212_vm13, %v6448_v21  ;;  %v6680_v21 = vld [vmem:[#allocation7 + $0x110] sm:$0xff] }
 0x6f8   :  { %v8589_v33 = vpop.f32.mrb[180].mxu0 }
 0x6f9   :  { %v8590_v34 = vpop.f32.mrb[181].mxu0  ;;  %v6193_v56 = vpop.permute.xlu0 %6192 }
 0x6fa   :  { %v13748_v51 = vadd.f32 %v8590_v34, %v8589_v33  ;;  %v8660_v3 = vpop.f32.mrb[146].mxu1  ;;  %6227 = vst.msk [vmem:[#allocation7 + $0x230] sm:$0xff] %vm6212_vm13, %v6193_v56  ;;  %v6685_v33 = vld [vmem:[#allocation7 + $0x138] sm:$0xff] }
 0x6fb   :  { %v8661_v25 = vpop.f32.mrb[147].mxu1 }
 0x6fc   :  { %v8662_v52 = vadd.f32 %v8661_v25, %v8660_v3  ;;  %v6698_v3 = vld [vmem:[#allocation7 + $0x1a0] sm:$0xff] }
 0x6fd   :  { %v6712_v47 = vld [vmem:[#allocation7 + $0x210] sm:$0xff]  ;;  %v6690_v25 = vld [vmem:[#allocation7 + $0x160] sm:$0xff] }
 0x6fe   :  { %v13752_v19 = vadd.f32 %v8662_v52, %v6940_v42  ;;  %6982 = vmatprep.mubr.f32.mxu0 %v6712_v47  ;;  %v6703_v47 = vld [vmem:[#allocation7 + $0x1c8] sm:$0xff] }
 0x6ff   :  { %6983 = vmatmul.mubr.f32.gmra.mrb[192].mxu0 %v6711_v58  ;;  %v6695_v58 = vld [vmem:[#allocation7 + $0x188] sm:$0xff] }
 0x701   :  { %v6716_v43 = vld [vmem:[#allocation7 + $0x230] sm:$0xff] }
 0x702   :  { %v8663_v57 = vpop.f32.mrb[148].mxu1  ;;  %v8592_v35 = vpop.f32.mrb[182].mxu0 }
 0x703   :  { %v8664_v5 = vpop.f32.mrb[149].mxu1  ;;  %v8593_v49 = vpop.f32.mrb[183].mxu0 }
 0x704   :  { %v8665_v2 = vadd.f32 %v8664_v5, %v8663_v57  ;;  %v13755_v18 = vadd.f32 %v8593_v49, %v8592_v35  ;;  %v6700_v57 = vld [vmem:[#allocation7 + $0x1b0] sm:$0xff] }
 0x705   :  { %v6708_v49 = vld [vmem:[#allocation7 + $0x1f0] sm:$0xff] }
 0x706   :  { %v13757_v16 = vadd.f32 %v8665_v2, %v6945_v14  ;;  %v6705_v14 = vld [vmem:[#allocation7 + $0x1d8] sm:$0xff]  ;;  %v6710_v2 = vld [vmem:[#allocation7 + $0x200] sm:$0xff] }
 0x709   :  { %v8666_v15 = vpop.f32.mrb[150].mxu1 }
 0x70a   :  { %v8667_v45 = vpop.f32.mrb[151].mxu1 }
 0x70b   :  { %v8668_v20 = vadd.f32 %v8667_v45, %v8666_v15 }
 0x70d   :  { %v13760_v28 = vadd.f32 %v8668_v20, %v6950_v59  ;;  %v6713_v59 = vld [vmem:[#allocation7 + $0x218] sm:$0xff]  ;;  %v6715_v20 = vld [vmem:[#allocation7 + $0x228] sm:$0xff] }
 0x712   :  { %v8595_v26 = vpop.f32.mrb[184].mxu0 }
 0x713   :  { %v8596_v44 = vpop.f32.mrb[185].mxu0 }
 0x714   :  { %v13762_v36 = vadd.f32 %v8596_v44, %v8595_v26  ;;  %v6720_v26 = vld [vmem:[#allocation7 + $0x250] sm:$0xff]  ;;  %v6725_v44 = vld [vmem:[#allocation7 + $0x278] sm:$0xff] }
 0x726   :  { %v6450_v32 = vpop.permute.xlu1 %6449 }
 0x727   :  { %v6322_v1 = vpop.permute.xlu0 %6321  ;;  %6483 = vst.msk [vmem:[#allocation7 + $0x240] sm:$0xff] %vm6212_vm13, %v6450_v32 }
 0x728   :  { %6355 = vst.msk [vmem:[#allocation7 + $0x238] sm:$0xff] %vm6212_vm13, %v6322_v1 }
 0x72b   :  { %v6195_v24 = vpop.permute.xlu0 %6194 }
 0x72c   :  { %6228 = vst.msk [vmem:[#allocation7 + $0x258] sm:$0xff] %vm6212_vm13, %v6195_v24 }
 0x72e   :  { %v6718_v32 = vld [vmem:[#allocation7 + $0x240] sm:$0xff] }
 0x72f   :  { %v6717_v40 = vld [vmem:[#allocation7 + $0x238] sm:$0xff] }
 0x730   :  { %6987 = vmatprep.mubr.f32.mxu0 %v6717_v40 }
 0x731   :  { %6988 = vmatmul.mubr.f32.gmra.mrb[194].mxu0 %v6716_v43  ;;  %v6324_v22 = vpop.permute.xlu0 %6323 }
 0x732   :  { %v6452_v54 = vpop.permute.xlu1 %6451  ;;  %6356 = vst.msk [vmem:[#allocation7 + $0x260] sm:$0xff] %vm6212_vm13, %v6324_v22 }
 0x733   :  { %6484 = vst.msk [vmem:[#allocation7 + $0x268] sm:$0xff] %vm6212_vm13, %v6452_v54  ;;  %v6721_v4 = vld [vmem:[#allocation7 + $0x258] sm:$0xff] }
 0x735   :  { %v6565_v61 = vpop.permute.xlu0 %6564 }
 0x736   :  { %6605 = vst.msk [vmem:[#allocation7 + $0x130] sm:$0xff] %vm6212_vm13, %v6565_v61 }
 0x739   :  { %v6567_v27 = vpop.permute.xlu0 %6566  ;;  %v6722_v37 = vld [vmem:[#allocation7 + $0x260] sm:$0xff] }
 0x73a   :  { %6606 = vst.msk [vmem:[#allocation7 + $0x158] sm:$0xff] %vm6212_vm13, %v6567_v27  ;;  %6992 = vmatprep.mubr.f32.mxu0 %v6722_v37  ;;  %v6723_v40 = vld [vmem:[#allocation7 + $0x268] sm:$0xff] }
 0x73b   :  { %6993 = vmatmul.mubr.f32.gmra.mrb[196].mxu0 %v6721_v4 }
 0x73c   :  { %9133 = vmatprep.mubr.msk.f32.mxu0 %vm6040_vm10, %v6650_v9  ;;  %v7580_v9 = vld [vmem:[%s14453_s9 + $0x80] sm:$0xff] }
 0x73d   :  { %v6569_v10 = vpop.permute.xlu0 %6568  ;;  %v6684_v39 = vld [vmem:[#allocation7 + $0x130] sm:$0xff] }
 0x73e   :  { %6607 = vst.msk [vmem:[#allocation7 + $0x180] sm:$0xff] %vm6212_vm13, %v6569_v10  ;;  %7097 = vmatprep.mubr.f32.mxu1 %v6684_v39  ;;  %v7581_v10 = vld [vmem:[%s14453_s9 + $0x88] sm:$0xff]  ;;  %v7564_v39 = vld [vmem:[%s14453_s9] sm:$0xff] }
 0x73f   :  { %7098 = vmatmul.mubr.f32.gmra.mrb[152].mxu1 %v6683_v0  ;;  %9134 = vmatmul.mubr.msk.f32.vlgmr.msra.gmra.mrb[198].mxu0 %vm6040_vm10, %v6655_v29  ;;  %v9378_v29 = vpack.c.bf16 %v7581_v10, %v7580_v9  ;;  %v7590_v9 = vld [vmem:[%s14453_s9 + $0xd0] sm:$0xff]  ;;  %v7591_v10 = vld [vmem:[%s14453_s9 + $0xd8] sm:$0xff] }
 0x740   :  { %9136 = vmatprep.mubr.msk.f32.mxu0 %vm6040_vm10, %v6660_v63  ;;  %v7565_v63 = vld [vmem:[%s14453_s9 + $0x8] sm:$0xff] }
 0x741   :  { %v6571_v50 = vpop.permute.xlu0 %6570  ;;  %v6689_v55 = vld [vmem:[#allocation7 + $0x158] sm:$0xff]  ;;  %9379 = vmatprep.subr.bf16.mxu1 %v9378_v29  ;;  %v9398_v29 = vpack.c.bf16 %v7591_v10, %v7590_v9 }
 0x742   :  { %6608 = vst.msk [vmem:[#allocation7 + $0x1a8] sm:$0xff] %vm6212_vm13, %v6571_v50  ;;  %v8598_v38 = vpop.f32.mrb[186].mxu0  ;;  %7102 = vmatprep.mubr.f32.mxu1 %v6689_v55  ;;  %v7582_v50 = vld [vmem:[%s14453_s9 + $0x90] sm:$0xff]  ;;  %v7583_v55 = vld [vmem:[%s14453_s9 + $0x98] sm:$0xff] }
 0x743   :  { %v8599_v31 = vpop.f32.mrb[187].mxu0  ;;  %7103 = vmatmul.mubr.f32.gmra.mrb[154].mxu1 %v6688_v60  ;;  %9137 = vmatmul.mubr.msk.f32.gmra.mrb[200].mxu0 %vm6040_vm10, %v6665_v62  ;;  %v9380_v60 = vpack.c.bf16 %v7565_v63, %v7564_v39  ;;  %v9382_v62 = vpack.c.bf16 %v7583_v55, %v7582_v50  ;;  %v7574_v63 = vld [vmem:[%s14453_s9 + $0x50] sm:$0xff]  ;;  %v7575_v50 = vld [vmem:[%s14453_s9 + $0x58] sm:$0xff] }
 0x744   :  { %v13777_v13 = vadd.f32 %v8599_v31, %v8598_v38  ;;  %9139 = vmatprep.mubr.msk.f32.mxu0 %vm6040_vm10, %v6670_v6  ;;  %v7566_v31 = vld [vmem:[%s14453_s9 + $0x10] sm:$0xff]  ;;  %v7567_v6 = vld [vmem:[%s14453_s9 + $0x18] sm:$0xff]  ;;  %v9400_v55 = vpack.c.bf16 %v7575_v50, %v7574_v63 }
 0x745   :  { %v6573_v53 = vpop.permute.xlu0 %6572  ;;  %v6694_v48 = vld [vmem:[#allocation7 + $0x180] sm:$0xff]  ;;  %9381 = vmatpush3.bf16.msra.mxu1 %v9380_v60 }
 0x746   :  { %6609 = vst.msk [vmem:[#allocation7 + $0x1d0] sm:$0xff] %vm6212_vm13, %v6573_v53  ;;  %7107 = vmatprep.mubr.f32.mxu1 %v6694_v48  ;;  %v7584_v53 = vld [vmem:[%s14453_s9 + $0xa0] sm:$0xff]  ;;  %v7585_v48 = vld [vmem:[%s14453_s9 + $0xa8] sm:$0xff]  ;;  %9383 = vmatprep.subr.bf16.mxu1 %v9382_v62 }
 0x747   :  { %7108 = vmatmul.mubr.f32.gmra.mrb[156].mxu1 %v6693_v46  ;;  %9140 = vmatmul.mubr.msk.f32.gmra.mrb[202].mxu0 %vm6040_vm10, %v6675_v23  ;;  %v9384_v46 = vpack.c.bf16 %v7567_v6, %v7566_v31  ;;  %v9386_v23 = vpack.c.bf16 %v7585_v48, %v7584_v53 }
 0x748   :  { %9142 = vmatprep.mubr.msk.f32.mxu0 %vm6040_vm10, %v6680_v21  ;;  %v7568_v21 = vld [vmem:[%s14453_s9 + $0x20] sm:$0xff] }
 0x749   :  { %v6575_v34 = vpop.permute.xlu0 %6574  ;;  %v6699_v56 = vld [vmem:[#allocation7 + $0x1a8] sm:$0xff]  ;;  %9385 = vmatpush3.bf16.msra.mxu1 %v9384_v46 }
 0x74a   :  { %6610 = vst.msk [vmem:[#allocation7 + $0x1f8] sm:$0xff] %vm6212_vm13, %v6575_v34  ;;  %7112 = vmatprep.mubr.f32.mxu1 %v6699_v56  ;;  %v7586_v34 = vld [vmem:[%s14453_s9 + $0xb0] sm:$0xff]  ;;  %v7587_v56 = vld [vmem:[%s14453_s9 + $0xb8] sm:$0xff]  ;;  %9387 = vmatprep.subr.bf16.mxu1 %v9386_v23 }
 0x74b   :  { %7113 = vmatmul.mubr.f32.gmra.mrb[158].mxu1 %v6698_v3  ;;  %9143 = vmatmul.mubr.msk.f32.gmra.mrb[204].mxu0 %vm6040_vm10, %v6685_v33  ;;  %v7569_v33 = vld [vmem:[%s14453_s9 + $0x28] sm:$0xff]  ;;  %v7612_v3 = vld [vmem:[%s14453_s9 + $0x180] sm:$0xff] }
 0x74c   :  { %9145 = vmatprep.mubr.msk.f32.mxu0 %vm6040_vm10, %v6690_v25  ;;  %v7613_v25 = vld [vmem:[%s14453_s9 + $0x188] sm:$0xff] }
 0x74d   :  { %v6577_v42 = vpop.permute.xlu0 %6576  ;;  %v6704_v52 = vld [vmem:[#allocation7 + $0x1d0] sm:$0xff] }
 0x74e   :  { %6611 = vst.msk [vmem:[#allocation7 + $0x220] sm:$0xff] %vm6212_vm13, %v6577_v42  ;;  %7117 = vmatprep.mubr.f32.mxu1 %v6704_v52  ;;  %v7596_v42 = vld [vmem:[%s14453_s9 + $0x100] sm:$0xff]  ;;  %v7597_v52 = vld [vmem:[%s14453_s9 + $0x108] sm:$0xff] }
 0x74f   :  { %7118 = vmatmul.mubr.f32.gmra.mrb[160].mxu1 %v6703_v47  ;;  %9146 = vmatmul.mubr.msk.f32.gmra.mrb[206].mxu0 %vm6040_vm10, %v6695_v58  ;;  %v9388_v47 = vpack.c.bf16 %v7569_v33, %v7568_v21  ;;  %v9410_v58 = vpack.c.bf16 %v7613_v25, %v7612_v3 }
 0x750   :  { %9148 = vmatprep.mubr.msk.f32.mxu0 %vm6040_vm10, %v6700_v57  ;;  %v9412_v57 = vpack.c.bf16 %v7597_v52, %v7596_v42 }
 0x751   :  { %v6579_v35 = vpop.permute.xlu0 %6578  ;;  %v6709_v5 = vld [vmem:[#allocation7 + $0x1f8] sm:$0xff]  ;;  %9411 = vmatprep.subr.bf16.mxu0 %v9410_v58  ;;  %9389 = vmatpush3.bf16.msra.mxu1 %v9388_v47 }
 0x752   :  { %6612 = vst.msk [vmem:[#allocation7 + $0x248] sm:$0xff] %vm6212_vm13, %v6579_v35  ;;  %7122 = vmatprep.mubr.f32.mxu1 %v6709_v5  ;;  %v7614_v35 = vld [vmem:[%s14453_s9 + $0x190] sm:$0xff]  ;;  %v7615_v5 = vld [vmem:[%s14453_s9 + $0x198] sm:$0xff]  ;;  %9413 = vmatpush3.bf16.msra.mxu0 %v9412_v57 }
 0x753   :  { %7123 = vmatmul.mubr.f32.gmra.mrb[162].mxu1 %v6708_v49  ;;  %9149 = vmatmul.mubr.msk.f32.gmra.mrb[208].mxu0 %vm6040_vm10, %v6705_v14  ;;  %v7598_v49 = vld [vmem:[%s14453_s9 + $0x110] sm:$0xff]  ;;  %v9390_v14 = vpack.c.bf16 %v7587_v56, %v7586_v34  ;;  %v6955_v56 = vadd.f32 %v13748_v51, %v13703_v12 }
 0x754   :  { %9151 = vmatprep.mubr.msk.f32.mxu0 %vm6040_vm10, %v6710_v2  ;;  %v7570_v2 = vld [vmem:[%s14453_s9 + $0x30] sm:$0xff] }
 0x755   :  { %v6581_v15 = vpop.permute.xlu0 %6580  ;;  %v6714_v45 = vld [vmem:[#allocation7 + $0x220] sm:$0xff]  ;;  %9391 = vmatprep.subr.bf16.mxu1 %v9390_v14 }
 0x756   :  { %6613 = vst.msk [vmem:[#allocation7 + $0x270] sm:$0xff] %vm6212_vm13, %v6581_v15  ;;  %7127 = vmatprep.mubr.f32.mxu1 %v6714_v45  ;;  %v7571_v15 = vld [vmem:[%s14453_s9 + $0x38] sm:$0xff]  ;;  %v9414_v45 = vpack.c.bf16 %v7615_v5, %v7614_v35 }
 0x757   :  { %7128 = vmatmul.mubr.f32.gmra.mrb[164].mxu1 %v6713_v59  ;;  %9152 = vmatmul.mubr.msk.f32.gmra.mrb[210].mxu0 %vm6040_vm10, %v6715_v20  ;;  %v7599_v59 = vld [vmem:[%s14453_s9 + $0x118] sm:$0xff]  ;;  %v7588_v20 = vld [vmem:[%s14453_s9 + $0xc0] sm:$0xff] }
 0x758   :  { %9154 = vmatprep.mubr.msk.f32.mxu0 %vm6040_vm10, %v6720_v26  ;;  %v7589_v26 = vld [vmem:[%s14453_s9 + $0xc8] sm:$0xff]  ;;  %9415 = vmatprep.subr.bf16.mxu0 %v9414_v45 }
 0x759   :  { %v6719_v1 = vld [vmem:[#allocation7 + $0x248] sm:$0xff] }
 0x75a   :  { %7132 = vmatprep.mubr.f32.mxu1 %v6719_v1  ;;  %v9416_v1 = vpack.c.bf16 %v7599_v59, %v7598_v49  ;;  %v6960_v49 = vadd.f32 %v13755_v18, %v13703_v12 }
 0x75b   :  { %7133 = vmatmul.mubr.f32.gmra.mrb[166].mxu1 %v6718_v32  ;;  %9155 = vmatmul.mubr.msk.f32.gmra.mrb[212].mxu0 %vm6040_vm10, %v6725_v44  ;;  %v7616_v44 = vld [vmem:[%s14453_s9 + $0x1a0] sm:$0xff]  ;;  %v7617_v32 = vld [vmem:[%s14453_s9 + $0x1a8] sm:$0xff] }
 0x75c   :  { %9417 = vmatpush3.bf16.msra.mxu0 %v9416_v1 }
 0x75d   :  { %v6724_v24 = vld [vmem:[#allocation7 + $0x270] sm:$0xff] }
 0x75e   :  { %7137 = vmatprep.mubr.f32.mxu1 %v6724_v24  ;;  %v9392_v24 = vpack.c.bf16 %v7571_v15, %v7570_v2 }
 0x75f   :  { %7138 = vmatmul.mubr.f32.gmra.mrb[168].mxu1 %v6723_v40  ;;  %v9418_v40 = vpack.c.bf16 %v7617_v32, %v7616_v44 }
 0x760   :  { %9393 = vmatpush3.bf16.msra.mxu1 %v9392_v24 }
 0x761   :  { %9419 = vmatprep.subr.bf16.mxu0 %v9418_v40 }
 0x772   :  { %v8601_v43 = vpop.f32.mrb[188].mxu0 }
 0x773   :  { %v8602_v22 = vpop.f32.mrb[189].mxu0 }
 0x774   :  { %v13796_v54 = vadd.f32 %v8602_v22, %v8601_v43  ;;  %v7600_v43 = vld [vmem:[%s14453_s9 + $0x120] sm:$0xff]  ;;  %v7601_v22 = vld [vmem:[%s14453_s9 + $0x128] sm:$0xff] }
 0x775   :  { %v9420_v39 = vpack.c.bf16 %v7601_v22, %v7600_v43 }
 0x777   :  { %9421 = vmatpush3.bf16.msra.mxu0 %v9420_v39 }
 0x7a2   :  { %v8604_v61 = vpop.f32.mrb[190].mxu0 }
 0x7a3   :  { %v8605_v27 = vpop.f32.mrb[191].mxu0 }
 0x7a4   :  { %v13798_v37 = vadd.f32 %v8605_v27, %v8604_v61  ;;  %v9394_v61 = vpack.c.bf16 %v7589_v26, %v7588_v20  ;;  %v7572_v27 = vld [vmem:[%s14453_s9 + $0x40] sm:$0xff] }
 0x7a6   :  { %9395 = vmatprep.subr.bf16.mxu1 %v9394_v61  ;;  %v9608_v61 = vmov 1983009808  }
 0x7d2   :  { %v8607_v4 = vpop.f32.mrb[192].mxu0 }
 0x7d3   :  { %v8608_v0 = vpop.f32.mrb[193].mxu0 }
 0x7d4   :  { %v13818_v38 = vadd.f32 %v8608_v0, %v8607_v4  ;;  %v7573_v4 = vld [vmem:[%s14453_s9 + $0x48] sm:$0xff] }
 0x7d5   :  { %v9396_v0 = vpack.c.bf16 %v7573_v4, %v7572_v27  ;;  %v7326_v27 = vunpack.c.l.s4 %v9608_v61  ;;  %v7328_v4 = vlaneseq }
 0x7d7   :  { %9397 = vmatpush3.bf16.msra.mxu1 %v9396_v0 }
 0x7d8   :  { %9399 = vmatprep.subr.bf16.mxu1 %v9398_v29 }
 0x7db   :  { %9401 = vmatpush3.bf16.msra.mxu1 %v9400_v55 }
 0x804   :  { %v8610_v60 = vpop.f32.mrb[194].mxu0 }
 0x805   :  { %v8611_v62 = vpop.f32.mrb[195].mxu0 }
 0x806   :  { %v13910_v31 = vadd.f32 %v8611_v62, %v8610_v60 }
 0x80e   :  { %v8613_v6 = vpop.f32.mrb[196].mxu0 }
 0x80f   :  { %v8614_v53 = vpop.f32.mrb[197].mxu0 }
 0x810   :  { %v13912_v48 = vadd.f32 %v8614_v53, %v8613_v6  ;;  %v7327_v6 = vunpack.c.0.s8 %v7326_v27  ;;  %v7329_v53 = vshrl.u32 %v7328_v4, 7  ;;  %v7593_v27 = vld [vmem:[%s14453_s9 + $0xe8] sm:$0xff]  ;;  %v7576_v4 = vld [vmem:[%s14453_s9 + $0x60] sm:$0xff] }
 0x812   :  { %v8669_v46 = vpop.f32.mrb[152].mxu1  ;;  %v9135_v23 = vpop.f32.mrb[198].mxu0 }
 0x813   :  { %v7215_v21 = vadd.f32 %v9135_v23, %v13722_v11  ;;  %v8670_v33 = vpop.f32.mrb[153].mxu1  ;;  %v7209_v34 = vpop.f32.mrb[199].mxu0 }
 0x814   :  { %v8671_v3 = vadd.f32 %v8670_v33, %v8669_v46  ;;  %v7210_v25 = vadd.f32 %v7209_v34, %v13709_v17 }
 0x816   :  { %v7288_v42 = vmax.f32 %v7210_v25, %v7215_v21  ;;  %v8672_v52 = vpop.f32.mrb[154].mxu1  ;;  %v9138_v47 = vpop.f32.mrb[200].mxu0  ;;  %v7100_v58 = vadd.f32 %v8671_v3, %v6955_v56  ;;  %v6980_v3 = vadd.f32 %v13798_v37, %v13703_v12 }
 0x817   :  { %v7225_v57 = vadd.f32 %v9138_v47, %v13744_v8  ;;  %v8673_v35 = vpop.f32.mrb[155].mxu1  ;;  %v7219_v5 = vpop.f32.mrb[201].mxu0  ;;  %v6965_v8 = vadd.f32 %v13762_v36, %v13703_v12 }
 0x818   :  { %7296 = vst.msk [vmem:[#allocation9] sm:$0xff] %vm6040_vm10, %v7288_v42  ;;  %v8674_v11 = vadd.f32 %v8673_v35, %v8672_v52  ;;  %v7220_v14 = vadd.f32 %v7219_v5, %v13733_v7  ;;  %v13938_v52 = vsub.s32 %v7327_v6, %v7329_v53 }
 0x81a   :  { %v7289_v51 = vmax.f32 %v7220_v14, %v7225_v57  ;;  %v8675_v2 = vpop.f32.mrb[156].mxu1  ;;  %v9141_v15 = vpop.f32.mrb[202].mxu0  ;;  %v7105_v17 = vadd.f32 %v8674_v11, %v6960_v49  ;;  %v6985_v14 = vadd.f32 %v13818_v38, %v13703_v12 }
 0x81b   :  { %v7235_v45 = vadd.f32 %v9141_v15, %v13757_v16  ;;  %v8676_v59 = vpop.f32.mrb[157].mxu1  ;;  %v7229_v20 = vpop.f32.mrb[203].mxu0  ;;  %v6970_v16 = vadd.f32 %v13777_v13, %v13703_v12  ;;  %v6975_v13 = vadd.f32 %v13796_v54, %v13703_v12 }
 0x81c   :  { %7297 = vst.msk [vmem:[#allocation9 + $0x8] sm:$0xff] %vm6040_vm10, %v7289_v51  ;;  %v8677_v26 = vadd.f32 %v8676_v59, %v8675_v2  ;;  %v7230_v18 = vadd.f32 %v7229_v20, %v13752_v19 }
 0x81e   :  { %v7290_v44 = vmax.f32 %v7230_v18, %v7235_v45  ;;  %v8678_v1 = vpop.f32.mrb[158].mxu1  ;;  %v9144_v32 = vpop.f32.mrb[204].mxu0  ;;  %v7110_v7 = vadd.f32 %v8677_v26, %v6965_v8 }
 0x81f   :  { %v7245_v24 = vadd.f32 %v9144_v32, %v7100_v58  ;;  %v8679_v40 = vpop.f32.mrb[159].mxu1  ;;  %v7239_v43 = vpop.f32.mrb[205].mxu0  ;;  %v7602_v32 = vld [vmem:[%s14453_s9 + $0x130] sm:$0xff] }
 0x820   :  { %7298 = vst.msk [vmem:[#allocation9 + $0x10] sm:$0xff] %vm6040_vm10, %v7290_v44  ;;  %v8680_v22 = vadd.f32 %v8679_v40, %v8678_v1  ;;  %v7240_v36 = vadd.f32 %v7239_v43, %v13760_v28  ;;  %v7618_v44 = vld [vmem:[%s14453_s9 + $0x1b0] sm:$0xff]  ;;  %v7619_v1 = vld [vmem:[%s14453_s9 + $0x1b8] sm:$0xff] }
 0x821   :  { %v9422_v43 = vpack.c.bf16 %v7619_v1, %v7618_v44 }
 0x822   :  { %v7291_v9 = vmax.f32 %v7240_v36, %v7245_v24  ;;  %v8681_v19 = vpop.f32.mrb[160].mxu1  ;;  %v9147_v10 = vpop.f32.mrb[206].mxu0  ;;  %v7115_v39 = vadd.f32 %v8680_v22, %v6970_v16  ;;  %v7603_v16 = vld [vmem:[%s14453_s9 + $0x138] sm:$0xff] }
 0x823   :  { %v7255_v0 = vadd.f32 %v9147_v10, %v7110_v7  ;;  %v8682_v29 = vpop.f32.mrb[161].mxu1  ;;  %v7249_v63 = vpop.f32.mrb[207].mxu0  ;;  %v7304_v50 = vld [vmem:[#allocation9] ss:$2 sm:$0xff]  ;;  %v7312_v55 = vld [vmem:[#allocation9 + $0x1] ss:$2 sm:$0xff]  ;;  %v6990_v7 = vadd.f32 %v13910_v31, %v13703_v12  ;;  %v9424_v61 = vpack.c.bf16 %v7603_v16, %v7602_v32  ;;  %9423 = vmatprep.subr.bf16.mxu0 %v9422_v43 }
 0x824   :  { %7299 = vst.msk [vmem:[#allocation9 + $0x18] sm:$0xff] %vm6040_vm10, %v7291_v9  ;;  %v8683_v60 = vadd.f32 %v8682_v29, %v8681_v19  ;;  %v7250_v62 = vadd.f32 %v7249_v63, %v7105_v17  ;;  %v7319_v28 = vmax.f32 %v7304_v50, %v7312_v55  ;;  %v7592_v31 = vld [vmem:[%s14453_s9 + $0xe0] sm:$0xff]  ;;  %v6995_v29 = vadd.f32 %v13912_v48, %v13703_v12  ;;  %v7621_v48 = vld [vmem:[%s14453_s9 + $0x1c8] sm:$0xff] }
 0x825   :  { %9425 = vmatpush3.bf16.msra.mxu0 %v9424_v61  ;;  %v7620_v12 = vld [vmem:[%s14453_s9 + $0x1c0] sm:$0xff] }
 0x826   :  { %v7292_v46 = vmax.f32 %v7250_v62, %v7255_v0  ;;  %v8684_v23 = vpop.f32.mrb[162].mxu1  ;;  %v7120_v21 = vadd.f32 %v8683_v60, %v6975_v13  ;;  %v9150_v33 = vpop.f32.mrb[208].mxu0  ;;  %v7388_v47 = vcombine.high %v7319_v28, %v7319_v28  ;;  %v13944_v17 = vrot.slane %v7319_v28, %v13938_v52  ;;  %v7577_v0 = vld [vmem:[%s14453_s9 + $0x68] sm:$0xff] }
 0x827   :  { %v8685_v34 = vpop.f32.mrb[163].mxu1  ;;  %v7259_v56 = vpop.f32.mrb[209].mxu0  ;;  %v9404_v62 = vpack.c.bf16 %v7577_v0, %v7576_v4 }
 0x828   :  { %7300 = vst.msk [vmem:[#allocation9 + $0x20] sm:$0xff] %vm6040_vm10, %v7292_v46  ;;  %v7265_v25 = vadd.f32 %v9150_v33, %v7120_v21  ;;  %v8686_v54 = vadd.f32 %v8685_v34, %v8684_v23  ;;  %v7260_v42 = vadd.f32 %v7259_v56, %v7115_v39  ;;  %v13947_v45 = vrot.slane %v7388_v47, %v13938_v52  ;;  %v7604_v23 = vld [vmem:[%s14453_s9 + $0x140] sm:$0xff] }
 0x829   :  { %v13967_v22 = vcombine.high %v13944_v17, %v13944_v17  ;;  %v9402_v39 = vpack.c.bf16 %v7593_v27, %v7592_v31  ;;  %v7354_v46 = vrot.slane %v13944_v17, 1  ;;  %v9426_v56 = vpack.c.bf16 %v7621_v48, %v7620_v12 }
 0x82a   :  { %v7293_v58 = vmax.f32 %v7260_v42, %v7265_v25  ;;  %v8687_v57 = vpop.f32.mrb[164].mxu1  ;;  %v9153_v35 = vpop.f32.mrb[210].mxu0  ;;  %v7125_v5 = vadd.f32 %v8686_v54, %v6980_v3  ;;  %v13971_v36 = vcombine.high %v13947_v45, %v13947_v45  ;;  %v7413_v33 = vrot.slane %v13947_v45, 1  ;;  %v7605_v3 = vld [vmem:[%s14453_s9 + $0x148] sm:$0xff]  ;;  %v7622_v25 = vld [vmem:[%s14453_s9 + $0x1d0] sm:$0xff]  ;;  %v7623_v54 = vld [vmem:[%s14453_s9 + $0x1d8] sm:$0xff] }
 0x82b   :  { %v8688_v49 = vpop.f32.mrb[165].mxu1  ;;  %v7269_v11 = vpop.f32.mrb[211].mxu0  ;;  %v7306_v2 = vld [vmem:[#allocation9 + $0x10] ss:$2 sm:$0xff]  ;;  %v7314_v15 = vld [vmem:[#allocation9 + $0x11] ss:$2 sm:$0xff]  ;;  %9403 = vmatprep.subr.bf16.mxu1 %v9402_v39  ;;  %9427 = vmatprep.subr.bf16.mxu0 %v9426_v56 }
 0x82c   :  { %7301 = vst.msk [vmem:[#allocation9 + $0x28] sm:$0xff] %vm6040_vm10, %v7293_v58  ;;  %v8689_v37 = vadd.f32 %v8688_v49, %v8687_v57  ;;  %v7270_v51 = vadd.f32 %v7269_v11, %v7125_v5  ;;  %v7320_v38 = vmax.f32 %v7306_v2, %v7314_v15  ;;  %v7377_v21 = vrot.slane %v13967_v22, 1  ;;  %9405 = vmatpush3.bf16.msra.mxu1 %v9404_v62  ;;  %v7607_v5 = vld [vmem:[%s14453_s9 + $0x158] sm:$0xff]  ;;  %v7594_v49 = vld [vmem:[%s14453_s9 + $0xf0] sm:$0xff] }
 0x82d   :  { %v7435_v34 = vrot.slane %v13971_v36, 1  ;;  %v9428_v57 = vpack.c.bf16 %v7605_v3, %v7604_v23  ;;  %v7595_v2 = vld [vmem:[%s14453_s9 + $0xf8] sm:$0xff]  ;;  %v7578_v15 = vld [vmem:[%s14453_s9 + $0x70] sm:$0xff] }
 0x82e   :  { %v7130_v59 = vadd.f32 %v8689_v37, %v6985_v14  ;;  %v8690_v20 = vpop.f32.mrb[166].mxu1  ;;  %v13949_v8 = vpop.f32.mrb[212].mxu0  ;;  %v13988_v13 = vrot.slane %v7320_v38, %v13938_v52  ;;  %v7504_v60 = vcombine.high %v7320_v38, %v7320_v38  ;;  %v9430_v37 = vpack.c.bf16 %v7623_v54, %v7622_v25  ;;  %v7610_v25 = vld [vmem:[%s14453_s9 + $0x170] sm:$0xff]  ;;  %v7611_v54 = vld [vmem:[%s14453_s9 + $0x178] sm:$0xff] }
 0x82f   :  { %v8691_v26 = vpop.f32.mrb[167].mxu1  ;;  %v7279_v18 = vpop.f32.mrb[213].mxu0  ;;  %9429 = vmatpush3.bf16.msra.mxu0 %v9428_v57  ;;  %v9406_v32 = vpack.c.bf16 %v7595_v2, %v7594_v49 }
 0x830   :  { %v7275_v24 = vadd.f32 %v9153_v35, %v7130_v59  ;;  %v8692_v40 = vadd.f32 %v8691_v26, %v8690_v20  ;;  %v7606_v35 = vld [vmem:[%s14453_s9 + $0x150] sm:$0xff]  ;;  %v14025_v11 = vcombine.high %v13988_v13, %v13988_v13  ;;  %v14028_v14 = vrot.slane %v7504_v60, %v13938_v52  ;;  %v7579_v59 = vld [vmem:[%s14453_s9 + $0x78] sm:$0xff]  ;;  %9431 = vmatprep.subr.bf16.mxu0 %v9430_v37 }
 0x831   :  { %9407 = vmatprep.subr.bf16.mxu1 %v9406_v32 }
 0x832   :  { %v7294_v9 = vmax.f32 %v7270_v51, %v7275_v24  ;;  %v8693_v19 = vpop.f32.mrb[168].mxu1  ;;  %v7135_v10 = vadd.f32 %v8692_v40, %v6990_v7  ;;  %v9432_v51 = vpack.c.bf16 %v7607_v5, %v7606_v35  ;;  %v9408_v7 = vpack.c.bf16 %v7579_v59, %v7578_v15  ;;  %v7645_v35 = vld [vmem:[%s14453_s9 + $0x288] sm:$0xff] }
 0x833   :  { %v8694_v63 = vpop.f32.mrb[169].mxu1  ;;  %v7308_v50 = vld [vmem:[#allocation9 + $0x20] ss:$2 sm:$0xff]  ;;  %v7316_v55 = vld [vmem:[#allocation9 + $0x21] ss:$2 sm:$0xff]  ;;  %v9440_v59 = vpack.c.bf16 %v7611_v54, %v7610_v25 }
 0x834   :  { %7302 = vst.msk [vmem:[#allocation9 + $0x30] sm:$0xff] %vm6040_vm10, %v7294_v9  ;;  %v8695_v28 = vadd.f32 %v8694_v63, %v8693_v19  ;;  %v7280_v6 = vadd.f32 %v7279_v18, %v7135_v10  ;;  %v7321_v53 = vmax.f32 %v7308_v50, %v7316_v55  ;;  %9433 = vmatpush3.bf16.msra.mxu0 %v9432_v51  ;;  %v7624_v50 = vld [vmem:[%s14453_s9 + $0x1e0] sm:$0xff]  ;;  %v7625_v55 = vld [vmem:[%s14453_s9 + $0x1e8] sm:$0xff] }
 0x835   :  { %9409 = vmatpush3.bf16.msra.mxu1 %v9408_v7  ;;  %v9434_v3 = vpack.c.bf16 %v7625_v55, %v7624_v50 }
 0x836   :  { %v7140_v42 = vadd.f32 %v8695_v28, %v6995_v29  ;;  %v7338_v47 = vrot.slane %v7321_v53, %v13938_v52  ;;  %v7396_v58 = vcombine.high %v7321_v53, %v7321_v53  ;;  %v7609_v53 = vld [vmem:[%s14453_s9 + $0x168] sm:$0xff] }
 0x837   :  { %9435 = vmatprep.subr.bf16.mxu0 %v9434_v3 }
 0x838   :  { %v7285_v20 = vadd.f32 %v13949_v8, %v7140_v42  ;;  %v7357_v26 = vsel %vm7344_vm14, %v7338_v47, %v7354_v46  ;;  %v7367_v18 = vcombine.high %v7338_v47, %v7338_v47  ;;  %v7403_v38 = vrot.slane %v7396_v58, %v13938_v52 }
 0x839   :  { %v7358_v44 = vsel %vm7346_vm15, %v7338_v47, %v7357_v26  ;;  %v7343_v1 = vrot.slane %v7338_v47, 7 }
 0x83a   :  { %v7295_v24 = vmax.f32 %v7280_v6, %v7285_v20  ;;  %v7359_v40 = vsel %vm7348_vm0, %v7338_v47, %v7358_v44  ;;  %v7380_v43 = vsel %vm7344_vm14, %v7367_v18, %v7377_v21  ;;  %v7416_v16 = vsel %vm7344_vm14, %v7403_v38, %v7413_v33  ;;  %v7608_v6 = vld [vmem:[%s14453_s9 + $0x160] sm:$0xff]  ;;  %v7627_v21 = vld [vmem:[%s14453_s9 + $0x1f8] sm:$0xff]  ;;  %v7677_v44 = vld [vmem:[%s14453_s9 + $0x388] sm:$0xff] }
 0x83b   :  { %v7360_v8 = vsel %vm7350_vm1, %v7338_v47, %v7359_v40  ;;  %v7381_v61 = vsel %vm7346_vm15, %v7367_v18, %v7380_v43  ;;  %v7417_v31 = vsel %vm7346_vm15, %v7403_v38, %v7416_v16  ;;  %v7425_v27 = vcombine.high %v7403_v38, %v7403_v38 }
 0x83c   :  { %7303 = vst.msk [vmem:[#allocation9 + $0x38] sm:$0xff] %vm6040_vm10, %v7295_v24  ;;  %7361 = vrot.lane.b32.xlu0 %v7360_v8, %s9605_s27  ;;  %v7382_v4 = vsel %vm7348_vm0, %v7367_v18, %v7381_v61  ;;  %v7418_v9 = vsel %vm7348_vm0, %v7403_v38, %v7417_v31  ;;  %v7345_v19 = vsel %vm7344_vm14, %v7343_v1, %v13944_v17  ;;  %v7370_v10 = vrot.slane %v7367_v18, 7 }
 0x83d   :  { %v7383_v39 = vsel %vm7350_vm1, %v7367_v18, %v7382_v4  ;;  %v7419_v0 = vsel %vm7350_vm1, %v7403_v38, %v7418_v9  ;;  %v7438_v29 = vsel %vm7344_vm14, %v7425_v27, %v7435_v34  ;;  %v7347_v63 = vsel %vm7346_vm15, %v7343_v1, %v7345_v19 }
 0x83e   :  { %7384 = vrot.lane.b32.xlu1 %v7383_v39, %s9605_s27  ;;  %v7439_v17 = vsel %vm7346_vm15, %v7425_v27, %v7438_v29  ;;  %v7349_v60 = vsel %vm7348_vm0, %v7343_v1, %v7347_v63  ;;  %v7371_v62 = vsel %vm7344_vm14, %v7370_v10, %v13967_v22  ;;  %v7406_v28 = vrot.slane %v7403_v38, 7  ;;  %v7626_v22 = vld [vmem:[%s14453_s9 + $0x1f0] sm:$0xff]  ;;  %v7676_v38 = vld [vmem:[%s14453_s9 + $0x380] sm:$0xff] }
 0x83f   :  { %v7440_v46 = vsel %vm7348_vm0, %v7425_v27, %v7439_v17  ;;  %v7351_v12 = vsel %vm7350_vm1, %v7343_v1, %v7349_v60  ;;  %v7372_v48 = vsel %vm7346_vm15, %v7370_v10, %v7371_v62  ;;  %v7428_v23 = vrot.slane %v7425_v27, 7 }
 0x840   :  { %7420 = vrot.lane.b32.xlu0 %v7419_v0, %s9605_s27  ;;  %v7441_v33 = vsel %vm7350_vm1, %v7425_v27, %v7440_v46  ;;  %7353 = vst.msk [vmem:[#allocation10] sm:$0x3] %vm6058_vm12, %v7351_v12  ;;  %v7373_v34 = vsel %vm7348_vm0, %v7370_v10, %v7372_v48  ;;  %v7407_v56 = vsel %vm7344_vm14, %v7406_v28, %v13947_v45  ;;  %v7644_v45 = vld [vmem:[%s14453_s9 + $0x280] sm:$0xff]  ;;  %v7471_v24 = vrot.slane %v13988_v13, 1 }
 0x841   :  { %v7374_v42 = vsel %vm7350_vm1, %v7370_v10, %v7373_v34  ;;  %v7408_v47 = vsel %vm7346_vm15, %v7406_v28, %v7407_v56  ;;  %v7429_v58 = vsel %vm7344_vm14, %v7428_v23, %v13971_v36  ;;  %v9436_v57 = vpack.c.bf16 %v7609_v53, %v7608_v6 }
 0x842   :  { %7442 = vrot.lane.b32.xlu1 %v7441_v33, %s9605_s27  ;;  %7376 = vst.msk [vmem:[#allocation10 + $0x2] sm:$0x3] %vm6058_vm12, %v7374_v42  ;;  %v7409_v5 = vsel %vm7348_vm0, %v7406_v28, %v7408_v47  ;;  %v7430_v49 = vsel %vm7346_vm15, %v7428_v23, %v7429_v58  ;;  %v9438_v37 = vpack.c.bf16 %v7627_v21, %v7626_v22  ;;  %v7493_v43 = vrot.slane %v14025_v11, 1 }
 0x843   :  { %v7310_v36 = vld [vmem:[#allocation9 + $0x30] ss:$2 sm:$0xff]  ;;  %v7318_v51 = vld [vmem:[#allocation9 + $0x31] ss:$2 sm:$0xff]  ;;  %v7410_v2 = vsel %vm7350_vm1, %v7406_v28, %v7409_v5  ;;  %v7431_v15 = vsel %vm7348_vm0, %v7428_v23, %v7430_v49  ;;  %9437 = vmatpush3.bf16.msra.mxu0 %v9436_v57  ;;  %v9442_v20 = vpack.c.bf16 %v7645_v35, %v7644_v45  ;;  %v7540_v1 = vcombine.high %v14028_v14, %v14028_v14 }
 0x844   :  { %v7322_v26 = vmax.f32 %v7310_v36, %v7318_v51  ;;  %7412 = vst.msk [vmem:[#allocation10 + $0x4] sm:$0x3] %vm6058_vm12, %v7410_v2  ;;  %v7432_v18 = vsel %vm7350_vm1, %v7428_v23, %v7431_v15  ;;  %9439 = vmatprep.subr.bf16.mxu0 %v9438_v37  ;;  %v9474_v32 = vpack.c.bf16 %v7677_v44, %v7676_v38  ;;  %v7529_v16 = vrot.slane %v14028_v14, 1  ;;  %v7628_v51 = vld [vmem:[%s14453_s9 + $0x200] sm:$0xff]  ;;  %v7629_v2 = vld [vmem:[%s14453_s9 + $0x208] sm:$0xff] }
 0x845   :  { %7434 = vst.msk [vmem:[#allocation10 + $0x6] sm:$0x3] %vm6058_vm12, %v7432_v18  ;;  %9443 = vmatprep.subr.bf16.mxu1 %v9442_v20  ;;  %v7551_v9 = vrot.slane %v7540_v1, 1  ;;  %v7646_v20 = vld [vmem:[%s14453_s9 + $0x290] sm:$0xff]  ;;  %v7660_v38 = vld [vmem:[%s14453_s9 + $0x300] sm:$0xff]  ;;  %v7661_v44 = vld [vmem:[%s14453_s9 + $0x308] sm:$0xff] }
 0x846   :  { %v7461_v7 = vrot.slane %v7322_v26, %v13938_v52  ;;  %v7512_v40 = vcombine.high %v7322_v26, %v7322_v26  ;;  %v7647_v26 = vld [vmem:[%s14453_s9 + $0x298] sm:$0xff] }
 0x847   :  { %9441 = vmatpush3.bf16.msra.mxu0 %v9440_v59 }
 0x848   :  { %v7474_v8 = vsel %vm7344_vm14, %v7461_v7, %v7471_v24  ;;  %v7483_v61 = vcombine.high %v7461_v7, %v7461_v7  ;;  %v7519_v31 = vrot.slane %v7512_v40, %v13938_v52  ;;  %v7464_v27 = vrot.slane %v7461_v7, 7  ;;  %9475 = vmatprep.subr.bf16.mxu0 %v9474_v32  ;;  %v7678_v24 = vld [vmem:[%s14453_s9 + $0x390] sm:$0xff]  ;;  %v7679_v40 = vld [vmem:[%s14453_s9 + $0x398] sm:$0xff] }
 0x849   :  { %v7475_v4 = vsel %vm7346_vm15, %v7461_v7, %v7474_v8  ;;  %v9444_v32 = vpack.c.bf16 %v7629_v2, %v7628_v51  ;;  %v7630_v8 = vld [vmem:[%s14453_s9 + $0x210] sm:$0xff]  ;;  %v7655_v2 = vld [vmem:[%s14453_s9 + $0x2d8] sm:$0xff] }
 0x84a   :  { %v7476_v19 = vsel %vm7348_vm0, %v7461_v7, %v7475_v4  ;;  %v7496_v10 = vsel %vm7344_vm14, %v7483_v61, %v7493_v43  ;;  %v7532_v39 = vsel %vm7344_vm14, %v7519_v31, %v7529_v16  ;;  %v7541_v0 = vcombine.high %v7519_v31, %v7519_v31  ;;  %v7648_v4 = vld [vmem:[%s14453_s9 + $0x2a0] sm:$0xff]  ;;  %v7654_v51 = vld [vmem:[%s14453_s9 + $0x2d0] sm:$0xff] }
 0x84b   :  { %v7477_v29 = vsel %vm7350_vm1, %v7461_v7, %v7476_v19  ;;  %v7497_v63 = vsel %vm7346_vm15, %v7483_v61, %v7496_v10  ;;  %v7533_v50 = vsel %vm7346_vm15, %v7519_v31, %v7532_v39  ;;  %v7465_v55 = vsel %vm7344_vm14, %v7464_v27, %v13988_v13  ;;  %v7662_v39 = vld [vmem:[%s14453_s9 + $0x310] sm:$0xff] }
 0x84c   :  { %7478 = vrot.lane.b32.xlu0 %v7477_v29, %s9605_s27  ;;  %v7498_v17 = vsel %vm7348_vm0, %v7483_v61, %v7497_v63  ;;  %v7534_v60 = vsel %vm7348_vm0, %v7519_v31, %v7533_v50  ;;  %v7554_v62 = vsel %vm7344_vm14, %v7541_v0, %v7551_v9  ;;  %v7466_v28 = vsel %vm7346_vm15, %v7464_v27, %v7465_v55  ;;  %v7649_v9 = vld [vmem:[%s14453_s9 + $0x2a8] sm:$0xff]  ;;  %v7680_v63 = vld [vmem:[%s14453_s9 + $0x3a0] sm:$0xff] }
 0x84d   :  { %v7499_v6 = vsel %vm7350_vm1, %v7483_v61, %v7498_v17  ;;  %v7555_v53 = vsel %vm7346_vm15, %v7541_v0, %v7554_v62  ;;  %v7467_v46 = vsel %vm7348_vm0, %v7464_v27, %v7466_v28  ;;  %v7486_v48 = vrot.slane %v7483_v61, 7  ;;  %v7631_v61 = vld [vmem:[%s14453_s9 + $0x218] sm:$0xff]  ;;  %v7681_v50 = vld [vmem:[%s14453_s9 + $0x3a8] sm:$0xff] }
 0x84e   :  { %7500 = vrot.lane.b32.xlu1 %v7499_v6, %s9605_s27  ;;  %v7556_v13 = vsel %vm7348_vm0, %v7541_v0, %v7555_v53  ;;  %v7468_v12 = vsel %vm7350_vm1, %v7464_v27, %v7467_v46  ;;  %v7522_v23 = vrot.slane %v7519_v31, 7  ;;  %v7535_v22 = vsel %vm7350_vm1, %v7519_v31, %v7534_v60  ;;  %v7632_v60 = vld [vmem:[%s14453_s9 + $0x220] sm:$0xff]  ;;  %v7633_v62 = vld [vmem:[%s14453_s9 + $0x228] sm:$0xff]  ;;  %v7650_v6 = vld [vmem:[%s14453_s9 + $0x2b0] sm:$0xff] }
 0x84f   :  { %7470 = vst.msk [vmem:[#allocation10 + $0x8] sm:$0x3] %vm6058_vm12, %v7468_v12  ;;  %v7544_v21 = vrot.slane %v7541_v0, 7  ;;  %v7487_v33 = vsel %vm7344_vm14, %v7486_v48, %v14025_v11  ;;  %v7557_v56 = vsel %vm7350_vm1, %v7541_v0, %v7556_v13  ;;  %v9446_v16 = vpack.c.bf16 %v7647_v26, %v7646_v20  ;;  %v7663_v0 = vld [vmem:[%s14453_s9 + $0x318] sm:$0xff]  ;;  %v7664_v13 = vld [vmem:[%s14453_s9 + $0x320] sm:$0xff]  ;;  %v7665_v12 = vld [vmem:[%s14453_s9 + $0x328] sm:$0xff] }
 0x850   :  { %7536 = vrot.lane.b32.xlu0 %v7535_v22, %s9605_s27  ;;  %v7523_v34 = vsel %vm7344_vm14, %v7522_v23, %v14028_v14  ;;  %v7488_v3 = vsel %vm7346_vm15, %v7486_v48, %v7487_v33  ;;  %v9476_v27 = vpack.c.bf16 %v7661_v44, %v7660_v38  ;;  %v9478_v10 = vpack.c.bf16 %v7679_v40, %v7678_v24  ;;  %v7651_v53 = vld [vmem:[%s14453_s9 + $0x2b8] sm:$0xff]  ;;  %v7634_v33 = vld [vmem:[%s14453_s9 + $0x230] sm:$0xff]  ;;  %v7669_v20 = vld [vmem:[%s14453_s9 + $0x348] sm:$0xff] }
 0x851   :  { %v7524_v25 = vsel %vm7346_vm15, %v7522_v23, %v7523_v34  ;;  %v7545_v54 = vsel %vm7344_vm14, %v7544_v21, %v7540_v1  ;;  %v7489_v42 = vsel %vm7348_vm0, %v7486_v48, %v7488_v3  ;;  %v9448_v29 = vpack.c.bf16 %v7631_v61, %v7630_v8  ;;  %v7683_v22 = vld [vmem:[%s14453_s9 + $0x3b8] sm:$0xff]  ;;  %v7652_v3 = vld [vmem:[%s14453_s9 + $0x2c0] sm:$0xff]  ;;  %v7686_v44 = vld [vmem:[%s14453_s9 + $0x3d0] sm:$0xff] }
 0x852   :  { %7558 = vrot.lane.b32.xlu1 %v7557_v56, %s9605_s27  ;;  %v7525_v47 = vsel %vm7348_vm0, %v7522_v23, %v7524_v25  ;;  %v7546_v58 = vsel %vm7346_vm15, %v7544_v21, %v7545_v54  ;;  %v7490_v11 = vsel %vm7350_vm1, %v7486_v48, %v7489_v42  ;;  %v9450_v17 = vpack.c.bf16 %v7649_v9, %v7648_v4  ;;  %v7635_v34 = vld [vmem:[%s14453_s9 + $0x238] sm:$0xff]  ;;  %v7653_v25 = vld [vmem:[%s14453_s9 + $0x2c8] sm:$0xff]  ;;  %v7666_v42 = vld [vmem:[%s14453_s9 + $0x330] sm:$0xff] }
 0x853   :  { %v7526_v14 = vsel %vm7350_vm1, %v7522_v23, %v7525_v47  ;;  %v7547_v57 = vsel %vm7348_vm0, %v7544_v21, %v7546_v58  ;;  %7492 = vst.msk [vmem:[#allocation10 + $0xa] sm:$0x3] %vm6058_vm12, %v7490_v11  ;;  %v9480_v28 = vpack.c.bf16 %v7663_v0, %v7662_v39  ;;  %v9482_v46 = vpack.c.bf16 %v7681_v50, %v7680_v63  ;;  %v7682_v23 = vld [vmem:[%s14453_s9 + $0x3b0] sm:$0xff]  ;;  %v7667_v47 = vld [vmem:[%s14453_s9 + $0x338] sm:$0xff]  ;;  %v7684_v11 = vld [vmem:[%s14453_s9 + $0x3c0] sm:$0xff] }
 0x854   :  { %7528 = vst.msk [vmem:[#allocation10 + $0xc] sm:$0x3] %vm6058_vm12, %v7526_v14  ;;  %v7548_v45 = vsel %vm7350_vm1, %v7544_v21, %v7547_v57  ;;  %v9452_v48 = vpack.c.bf16 %v7633_v62, %v7632_v60  ;;  %v9454_v21 = vpack.c.bf16 %v7651_v53, %v7650_v6  ;;  %v9484_v56 = vpack.c.bf16 %v7665_v12, %v7664_v13  ;;  %v7685_v14 = vld [vmem:[%s14453_s9 + $0x3c8] sm:$0xff]  ;;  %v7639_v24 = vld [vmem:[%s14453_s9 + $0x258] sm:$0xff]  ;;  %v7670_v61 = vld [vmem:[%s14453_s9 + $0x350] sm:$0xff] }
 0x855   :  { %7550 = vst.msk [vmem:[#allocation10 + $0xe] sm:$0x3] %vm6058_vm12, %v7548_v45  ;;  %v9486_v54 = vpack.c.bf16 %v7683_v22, %v7682_v23  ;;  %v9456_v58 = vpack.c.bf16 %v7635_v34, %v7634_v33  ;;  %v9458_v57 = vpack.c.bf16 %v7653_v25, %v7652_v3  ;;  %v7688_v4 = vld [vmem:[%s14453_s9 + $0x3e0] sm:$0xff]  ;;  %v7689_v9 = vld [vmem:[%s14453_s9 + $0x3e8] sm:$0xff]  ;;  %v7659_v63 = vld [vmem:[%s14453_s9 + $0x2f8] sm:$0xff] }
 0x856   :  { %v7641_v39 = vld [vmem:[%s14453_s9 + $0x268] sm:$0xff]  ;;  %v9498_v50 = vpack.c.bf16 %v7689_v9, %v7688_v4  ;;  %v7690_v62 = vld [vmem:[%s14453_s9 + $0x3f0] sm:$0xff]  ;;  %v7675_v23 = vld [vmem:[%s14453_s9 + $0x378] sm:$0xff] }
 0x857   :  { %v7642_v53 = vld [vmem:[%s14453_s9 + $0x270] sm:$0xff]  ;;  %v8024_v33 = vld [vmem:[%s14455_s11] sm:$0xff]  ;;  %v8025_v34 = vld [vmem:[%s14455_s11 + $0x8] sm:$0xff] }
 0x858   :  { %v9507_v3 = vpack.c.bf16 %v8025_v34, %v8024_v33  ;;  %v8027_v25 = vld [vmem:[%s14455_s11 + $0x18] sm:$0xff]  ;;  %v8299_v9 = vld [vmem:[%s14456_s12] ss:$0 sm:$0xff] }
 0x8ae   :  { %v7362_v35 = vpop.permute.xlu0 %7361 }
 0x8af   :  { %7365 = vst.msk [vmem:[#allocation10] sm:$0x3] %vm7364_vm2, %v7362_v35  ;;  %v7636_v35 = vld [vmem:[%s14453_s9 + $0x240] sm:$0xff] }
 0x8b0   :  { %v7385_v5 = vpop.permute.xlu1 %7384 }
 0x8b1   :  { %7387 = vst.msk [vmem:[#allocation10 + $0x2] sm:$0x3] %vm7364_vm2, %v7385_v5  ;;  %v7637_v5 = vld [vmem:[%s14453_s9 + $0x248] sm:$0xff] }
 0x8b2   :  { %v7421_v49 = vpop.permute.xlu0 %7420 }
 0x8b3   :  { %7423 = vst.msk [vmem:[#allocation10 + $0x4] sm:$0x3] %vm7364_vm2, %v7421_v49  ;;  %v9488_v49 = vpack.c.bf16 %v7667_v47, %v7666_v42  ;;  %v8028_v42 = vld [vmem:[%s14455_s11 + $0x20] sm:$0xff]  ;;  %v8029_v47 = vld [vmem:[%s14455_s11 + $0x28] sm:$0xff] }
 0x8b4   :  { %v7443_v37 = vpop.permute.xlu1 %7442 }
 0x8b5   :  { %7445 = vst.msk [vmem:[#allocation10 + $0x6] sm:$0x3] %vm7364_vm2, %v7443_v37 }
 0x8bc   :  { %v7562_v36 = vld [vmem:[#allocation10] sm:$0xff] }
 0x8bd   :  { %v7708_v15 = vrot.slane %v7562_v36, %v13938_v52  ;;  %v7701_v59 = vcombine.high %v7562_v36, %v7562_v36 }
 0x8be   :  { %v7479_v18 = vpop.permute.xlu0 %7478 }
 0x8bf   :  { %7481 = vst.msk [vmem:[#allocation10 + $0x8] sm:$0x3] %vm7364_vm2, %v7479_v18  ;;  %v7716_v1 = vcombine.high %v7708_v15, %v7708_v15  ;;  %v7715_v7 = vrot.slane %v7701_v59, %v13938_v52  ;;  %v7668_v59 = vld [vmem:[%s14453_s9 + $0x340] sm:$0xff]  ;;  %v9460_v18 = vpack.c.bf16 %v7637_v5, %v7636_v35  ;;  %v8033_v35 = vld [vmem:[%s14455_s11 + $0x48] sm:$0xff] }
 0x8c0   :  { %v7501_v43 = vpop.permute.xlu1 %7500  ;;  %v9492_v40 = vpack.c.bf16 %v7669_v20, %v7668_v59  ;;  %v8038_v59 = vld [vmem:[%s14455_s11 + $0x70] sm:$0xff]  ;;  %v8039_v20 = vld [vmem:[%s14455_s11 + $0x78] sm:$0xff] }
 0x8c1   :  { %7503 = vst.msk [vmem:[#allocation10 + $0xa] sm:$0x3] %vm7364_vm2, %v7501_v43  ;;  %7807 = vmatprep.mubr.f32.mxu1 %v7716_v1  ;;  %v7717_v31 = vcombine.high %v7715_v7, %v7715_v7  ;;  %v7687_v1 = vld [vmem:[%s14453_s9 + $0x3d8] sm:$0xff]  ;;  %v7656_v43 = vld [vmem:[%s14453_s9 + $0x2e0] sm:$0xff] }
 0x8c2   :  { %v7537_v19 = vpop.permute.xlu0 %7536  ;;  %7808 = vmatmul.mubr.f32.vlgmr.msra.gmra.mrb[170].mxu1 %v7708_v15  ;;  %v9490_v15 = vpack.c.bf16 %v7685_v14, %v7684_v11  ;;  %v9494_v8 = vpack.c.bf16 %v7687_v1, %v7686_v44  ;;  %v8030_v11 = vld [vmem:[%s14455_s11 + $0x30] sm:$0xff]  ;;  %v8031_v14 = vld [vmem:[%s14455_s11 + $0x38] sm:$0xff] }
 0x8c3   :  { %7539 = vst.msk [vmem:[#allocation10 + $0xc] sm:$0x3] %vm7364_vm2, %v7537_v19  ;;  %9445 = vmatpush3.bf16.msra.mxu1 %v9444_v32  ;;  %7877 = vmatprep.mubr.f32.mxu0 %v7717_v31  ;;  %v9462_v32 = vpack.c.bf16 %v7655_v2, %v7654_v51  ;;  %v7671_v31 = vld [vmem:[%s14453_s9 + $0x358] sm:$0xff]  ;;  %v8036_v51 = vld [vmem:[%s14455_s11 + $0x60] sm:$0xff]  ;;  %v8037_v2 = vld [vmem:[%s14455_s11 + $0x68] sm:$0xff] }
 0x8c4   :  { %v7559_v55 = vpop.permute.xlu1 %7558  ;;  %7878 = vmatmul.mubr.f32.vlgmr.msra.gmra.mrb[214].mxu0 %v7715_v7  ;;  %9447 = vmatprep.subr.bf16.mxu1 %v9446_v16  ;;  %v7638_v7 = vld [vmem:[%s14453_s9 + $0x250] sm:$0xff]  ;;  %v7657_v16 = vld [vmem:[%s14453_s9 + $0x2e8] sm:$0xff]  ;;  %v9496_v0 = vpack.c.bf16 %v7671_v31, %v7670_v61 }
 0x8c5   :  { %7561 = vst.msk [vmem:[#allocation10 + $0xe] sm:$0x3] %vm7364_vm2, %v7559_v55  ;;  %9477 = vmatpush3.bf16.msra.mxu0 %v9476_v27  ;;  %v9464_v27 = vpack.c.bf16 %v7639_v24, %v7638_v7  ;;  %v9466_v19 = vpack.c.bf16 %v7657_v16, %v7656_v43  ;;  %v7672_v55 = vld [vmem:[%s14453_s9 + $0x360] sm:$0xff] }
 0x8c6   :  { %9479 = vmatprep.subr.bf16.mxu0 %v9478_v10  ;;  %v7640_v10 = vld [vmem:[%s14453_s9 + $0x260] sm:$0xff] }
 0x8c7   :  { %9449 = vmatpush3.bf16.msra.mxu1 %v9448_v29  ;;  %v7658_v29 = vld [vmem:[%s14453_s9 + $0x2f0] sm:$0xff]  ;;  %v9468_v60 = vpack.c.bf16 %v7641_v39, %v7640_v10 }
 0x8c8   :  { %9451 = vmatprep.subr.bf16.mxu1 %v9450_v17  ;;  %v7673_v17 = vld [vmem:[%s14453_s9 + $0x368] sm:$0xff]  ;;  %v9470_v6 = vpack.c.bf16 %v7659_v63, %v7658_v29 }
 0x8c9   :  { %9481 = vmatpush3.bf16.msra.mxu0 %v9480_v28  ;;  %v7691_v28 = vld [vmem:[%s14453_s9 + $0x3f8] sm:$0xff]  ;;  %v9500_v13 = vpack.c.bf16 %v7673_v17, %v7672_v55 }
 0x8ca   :  { %9483 = vmatprep.subr.bf16.mxu0 %v9482_v46  ;;  %v7643_v46 = vld [vmem:[%s14453_s9 + $0x278] sm:$0xff]  ;;  %v9502_v12 = vpack.c.bf16 %v7691_v28, %v7690_v62 }
 0x8cb   :  { %9453 = vmatpush3.bf16.msra.mxu1 %v9452_v48  ;;  %v7674_v48 = vld [vmem:[%s14453_s9 + $0x370] sm:$0xff]  ;;  %v9472_v22 = vpack.c.bf16 %v7643_v46, %v7642_v53 }
 0x8cc   :  { %9455 = vmatprep.subr.bf16.mxu1 %v9454_v21  ;;  %v7563_v45 = vld [vmem:[#allocation10 + $0x8] sm:$0xff]  ;;  %v9504_v21 = vpack.c.bf16 %v7675_v23, %v7674_v48 }
 0x8cd   :  { %9485 = vmatpush3.bf16.msra.mxu0 %v9484_v56  ;;  %v14285_v37 = vrot.slane %v7563_v45, %v13938_v52  ;;  %v7718_v36 = vcombine.high %v7563_v45, %v7563_v45  ;;  %v8026_v56 = vld [vmem:[%s14455_s11 + $0x10] sm:$0xff]  ;;  %v8032_v45 = vld [vmem:[%s14455_s11 + $0x40] sm:$0xff] }
 0x8ce   :  { %9487 = vmatprep.subr.bf16.mxu0 %v9486_v54  ;;  %v9510_v54 = vpack.c.bf16 %v8027_v25, %v8026_v56  ;;  %v9519_v5 = vpack.c.bf16 %v8033_v35, %v8032_v45 }
 0x8cf   :  { %9457 = vmatpush3.bf16.msra.mxu1 %v9456_v58  ;;  %v7733_v26 = vcombine.high %v14285_v37, %v14285_v37  ;;  %v7732_v38 = vrot.slane %v7718_v36, %v13938_v52  ;;  %v9513_v58 = vpack.c.bf16 %v8029_v47, %v8028_v42 }
 0x8d0   :  { %9459 = vmatprep.subr.bf16.mxu1 %v9458_v57  ;;  %v9516_v57 = vpack.c.bf16 %v8031_v14, %v8030_v11 }
 0x8d1   :  { %9489 = vmatpush3.bf16.msra.mxu0 %v9488_v49  ;;  %7947 = vmatprep.mubr.f32.mxu1 %v7733_v26  ;;  %v7734_v52 = vcombine.high %v7732_v38, %v7732_v38  ;;  %v8034_v49 = vld [vmem:[%s14455_s11 + $0x50] sm:$0xff]  ;;  %v9528_v26 = vpack.c.bf16 %v8039_v20, %v8038_v59 }
 0x8d2   :  { %9491 = vmatprep.subr.bf16.mxu0 %v9490_v15  ;;  %v9525_v15 = vpack.c.bf16 %v8037_v2, %v8036_v51 }
 0x8d3   :  { %9461 = vmatpush3.bf16.msra.mxu1 %v9460_v18  ;;  %8017 = vmatprep.mubr.f32.mxu0 %v7734_v52 }
 0x8d4   :  { %9463 = vmatprep.subr.bf16.mxu1 %v9462_v32 }
 0x8d5   :  { %9493 = vmatpush3.bf16.msra.mxu0 %v9492_v40 }
 0x8d6   :  { %9495 = vmatprep.subr.bf16.mxu0 %v9494_v8 }
 0x8d7   :  { %9465 = vmatpush3.bf16.msra.mxu1 %v9464_v27 }
 0x8d8   :  { %9467 = vmatprep.subr.bf16.mxu1 %v9466_v19 }
 0x8d9   :  { %9497 = vmatpush3.bf16.msra.mxu0 %v9496_v0 }
 0x8da   :  { %9499 = vmatprep.subr.bf16.mxu0 %v9498_v50 }
 0x8db   :  { %9469 = vmatpush3.bf16.msra.mxu1 %v9468_v60 }
 0x8dc   :  { %9471 = vmatprep.subr.bf16.mxu1 %v9470_v6 }
 0x8dd   :  { %9501 = vmatpush3.bf16.msra.mxu0 %v9500_v13 }
 0x8de   :  { %9503 = vmatprep.subr.bf16.mxu0 %v9502_v12 }
 0x8df   :  { %9473 = vmatpush3.bf16.msra.mxu1 %v9472_v22 }
 0x8e0   :  { %9506 = vmatprep.subr.bf16.mxu1 %v9604_v41 }
 0x8e1   :  { %9505 = vmatpush3.bf16.msra.mxu0 %v9504_v21 }
 0x8e2   :  { %7948 = vmatmul.mubr.f32.vlgmr.msra.gmra.mrb[172].mxu1 %v14285_v37  ;;  %v8035_v37 = vld [vmem:[%s14455_s11 + $0x58] sm:$0xff] }
 0x8e3   :  { %9508 = vmatpush3.bf16.msra.mxu1 %v9507_v3  ;;  %v9522_v36 = vpack.c.bf16 %v8035_v37, %v8034_v49  ;;  %9189 = vmatprep.mubr.msk.f32.mxu1 %vm9609_vm3, %v9603_v30 }
 0x8e4   :  { %8018 = vmatmul.mubr.f32.vlgmr.msra.gmra.mrb[216].mxu0 %v7732_v38  ;;  %9509 = vmatprep.subr.bf16.mxu1 %v9604_v41  ;;  %v8298_v38 = vld [vmem:[%s14454_s10] ss:$0 sm:$0xff]  ;;  %s9610_s10 = smov [#allocation11]  }
 0x8e5   :  { %s8125_s22 = sshll.u32 %s9610_s10, 4  ;;  %s8126_s22 = int_to_ptr.vmem [resolvable:$true] %s8125_s22 }
 0x8e6   :  { %s9578_s23 = scalar_lea.vmem %s8126_s22, 32  ;;  %p9583_p1 = scmp.lt.s32.totalorder %s8126_s22, %s8126_s22 }
 0x8e7   :  { %9511 = vmatpush3.bf16.msra.mxu1 %v9510_v54  ;;  %p9579_p0 = scmp.ne.s32.totalorder %s8126_s22, %s9578_s23  ;;  %p9584_p2 = scmp.lt.s32.totalorder %s9578_s23, %s9578_s23 }
 0x8e8   :  { %9512 = vmatprep.subr.bf16.mxu1 %v9604_v41 }
 0x8e9   :  { %p9585_p3 = por %p9584_p2, %p9583_p1 }
 0x8eb   :  { %9514 = vmatpush3.bf16.msra.mxu1 %v9513_v58  ;;  %p9586_p4 = pnand %p9585_p3, %p9579_p0 }
 0x8ec   :  { %9515 = vmatprep.subr.bf16.mxu1 %v9604_v41 }
 0x8ef   :  { %9517 = vmatpush3.bf16.msra.mxu1 %v9516_v57 }
 0x8f0   :  { %9518 = vmatprep.subr.bf16.mxu1 %v9604_v41 }
 0x8f3   :  { %9520 = vmatpush3.bf16.msra.mxu1 %v9519_v5 }
 0x8f4   :  { %9521 = vmatprep.subr.bf16.mxu1 %v9604_v41 }
 0x8f7   :  { %9523 = vmatpush3.bf16.msra.mxu1 %v9522_v36 }
 0x8f8   :  { %9524 = vmatprep.subr.bf16.mxu1 %v9604_v41 }
 0x8fb   :  { %9526 = vmatpush3.bf16.msra.mxu1 %v9525_v15 }
 0x8fc   :  { %9527 = vmatprep.subr.bf16.mxu1 %v9604_v41 }
 0x8ff   :  { %9529 = vmatpush3.bf16.msra.mxu1 %v9528_v26 }
 0x995   :  { %v8752_v18 = vpop.f32.mrb[170].mxu1 }
 0x996   :  { %v8753_v44 = vpop.f32.mrb[171].mxu1 }
 0x997   :  { %v8754_v1 = vadd.f32 %v8753_v44, %v8752_v18  ;;  %v8787_v32 = vpop.f32.mrb[214].mxu0 }
 0x998   :  { %v8788_v7 = vpop.f32.mrb[215].mxu0 }
 0x999   :  { %v7810_v24 = vadd.f32 %v8754_v1, %v8298_v38  ;;  %v8789_v52 = vadd.f32 %v8788_v7, %v8787_v32 }
 0x99b   :  { %v7880_v40 = vadd.f32 %v8789_v52, %v7810_v24 }
 0x9b5   :  { %v8822_v43 = vpop.f32.mrb[172].mxu1 }
 0x9b6   :  { %v8823_v16 = vpop.f32.mrb[173].mxu1 }
 0x9b7   :  { %v8824_v8 = vadd.f32 %v8823_v16, %v8822_v43  ;;  %v8857_v61 = vpop.f32.mrb[216].mxu0 }
 0x9b8   :  { %v8858_v30 = vpop.f32.mrb[217].mxu0 }
 0x9b9   :  { %v7950_v31 = vadd.f32 %v8824_v8, %v7880_v40  ;;  %v8859_v41 = vadd.f32 %v8858_v30, %v8857_v61 }
 0x9bb   :  { %v8020_v27 = vadd.f32 %v8859_v41, %v7950_v31 }
 0x9bd   :  { %v8023_v4 = vmax.f32 %v8020_v27, 0.0 }
 0x9bf   :  { %9190 = vmatmul.mubr.f32.vlgmr.msra.gmra.mrb[174].mxu1 %v8023_v4 }
 0xa92   :  { %v8113_v19 = vpop.f32.mrb[174].mxu1 }
 0xa93   :  { %v8114_v10 = vadd.f32 %v8299_v9, %v8113_v19  ;;  %v9191_v39 = vpop.f32.mrb[175].mxu1 }
 0xa95   :  { %8118 = vst.msk [vmem:[#allocation11] sm:$0x3] %vm8117_vm4, %v8114_v10 }
 0xa96   :  { %9589 = shalt.err (!%p9586_p4)
}
 0xa97   :  { %s9590_s3 = scalar_lea.hbm %s14457_s13, 32 }
 0xa98   :  { %p9591_p5 = scmp.ne.s32.totalorder %s14457_s13, %s9590_s3  ;;  %p9594_p6 = scmp.lt.u32.totalorder %s9590_s3, %s14457_s13 }
 0xa9a   :  { %p9596_p7 = pnand %p9594_p6, %p9591_p5 }
 0xa9c   :  { %9599 = shalt.err (!%p9596_p7)
}
 0xa9d   :  { %8128 = dma.vmem_to_hbm [thread:$0]  %s8126_s22, 32, %s14457_s13, [#allocation12]  }
 0xa9e   :  { %9600 = dma.done.wait [#allocation12], 32  }
 0xa9f   :  { %9601 = vsyncadd [#allocation12], 4294967264 }
 0xaa0   :  { %8132 = vsyncpa [#allocation12], 1 }

</bundles_post_ra>
